<compile_context>
chip_gen: v7x
topology: tpu7x:2x2x1
jax: 0.10.0
libtpu: 0.0.40
codegen_flags: <defaults>
</compile_context>

<pallas_src>
import functools

import jax
import jax.numpy as jnp
from jax.experimental import pallas as pl
from jax.experimental.pallas import tpu as pltpu


# --------------------------------------------------------------------------
# Pallas kernel: one grid step == `chunk` GRU-D time steps for one batch block.
# --------------------------------------------------------------------------
def _grud_kernel(chunk, time_step, pad_steps, dot_dtype,
                 # inputs
                 x_ref, h0_ref, xmean_ref,
                 w_dec_ref, b_dec_ref, w_xm_ref, w_hzr_ref, w_hh_ref,
                 b_gates_ref,
                 # outputs
                 out_ref, hfin_ref,
                 # scratch (persists across grid steps)
                 h_sc, xlast_sc, delta_sc, mask_sc):
    tc = pl.program_id(1)                    # time-chunk index (axis 1)
    Bb = h0_ref.shape[0]
    Dp = xmean_ref.shape[1]
    Hp = h0_ref.shape[1]
    f32 = jnp.float32

    # ---- first time-chunk of this batch block: initialize recurrent state --
    @pl.when(tc == 0)
    def _init():
        h_sc[...] = h0_ref[...]
        xlast_sc[...] = jnp.zeros_like(xlast_sc)
        # delta starts at -time_step so the uniform update
        #     delta = (1 - mask_prev) * delta + time_step
        # yields exactly 0 at global step 0 (mask_prev == 0), reproducing the
        # PyTorch `if t > 0:` special case with no per-step scalar compare.
        delta_sc[...] = jnp.full(delta_sc.shape, -time_step, delta_sc.dtype)
        mask_sc[...] = jnp.zeros_like(mask_sc)

    # Loop-invariant operands (single-buffered VMEM blocks).
    x_mean = xmean_ref[...]
    w_dec = w_dec_ref[...]
    b_dec = b_dec_ref[...]
    w_xm = w_xm_ref[...]
    w_hzr = w_hzr_ref[...]
    w_hh = w_hh_ref[...]
    b_gates = b_gates_ref[...]

    # ---- phase 1: input-only scan (VPU), off the recurrent critical path ---
    delta = delta_sc[...]
    x_last = xlast_sc[...]
    mask_prev = mask_sc[...]
    x_l, mask_l, delta_l, xlast_l = [], [], [], []
    for i in range(chunk):                           # chunk is a Python int
        x_t = x_ref[:, i, :].astype(f32)             # (Bb, Dp)
        delta = (1.0 - mask_prev) * delta + time_step
        m = x_t != 0.0                               # single compare, reused
        mask = m.astype(f32)
        x_last = jnp.where(m, x_t, x_last)
        x_l.append(x_t)
        mask_l.append(mask)
        delta_l.append(delta)
        xlast_l.append(x_last)
        mask_prev = mask
    delta_sc[...] = delta
    xlast_sc[...] = x_last
    mask_sc[...] = mask_prev

    # ---- phase 2: chunk-batched matmuls, M = chunk * Bb ---------------------
    x_s = jnp.concatenate(x_l, axis=0)               # (chunk*Bb, Dp)
    mask_s = jnp.concatenate(mask_l, axis=0)
    delta_s = jnp.concatenate(delta_l, axis=0)
    xlast_s = jnp.concatenate(xlast_l, axis=0)
    xmean_s = jnp.concatenate([x_mean] * chunk, axis=0)

    # decay gates: one fused matmul; slices land on 128-lane boundaries
    dec = jnp.exp(-jax.nn.relu(
        jnp.dot(delta_s.astype(dot_dtype), w_dec,
                preferred_element_type=f32) + b_dec))        # (chunk*Bb, Dp+Hp)
    delta_x = dec[:, :Dp]
    delta_h = dec[:, Dp:]

    x_imp = (mask_s * x_s
             + (1.0 - mask_s) * (delta_x * xlast_s + (1.0 - delta_x) * xmean_s))

    # fused [x_imp | mask] @ W -> (z | r | h) pre-activations
    xm = jnp.concatenate([x_imp, mask_s], axis=-1).astype(dot_dtype)
    g_xm = (jnp.dot(xm, w_xm, preferred_element_type=f32)
            + b_gates)                                       # (chunk*Bb, 3Hp)

    # ---- phase 3: serial recurrence (2 MXU pushes per step) -----------------
    h = h_sc[...]
    if pad_steps > 0:
        # Only the last time-chunk contains padded steps; freeze h on them.
        keep = (tc != pl.num_programs(1) - 1).astype(f32)    # scalar 0/1
    for i in range(chunk):
        lo = i * Bb                                          # sublane-aligned
        g_i = g_xm[lo:lo + Bb]                               # (Bb, 3Hp)
        hd = delta_h[lo:lo + Bb] * h
        g_h = jnp.dot(hd.astype(dot_dtype), w_hzr,
                      preferred_element_type=f32)            # (Bb, 2Hp)
        z = jax.nn.sigmoid(g_i[:, 0 * Hp:1 * Hp] + g_h[:, :Hp])
        r = jax.nn.sigmoid(g_i[:, 1 * Hp:2 * Hp] + g_h[:, Hp:])
        h_tilde = jnp.tanh(
            g_i[:, 2 * Hp:]
            + jnp.dot((r * hd).astype(dot_dtype), w_hh,
                      preferred_element_type=f32))
        h_new = (1.0 - z) * hd + z * h_tilde
        if pad_steps > 0 and i >= chunk - pad_steps:
            h = keep * h_new + (1.0 - keep) * h              # padded tail
        else:
            h = h_new
        out_ref[:, i, :] = h                                 # lane-dense Hp
    h_sc[...] = h

    @pl.when(tc == pl.num_programs(1) - 1)
    def _final():
        hfin_ref[...] = h


# --------------------------------------------------------------------------
# Helpers
# --------------------------------------------------------------------------
def _round_up(n, m):
    return ((n + m - 1) // m) * m


def _build_call(*, Bp, Tp, Dp, Hp, Bb, b_blocks, chunk, pad_steps, time_step,
                dot_dtype, single_buffer_weights, vmem_limit_bytes):
    n_chunks = Tp // chunk

    def spec(shape, index_map, single_buffer=False):
        if single_buffer:
            # Loop-invariant operand: no need for double buffering.
            return pl.BlockSpec(shape, index_map, pipeline_mode=pl.Buffered(1))
        return pl.BlockSpec(shape, index_map)

    sb = single_buffer_weights
    in_specs = [
        # streamed x block in native (batch, time, feature) layout
        pl.BlockSpec((Bb, chunk, Dp), lambda b, t: (b, t, 0)),
        spec((Bb, Hp), lambda b, t: (b, 0), sb),           # h0
        spec((Bb, Dp), lambda b, t: (b, 0), sb),           # x_mean
        spec((Dp, Dp + Hp), lambda b, t: (0, 0), sb),      # w_dec
        spec((1, Dp + Hp), lambda b, t: (0, 0), sb),       # b_dec
        spec((2 * Dp, 3 * Hp), lambda b, t: (0, 0), sb),   # w_xm
        spec((Hp, 2 * Hp), lambda b, t: (0, 0), sb),       # w_hzr
        spec((Hp, Hp), lambda b, t: (0, 0), sb),           # w_hh
        spec((1, 3 * Hp), lambda b, t: (0, 0), sb),        # b_gates
    ]
    out_specs = [
        pl.BlockSpec((Bb, chunk, Hp), lambda b, t: (b, t, 0)),   # outputs
        pl.BlockSpec((Bb, Hp), lambda b, t: (b, 0)),             # final h
    ]
    grid_spec = pltpu.PrefetchScalarGridSpec(
        num_scalar_prefetch=0,
        grid=(b_blocks, n_chunks),
        in_specs=in_specs,
        out_specs=out_specs,
        scratch_shapes=[
            pltpu.VMEM((Bb, Hp), jnp.float32),   # h
            pltpu.VMEM((Bb, Dp), jnp.float32),   # x_last_obsv
            pltpu.VMEM((Bb, Dp), jnp.float32),   # delta
            pltpu.VMEM((Bb, Dp), jnp.float32),   # previous observation mask
        ],
    )
    kernel = functools.partial(_grud_kernel, chunk, time_step, pad_steps,
                               dot_dtype)
    return pl.pallas_call(
        kernel,
        grid_spec=grid_spec,
        out_shape=(jax.ShapeDtypeStruct((Bp, Tp, Hp), jnp.float32),
                   jax.ShapeDtypeStruct((Bp, Hp), jnp.float32)),
        compiler_params=pltpu.CompilerParams(
            dimension_semantics=("parallel", "arbitrary"),
            vmem_limit_bytes=vmem_limit_bytes),
    )


# --------------------------------------------------------------------------
# Wrapper
# --------------------------------------------------------------------------
def grud_forward(x, params, h=None, *, max_chunk=32, dot_dtype=jnp.float32,
                 batch_blocks=1):
    """GRU-D forward. x: (batch, seq, input). Returns (outputs, h_n) like PyTorch.

    dot_dtype:    dtype of the MXU operands (streamed x and all weights).
                  Use jnp.bfloat16 on v6e/v7x; state / VPU math stays f32.
    batch_blocks: blocks on a leading "parallel" grid axis; set to 2 on v7x
                  (2 TensorCores) when the padded batch is >= 16.
    """
    x = jnp.asarray(x, jnp.float32)
    B, T, D = x.shape
    H = params["w_gh"].shape[1]

    Bp = _round_up(B, 8)
    Dp = _round_up(D, 128)
    Hp = _round_up(H, 128)
    chunk = min(max(8, (max_chunk // 8) * 8), _round_up(T, 8))
    Tp = _round_up(T, chunk)
    pad_steps = Tp - T
    time_step = 1.0 / T

    b_blocks = (batch_blocks
                if batch_blocks > 1 and Bp % (8 * batch_blocks) == 0 else 1)
    Bb = Bp // b_blocks

    if h is None:
        h0 = jnp.zeros((B, H), jnp.float32)
    else:
        h0 = jnp.reshape(jnp.asarray(h, jnp.float32), (B, H))

    # x_mean: one-pass reduction done with plain JAX (HBM-roofline bound).
    x_mean = jnp.sum(x, axis=1) / jnp.maximum(
        jnp.sum((x != 0.0).astype(jnp.float32), axis=1), 1e-6)

    # ---- padded inputs (single pad copy; no transpose) ----------------------
    dd = dot_dtype
    if (B, T, D) == (Bp, Tp, Dp):
        x_p = x.astype(dd)
    else:
        x_p = jnp.zeros((Bp, Tp, Dp), dd).at[:B, :T, :D].set(x.astype(dd))
    h0_p = jnp.zeros((Bp, Hp), jnp.float32).at[:B, :H].set(h0)
    xmean_p = jnp.zeros((Bp, Dp), jnp.float32).at[:B, :D].set(x_mean)

    # ---- pre-stacked, zero-padded weights (all slicing at trace time) -------
    w_z, b_z = params["w_z"], params["b_z"]
    w_r, b_r = params["w_r"], params["b_r"]
    w_h, b_h = params["w_h"], params["b_h"]
    w_gx, b_gx = params["w_gx"], params["b_gx"]
    w_gh, b_gh = params["w_gh"], params["b_gh"]

    # decay: delta @ [w_gx | w_gh]  (output slices on 128-lane boundaries)
    w_dec = (jnp.zeros((Dp, Dp + Hp), jnp.float32)
             .at[:D, :D].set(w_gx)
             .at[:D, Dp:Dp + H].set(w_gh)).astype(dd)
    b_dec = (jnp.zeros((1, Dp + Hp), jnp.float32)
             .at[:, :D].set(b_gx)
             .at[:, Dp:Dp + H].set(b_gh))

    # gates: [x_imp | mask] rows of the concatenated [x, h, mask] weights,
    # stacked along the output axis as (z | r | h) with 128-aligned blocks.
    w_xm = (jnp.zeros((2 * Dp, 3 * Hp), jnp.float32)
            .at[:D, 0 * Hp:0 * Hp + H].set(w_z[:D])
            .at[:D, 1 * Hp:1 * Hp + H].set(w_r[:D])
            .at[:D, 2 * Hp:2 * Hp + H].set(w_h[:D])
            .at[Dp:Dp + D, 0 * Hp:0 * Hp + H].set(w_z[D + H:])
            .at[Dp:Dp + D, 1 * Hp:1 * Hp + H].set(w_r[D + H:])
            .at[Dp:Dp + D, 2 * Hp:2 * Hp + H].set(w_h[D + H:])).astype(dd)
    w_hzr = (jnp.zeros((Hp, 2 * Hp), jnp.float32)
             .at[:H, :H].set(w_z[D:D + H])
             .at[:H, Hp:Hp + H].set(w_r[D:D + H])).astype(dd)
    w_hh = (jnp.zeros((Hp, Hp), jnp.float32)
            .at[:H, :H].set(w_h[D:D + H])).astype(dd)
    b_gates = (jnp.zeros((1, 3 * Hp), jnp.float32)
               .at[:, 0 * Hp:0 * Hp + H].set(b_z)
               .at[:, 1 * Hp:1 * Hp + H].set(b_r)
               .at[:, 2 * Hp:2 * Hp + H].set(b_h))

    inputs = (x_p, h0_p, xmean_p, w_dec, b_dec, w_xm, w_hzr, w_hh, b_gates)

    # ---- explicit scoped-VMEM budget (blocks + weights + scratch + temps) ---
    itemd = jnp.dtype(dd).itemsize
    wbytes = ((Dp * (Dp + Hp) + 2 * Dp * 3 * Hp + Hp * 2 * Hp + Hp * Hp) * itemd
              + (4 * Hp + Dp) * 4 + (Bb * Hp + Bb * Dp) * 4)
    est = (2 * wbytes                                   # weights (<= 2 buffers)
           + 2 * Bb * chunk * Dp * itemd                # x block, double buf
           + 2 * Bb * chunk * Hp * 4 + 2 * Bb * Hp * 4  # output blocks
           + (Bb * Hp + 3 * Bb * Dp) * 4                # scratch
           + chunk * Bb * (8 * Dp + 4 * Hp) * 4)        # hoisted temporaries
    vmem_limit = int(min(max(2 * est, 32 * 1024 * 1024), 64 * 1024 * 1024))

    build = functools.partial(
        _build_call, Bp=Bp, Tp=Tp, Dp=Dp, Hp=Hp, Bb=Bb, b_blocks=b_blocks,
        chunk=chunk, pad_steps=pad_steps, time_step=time_step, dot_dtype=dd,
        vmem_limit_bytes=vmem_limit)
    try:
        # Single-buffer the loop-invariant weights (halves their VMEM; key on
        # v7x's 64 MiB VMEM).
        outs, hfin = build(single_buffer_weights=True)(*inputs)
    except Exception:
        # This JAX build may not support per-operand pipeline_mode on the
        # grid-pipelined path; fall back to default double buffering.
        outs, hfin = build(single_buffer_weights=False)(*inputs)

    outputs = outs[:B, :T, :H]          # (B, T, H), no post-kernel transpose
    h_n = hfin[None, :B, :H]            # (1, B, H), matches h.unsqueeze(0)
    return outputs, h_n


# --------------------------------------------------------------------------
# Deterministic parameter initialization (mirrors nn.Linear shapes, stored
# transposed as (in_features, out_features)).
# --------------------------------------------------------------------------
def init_grud_params(key, input_size, hidden_size):
    D, H = input_size, hidden_size
    comb = D + H + D

    def linear(k, fan_in, fan_out):
        kw, kb = jax.random.split(k)
        bound = 1.0 / jnp.sqrt(float(fan_in))
        w = jax.random.uniform(kw, (fan_in, fan_out), jnp.float32, -bound, bound)
        b = jax.random.uniform(kb, (1, fan_out), jnp.float32, -bound, bound)
        return w, b

    ks = jax.random.split(key, 5)
    w_z, b_z = linear(ks[0], comb, H)
    w_r, b_r = linear(ks[1], comb, H)
    w_h, b_h = linear(ks[2], comb, H)
    w_gx, b_gx = linear(ks[3], D, D)
    w_gh, b_gh = linear(ks[4], D, H)
    return dict(w_z=w_z, b_z=b_z, w_r=w_r, b_r=b_r, w_h=w_h, b_h=b_h,
                w_gx=w_gx, b_gx=b_gx, w_gh=w_gh, b_gh=b_gh)


# --------------------------------------------------------------------------
# Pure-JAX reference (mirrors the PyTorch forward exactly) for validation.
# --------------------------------------------------------------------------
def grud_reference(x, params, h=None):
    x = x.astype(jnp.float32)
    B, T, D = x.shape
    H = params["w_gh"].shape[1]
    x_mean = jnp.sum(x, axis=1) / jnp.maximum(
        jnp.sum((x != 0.0).astype(x.dtype), axis=1), 1e-6)
    hcur = jnp.zeros((B, H), jnp.float32) if h is None else jnp.reshape(h, (B, H))
    x_tm1 = jnp.zeros((B, D), jnp.float32)
    delta = jnp.zeros((B, D), jnp.float32)
    mask_prev = jnp.zeros((B, D), jnp.float32)
    ts = 1.0 / T
    outs = []
    for t in range(T):
        x_t = x[:, t]
        if t > 0:
            delta = (1.0 - mask_prev) * delta + ts
        mask = (x_t != 0.0).astype(jnp.float32)
        x_tm1 = jnp.where(mask > 0.0, x_t, x_tm1)

        dx = jnp.exp(-jax.nn.relu(delta @ params["w_gx"] + params["b_gx"]))
        dh = jnp.exp(-jax.nn.relu(delta @ params["w_gh"] + params["b_gh"]))
        x_imp = mask * x_t + (1.0 - mask) * (dx * x_tm1 + (1.0 - dx) * x_mean)
        hcur = dh * hcur
        combined = jnp.concatenate([x_imp, hcur, mask], axis=1)
        z = jax.nn.sigmoid(combined @ params["w_z"] + params["b_z"])
        r = jax.nn.sigmoid(combined @ params["w_r"] + params["b_r"])
        combined_r = jnp.concatenate([x_imp, r * hcur, mask], axis=1)
        h_tilde = jnp.tanh(combined_r @ params["w_h"] + params["b_h"])
        hcur = (1.0 - z) * hcur + z * h_tilde
        mask_prev = mask
        outs.append(hcur)
    return jnp.stack(outs, axis=1), hcur[None, :, :]


if __name__ == "__main__":
    key = jax.random.PRNGKey(0)
    k_x, k_p, k_m, k_x2, k_m2 = jax.random.split(key, 5)

    batch, seq, input_size, hidden_size = 2, 8, 4, 32

    x = jax.random.normal(k_x, (batch, seq, input_size), jnp.float32)
    # Introduce exact zeros so the missing-value / mask path is exercised.
    drop = jax.random.bernoulli(k_m, 0.3, (batch, seq, input_size))
    x = jnp.where(drop, 0.0, x)
    params = init_grud_params(k_p, input_size, hidden_size)

    ref_out, ref_h = grud_reference(x, params)

    # 1) f32 path, single time chunk (T == chunk == 8).
    outputs, h_n = grud_forward(x, params)
    jax.block_until_ready((outputs, h_n))
    assert outputs.shape == (batch, seq, hidden_size)
    assert h_n.shape == (1, batch, hidden_size)
    assert jnp.allclose(outputs, ref_out, atol=1e-4, rtol=1e-4)
    assert jnp.allclose(h_n, ref_h, atol=1e-4, rtol=1e-4)

    # 2) multi-chunk carry + padded (non-divisor) T + parallel batch-block axis.
    b2, t2 = 16, 11          # Bp=16 -> two batch blocks; Tp=16 -> 5 padded steps
    x2 = jax.random.normal(k_x2, (b2, t2, input_size), jnp.float32)
    drop2 = jax.random.bernoulli(k_m2, 0.3, (b2, t2, input_size))
    x2 = jnp.where(drop2, 0.0, x2)
    ref_out2, ref_h2 = grud_reference(x2, params)
    outputs2, h_n2 = grud_forward(x2, params, max_chunk=8, batch_blocks=2)
    jax.block_until_ready((outputs2, h_n2))
    assert jnp.allclose(outputs2, ref_out2, atol=1e-4, rtol=1e-4)
    assert jnp.allclose(h_n2, ref_h2, atol=1e-4, rtol=1e-4)

    # 3) bf16 MXU-operand path (v6e/v7x); state stays f32, looser tolerance.
    outputs3, h_n3 = grud_forward(x, params, dot_dtype=jnp.bfloat16)
    jax.block_until_ready((outputs3, h_n3))
    assert jnp.allclose(outputs3, ref_out, atol=5e-2, rtol=5e-2)
    assert jnp.allclose(h_n3, ref_h, atol=5e-2, rtol=5e-2)

    print("KERNEL_OK")
</pallas_src>

<mosaic_0001>
module attributes {stable_mosaic.version = 11 : i64} {
  func.func @_grud_kernel(%arg0: i32, %arg1: i32, %arg2: memref<8x8x128xf32, #tpu.memory_space<vmem>>, %arg3: memref<8x128xf32, #tpu.memory_space<vmem>>, %arg4: memref<8x128xf32, #tpu.memory_space<vmem>>, %arg5: memref<128x256xf32, #tpu.memory_space<vmem>>, %arg6: memref<1x256xf32, #tpu.memory_space<vmem>>, %arg7: memref<256x384xf32, #tpu.memory_space<vmem>>, %arg8: memref<128x256xf32, #tpu.memory_space<vmem>>, %arg9: memref<128x128xf32, #tpu.memory_space<vmem>>, %arg10: memref<1x384xf32, #tpu.memory_space<vmem>>, %arg11: memref<8x8x128xf32, #tpu.memory_space<vmem>>, %arg12: memref<8x128xf32, #tpu.memory_space<vmem>>, %arg13: memref<8x128xf32, #tpu.memory_space<vmem>>, %arg14: memref<8x128xf32, #tpu.memory_space<vmem>>, %arg15: memref<8x128xf32, #tpu.memory_space<vmem>>, %arg16: memref<8x128xf32, #tpu.memory_space<vmem>>) attributes {dimension_semantics = [#tpu.dimension_semantics<parallel>, #tpu.dimension_semantics<arbitrary>], iteration_bounds = array<i64: 1, 1>, scalar_prefetch = 0 : i64, scratch_operands = 4 : i64, tpu.core_type = #tpu.core_type<tc>, window_params = [{transform_indices = @transform_0, window_bounds = array<i64: 8, 8, 128>}, {pipeline_mode = #tpu.pipeline_mode<synchronous>, transform_indices = @transform_1, window_bounds = array<i64: 8, 128>}, {pipeline_mode = #tpu.pipeline_mode<synchronous>, transform_indices = @transform_2, window_bounds = array<i64: 8, 128>}, {pipeline_mode = #tpu.pipeline_mode<synchronous>, transform_indices = @transform_3, window_bounds = array<i64: 128, 256>}, {pipeline_mode = #tpu.pipeline_mode<synchronous>, transform_indices = @transform_4, window_bounds = array<i64: 1, 256>}, {pipeline_mode = #tpu.pipeline_mode<synchronous>, transform_indices = @transform_5, window_bounds = array<i64: 256, 384>}, {pipeline_mode = #tpu.pipeline_mode<synchronous>, transform_indices = @transform_6, window_bounds = array<i64: 128, 256>}, {pipeline_mode = #tpu.pipeline_mode<synchronous>, transform_indices = @transform_7, window_bounds = array<i64: 128, 128>}, {pipeline_mode = #tpu.pipeline_mode<synchronous>, transform_indices = @transform_8, window_bounds = array<i64: 1, 384>}, {transform_indices = @transform_9, window_bounds = array<i64: 8, 8, 128>}, {transform_indices = @transform_10, window_bounds = array<i64: 8, 128>}]} {
    %c0_i32 = arith.constant 0 : i32
    %0 = arith.cmpi eq, %arg1, %c0_i32 : i32
    %1 = arith.extui %0 : i1 to i32
    %c0_i32_0 = arith.constant 0 : i32
    %2 = arith.cmpi ne, %1, %c0_i32_0 : i32
    scf.if %2 {
      %c0_142 = arith.constant 0 : index
      %c0_143 = arith.constant 0 : index
      %410 = vector.load %arg3[%c0_142, %c0_143] : memref<8x128xf32, #tpu.memory_space<vmem>>, vector<8x128xf32>
      %c0_144 = arith.constant 0 : index
      %c0_145 = arith.constant 0 : index
      %411 = vector.load %arg13[%c0_144, %c0_145] : memref<8x128xf32, #tpu.memory_space<vmem>>, vector<8x128xf32>
      tpu.vector_store %arg13[%c0_144, %c0_145], %410 {strides = array<i32>} : memref<8x128xf32, #tpu.memory_space<vmem>>, vector<8x128xf32>,
      %cst_146 = arith.constant 0.000000e+00 : f32
      %412 = vector.broadcast %cst_146 : f32 to vector<8x128xf32>
      %c0_147 = arith.constant 0 : index
      %c0_148 = arith.constant 0 : index
      %413 = vector.load %arg14[%c0_147, %c0_148] : memref<8x128xf32, #tpu.memory_space<vmem>>, vector<8x128xf32>
      tpu.vector_store %arg14[%c0_147, %c0_148], %412 {strides = array<i32>} : memref<8x128xf32, #tpu.memory_space<vmem>>, vector<8x128xf32>,
      %cst_149 = arith.constant -1.250000e-01 : f32
      %414 = vector.broadcast %cst_149 : f32 to vector<8x128xf32>
      %c0_150 = arith.constant 0 : index
      %c0_151 = arith.constant 0 : index
      %415 = vector.load %arg15[%c0_150, %c0_151] : memref<8x128xf32, #tpu.memory_space<vmem>>, vector<8x128xf32>
      tpu.vector_store %arg15[%c0_150, %c0_151], %414 {strides = array<i32>} : memref<8x128xf32, #tpu.memory_space<vmem>>, vector<8x128xf32>,
      %cst_152 = arith.constant 0.000000e+00 : f32
      %416 = vector.broadcast %cst_152 : f32 to vector<8x128xf32>
      %c0_153 = arith.constant 0 : index
      %c0_154 = arith.constant 0 : index
      %417 = vector.load %arg16[%c0_153, %c0_154] : memref<8x128xf32, #tpu.memory_space<vmem>>, vector<8x128xf32>
      tpu.vector_store %arg16[%c0_153, %c0_154], %416 {strides = array<i32>} : memref<8x128xf32, #tpu.memory_space<vmem>>, vector<8x128xf32>,
    } else {
    }
    %c0 = arith.constant 0 : index
    %c0_1 = arith.constant 0 : index
    %3 = vector.load %arg4[%c0, %c0_1] : memref<8x128xf32, #tpu.memory_space<vmem>>, vector<8x128xf32>
    %c0_2 = arith.constant 0 : index
    %c0_3 = arith.constant 0 : index
    %4 = vector.load %arg5[%c0_2, %c0_3] : memref<128x256xf32, #tpu.memory_space<vmem>>, vector<128x256xf32>
    %c0_4 = arith.constant 0 : index
    %c0_5 = arith.constant 0 : index
    %5 = vector.load %arg6[%c0_4, %c0_5] : memref<1x256xf32, #tpu.memory_space<vmem>>, vector<1x256xf32>
    %c0_6 = arith.constant 0 : index
    %c0_7 = arith.constant 0 : index
    %6 = vector.load %arg7[%c0_6, %c0_7] : memref<256x384xf32, #tpu.memory_space<vmem>>, vector<256x384xf32>
    %c0_8 = arith.constant 0 : index
    %c0_9 = arith.constant 0 : index
    %7 = vector.load %arg8[%c0_8, %c0_9] : memref<128x256xf32, #tpu.memory_space<vmem>>, vector<128x256xf32>
    %c0_10 = arith.constant 0 : index
    %c0_11 = arith.constant 0 : index
    %8 = vector.load %arg9[%c0_10, %c0_11] : memref<128x128xf32, #tpu.memory_space<vmem>>, vector<128x128xf32>
    %c0_12 = arith.constant 0 : index
    %c0_13 = arith.constant 0 : index
    %9 = vector.load %arg10[%c0_12, %c0_13] : memref<1x384xf32, #tpu.memory_space<vmem>>, vector<1x384xf32>
    %c0_14 = arith.constant 0 : index
    %c0_15 = arith.constant 0 : index
    %10 = vector.load %arg15[%c0_14, %c0_15] : memref<8x128xf32, #tpu.memory_space<vmem>>, vector<8x128xf32>
    %c0_16 = arith.constant 0 : index
    %c0_17 = arith.constant 0 : index
    %11 = vector.load %arg14[%c0_16, %c0_17] : memref<8x128xf32, #tpu.memory_space<vmem>>, vector<8x128xf32>
    %c0_18 = arith.constant 0 : index
    %c0_19 = arith.constant 0 : index
    %12 = vector.load %arg16[%c0_18, %c0_19] : memref<8x128xf32, #tpu.memory_space<vmem>>, vector<8x128xf32>
    %c0_20 = arith.constant 0 : index
    %c0_21 = arith.constant 0 : index
    %c0_22 = arith.constant 0 : index
    %13 = vector.load %arg2[%c0_20, %c0_21, %c0_22] : memref<8x8x128xf32, #tpu.memory_space<vmem>>, vector<8x1x128xf32>
    %14 = vector.shape_cast %13 : vector<8x1x128xf32> to vector<8x128xf32>
    %cst = arith.constant 1.000000e+00 : f32
    %15 = vector.broadcast %cst : f32 to vector<8x128xf32>
    %16 = arith.subf %15, %12 : vector<8x128xf32>
    %17 = arith.mulf %16, %10 : vector<8x128xf32>
    %cst_23 = arith.constant 1.250000e-01 : f32
    %18 = vector.broadcast %cst_23 : f32 to vector<8x128xf32>
    %19 = arith.addf %17, %18 : vector<8x128xf32>
    %cst_24 = arith.constant 0.000000e+00 : f32
    %20 = vector.broadcast %cst_24 : f32 to vector<8x128xf32>
    %21 = arith.cmpf one, %14, %20 : vector<8x128xf32>
    %22 = arith.extui %21 : vector<8x128xi1> to vector<8x128xi32>
    %23 = arith.sitofp %22 : vector<8x128xi32> to vector<8x128xf32>
    %24 = arith.select %21, %14, %11 : vector<8x128xi1>, vector<8x128xf32>
    %c0_25 = arith.constant 0 : index
    %c1 = arith.constant 1 : index
    %c0_26 = arith.constant 0 : index
    %25 = vector.load %arg2[%c0_25, %c1, %c0_26] : memref<8x8x128xf32, #tpu.memory_space<vmem>>, vector<8x1x128xf32>
    %26 = vector.shape_cast %25 : vector<8x1x128xf32> to vector<8x128xf32>
    %cst_27 = arith.constant 1.000000e+00 : f32
    %27 = vector.broadcast %cst_27 : f32 to vector<8x128xf32>
    %28 = arith.subf %27, %23 : vector<8x128xf32>
    %29 = arith.mulf %28, %19 : vector<8x128xf32>
    %cst_28 = arith.constant 1.250000e-01 : f32
    %30 = vector.broadcast %cst_28 : f32 to vector<8x128xf32>
    %31 = arith.addf %29, %30 : vector<8x128xf32>
    %cst_29 = arith.constant 0.000000e+00 : f32
    %32 = vector.broadcast %cst_29 : f32 to vector<8x128xf32>
    %33 = arith.cmpf one, %26, %32 : vector<8x128xf32>
    %34 = arith.extui %33 : vector<8x128xi1> to vector<8x128xi32>
    %35 = arith.sitofp %34 : vector<8x128xi32> to vector<8x128xf32>
    %36 = arith.select %33, %26, %24 : vector<8x128xi1>, vector<8x128xf32>
    %c0_30 = arith.constant 0 : index
    %c2 = arith.constant 2 : index
    %c0_31 = arith.constant 0 : index
    %37 = vector.load %arg2[%c0_30, %c2, %c0_31] : memref<8x8x128xf32, #tpu.memory_space<vmem>>, vector<8x1x128xf32>
    %38 = vector.shape_cast %37 : vector<8x1x128xf32> to vector<8x128xf32>
    %cst_32 = arith.constant 1.000000e+00 : f32
    %39 = vector.broadcast %cst_32 : f32 to vector<8x128xf32>
    %40 = arith.subf %39, %35 : vector<8x128xf32>
    %41 = arith.mulf %40, %31 : vector<8x128xf32>
    %cst_33 = arith.constant 1.250000e-01 : f32
    %42 = vector.broadcast %cst_33 : f32 to vector<8x128xf32>
    %43 = arith.addf %41, %42 : vector<8x128xf32>
    %cst_34 = arith.constant 0.000000e+00 : f32
    %44 = vector.broadcast %cst_34 : f32 to vector<8x128xf32>
    %45 = arith.cmpf one, %38, %44 : vector<8x128xf32>
    %46 = arith.extui %45 : vector<8x128xi1> to vector<8x128xi32>
    %47 = arith.sitofp %46 : vector<8x128xi32> to vector<8x128xf32>
    %48 = arith.select %45, %38, %36 : vector<8x128xi1>, vector<8x128xf32>
    %c0_35 = arith.constant 0 : index
    %c3 = arith.constant 3 : index
    %c0_36 = arith.constant 0 : index
    %49 = vector.load %arg2[%c0_35, %c3, %c0_36] : memref<8x8x128xf32, #tpu.memory_space<vmem>>, vector<8x1x128xf32>
    %50 = vector.shape_cast %49 : vector<8x1x128xf32> to vector<8x128xf32>
    %cst_37 = arith.constant 1.000000e+00 : f32
    %51 = vector.broadcast %cst_37 : f32 to vector<8x128xf32>
    %52 = arith.subf %51, %47 : vector<8x128xf32>
    %53 = arith.mulf %52, %43 : vector<8x128xf32>
    %cst_38 = arith.constant 1.250000e-01 : f32
    %54 = vector.broadcast %cst_38 : f32 to vector<8x128xf32>
    %55 = arith.addf %53, %54 : vector<8x128xf32>
    %cst_39 = arith.constant 0.000000e+00 : f32
    %56 = vector.broadcast %cst_39 : f32 to vector<8x128xf32>
    %57 = arith.cmpf one, %50, %56 : vector<8x128xf32>
    %58 = arith.extui %57 : vector<8x128xi1> to vector<8x128xi32>
    %59 = arith.sitofp %58 : vector<8x128xi32> to vector<8x128xf32>
    %60 = arith.select %57, %50, %48 : vector<8x128xi1>, vector<8x128xf32>
    %c0_40 = arith.constant 0 : index
    %c4 = arith.constant 4 : index
    %c0_41 = arith.constant 0 : index
    %61 = vector.load %arg2[%c0_40, %c4, %c0_41] : memref<8x8x128xf32, #tpu.memory_space<vmem>>, vector<8x1x128xf32>
    %62 = vector.shape_cast %61 : vector<8x1x128xf32> to vector<8x128xf32>
    %cst_42 = arith.constant 1.000000e+00 : f32
    %63 = vector.broadcast %cst_42 : f32 to vector<8x128xf32>
    %64 = arith.subf %63, %59 : vector<8x128xf32>
    %65 = arith.mulf %64, %55 : vector<8x128xf32>
    %cst_43 = arith.constant 1.250000e-01 : f32
    %66 = vector.broadcast %cst_43 : f32 to vector<8x128xf32>
    %67 = arith.addf %65, %66 : vector<8x128xf32>
    %cst_44 = arith.constant 0.000000e+00 : f32
    %68 = vector.broadcast %cst_44 : f32 to vector<8x128xf32>
    %69 = arith.cmpf one, %62, %68 : vector<8x128xf32>
    %70 = arith.extui %69 : vector<8x128xi1> to vector<8x128xi32>
    %71 = arith.sitofp %70 : vector<8x128xi32> to vector<8x128xf32>
    %72 = arith.select %69, %62, %60 : vector<8x128xi1>, vector<8x128xf32>
    %c0_45 = arith.constant 0 : index
    %c5 = arith.constant 5 : index
    %c0_46 = arith.constant 0 : index
    %73 = vector.load %arg2[%c0_45, %c5, %c0_46] : memref<8x8x128xf32, #tpu.memory_space<vmem>>, vector<8x1x128xf32>
    %74 = vector.shape_cast %73 : vector<8x1x128xf32> to vector<8x128xf32>
    %cst_47 = arith.constant 1.000000e+00 : f32
    %75 = vector.broadcast %cst_47 : f32 to vector<8x128xf32>
    %76 = arith.subf %75, %71 : vector<8x128xf32>
    %77 = arith.mulf %76, %67 : vector<8x128xf32>
    %cst_48 = arith.constant 1.250000e-01 : f32
    %78 = vector.broadcast %cst_48 : f32 to vector<8x128xf32>
    %79 = arith.addf %77, %78 : vector<8x128xf32>
    %cst_49 = arith.constant 0.000000e+00 : f32
    %80 = vector.broadcast %cst_49 : f32 to vector<8x128xf32>
    %81 = arith.cmpf one, %74, %80 : vector<8x128xf32>
    %82 = arith.extui %81 : vector<8x128xi1> to vector<8x128xi32>
    %83 = arith.sitofp %82 : vector<8x128xi32> to vector<8x128xf32>
    %84 = arith.select %81, %74, %72 : vector<8x128xi1>, vector<8x128xf32>
    %c0_50 = arith.constant 0 : index
    %c6 = arith.constant 6 : index
    %c0_51 = arith.constant 0 : index
    %85 = vector.load %arg2[%c0_50, %c6, %c0_51] : memref<8x8x128xf32, #tpu.memory_space<vmem>>, vector<8x1x128xf32>
    %86 = vector.shape_cast %85 : vector<8x1x128xf32> to vector<8x128xf32>
    %cst_52 = arith.constant 1.000000e+00 : f32
    %87 = vector.broadcast %cst_52 : f32 to vector<8x128xf32>
    %88 = arith.subf %87, %83 : vector<8x128xf32>
    %89 = arith.mulf %88, %79 : vector<8x128xf32>
    %cst_53 = arith.constant 1.250000e-01 : f32
    %90 = vector.broadcast %cst_53 : f32 to vector<8x128xf32>
    %91 = arith.addf %89, %90 : vector<8x128xf32>
    %cst_54 = arith.constant 0.000000e+00 : f32
    %92 = vector.broadcast %cst_54 : f32 to vector<8x128xf32>
    %93 = arith.cmpf one, %86, %92 : vector<8x128xf32>
    %94 = arith.extui %93 : vector<8x128xi1> to vector<8x128xi32>
    %95 = arith.sitofp %94 : vector<8x128xi32> to vector<8x128xf32>
    %96 = arith.select %93, %86, %84 : vector<8x128xi1>, vector<8x128xf32>
    %c0_55 = arith.constant 0 : index
    %c7 = arith.constant 7 : index
    %c0_56 = arith.constant 0 : index
    %97 = vector.load %arg2[%c0_55, %c7, %c0_56] : memref<8x8x128xf32, #tpu.memory_space<vmem>>, vector<8x1x128xf32>
    %98 = vector.shape_cast %97 : vector<8x1x128xf32> to vector<8x128xf32>
    %cst_57 = arith.constant 1.000000e+00 : f32
    %99 = vector.broadcast %cst_57 : f32 to vector<8x128xf32>
    %100 = arith.subf %99, %95 : vector<8x128xf32>
    %101 = arith.mulf %100, %91 : vector<8x128xf32>
    %cst_58 = arith.constant 1.250000e-01 : f32
    %102 = vector.broadcast %cst_58 : f32 to vector<8x128xf32>
    %103 = arith.addf %101, %102 : vector<8x128xf32>
    %cst_59 = arith.constant 0.000000e+00 : f32
    %104 = vector.broadcast %cst_59 : f32 to vector<8x128xf32>
    %105 = arith.cmpf one, %98, %104 : vector<8x128xf32>
    %106 = arith.extui %105 : vector<8x128xi1> to vector<8x128xi32>
    %107 = arith.sitofp %106 : vector<8x128xi32> to vector<8x128xf32>
    %108 = arith.select %105, %98, %96 : vector<8x128xi1>, vector<8x128xf32>
    %c0_60 = arith.constant 0 : index
    %c0_61 = arith.constant 0 : index
    %109 = vector.load %arg15[%c0_60, %c0_61] : memref<8x128xf32, #tpu.memory_space<vmem>>, vector<8x128xf32>
    tpu.vector_store %arg15[%c0_60, %c0_61], %103 {strides = array<i32>} : memref<8x128xf32, #tpu.memory_space<vmem>>, vector<8x128xf32>,
    %c0_62 = arith.constant 0 : index
    %c0_63 = arith.constant 0 : index
    %110 = vector.load %arg14[%c0_62, %c0_63] : memref<8x128xf32, #tpu.memory_space<vmem>>, vector<8x128xf32>
    tpu.vector_store %arg14[%c0_62, %c0_63], %108 {strides = array<i32>} : memref<8x128xf32, #tpu.memory_space<vmem>>, vector<8x128xf32>,
    %c0_64 = arith.constant 0 : index
    %c0_65 = arith.constant 0 : index
    %111 = vector.load %arg16[%c0_64, %c0_65] : memref<8x128xf32, #tpu.memory_space<vmem>>, vector<8x128xf32>
    tpu.vector_store %arg16[%c0_64, %c0_65], %107 {strides = array<i32>} : memref<8x128xf32, #tpu.memory_space<vmem>>, vector<8x128xf32>,
    %112 = tpu.concatenate %14, %26, %38, %50, %62, %74, %86, %98 in 0 : vector<8x128xf32>, vector<8x128xf32>, vector<8x128xf32>, vector<8x128xf32>, vector<8x128xf32>, vector<8x128xf32>, vector<8x128xf32>, vector<8x128xf32> -> vector<64x128xf32>
    %113 = tpu.concatenate %23, %35, %47, %59, %71, %83, %95, %107 in 0 : vector<8x128xf32>, vector<8x128xf32>, vector<8x128xf32>, vector<8x128xf32>, vector<8x128xf32>, vector<8x128xf32>, vector<8x128xf32>, vector<8x128xf32> -> vector<64x128xf32>
    %114 = tpu.concatenate %19, %31, %43, %55, %67, %79, %91, %103 in 0 : vector<8x128xf32>, vector<8x128xf32>, vector<8x128xf32>, vector<8x128xf32>, vector<8x128xf32>, vector<8x128xf32>, vector<8x128xf32>, vector<8x128xf32> -> vector<64x128xf32>
    %115 = tpu.concatenate %24, %36, %48, %60, %72, %84, %96, %108 in 0 : vector<8x128xf32>, vector<8x128xf32>, vector<8x128xf32>, vector<8x128xf32>, vector<8x128xf32>, vector<8x128xf32>, vector<8x128xf32>, vector<8x128xf32> -> vector<64x128xf32>
    %116 = tpu.concatenate %3, %3, %3, %3, %3, %3, %3, %3 in 0 : vector<8x128xf32>, vector<8x128xf32>, vector<8x128xf32>, vector<8x128xf32>, vector<8x128xf32>, vector<8x128xf32>, vector<8x128xf32>, vector<8x128xf32> -> vector<64x128xf32>
    %cst_66 = arith.constant dense<0.000000e+00> : vector<64x256xf32>
    %117 = tpu.matmul %114, %4, %cst_66 {dimension_numbers = #tpu.dot_dimension_numbers<[1], [0], [0], [1], [0, 0, 1, 1], [], []>} : vector<64x128xf32>, vector<128x256xf32>, vector<64x256xf32> -> vector<64x256xf32>
    %118 = vector.broadcast %5 : vector<1x256xf32> to vector<64x256xf32>
    %119 = arith.addf %117, %118 : vector<64x256xf32>
    %cst_67 = arith.constant 0.000000e+00 : f32
    %120 = vector.broadcast %cst_67 : f32 to vector<64x256xf32>
    %121 = arith.maximumf %119, %120 : vector<64x256xf32>
    %cst_68 = arith.constant 0.000000e+00 : f32
    %122 = vector.broadcast %cst_68 : f32 to vector<64x256xf32>
    %123 = arith.subf %122, %121 : vector<64x256xf32>
    %124 = math.exp %123 : vector<64x256xf32>
    %125 = vector.extract_strided_slice %124 {offsets = [0, 0], sizes = [64, 128], strides = [1, 1]} : vector<64x256xf32> to vector<64x128xf32>
    %126 = vector.extract_strided_slice %124 {offsets = [0, 128], sizes = [64, 128], strides = [1, 1]} : vector<64x256xf32> to vector<64x128xf32>
    %127 = arith.mulf %113, %112 : vector<64x128xf32>
    %cst_69 = arith.constant 1.000000e+00 : f32
    %128 = vector.broadcast %cst_69 : f32 to vector<64x128xf32>
    %129 = arith.subf %128, %113 : vector<64x128xf32>
    %130 = arith.mulf %125, %115 : vector<64x128xf32>
    %cst_70 = arith.constant 1.000000e+00 : f32
    %131 = vector.broadcast %cst_70 : f32 to vector<64x128xf32>
    %132 = arith.subf %131, %125 : vector<64x128xf32>
    %133 = arith.mulf %132, %116 : vector<64x128xf32>
    %134 = arith.addf %130, %133 : vector<64x128xf32>
    %135 = arith.mulf %129, %134 : vector<64x128xf32>
    %136 = arith.addf %127, %135 : vector<64x128xf32>
    %137 = tpu.concatenate %136, %113 in 1 : vector<64x128xf32>, vector<64x128xf32> -> vector<64x256xf32>
    %cst_71 = arith.constant dense<0.000000e+00> : vector<64x384xf32>
    %138 = tpu.matmul %137, %6, %cst_71 {dimension_numbers = #tpu.dot_dimension_numbers<[1], [0], [0], [1], [0, 0, 1, 1], [], []>} : vector<64x256xf32>, vector<256x384xf32>, vector<64x384xf32> -> vector<64x384xf32>
    %139 = vector.broadcast %9 : vector<1x384xf32> to vector<64x384xf32>
    %140 = arith.addf %138, %139 : vector<64x384xf32>
    %c0_72 = arith.constant 0 : index
    %c0_73 = arith.constant 0 : index
    %141 = vector.load %arg13[%c0_72, %c0_73] : memref<8x128xf32, #tpu.memory_space<vmem>>, vector<8x128xf32>
    %142 = vector.extract_strided_slice %140 {offsets = [0, 0], sizes = [8, 384], strides = [1, 1]} : vector<64x384xf32> to vector<8x384xf32>
    %143 = vector.extract_strided_slice %126 {offsets = [0, 0], sizes = [8, 128], strides = [1, 1]} : vector<64x128xf32> to vector<8x128xf32>
    %144 = arith.mulf %143, %141 : vector<8x128xf32>
    %cst_74 = arith.constant dense<0.000000e+00> : vector<8x256xf32>
    %145 = tpu.matmul %144, %7, %cst_74 {dimension_numbers = #tpu.dot_dimension_numbers<[1], [0], [0], [1], [0, 0, 1, 1], [], []>} : vector<8x128xf32>, vector<128x256xf32>, vector<8x256xf32> -> vector<8x256xf32>
    %146 = vector.extract_strided_slice %142 {offsets = [0, 0], sizes = [8, 128], strides = [1, 1]} : vector<8x384xf32> to vector<8x128xf32>
    %147 = vector.extract_strided_slice %145 {offsets = [0, 0], sizes = [8, 128], strides = [1, 1]} : vector<8x256xf32> to vector<8x128xf32>
    %148 = arith.addf %146, %147 : vector<8x128xf32>
    %149 = arith.negf %148 : vector<8x128xf32>
    %150 = math.exp %149 : vector<8x128xf32>
    %cst_75 = arith.constant 1.000000e+00 : f32
    %151 = vector.broadcast %cst_75 : f32 to vector<8x128xf32>
    %152 = arith.addf %151, %150 : vector<8x128xf32>
    %153 = arith.divf %151, %152 : vector<8x128xf32>
    %154 = vector.extract_strided_slice %142 {offsets = [0, 128], sizes = [8, 128], strides = [1, 1]} : vector<8x384xf32> to vector<8x128xf32>
    %155 = vector.extract_strided_slice %145 {offsets = [0, 128], sizes = [8, 128], strides = [1, 1]} : vector<8x256xf32> to vector<8x128xf32>
    %156 = arith.addf %154, %155 : vector<8x128xf32>
    %157 = arith.negf %156 : vector<8x128xf32>
    %158 = math.exp %157 : vector<8x128xf32>
    %cst_76 = arith.constant 1.000000e+00 : f32
    %159 = vector.broadcast %cst_76 : f32 to vector<8x128xf32>
    %160 = arith.addf %159, %158 : vector<8x128xf32>
    %161 = arith.divf %159, %160 : vector<8x128xf32>
    %162 = vector.extract_strided_slice %142 {offsets = [0, 256], sizes = [8, 128], strides = [1, 1]} : vector<8x384xf32> to vector<8x128xf32>
    %163 = arith.mulf %161, %144 : vector<8x128xf32>
    %cst_77 = arith.constant dense<0.000000e+00> : vector<8x128xf32>
    %164 = tpu.matmul %163, %8, %cst_77 {dimension_numbers = #tpu.dot_dimension_numbers<[1], [0], [0], [1], [0, 0, 1, 1], [], []>} : vector<8x128xf32>, vector<128x128xf32>, vector<8x128xf32> -> vector<8x128xf32>
    %165 = arith.addf %162, %164 : vector<8x128xf32>
    %166 = math.tanh %165 : vector<8x128xf32>
    %cst_78 = arith.constant 1.000000e+00 : f32
    %167 = vector.broadcast %cst_78 : f32 to vector<8x128xf32>
    %168 = arith.subf %167, %153 : vector<8x128xf32>
    %169 = arith.mulf %168, %144 : vector<8x128xf32>
    %170 = arith.mulf %153, %166 : vector<8x128xf32>
    %171 = arith.addf %169, %170 : vector<8x128xf32>
    %c0_79 = arith.constant 0 : index
    %c0_80 = arith.constant 0 : index
    %c0_81 = arith.constant 0 : index
    %172 = vector.load %arg11[%c0_79, %c0_80, %c0_81] : memref<8x8x128xf32, #tpu.memory_space<vmem>>, vector<8x1x128xf32>
    %173 = vector.shape_cast %172 : vector<8x1x128xf32> to vector<8x128xf32>
    %174 = vector.shape_cast %171 : vector<8x128xf32> to vector<8x1x128xf32>
    tpu.vector_store %arg11[%c0_79, %c0_80, %c0_81], %174 {strides = array<i32>} : memref<8x8x128xf32, #tpu.memory_space<vmem>>, vector<8x1x128xf32>,
    %175 = vector.extract_strided_slice %140 {offsets = [8, 0], sizes = [8, 384], strides = [1, 1]} : vector<64x384xf32> to vector<8x384xf32>
    %176 = vector.extract_strided_slice %126 {offsets = [8, 0], sizes = [8, 128], strides = [1, 1]} : vector<64x128xf32> to vector<8x128xf32>
    %177 = arith.mulf %176, %171 : vector<8x128xf32>
    %cst_82 = arith.constant dense<0.000000e+00> : vector<8x256xf32>
    %178 = tpu.matmul %177, %7, %cst_82 {dimension_numbers = #tpu.dot_dimension_numbers<[1], [0], [0], [1], [0, 0, 1, 1], [], []>} : vector<8x128xf32>, vector<128x256xf32>, vector<8x256xf32> -> vector<8x256xf32>
    %179 = vector.extract_strided_slice %175 {offsets = [0, 0], sizes = [8, 128], strides = [1, 1]} : vector<8x384xf32> to vector<8x128xf32>
    %180 = vector.extract_strided_slice %178 {offsets = [0, 0], sizes = [8, 128], strides = [1, 1]} : vector<8x256xf32> to vector<8x128xf32>
    %181 = arith.addf %179, %180 : vector<8x128xf32>
    %182 = arith.negf %181 : vector<8x128xf32>
    %183 = math.exp %182 : vector<8x128xf32>
    %cst_83 = arith.constant 1.000000e+00 : f32
    %184 = vector.broadcast %cst_83 : f32 to vector<8x128xf32>
    %185 = arith.addf %184, %183 : vector<8x128xf32>
    %186 = arith.divf %184, %185 : vector<8x128xf32>
    %187 = vector.extract_strided_slice %175 {offsets = [0, 128], sizes = [8, 128], strides = [1, 1]} : vector<8x384xf32> to vector<8x128xf32>
    %188 = vector.extract_strided_slice %178 {offsets = [0, 128], sizes = [8, 128], strides = [1, 1]} : vector<8x256xf32> to vector<8x128xf32>
    %189 = arith.addf %187, %188 : vector<8x128xf32>
    %190 = arith.negf %189 : vector<8x128xf32>
    %191 = math.exp %190 : vector<8x128xf32>
    %cst_84 = arith.constant 1.000000e+00 : f32
    %192 = vector.broadcast %cst_84 : f32 to vector<8x128xf32>
    %193 = arith.addf %192, %191 : vector<8x128xf32>
    %194 = arith.divf %192, %193 : vector<8x128xf32>
    %195 = vector.extract_strided_slice %175 {offsets = [0, 256], sizes = [8, 128], strides = [1, 1]} : vector<8x384xf32> to vector<8x128xf32>
    %196 = arith.mulf %194, %177 : vector<8x128xf32>
    %cst_85 = arith.constant dense<0.000000e+00> : vector<8x128xf32>
    %197 = tpu.matmul %196, %8, %cst_85 {dimension_numbers = #tpu.dot_dimension_numbers<[1], [0], [0], [1], [0, 0, 1, 1], [], []>} : vector<8x128xf32>, vector<128x128xf32>, vector<8x128xf32> -> vector<8x128xf32>
    %198 = arith.addf %195, %197 : vector<8x128xf32>
    %199 = math.tanh %198 : vector<8x128xf32>
    %cst_86 = arith.constant 1.000000e+00 : f32
    %200 = vector.broadcast %cst_86 : f32 to vector<8x128xf32>
    %201 = arith.subf %200, %186 : vector<8x128xf32>
    %202 = arith.mulf %201, %177 : vector<8x128xf32>
    %203 = arith.mulf %186, %199 : vector<8x128xf32>
    %204 = arith.addf %202, %203 : vector<8x128xf32>
    %c0_87 = arith.constant 0 : index
    %c1_88 = arith.constant 1 : index
    %c0_89 = arith.constant 0 : index
    %205 = vector.load %arg11[%c0_87, %c1_88, %c0_89] : memref<8x8x128xf32, #tpu.memory_space<vmem>>, vector<8x1x128xf32>
    %206 = vector.shape_cast %205 : vector<8x1x128xf32> to vector<8x128xf32>
    %207 = vector.shape_cast %204 : vector<8x128xf32> to vector<8x1x128xf32>
    tpu.vector_store %arg11[%c0_87, %c1_88, %c0_89], %207 {strides = array<i32>} : memref<8x8x128xf32, #tpu.memory_space<vmem>>, vector<8x1x128xf32>,
    %208 = vector.extract_strided_slice %140 {offsets = [16, 0], sizes = [8, 384], strides = [1, 1]} : vector<64x384xf32> to vector<8x384xf32>
    %209 = vector.extract_strided_slice %126 {offsets = [16, 0], sizes = [8, 128], strides = [1, 1]} : vector<64x128xf32> to vector<8x128xf32>
    %210 = arith.mulf %209, %204 : vector<8x128xf32>
    %cst_90 = arith.constant dense<0.000000e+00> : vector<8x256xf32>
    %211 = tpu.matmul %210, %7, %cst_90 {dimension_numbers = #tpu.dot_dimension_numbers<[1], [0], [0], [1], [0, 0, 1, 1], [], []>} : vector<8x128xf32>, vector<128x256xf32>, vector<8x256xf32> -> vector<8x256xf32>
    %212 = vector.extract_strided_slice %208 {offsets = [0, 0], sizes = [8, 128], strides = [1, 1]} : vector<8x384xf32> to vector<8x128xf32>
    %213 = vector.extract_strided_slice %211 {offsets = [0, 0], sizes = [8, 128], strides = [1, 1]} : vector<8x256xf32> to vector<8x128xf32>
    %214 = arith.addf %212, %213 : vector<8x128xf32>
    %215 = arith.negf %214 : vector<8x128xf32>
    %216 = math.exp %215 : vector<8x128xf32>
    %cst_91 = arith.constant 1.000000e+00 : f32
    %217 = vector.broadcast %cst_91 : f32 to vector<8x128xf32>
    %218 = arith.addf %217, %216 : vector<8x128xf32>
    %219 = arith.divf %217, %218 : vector<8x128xf32>
    %220 = vector.extract_strided_slice %208 {offsets = [0, 128], sizes = [8, 128], strides = [1, 1]} : vector<8x384xf32> to vector<8x128xf32>
    %221 = vector.extract_strided_slice %211 {offsets = [0, 128], sizes = [8, 128], strides = [1, 1]} : vector<8x256xf32> to vector<8x128xf32>
    %222 = arith.addf %220, %221 : vector<8x128xf32>
    %223 = arith.negf %222 : vector<8x128xf32>
    %224 = math.exp %223 : vector<8x128xf32>
    %cst_92 = arith.constant 1.000000e+00 : f32
    %225 = vector.broadcast %cst_92 : f32 to vector<8x128xf32>
    %226 = arith.addf %225, %224 : vector<8x128xf32>
    %227 = arith.divf %225, %226 : vector<8x128xf32>
    %228 = vector.extract_strided_slice %208 {offsets = [0, 256], sizes = [8, 128], strides = [1, 1]} : vector<8x384xf32> to vector<8x128xf32>
    %229 = arith.mulf %227, %210 : vector<8x128xf32>
    %cst_93 = arith.constant dense<0.000000e+00> : vector<8x128xf32>
    %230 = tpu.matmul %229, %8, %cst_93 {dimension_numbers = #tpu.dot_dimension_numbers<[1], [0], [0], [1], [0, 0, 1, 1], [], []>} : vector<8x128xf32>, vector<128x128xf32>, vector<8x128xf32> -> vector<8x128xf32>
    %231 = arith.addf %228, %230 : vector<8x128xf32>
    %232 = math.tanh %231 : vector<8x128xf32>
    %cst_94 = arith.constant 1.000000e+00 : f32
    %233 = vector.broadcast %cst_94 : f32 to vector<8x128xf32>
    %234 = arith.subf %233, %219 : vector<8x128xf32>
    %235 = arith.mulf %234, %210 : vector<8x128xf32>
    %236 = arith.mulf %219, %232 : vector<8x128xf32>
    %237 = arith.addf %235, %236 : vector<8x128xf32>
    %c0_95 = arith.constant 0 : index
    %c2_96 = arith.constant 2 : index
    %c0_97 = arith.constant 0 : index
    %238 = vector.load %arg11[%c0_95, %c2_96, %c0_97] : memref<8x8x128xf32, #tpu.memory_space<vmem>>, vector<8x1x128xf32>
    %239 = vector.shape_cast %238 : vector<8x1x128xf32> to vector<8x128xf32>
    %240 = vector.shape_cast %237 : vector<8x128xf32> to vector<8x1x128xf32>
    tpu.vector_store %arg11[%c0_95, %c2_96, %c0_97], %240 {strides = array<i32>} : memref<8x8x128xf32, #tpu.memory_space<vmem>>, vector<8x1x128xf32>,
    %241 = vector.extract_strided_slice %140 {offsets = [24, 0], sizes = [8, 384], strides = [1, 1]} : vector<64x384xf32> to vector<8x384xf32>
    %242 = vector.extract_strided_slice %126 {offsets = [24, 0], sizes = [8, 128], strides = [1, 1]} : vector<64x128xf32> to vector<8x128xf32>
    %243 = arith.mulf %242, %237 : vector<8x128xf32>
    %cst_98 = arith.constant dense<0.000000e+00> : vector<8x256xf32>
    %244 = tpu.matmul %243, %7, %cst_98 {dimension_numbers = #tpu.dot_dimension_numbers<[1], [0], [0], [1], [0, 0, 1, 1], [], []>} : vector<8x128xf32>, vector<128x256xf32>, vector<8x256xf32> -> vector<8x256xf32>
    %245 = vector.extract_strided_slice %241 {offsets = [0, 0], sizes = [8, 128], strides = [1, 1]} : vector<8x384xf32> to vector<8x128xf32>
    %246 = vector.extract_strided_slice %244 {offsets = [0, 0], sizes = [8, 128], strides = [1, 1]} : vector<8x256xf32> to vector<8x128xf32>
    %247 = arith.addf %245, %246 : vector<8x128xf32>
    %248 = arith.negf %247 : vector<8x128xf32>
    %249 = math.exp %248 : vector<8x128xf32>
    %cst_99 = arith.constant 1.000000e+00 : f32
    %250 = vector.broadcast %cst_99 : f32 to vector<8x128xf32>
    %251 = arith.addf %250, %249 : vector<8x128xf32>
    %252 = arith.divf %250, %251 : vector<8x128xf32>
    %253 = vector.extract_strided_slice %241 {offsets = [0, 128], sizes = [8, 128], strides = [1, 1]} : vector<8x384xf32> to vector<8x128xf32>
    %254 = vector.extract_strided_slice %244 {offsets = [0, 128], sizes = [8, 128], strides = [1, 1]} : vector<8x256xf32> to vector<8x128xf32>
    %255 = arith.addf %253, %254 : vector<8x128xf32>
    %256 = arith.negf %255 : vector<8x128xf32>
    %257 = math.exp %256 : vector<8x128xf32>
    %cst_100 = arith.constant 1.000000e+00 : f32
    %258 = vector.broadcast %cst_100 : f32 to vector<8x128xf32>
    %259 = arith.addf %258, %257 : vector<8x128xf32>
    %260 = arith.divf %258, %259 : vector<8x128xf32>
    %261 = vector.extract_strided_slice %241 {offsets = [0, 256], sizes = [8, 128], strides = [1, 1]} : vector<8x384xf32> to vector<8x128xf32>
    %262 = arith.mulf %260, %243 : vector<8x128xf32>
    %cst_101 = arith.constant dense<0.000000e+00> : vector<8x128xf32>
    %263 = tpu.matmul %262, %8, %cst_101 {dimension_numbers = #tpu.dot_dimension_numbers<[1], [0], [0], [1], [0, 0, 1, 1], [], []>} : vector<8x128xf32>, vector<128x128xf32>, vector<8x128xf32> -> vector<8x128xf32>
    %264 = arith.addf %261, %263 : vector<8x128xf32>
    %265 = math.tanh %264 : vector<8x128xf32>
    %cst_102 = arith.constant 1.000000e+00 : f32
    %266 = vector.broadcast %cst_102 : f32 to vector<8x128xf32>
    %267 = arith.subf %266, %252 : vector<8x128xf32>
    %268 = arith.mulf %267, %243 : vector<8x128xf32>
    %269 = arith.mulf %252, %265 : vector<8x128xf32>
    %270 = arith.addf %268, %269 : vector<8x128xf32>
    %c0_103 = arith.constant 0 : index
    %c3_104 = arith.constant 3 : index
    %c0_105 = arith.constant 0 : index
    %271 = vector.load %arg11[%c0_103, %c3_104, %c0_105] : memref<8x8x128xf32, #tpu.memory_space<vmem>>, vector<8x1x128xf32>
    %272 = vector.shape_cast %271 : vector<8x1x128xf32> to vector<8x128xf32>
    %273 = vector.shape_cast %270 : vector<8x128xf32> to vector<8x1x128xf32>
    tpu.vector_store %arg11[%c0_103, %c3_104, %c0_105], %273 {strides = array<i32>} : memref<8x8x128xf32, #tpu.memory_space<vmem>>, vector<8x1x128xf32>,
    %274 = vector.extract_strided_slice %140 {offsets = [32, 0], sizes = [8, 384], strides = [1, 1]} : vector<64x384xf32> to vector<8x384xf32>
    %275 = vector.extract_strided_slice %126 {offsets = [32, 0], sizes = [8, 128], strides = [1, 1]} : vector<64x128xf32> to vector<8x128xf32>
    %276 = arith.mulf %275, %270 : vector<8x128xf32>
    %cst_106 = arith.constant dense<0.000000e+00> : vector<8x256xf32>
    %277 = tpu.matmul %276, %7, %cst_106 {dimension_numbers = #tpu.dot_dimension_numbers<[1], [0], [0], [1], [0, 0, 1, 1], [], []>} : vector<8x128xf32>, vector<128x256xf32>, vector<8x256xf32> -> vector<8x256xf32>
    %278 = vector.extract_strided_slice %274 {offsets = [0, 0], sizes = [8, 128], strides = [1, 1]} : vector<8x384xf32> to vector<8x128xf32>
    %279 = vector.extract_strided_slice %277 {offsets = [0, 0], sizes = [8, 128], strides = [1, 1]} : vector<8x256xf32> to vector<8x128xf32>
    %280 = arith.addf %278, %279 : vector<8x128xf32>
    %281 = arith.negf %280 : vector<8x128xf32>
    %282 = math.exp %281 : vector<8x128xf32>
    %cst_107 = arith.constant 1.000000e+00 : f32
    %283 = vector.broadcast %cst_107 : f32 to vector<8x128xf32>
    %284 = arith.addf %283, %282 : vector<8x128xf32>
    %285 = arith.divf %283, %284 : vector<8x128xf32>
    %286 = vector.extract_strided_slice %274 {offsets = [0, 128], sizes = [8, 128], strides = [1, 1]} : vector<8x384xf32> to vector<8x128xf32>
    %287 = vector.extract_strided_slice %277 {offsets = [0, 128], sizes = [8, 128], strides = [1, 1]} : vector<8x256xf32> to vector<8x128xf32>
    %288 = arith.addf %286, %287 : vector<8x128xf32>
    %289 = arith.negf %288 : vector<8x128xf32>
    %290 = math.exp %289 : vector<8x128xf32>
    %cst_108 = arith.constant 1.000000e+00 : f32
    %291 = vector.broadcast %cst_108 : f32 to vector<8x128xf32>
    %292 = arith.addf %291, %290 : vector<8x128xf32>
    %293 = arith.divf %291, %292 : vector<8x128xf32>
    %294 = vector.extract_strided_slice %274 {offsets = [0, 256], sizes = [8, 128], strides = [1, 1]} : vector<8x384xf32> to vector<8x128xf32>
    %295 = arith.mulf %293, %276 : vector<8x128xf32>
    %cst_109 = arith.constant dense<0.000000e+00> : vector<8x128xf32>
    %296 = tpu.matmul %295, %8, %cst_109 {dimension_numbers = #tpu.dot_dimension_numbers<[1], [0], [0], [1], [0, 0, 1, 1], [], []>} : vector<8x128xf32>, vector<128x128xf32>, vector<8x128xf32> -> vector<8x128xf32>
    %297 = arith.addf %294, %296 : vector<8x128xf32>
    %298 = math.tanh %297 : vector<8x128xf32>
    %cst_110 = arith.constant 1.000000e+00 : f32
    %299 = vector.broadcast %cst_110 : f32 to vector<8x128xf32>
    %300 = arith.subf %299, %285 : vector<8x128xf32>
    %301 = arith.mulf %300, %276 : vector<8x128xf32>
    %302 = arith.mulf %285, %298 : vector<8x128xf32>
    %303 = arith.addf %301, %302 : vector<8x128xf32>
    %c0_111 = arith.constant 0 : index
    %c4_112 = arith.constant 4 : index
    %c0_113 = arith.constant 0 : index
    %304 = vector.load %arg11[%c0_111, %c4_112, %c0_113] : memref<8x8x128xf32, #tpu.memory_space<vmem>>, vector<8x1x128xf32>
    %305 = vector.shape_cast %304 : vector<8x1x128xf32> to vector<8x128xf32>
    %306 = vector.shape_cast %303 : vector<8x128xf32> to vector<8x1x128xf32>
    tpu.vector_store %arg11[%c0_111, %c4_112, %c0_113], %306 {strides = array<i32>} : memref<8x8x128xf32, #tpu.memory_space<vmem>>, vector<8x1x128xf32>,
    %307 = vector.extract_strided_slice %140 {offsets = [40, 0], sizes = [8, 384], strides = [1, 1]} : vector<64x384xf32> to vector<8x384xf32>
    %308 = vector.extract_strided_slice %126 {offsets = [40, 0], sizes = [8, 128], strides = [1, 1]} : vector<64x128xf32> to vector<8x128xf32>
    %309 = arith.mulf %308, %303 : vector<8x128xf32>
    %cst_114 = arith.constant dense<0.000000e+00> : vector<8x256xf32>
    %310 = tpu.matmul %309, %7, %cst_114 {dimension_numbers = #tpu.dot_dimension_numbers<[1], [0], [0], [1], [0, 0, 1, 1], [], []>} : vector<8x128xf32>, vector<128x256xf32>, vector<8x256xf32> -> vector<8x256xf32>
    %311 = vector.extract_strided_slice %307 {offsets = [0, 0], sizes = [8, 128], strides = [1, 1]} : vector<8x384xf32> to vector<8x128xf32>
    %312 = vector.extract_strided_slice %310 {offsets = [0, 0], sizes = [8, 128], strides = [1, 1]} : vector<8x256xf32> to vector<8x128xf32>
    %313 = arith.addf %311, %312 : vector<8x128xf32>
    %314 = arith.negf %313 : vector<8x128xf32>
    %315 = math.exp %314 : vector<8x128xf32>
    %cst_115 = arith.constant 1.000000e+00 : f32
    %316 = vector.broadcast %cst_115 : f32 to vector<8x128xf32>
    %317 = arith.addf %316, %315 : vector<8x128xf32>
    %318 = arith.divf %316, %317 : vector<8x128xf32>
    %319 = vector.extract_strided_slice %307 {offsets = [0, 128], sizes = [8, 128], strides = [1, 1]} : vector<8x384xf32> to vector<8x128xf32>
    %320 = vector.extract_strided_slice %310 {offsets = [0, 128], sizes = [8, 128], strides = [1, 1]} : vector<8x256xf32> to vector<8x128xf32>
    %321 = arith.addf %319, %320 : vector<8x128xf32>
    %322 = arith.negf %321 : vector<8x128xf32>
    %323 = math.exp %322 : vector<8x128xf32>
    %cst_116 = arith.constant 1.000000e+00 : f32
    %324 = vector.broadcast %cst_116 : f32 to vector<8x128xf32>
    %325 = arith.addf %324, %323 : vector<8x128xf32>
    %326 = arith.divf %324, %325 : vector<8x128xf32>
    %327 = vector.extract_strided_slice %307 {offsets = [0, 256], sizes = [8, 128], strides = [1, 1]} : vector<8x384xf32> to vector<8x128xf32>
    %328 = arith.mulf %326, %309 : vector<8x128xf32>
    %cst_117 = arith.constant dense<0.000000e+00> : vector<8x128xf32>
    %329 = tpu.matmul %328, %8, %cst_117 {dimension_numbers = #tpu.dot_dimension_numbers<[1], [0], [0], [1], [0, 0, 1, 1], [], []>} : vector<8x128xf32>, vector<128x128xf32>, vector<8x128xf32> -> vector<8x128xf32>
    %330 = arith.addf %327, %329 : vector<8x128xf32>
    %331 = math.tanh %330 : vector<8x128xf32>
    %cst_118 = arith.constant 1.000000e+00 : f32
    %332 = vector.broadcast %cst_118 : f32 to vector<8x128xf32>
    %333 = arith.subf %332, %318 : vector<8x128xf32>
    %334 = arith.mulf %333, %309 : vector<8x128xf32>
    %335 = arith.mulf %318, %331 : vector<8x128xf32>
    %336 = arith.addf %334, %335 : vector<8x128xf32>
    %c0_119 = arith.constant 0 : index
    %c5_120 = arith.constant 5 : index
    %c0_121 = arith.constant 0 : index
    %337 = vector.load %arg11[%c0_119, %c5_120, %c0_121] : memref<8x8x128xf32, #tpu.memory_space<vmem>>, vector<8x1x128xf32>
    %338 = vector.shape_cast %337 : vector<8x1x128xf32> to vector<8x128xf32>
    %339 = vector.shape_cast %336 : vector<8x128xf32> to vector<8x1x128xf32>
    tpu.vector_store %arg11[%c0_119, %c5_120, %c0_121], %339 {strides = array<i32>} : memref<8x8x128xf32, #tpu.memory_space<vmem>>, vector<8x1x128xf32>,
    %340 = vector.extract_strided_slice %140 {offsets = [48, 0], sizes = [8, 384], strides = [1, 1]} : vector<64x384xf32> to vector<8x384xf32>
    %341 = vector.extract_strided_slice %126 {offsets = [48, 0], sizes = [8, 128], strides = [1, 1]} : vector<64x128xf32> to vector<8x128xf32>
    %342 = arith.mulf %341, %336 : vector<8x128xf32>
    %cst_122 = arith.constant dense<0.000000e+00> : vector<8x256xf32>
    %343 = tpu.matmul %342, %7, %cst_122 {dimension_numbers = #tpu.dot_dimension_numbers<[1], [0], [0], [1], [0, 0, 1, 1], [], []>} : vector<8x128xf32>, vector<128x256xf32>, vector<8x256xf32> -> vector<8x256xf32>
    %344 = vector.extract_strided_slice %340 {offsets = [0, 0], sizes = [8, 128], strides = [1, 1]} : vector<8x384xf32> to vector<8x128xf32>
    %345 = vector.extract_strided_slice %343 {offsets = [0, 0], sizes = [8, 128], strides = [1, 1]} : vector<8x256xf32> to vector<8x128xf32>
    %346 = arith.addf %344, %345 : vector<8x128xf32>
    %347 = arith.negf %346 : vector<8x128xf32>
    %348 = math.exp %347 : vector<8x128xf32>
    %cst_123 = arith.constant 1.000000e+00 : f32
    %349 = vector.broadcast %cst_123 : f32 to vector<8x128xf32>
    %350 = arith.addf %349, %348 : vector<8x128xf32>
    %351 = arith.divf %349, %350 : vector<8x128xf32>
    %352 = vector.extract_strided_slice %340 {offsets = [0, 128], sizes = [8, 128], strides = [1, 1]} : vector<8x384xf32> to vector<8x128xf32>
    %353 = vector.extract_strided_slice %343 {offsets = [0, 128], sizes = [8, 128], strides = [1, 1]} : vector<8x256xf32> to vector<8x128xf32>
    %354 = arith.addf %352, %353 : vector<8x128xf32>
    %355 = arith.negf %354 : vector<8x128xf32>
    %356 = math.exp %355 : vector<8x128xf32>
    %cst_124 = arith.constant 1.000000e+00 : f32
    %357 = vector.broadcast %cst_124 : f32 to vector<8x128xf32>
    %358 = arith.addf %357, %356 : vector<8x128xf32>
    %359 = arith.divf %357, %358 : vector<8x128xf32>
    %360 = vector.extract_strided_slice %340 {offsets = [0, 256], sizes = [8, 128], strides = [1, 1]} : vector<8x384xf32> to vector<8x128xf32>
    %361 = arith.mulf %359, %342 : vector<8x128xf32>
    %cst_125 = arith.constant dense<0.000000e+00> : vector<8x128xf32>
    %362 = tpu.matmul %361, %8, %cst_125 {dimension_numbers = #tpu.dot_dimension_numbers<[1], [0], [0], [1], [0, 0, 1, 1], [], []>} : vector<8x128xf32>, vector<128x128xf32>, vector<8x128xf32> -> vector<8x128xf32>
    %363 = arith.addf %360, %362 : vector<8x128xf32>
    %364 = math.tanh %363 : vector<8x128xf32>
    %cst_126 = arith.constant 1.000000e+00 : f32
    %365 = vector.broadcast %cst_126 : f32 to vector<8x128xf32>
    %366 = arith.subf %365, %351 : vector<8x128xf32>
    %367 = arith.mulf %366, %342 : vector<8x128xf32>
    %368 = arith.mulf %351, %364 : vector<8x128xf32>
    %369 = arith.addf %367, %368 : vector<8x128xf32>
    %c0_127 = arith.constant 0 : index
    %c6_128 = arith.constant 6 : index
    %c0_129 = arith.constant 0 : index
    %370 = vector.load %arg11[%c0_127, %c6_128, %c0_129] : memref<8x8x128xf32, #tpu.memory_space<vmem>>, vector<8x1x128xf32>
    %371 = vector.shape_cast %370 : vector<8x1x128xf32> to vector<8x128xf32>
    %372 = vector.shape_cast %369 : vector<8x128xf32> to vector<8x1x128xf32>
    tpu.vector_store %arg11[%c0_127, %c6_128, %c0_129], %372 {strides = array<i32>} : memref<8x8x128xf32, #tpu.memory_space<vmem>>, vector<8x1x128xf32>,
    %373 = vector.extract_strided_slice %140 {offsets = [56, 0], sizes = [8, 384], strides = [1, 1]} : vector<64x384xf32> to vector<8x384xf32>
    %374 = vector.extract_strided_slice %126 {offsets = [56, 0], sizes = [8, 128], strides = [1, 1]} : vector<64x128xf32> to vector<8x128xf32>
    %375 = arith.mulf %374, %369 : vector<8x128xf32>
    %cst_130 = arith.constant dense<0.000000e+00> : vector<8x256xf32>
    %376 = tpu.matmul %375, %7, %cst_130 {dimension_numbers = #tpu.dot_dimension_numbers<[1], [0], [0], [1], [0, 0, 1, 1], [], []>} : vector<8x128xf32>, vector<128x256xf32>, vector<8x256xf32> -> vector<8x256xf32>
    %377 = vector.extract_strided_slice %373 {offsets = [0, 0], sizes = [8, 128], strides = [1, 1]} : vector<8x384xf32> to vector<8x128xf32>
    %378 = vector.extract_strided_slice %376 {offsets = [0, 0], sizes = [8, 128], strides = [1, 1]} : vector<8x256xf32> to vector<8x128xf32>
    %379 = arith.addf %377, %378 : vector<8x128xf32>
    %380 = arith.negf %379 : vector<8x128xf32>
    %381 = math.exp %380 : vector<8x128xf32>
    %cst_131 = arith.constant 1.000000e+00 : f32
    %382 = vector.broadcast %cst_131 : f32 to vector<8x128xf32>
    %383 = arith.addf %382, %381 : vector<8x128xf32>
    %384 = arith.divf %382, %383 : vector<8x128xf32>
    %385 = vector.extract_strided_slice %373 {offsets = [0, 128], sizes = [8, 128], strides = [1, 1]} : vector<8x384xf32> to vector<8x128xf32>
    %386 = vector.extract_strided_slice %376 {offsets = [0, 128], sizes = [8, 128], strides = [1, 1]} : vector<8x256xf32> to vector<8x128xf32>
    %387 = arith.addf %385, %386 : vector<8x128xf32>
    %388 = arith.negf %387 : vector<8x128xf32>
    %389 = math.exp %388 : vector<8x128xf32>
    %cst_132 = arith.constant 1.000000e+00 : f32
    %390 = vector.broadcast %cst_132 : f32 to vector<8x128xf32>
    %391 = arith.addf %390, %389 : vector<8x128xf32>
    %392 = arith.divf %390, %391 : vector<8x128xf32>
    %393 = vector.extract_strided_slice %373 {offsets = [0, 256], sizes = [8, 128], strides = [1, 1]} : vector<8x384xf32> to vector<8x128xf32>
    %394 = arith.mulf %392, %375 : vector<8x128xf32>
    %cst_133 = arith.constant dense<0.000000e+00> : vector<8x128xf32>
    %395 = tpu.matmul %394, %8, %cst_133 {dimension_numbers = #tpu.dot_dimension_numbers<[1], [0], [0], [1], [0, 0, 1, 1], [], []>} : vector<8x128xf32>, vector<128x128xf32>, vector<8x128xf32> -> vector<8x128xf32>
    %396 = arith.addf %393, %395 : vector<8x128xf32>
    %397 = math.tanh %396 : vector<8x128xf32>
    %cst_134 = arith.constant 1.000000e+00 : f32
    %398 = vector.broadcast %cst_134 : f32 to vector<8x128xf32>
    %399 = arith.subf %398, %384 : vector<8x128xf32>
    %400 = arith.mulf %399, %375 : vector<8x128xf32>
    %401 = arith.mulf %384, %397 : vector<8x128xf32>
    %402 = arith.addf %400, %401 : vector<8x128xf32>
    %c0_135 = arith.constant 0 : index
    %c7_136 = arith.constant 7 : index
    %c0_137 = arith.constant 0 : index
    %403 = vector.load %arg11[%c0_135, %c7_136, %c0_137] : memref<8x8x128xf32, #tpu.memory_space<vmem>>, vector<8x1x128xf32>
    %404 = vector.shape_cast %403 : vector<8x1x128xf32> to vector<8x128xf32>
    %405 = vector.shape_cast %402 : vector<8x128xf32> to vector<8x1x128xf32>
    tpu.vector_store %arg11[%c0_135, %c7_136, %c0_137], %405 {strides = array<i32>} : memref<8x8x128xf32, #tpu.memory_space<vmem>>, vector<8x1x128xf32>,
    %c0_138 = arith.constant 0 : index
    %c0_139 = arith.constant 0 : index
    %406 = vector.load %arg13[%c0_138, %c0_139] : memref<8x128xf32, #tpu.memory_space<vmem>>, vector<8x128xf32>
    tpu.vector_store %arg13[%c0_138, %c0_139], %402 {strides = array<i32>} : memref<8x128xf32, #tpu.memory_space<vmem>>, vector<8x128xf32>,
    %c0_i32_140 = arith.constant 0 : i32
    %407 = arith.cmpi eq, %arg1, %c0_i32_140 : i32
    %408 = arith.extui %407 : i1 to i32
    %c0_i32_141 = arith.constant 0 : i32
    %409 = arith.cmpi ne, %408, %c0_i32_141 : i32
    scf.if %409 {
      %c0_142 = arith.constant 0 : index
      %c0_143 = arith.constant 0 : index
      %410 = vector.load %arg12[%c0_142, %c0_143] : memref<8x128xf32, #tpu.memory_space<vmem>>, vector<8x128xf32>
      tpu.vector_store %arg12[%c0_142, %c0_143], %402 {strides = array<i32>} : memref<8x128xf32, #tpu.memory_space<vmem>>, vector<8x128xf32>,
    } else {
    }
    return
  }
  func.func @transform_0(%arg0: i32, %arg1: i32) -> (i32, i32, i32) {
    %c0_i32 = arith.constant 0 : i32
    %c0_i32_0 = arith.constant 0 : i32
    return %arg0, %arg1, %c0_i32 : i32, i32, i32
  }
  func.func @transform_1(%arg0: i32, %arg1: i32) -> (i32, i32) {
    %c0_i32 = arith.constant 0 : i32
    %c0_i32_0 = arith.constant 0 : i32
    return %arg0, %c0_i32 : i32, i32
  }
  func.func @transform_2(%arg0: i32, %arg1: i32) -> (i32, i32) {
    %c0_i32 = arith.constant 0 : i32
    %c0_i32_0 = arith.constant 0 : i32
    return %arg0, %c0_i32 : i32, i32
  }
  func.func @transform_3(%arg0: i32, %arg1: i32) -> (i32, i32) {
    %c0_i32 = arith.constant 0 : i32
    %c0_i32_0 = arith.constant 0 : i32
    %c0_i32_1 = arith.constant 0 : i32
    return %c0_i32, %c0_i32_0 : i32, i32
  }
  func.func @transform_4(%arg0: i32, %arg1: i32) -> (i32, i32) {
    %c0_i32 = arith.constant 0 : i32
    %c0_i32_0 = arith.constant 0 : i32
    %c0_i32_1 = arith.constant 0 : i32
    return %c0_i32, %c0_i32_0 : i32, i32
  }
  func.func @transform_5(%arg0: i32, %arg1: i32) -> (i32, i32) {
    %c0_i32 = arith.constant 0 : i32
    %c0_i32_0 = arith.constant 0 : i32
    %c0_i32_1 = arith.constant 0 : i32
    return %c0_i32, %c0_i32_0 : i32, i32
  }
  func.func @transform_6(%arg0: i32, %arg1: i32) -> (i32, i32) {
    %c0_i32 = arith.constant 0 : i32
    %c0_i32_0 = arith.constant 0 : i32
    %c0_i32_1 = arith.constant 0 : i32
    return %c0_i32, %c0_i32_0 : i32, i32
  }
  func.func @transform_7(%arg0: i32, %arg1: i32) -> (i32, i32) {
    %c0_i32 = arith.constant 0 : i32
    %c0_i32_0 = arith.constant 0 : i32
    %c0_i32_1 = arith.constant 0 : i32
    return %c0_i32, %c0_i32_0 : i32, i32
  }
  func.func @transform_8(%arg0: i32, %arg1: i32) -> (i32, i32) {
    %c0_i32 = arith.constant 0 : i32
    %c0_i32_0 = arith.constant 0 : i32
    %c0_i32_1 = arith.constant 0 : i32
    return %c0_i32, %c0_i32_0 : i32, i32
  }
  func.func @transform_9(%arg0: i32, %arg1: i32) -> (i32, i32, i32) {
    %c0_i32 = arith.constant 0 : i32
    %c0_i32_0 = arith.constant 0 : i32
    return %arg0, %arg1, %c0_i32 : i32, i32, i32
  }
  func.func @transform_10(%arg0: i32, %arg1: i32) -> (i32, i32) {
    %c0_i32 = arith.constant 0 : i32
    %c0_i32_0 = arith.constant 0 : i32
    return %arg0, %c0_i32 : i32, i32
  }
}

module attributes {stable_mosaic.version = 11 : i64} {
  func.func @_grud_kernel(%arg0: i32, %arg1: i32, %arg2: memref<8x8x128xf32, #tpu.memory_space<vmem>>, %arg3: memref<8x128xf32, #tpu.memory_space<vmem>>, %arg4: memref<8x128xf32, #tpu.memory_space<vmem>>, %arg5: memref<128x256xf32, #tpu.memory_space<vmem>>, %arg6: memref<1x256xf32, #tpu.memory_space<vmem>>, %arg7: memref<256x384xf32, #tpu.memory_space<vmem>>, %arg8: memref<128x256xf32, #tpu.memory_space<vmem>>, %arg9: memref<128x128xf32, #tpu.memory_space<vmem>>, %arg10: memref<1x384xf32, #tpu.memory_space<vmem>>, %arg11: memref<8x8x128xf32, #tpu.memory_space<vmem>>, %arg12: memref<8x128xf32, #tpu.memory_space<vmem>>, %arg13: memref<8x128xf32, #tpu.memory_space<vmem>>, %arg14: memref<8x128xf32, #tpu.memory_space<vmem>>, %arg15: memref<8x128xf32, #tpu.memory_space<vmem>>, %arg16: memref<8x128xf32, #tpu.memory_space<vmem>>) attributes {dimension_semantics = [#tpu.dimension_semantics<parallel>, #tpu.dimension_semantics<arbitrary>], iteration_bounds = array<i64: 1, 1>, scalar_prefetch = 0 : i64, scratch_operands = 4 : i64, tpu.core_type = #tpu.core_type<tc>, window_params = [{transform_indices = @transform_0, window_bounds = array<i64: 8, 8, 128>}, {transform_indices = @transform_1, window_bounds = array<i64: 8, 128>}, {transform_indices = @transform_2, window_bounds = array<i64: 8, 128>}, {pipeline_mode = #tpu.pipeline_mode<synchronous>, transform_indices = @transform_3, window_bounds = array<i64: 128, 256>}, {pipeline_mode = #tpu.pipeline_mode<synchronous>, transform_indices = @transform_4, window_bounds = array<i64: 1, 256>}, {pipeline_mode = #tpu.pipeline_mode<synchronous>, transform_indices = @transform_5, window_bounds = array<i64: 256, 384>}, {pipeline_mode = #tpu.pipeline_mode<synchronous>, transform_indices = @transform_6, window_bounds = array<i64: 128, 256>}, {pipeline_mode = #tpu.pipeline_mode<synchronous>, transform_indices = @transform_7, window_bounds = array<i64: 128, 128>}, {pipeline_mode = #tpu.pipeline_mode<synchronous>, transform_indices = @transform_8, window_bounds = array<i64: 1, 384>}, {transform_indices = @transform_9, window_bounds = array<i64: 8, 8, 128>}, {transform_indices = @transform_10, window_bounds = array<i64: 8, 128>}]} {
    %c0_i32 = arith.constant 0 : i32
    %0 = arith.cmpi eq, %arg1, %c0_i32 : i32
    %1 = arith.extui %0 : i1 to i32
    %c0_i32_0 = arith.constant 0 : i32
    %2 = arith.cmpi ne, %1, %c0_i32_0 : i32
    scf.if %2 {
      %c0_142 = arith.constant 0 : index
      %c0_143 = arith.constant 0 : index
      %410 = vector.load %arg3[%c0_142, %c0_143] : memref<8x128xf32, #tpu.memory_space<vmem>>, vector<8x128xf32>
      %c0_144 = arith.constant 0 : index
      %c0_145 = arith.constant 0 : index
      %411 = vector.load %arg13[%c0_144, %c0_145] : memref<8x128xf32, #tpu.memory_space<vmem>>, vector<8x128xf32>
      tpu.vector_store %arg13[%c0_144, %c0_145], %410 {strides = array<i32>} : memref<8x128xf32, #tpu.memory_space<vmem>>, vector<8x128xf32>,
      %cst_146 = arith.constant 0.000000e+00 : f32
      %412 = vector.broadcast %cst_146 : f32 to vector<8x128xf32>
      %c0_147 = arith.constant 0 : index
      %c0_148 = arith.constant 0 : index
      %413 = vector.load %arg14[%c0_147, %c0_148] : memref<8x128xf32, #tpu.memory_space<vmem>>, vector<8x128xf32>
      tpu.vector_store %arg14[%c0_147, %c0_148], %412 {strides = array<i32>} : memref<8x128xf32, #tpu.memory_space<vmem>>, vector<8x128xf32>,
      %cst_149 = arith.constant -1.250000e-01 : f32
      %414 = vector.broadcast %cst_149 : f32 to vector<8x128xf32>
      %c0_150 = arith.constant 0 : index
      %c0_151 = arith.constant 0 : index
      %415 = vector.load %arg15[%c0_150, %c0_151] : memref<8x128xf32, #tpu.memory_space<vmem>>, vector<8x128xf32>
      tpu.vector_store %arg15[%c0_150, %c0_151], %414 {strides = array<i32>} : memref<8x128xf32, #tpu.memory_space<vmem>>, vector<8x128xf32>,
      %cst_152 = arith.constant 0.000000e+00 : f32
      %416 = vector.broadcast %cst_152 : f32 to vector<8x128xf32>
      %c0_153 = arith.constant 0 : index
      %c0_154 = arith.constant 0 : index
      %417 = vector.load %arg16[%c0_153, %c0_154] : memref<8x128xf32, #tpu.memory_space<vmem>>, vector<8x128xf32>
      tpu.vector_store %arg16[%c0_153, %c0_154], %416 {strides = array<i32>} : memref<8x128xf32, #tpu.memory_space<vmem>>, vector<8x128xf32>,
    } else {
    }
    %c0 = arith.constant 0 : index
    %c0_1 = arith.constant 0 : index
    %3 = vector.load %arg4[%c0, %c0_1] : memref<8x128xf32, #tpu.memory_space<vmem>>, vector<8x128xf32>
    %c0_2 = arith.constant 0 : index
    %c0_3 = arith.constant 0 : index
    %4 = vector.load %arg5[%c0_2, %c0_3] : memref<128x256xf32, #tpu.memory_space<vmem>>, vector<128x256xf32>
    %c0_4 = arith.constant 0 : index
    %c0_5 = arith.constant 0 : index
    %5 = vector.load %arg6[%c0_4, %c0_5] : memref<1x256xf32, #tpu.memory_space<vmem>>, vector<1x256xf32>
    %c0_6 = arith.constant 0 : index
    %c0_7 = arith.constant 0 : index
    %6 = vector.load %arg7[%c0_6, %c0_7] : memref<256x384xf32, #tpu.memory_space<vmem>>, vector<256x384xf32>
    %c0_8 = arith.constant 0 : index
    %c0_9 = arith.constant 0 : index
    %7 = vector.load %arg8[%c0_8, %c0_9] : memref<128x256xf32, #tpu.memory_space<vmem>>, vector<128x256xf32>
    %c0_10 = arith.constant 0 : index
    %c0_11 = arith.constant 0 : index
    %8 = vector.load %arg9[%c0_10, %c0_11] : memref<128x128xf32, #tpu.memory_space<vmem>>, vector<128x128xf32>
    %c0_12 = arith.constant 0 : index
    %c0_13 = arith.constant 0 : index
    %9 = vector.load %arg10[%c0_12, %c0_13] : memref<1x384xf32, #tpu.memory_space<vmem>>, vector<1x384xf32>
    %c0_14 = arith.constant 0 : index
    %c0_15 = arith.constant 0 : index
    %10 = vector.load %arg15[%c0_14, %c0_15] : memref<8x128xf32, #tpu.memory_space<vmem>>, vector<8x128xf32>
    %c0_16 = arith.constant 0 : index
    %c0_17 = arith.constant 0 : index
    %11 = vector.load %arg14[%c0_16, %c0_17] : memref<8x128xf32, #tpu.memory_space<vmem>>, vector<8x128xf32>
    %c0_18 = arith.constant 0 : index
    %c0_19 = arith.constant 0 : index
    %12 = vector.load %arg16[%c0_18, %c0_19] : memref<8x128xf32, #tpu.memory_space<vmem>>, vector<8x128xf32>
    %c0_20 = arith.constant 0 : index
    %c0_21 = arith.constant 0 : index
    %c0_22 = arith.constant 0 : index
    %13 = vector.load %arg2[%c0_20, %c0_21, %c0_22] : memref<8x8x128xf32, #tpu.memory_space<vmem>>, vector<8x1x128xf32>
    %14 = vector.shape_cast %13 : vector<8x1x128xf32> to vector<8x128xf32>
    %cst = arith.constant 1.000000e+00 : f32
    %15 = vector.broadcast %cst : f32 to vector<8x128xf32>
    %16 = arith.subf %15, %12 : vector<8x128xf32>
    %17 = arith.mulf %16, %10 : vector<8x128xf32>
    %cst_23 = arith.constant 1.250000e-01 : f32
    %18 = vector.broadcast %cst_23 : f32 to vector<8x128xf32>
    %19 = arith.addf %17, %18 : vector<8x128xf32>
    %cst_24 = arith.constant 0.000000e+00 : f32
    %20 = vector.broadcast %cst_24 : f32 to vector<8x128xf32>
    %21 = arith.cmpf one, %14, %20 : vector<8x128xf32>
    %22 = arith.extui %21 : vector<8x128xi1> to vector<8x128xi32>
    %23 = arith.sitofp %22 : vector<8x128xi32> to vector<8x128xf32>
    %24 = arith.select %21, %14, %11 : vector<8x128xi1>, vector<8x128xf32>
    %c0_25 = arith.constant 0 : index
    %c1 = arith.constant 1 : index
    %c0_26 = arith.constant 0 : index
    %25 = vector.load %arg2[%c0_25, %c1, %c0_26] : memref<8x8x128xf32, #tpu.memory_space<vmem>>, vector<8x1x128xf32>
    %26 = vector.shape_cast %25 : vector<8x1x128xf32> to vector<8x128xf32>
    %cst_27 = arith.constant 1.000000e+00 : f32
    %27 = vector.broadcast %cst_27 : f32 to vector<8x128xf32>
    %28 = arith.subf %27, %23 : vector<8x128xf32>
    %29 = arith.mulf %28, %19 : vector<8x128xf32>
    %cst_28 = arith.constant 1.250000e-01 : f32
    %30 = vector.broadcast %cst_28 : f32 to vector<8x128xf32>
    %31 = arith.addf %29, %30 : vector<8x128xf32>
    %cst_29 = arith.constant 0.000000e+00 : f32
    %32 = vector.broadcast %cst_29 : f32 to vector<8x128xf32>
    %33 = arith.cmpf one, %26, %32 : vector<8x128xf32>
    %34 = arith.extui %33 : vector<8x128xi1> to vector<8x128xi32>
    %35 = arith.sitofp %34 : vector<8x128xi32> to vector<8x128xf32>
    %36 = arith.select %33, %26, %24 : vector<8x128xi1>, vector<8x128xf32>
    %c0_30 = arith.constant 0 : index
    %c2 = arith.constant 2 : index
    %c0_31 = arith.constant 0 : index
    %37 = vector.load %arg2[%c0_30, %c2, %c0_31] : memref<8x8x128xf32, #tpu.memory_space<vmem>>, vector<8x1x128xf32>
    %38 = vector.shape_cast %37 : vector<8x1x128xf32> to vector<8x128xf32>
    %cst_32 = arith.constant 1.000000e+00 : f32
    %39 = vector.broadcast %cst_32 : f32 to vector<8x128xf32>
    %40 = arith.subf %39, %35 : vector<8x128xf32>
    %41 = arith.mulf %40, %31 : vector<8x128xf32>
    %cst_33 = arith.constant 1.250000e-01 : f32
    %42 = vector.broadcast %cst_33 : f32 to vector<8x128xf32>
    %43 = arith.addf %41, %42 : vector<8x128xf32>
    %cst_34 = arith.constant 0.000000e+00 : f32
    %44 = vector.broadcast %cst_34 : f32 to vector<8x128xf32>
    %45 = arith.cmpf one, %38, %44 : vector<8x128xf32>
    %46 = arith.extui %45 : vector<8x128xi1> to vector<8x128xi32>
    %47 = arith.sitofp %46 : vector<8x128xi32> to vector<8x128xf32>
    %48 = arith.select %45, %38, %36 : vector<8x128xi1>, vector<8x128xf32>
    %c0_35 = arith.constant 0 : index
    %c3 = arith.constant 3 : index
    %c0_36 = arith.constant 0 : index
    %49 = vector.load %arg2[%c0_35, %c3, %c0_36] : memref<8x8x128xf32, #tpu.memory_space<vmem>>, vector<8x1x128xf32>
    %50 = vector.shape_cast %49 : vector<8x1x128xf32> to vector<8x128xf32>
    %cst_37 = arith.constant 1.000000e+00 : f32
    %51 = vector.broadcast %cst_37 : f32 to vector<8x128xf32>
    %52 = arith.subf %51, %47 : vector<8x128xf32>
    %53 = arith.mulf %52, %43 : vector<8x128xf32>
    %cst_38 = arith.constant 1.250000e-01 : f32
    %54 = vector.broadcast %cst_38 : f32 to vector<8x128xf32>
    %55 = arith.addf %53, %54 : vector<8x128xf32>
    %cst_39 = arith.constant 0.000000e+00 : f32
    %56 = vector.broadcast %cst_39 : f32 to vector<8x128xf32>
    %57 = arith.cmpf one, %50, %56 : vector<8x128xf32>
    %58 = arith.extui %57 : vector<8x128xi1> to vector<8x128xi32>
    %59 = arith.sitofp %58 : vector<8x128xi32> to vector<8x128xf32>
    %60 = arith.select %57, %50, %48 : vector<8x128xi1>, vector<8x128xf32>
    %c0_40 = arith.constant 0 : index
    %c4 = arith.constant 4 : index
    %c0_41 = arith.constant 0 : index
    %61 = vector.load %arg2[%c0_40, %c4, %c0_41] : memref<8x8x128xf32, #tpu.memory_space<vmem>>, vector<8x1x128xf32>
    %62 = vector.shape_cast %61 : vector<8x1x128xf32> to vector<8x128xf32>
    %cst_42 = arith.constant 1.000000e+00 : f32
    %63 = vector.broadcast %cst_42 : f32 to vector<8x128xf32>
    %64 = arith.subf %63, %59 : vector<8x128xf32>
    %65 = arith.mulf %64, %55 : vector<8x128xf32>
    %cst_43 = arith.constant 1.250000e-01 : f32
    %66 = vector.broadcast %cst_43 : f32 to vector<8x128xf32>
    %67 = arith.addf %65, %66 : vector<8x128xf32>
    %cst_44 = arith.constant 0.000000e+00 : f32
    %68 = vector.broadcast %cst_44 : f32 to vector<8x128xf32>
    %69 = arith.cmpf one, %62, %68 : vector<8x128xf32>
    %70 = arith.extui %69 : vector<8x128xi1> to vector<8x128xi32>
    %71 = arith.sitofp %70 : vector<8x128xi32> to vector<8x128xf32>
    %72 = arith.select %69, %62, %60 : vector<8x128xi1>, vector<8x128xf32>
    %c0_45 = arith.constant 0 : index
    %c5 = arith.constant 5 : index
    %c0_46 = arith.constant 0 : index
    %73 = vector.load %arg2[%c0_45, %c5, %c0_46] : memref<8x8x128xf32, #tpu.memory_space<vmem>>, vector<8x1x128xf32>
    %74 = vector.shape_cast %73 : vector<8x1x128xf32> to vector<8x128xf32>
    %cst_47 = arith.constant 1.000000e+00 : f32
    %75 = vector.broadcast %cst_47 : f32 to vector<8x128xf32>
    %76 = arith.subf %75, %71 : vector<8x128xf32>
    %77 = arith.mulf %76, %67 : vector<8x128xf32>
    %cst_48 = arith.constant 1.250000e-01 : f32
    %78 = vector.broadcast %cst_48 : f32 to vector<8x128xf32>
    %79 = arith.addf %77, %78 : vector<8x128xf32>
    %cst_49 = arith.constant 0.000000e+00 : f32
    %80 = vector.broadcast %cst_49 : f32 to vector<8x128xf32>
    %81 = arith.cmpf one, %74, %80 : vector<8x128xf32>
    %82 = arith.extui %81 : vector<8x128xi1> to vector<8x128xi32>
    %83 = arith.sitofp %82 : vector<8x128xi32> to vector<8x128xf32>
    %84 = arith.select %81, %74, %72 : vector<8x128xi1>, vector<8x128xf32>
    %c0_50 = arith.constant 0 : index
    %c6 = arith.constant 6 : index
    %c0_51 = arith.constant 0 : index
    %85 = vector.load %arg2[%c0_50, %c6, %c0_51] : memref<8x8x128xf32, #tpu.memory_space<vmem>>, vector<8x1x128xf32>
    %86 = vector.shape_cast %85 : vector<8x1x128xf32> to vector<8x128xf32>
    %cst_52 = arith.constant 1.000000e+00 : f32
    %87 = vector.broadcast %cst_52 : f32 to vector<8x128xf32>
    %88 = arith.subf %87, %83 : vector<8x128xf32>
    %89 = arith.mulf %88, %79 : vector<8x128xf32>
    %cst_53 = arith.constant 1.250000e-01 : f32
    %90 = vector.broadcast %cst_53 : f32 to vector<8x128xf32>
    %91 = arith.addf %89, %90 : vector<8x128xf32>
    %cst_54 = arith.constant 0.000000e+00 : f32
    %92 = vector.broadcast %cst_54 : f32 to vector<8x128xf32>
    %93 = arith.cmpf one, %86, %92 : vector<8x128xf32>
    %94 = arith.extui %93 : vector<8x128xi1> to vector<8x128xi32>
    %95 = arith.sitofp %94 : vector<8x128xi32> to vector<8x128xf32>
    %96 = arith.select %93, %86, %84 : vector<8x128xi1>, vector<8x128xf32>
    %c0_55 = arith.constant 0 : index
    %c7 = arith.constant 7 : index
    %c0_56 = arith.constant 0 : index
    %97 = vector.load %arg2[%c0_55, %c7, %c0_56] : memref<8x8x128xf32, #tpu.memory_space<vmem>>, vector<8x1x128xf32>
    %98 = vector.shape_cast %97 : vector<8x1x128xf32> to vector<8x128xf32>
    %cst_57 = arith.constant 1.000000e+00 : f32
    %99 = vector.broadcast %cst_57 : f32 to vector<8x128xf32>
    %100 = arith.subf %99, %95 : vector<8x128xf32>
    %101 = arith.mulf %100, %91 : vector<8x128xf32>
    %cst_58 = arith.constant 1.250000e-01 : f32
    %102 = vector.broadcast %cst_58 : f32 to vector<8x128xf32>
    %103 = arith.addf %101, %102 : vector<8x128xf32>
    %cst_59 = arith.constant 0.000000e+00 : f32
    %104 = vector.broadcast %cst_59 : f32 to vector<8x128xf32>
    %105 = arith.cmpf one, %98, %104 : vector<8x128xf32>
    %106 = arith.extui %105 : vector<8x128xi1> to vector<8x128xi32>
    %107 = arith.sitofp %106 : vector<8x128xi32> to vector<8x128xf32>
    %108 = arith.select %105, %98, %96 : vector<8x128xi1>, vector<8x128xf32>
    %c0_60 = arith.constant 0 : index
    %c0_61 = arith.constant 0 : index
    %109 = vector.load %arg15[%c0_60, %c0_61] : memref<8x128xf32, #tpu.memory_space<vmem>>, vector<8x128xf32>
    tpu.vector_store %arg15[%c0_60, %c0_61], %103 {strides = array<i32>} : memref<8x128xf32, #tpu.memory_space<vmem>>, vector<8x128xf32>,
    %c0_62 = arith.constant 0 : index
    %c0_63 = arith.constant 0 : index
    %110 = vector.load %arg14[%c0_62, %c0_63] : memref<8x128xf32, #tpu.memory_space<vmem>>, vector<8x128xf32>
    tpu.vector_store %arg14[%c0_62, %c0_63], %108 {strides = array<i32>} : memref<8x128xf32, #tpu.memory_space<vmem>>, vector<8x128xf32>,
    %c0_64 = arith.constant 0 : index
    %c0_65 = arith.constant 0 : index
    %111 = vector.load %arg16[%c0_64, %c0_65] : memref<8x128xf32, #tpu.memory_space<vmem>>, vector<8x128xf32>
    tpu.vector_store %arg16[%c0_64, %c0_65], %107 {strides = array<i32>} : memref<8x128xf32, #tpu.memory_space<vmem>>, vector<8x128xf32>,
    %112 = tpu.concatenate %14, %26, %38, %50, %62, %74, %86, %98 in 0 : vector<8x128xf32>, vector<8x128xf32>, vector<8x128xf32>, vector<8x128xf32>, vector<8x128xf32>, vector<8x128xf32>, vector<8x128xf32>, vector<8x128xf32> -> vector<64x128xf32>
    %113 = tpu.concatenate %23, %35, %47, %59, %71, %83, %95, %107 in 0 : vector<8x128xf32>, vector<8x128xf32>, vector<8x128xf32>, vector<8x128xf32>, vector<8x128xf32>, vector<8x128xf32>, vector<8x128xf32>, vector<8x128xf32> -> vector<64x128xf32>
    %114 = tpu.concatenate %19, %31, %43, %55, %67, %79, %91, %103 in 0 : vector<8x128xf32>, vector<8x128xf32>, vector<8x128xf32>, vector<8x128xf32>, vector<8x128xf32>, vector<8x128xf32>, vector<8x128xf32>, vector<8x128xf32> -> vector<64x128xf32>
    %115 = tpu.concatenate %24, %36, %48, %60, %72, %84, %96, %108 in 0 : vector<8x128xf32>, vector<8x128xf32>, vector<8x128xf32>, vector<8x128xf32>, vector<8x128xf32>, vector<8x128xf32>, vector<8x128xf32>, vector<8x128xf32> -> vector<64x128xf32>
    %116 = tpu.concatenate %3, %3, %3, %3, %3, %3, %3, %3 in 0 : vector<8x128xf32>, vector<8x128xf32>, vector<8x128xf32>, vector<8x128xf32>, vector<8x128xf32>, vector<8x128xf32>, vector<8x128xf32>, vector<8x128xf32> -> vector<64x128xf32>
    %cst_66 = arith.constant dense<0.000000e+00> : vector<64x256xf32>
    %117 = tpu.matmul %114, %4, %cst_66 {dimension_numbers = #tpu.dot_dimension_numbers<[1], [0], [0], [1], [0, 0, 1, 1], [], []>} : vector<64x128xf32>, vector<128x256xf32>, vector<64x256xf32> -> vector<64x256xf32>
    %118 = vector.broadcast %5 : vector<1x256xf32> to vector<64x256xf32>
    %119 = arith.addf %117, %118 : vector<64x256xf32>
    %cst_67 = arith.constant 0.000000e+00 : f32
    %120 = vector.broadcast %cst_67 : f32 to vector<64x256xf32>
    %121 = arith.maximumf %119, %120 : vector<64x256xf32>
    %cst_68 = arith.constant 0.000000e+00 : f32
    %122 = vector.broadcast %cst_68 : f32 to vector<64x256xf32>
    %123 = arith.subf %122, %121 : vector<64x256xf32>
    %124 = math.exp %123 : vector<64x256xf32>
    %125 = vector.extract_strided_slice %124 {offsets = [0, 0], sizes = [64, 128], strides = [1, 1]} : vector<64x256xf32> to vector<64x128xf32>
    %126 = vector.extract_strided_slice %124 {offsets = [0, 128], sizes = [64, 128], strides = [1, 1]} : vector<64x256xf32> to vector<64x128xf32>
    %127 = arith.mulf %113, %112 : vector<64x128xf32>
    %cst_69 = arith.constant 1.000000e+00 : f32
    %128 = vector.broadcast %cst_69 : f32 to vector<64x128xf32>
    %129 = arith.subf %128, %113 : vector<64x128xf32>
    %130 = arith.mulf %125, %115 : vector<64x128xf32>
    %cst_70 = arith.constant 1.000000e+00 : f32
    %131 = vector.broadcast %cst_70 : f32 to vector<64x128xf32>
    %132 = arith.subf %131, %125 : vector<64x128xf32>
    %133 = arith.mulf %132, %116 : vector<64x128xf32>
    %134 = arith.addf %130, %133 : vector<64x128xf32>
    %135 = arith.mulf %129, %134 : vector<64x128xf32>
    %136 = arith.addf %127, %135 : vector<64x128xf32>
    %137 = tpu.concatenate %136, %113 in 1 : vector<64x128xf32>, vector<64x128xf32> -> vector<64x256xf32>
    %cst_71 = arith.constant dense<0.000000e+00> : vector<64x384xf32>
    %138 = tpu.matmul %137, %6, %cst_71 {dimension_numbers = #tpu.dot_dimension_numbers<[1], [0], [0], [1], [0, 0, 1, 1], [], []>} : vector<64x256xf32>, vector<256x384xf32>, vector<64x384xf32> -> vector<64x384xf32>
    %139 = vector.broadcast %9 : vector<1x384xf32> to vector<64x384xf32>
    %140 = arith.addf %138, %139 : vector<64x384xf32>
    %c0_72 = arith.constant 0 : index
    %c0_73 = arith.constant 0 : index
    %141 = vector.load %arg13[%c0_72, %c0_73] : memref<8x128xf32, #tpu.memory_space<vmem>>, vector<8x128xf32>
    %142 = vector.extract_strided_slice %140 {offsets = [0, 0], sizes = [8, 384], strides = [1, 1]} : vector<64x384xf32> to vector<8x384xf32>
    %143 = vector.extract_strided_slice %126 {offsets = [0, 0], sizes = [8, 128], strides = [1, 1]} : vector<64x128xf32> to vector<8x128xf32>
    %144 = arith.mulf %143, %141 : vector<8x128xf32>
    %cst_74 = arith.constant dense<0.000000e+00> : vector<8x256xf32>
    %145 = tpu.matmul %144, %7, %cst_74 {dimension_numbers = #tpu.dot_dimension_numbers<[1], [0], [0], [1], [0, 0, 1, 1], [], []>} : vector<8x128xf32>, vector<128x256xf32>, vector<8x256xf32> -> vector<8x256xf32>
    %146 = vector.extract_strided_slice %142 {offsets = [0, 0], sizes = [8, 128], strides = [1, 1]} : vector<8x384xf32> to vector<8x128xf32>
    %147 = vector.extract_strided_slice %145 {offsets = [0, 0], sizes = [8, 128], strides = [1, 1]} : vector<8x256xf32> to vector<8x128xf32>
    %148 = arith.addf %146, %147 : vector<8x128xf32>
    %149 = arith.negf %148 : vector<8x128xf32>
    %150 = math.exp %149 : vector<8x128xf32>
    %cst_75 = arith.constant 1.000000e+00 : f32
    %151 = vector.broadcast %cst_75 : f32 to vector<8x128xf32>
    %152 = arith.addf %151, %150 : vector<8x128xf32>
    %153 = arith.divf %151, %152 : vector<8x128xf32>
    %154 = vector.extract_strided_slice %142 {offsets = [0, 128], sizes = [8, 128], strides = [1, 1]} : vector<8x384xf32> to vector<8x128xf32>
    %155 = vector.extract_strided_slice %145 {offsets = [0, 128], sizes = [8, 128], strides = [1, 1]} : vector<8x256xf32> to vector<8x128xf32>
    %156 = arith.addf %154, %155 : vector<8x128xf32>
    %157 = arith.negf %156 : vector<8x128xf32>
    %158 = math.exp %157 : vector<8x128xf32>
    %cst_76 = arith.constant 1.000000e+00 : f32
    %159 = vector.broadcast %cst_76 : f32 to vector<8x128xf32>
    %160 = arith.addf %159, %158 : vector<8x128xf32>
    %161 = arith.divf %159, %160 : vector<8x128xf32>
    %162 = vector.extract_strided_slice %142 {offsets = [0, 256], sizes = [8, 128], strides = [1, 1]} : vector<8x384xf32> to vector<8x128xf32>
    %163 = arith.mulf %161, %144 : vector<8x128xf32>
    %cst_77 = arith.constant dense<0.000000e+00> : vector<8x128xf32>
    %164 = tpu.matmul %163, %8, %cst_77 {dimension_numbers = #tpu.dot_dimension_numbers<[1], [0], [0], [1], [0, 0, 1, 1], [], []>} : vector<8x128xf32>, vector<128x128xf32>, vector<8x128xf32> -> vector<8x128xf32>
    %165 = arith.addf %162, %164 : vector<8x128xf32>
    %166 = math.tanh %165 : vector<8x128xf32>
    %cst_78 = arith.constant 1.000000e+00 : f32
    %167 = vector.broadcast %cst_78 : f32 to vector<8x128xf32>
    %168 = arith.subf %167, %153 : vector<8x128xf32>
    %169 = arith.mulf %168, %144 : vector<8x128xf32>
    %170 = arith.mulf %153, %166 : vector<8x128xf32>
    %171 = arith.addf %169, %170 : vector<8x128xf32>
    %c0_79 = arith.constant 0 : index
    %c0_80 = arith.constant 0 : index
    %c0_81 = arith.constant 0 : index
    %172 = vector.load %arg11[%c0_79, %c0_80, %c0_81] : memref<8x8x128xf32, #tpu.memory_space<vmem>>, vector<8x1x128xf32>
    %173 = vector.shape_cast %172 : vector<8x1x128xf32> to vector<8x128xf32>
    %174 = vector.shape_cast %171 : vector<8x128xf32> to vector<8x1x128xf32>
    tpu.vector_store %arg11[%c0_79, %c0_80, %c0_81], %174 {strides = array<i32>} : memref<8x8x128xf32, #tpu.memory_space<vmem>>, vector<8x1x128xf32>,
    %175 = vector.extract_strided_slice %140 {offsets = [8, 0], sizes = [8, 384], strides = [1, 1]} : vector<64x384xf32> to vector<8x384xf32>
    %176 = vector.extract_strided_slice %126 {offsets = [8, 0], sizes = [8, 128], strides = [1, 1]} : vector<64x128xf32> to vector<8x128xf32>
    %177 = arith.mulf %176, %171 : vector<8x128xf32>
    %cst_82 = arith.constant dense<0.000000e+00> : vector<8x256xf32>
    %178 = tpu.matmul %177, %7, %cst_82 {dimension_numbers = #tpu.dot_dimension_numbers<[1], [0], [0], [1], [0, 0, 1, 1], [], []>} : vector<8x128xf32>, vector<128x256xf32>, vector<8x256xf32> -> vector<8x256xf32>
    %179 = vector.extract_strided_slice %175 {offsets = [0, 0], sizes = [8, 128], strides = [1, 1]} : vector<8x384xf32> to vector<8x128xf32>
    %180 = vector.extract_strided_slice %178 {offsets = [0, 0], sizes = [8, 128], strides = [1, 1]} : vector<8x256xf32> to vector<8x128xf32>
    %181 = arith.addf %179, %180 : vector<8x128xf32>
    %182 = arith.negf %181 : vector<8x128xf32>
    %183 = math.exp %182 : vector<8x128xf32>
    %cst_83 = arith.constant 1.000000e+00 : f32
    %184 = vector.broadcast %cst_83 : f32 to vector<8x128xf32>
    %185 = arith.addf %184, %183 : vector<8x128xf32>
    %186 = arith.divf %184, %185 : vector<8x128xf32>
    %187 = vector.extract_strided_slice %175 {offsets = [0, 128], sizes = [8, 128], strides = [1, 1]} : vector<8x384xf32> to vector<8x128xf32>
    %188 = vector.extract_strided_slice %178 {offsets = [0, 128], sizes = [8, 128], strides = [1, 1]} : vector<8x256xf32> to vector<8x128xf32>
    %189 = arith.addf %187, %188 : vector<8x128xf32>
    %190 = arith.negf %189 : vector<8x128xf32>
    %191 = math.exp %190 : vector<8x128xf32>
    %cst_84 = arith.constant 1.000000e+00 : f32
    %192 = vector.broadcast %cst_84 : f32 to vector<8x128xf32>
    %193 = arith.addf %192, %191 : vector<8x128xf32>
    %194 = arith.divf %192, %193 : vector<8x128xf32>
    %195 = vector.extract_strided_slice %175 {offsets = [0, 256], sizes = [8, 128], strides = [1, 1]} : vector<8x384xf32> to vector<8x128xf32>
    %196 = arith.mulf %194, %177 : vector<8x128xf32>
    %cst_85 = arith.constant dense<0.000000e+00> : vector<8x128xf32>
    %197 = tpu.matmul %196, %8, %cst_85 {dimension_numbers = #tpu.dot_dimension_numbers<[1], [0], [0], [1], [0, 0, 1, 1], [], []>} : vector<8x128xf32>, vector<128x128xf32>, vector<8x128xf32> -> vector<8x128xf32>
    %198 = arith.addf %195, %197 : vector<8x128xf32>
    %199 = math.tanh %198 : vector<8x128xf32>
    %cst_86 = arith.constant 1.000000e+00 : f32
    %200 = vector.broadcast %cst_86 : f32 to vector<8x128xf32>
    %201 = arith.subf %200, %186 : vector<8x128xf32>
    %202 = arith.mulf %201, %177 : vector<8x128xf32>
    %203 = arith.mulf %186, %199 : vector<8x128xf32>
    %204 = arith.addf %202, %203 : vector<8x128xf32>
    %c0_87 = arith.constant 0 : index
    %c1_88 = arith.constant 1 : index
    %c0_89 = arith.constant 0 : index
    %205 = vector.load %arg11[%c0_87, %c1_88, %c0_89] : memref<8x8x128xf32, #tpu.memory_space<vmem>>, vector<8x1x128xf32>
    %206 = vector.shape_cast %205 : vector<8x1x128xf32> to vector<8x128xf32>
    %207 = vector.shape_cast %204 : vector<8x128xf32> to vector<8x1x128xf32>
    tpu.vector_store %arg11[%c0_87, %c1_88, %c0_89], %207 {strides = array<i32>} : memref<8x8x128xf32, #tpu.memory_space<vmem>>, vector<8x1x128xf32>,
    %208 = vector.extract_strided_slice %140 {offsets = [16, 0], sizes = [8, 384], strides = [1, 1]} : vector<64x384xf32> to vector<8x384xf32>
    %209 = vector.extract_strided_slice %126 {offsets = [16, 0], sizes = [8, 128], strides = [1, 1]} : vector<64x128xf32> to vector<8x128xf32>
    %210 = arith.mulf %209, %204 : vector<8x128xf32>
    %cst_90 = arith.constant dense<0.000000e+00> : vector<8x256xf32>
    %211 = tpu.matmul %210, %7, %cst_90 {dimension_numbers = #tpu.dot_dimension_numbers<[1], [0], [0], [1], [0, 0, 1, 1], [], []>} : vector<8x128xf32>, vector<128x256xf32>, vector<8x256xf32> -> vector<8x256xf32>
    %212 = vector.extract_strided_slice %208 {offsets = [0, 0], sizes = [8, 128], strides = [1, 1]} : vector<8x384xf32> to vector<8x128xf32>
    %213 = vector.extract_strided_slice %211 {offsets = [0, 0], sizes = [8, 128], strides = [1, 1]} : vector<8x256xf32> to vector<8x128xf32>
    %214 = arith.addf %212, %213 : vector<8x128xf32>
    %215 = arith.negf %214 : vector<8x128xf32>
    %216 = math.exp %215 : vector<8x128xf32>
    %cst_91 = arith.constant 1.000000e+00 : f32
    %217 = vector.broadcast %cst_91 : f32 to vector<8x128xf32>
    %218 = arith.addf %217, %216 : vector<8x128xf32>
    %219 = arith.divf %217, %218 : vector<8x128xf32>
    %220 = vector.extract_strided_slice %208 {offsets = [0, 128], sizes = [8, 128], strides = [1, 1]} : vector<8x384xf32> to vector<8x128xf32>
    %221 = vector.extract_strided_slice %211 {offsets = [0, 128], sizes = [8, 128], strides = [1, 1]} : vector<8x256xf32> to vector<8x128xf32>
    %222 = arith.addf %220, %221 : vector<8x128xf32>
    %223 = arith.negf %222 : vector<8x128xf32>
    %224 = math.exp %223 : vector<8x128xf32>
    %cst_92 = arith.constant 1.000000e+00 : f32
    %225 = vector.broadcast %cst_92 : f32 to vector<8x128xf32>
    %226 = arith.addf %225, %224 : vector<8x128xf32>
    %227 = arith.divf %225, %226 : vector<8x128xf32>
    %228 = vector.extract_strided_slice %208 {offsets = [0, 256], sizes = [8, 128], strides = [1, 1]} : vector<8x384xf32> to vector<8x128xf32>
    %229 = arith.mulf %227, %210 : vector<8x128xf32>
    %cst_93 = arith.constant dense<0.000000e+00> : vector<8x128xf32>
    %230 = tpu.matmul %229, %8, %cst_93 {dimension_numbers = #tpu.dot_dimension_numbers<[1], [0], [0], [1], [0, 0, 1, 1], [], []>} : vector<8x128xf32>, vector<128x128xf32>, vector<8x128xf32> -> vector<8x128xf32>
    %231 = arith.addf %228, %230 : vector<8x128xf32>
    %232 = math.tanh %231 : vector<8x128xf32>
    %cst_94 = arith.constant 1.000000e+00 : f32
    %233 = vector.broadcast %cst_94 : f32 to vector<8x128xf32>
    %234 = arith.subf %233, %219 : vector<8x128xf32>
    %235 = arith.mulf %234, %210 : vector<8x128xf32>
    %236 = arith.mulf %219, %232 : vector<8x128xf32>
    %237 = arith.addf %235, %236 : vector<8x128xf32>
    %c0_95 = arith.constant 0 : index
    %c2_96 = arith.constant 2 : index
    %c0_97 = arith.constant 0 : index
    %238 = vector.load %arg11[%c0_95, %c2_96, %c0_97] : memref<8x8x128xf32, #tpu.memory_space<vmem>>, vector<8x1x128xf32>
    %239 = vector.shape_cast %238 : vector<8x1x128xf32> to vector<8x128xf32>
    %240 = vector.shape_cast %237 : vector<8x128xf32> to vector<8x1x128xf32>
    tpu.vector_store %arg11[%c0_95, %c2_96, %c0_97], %240 {strides = array<i32>} : memref<8x8x128xf32, #tpu.memory_space<vmem>>, vector<8x1x128xf32>,
    %241 = vector.extract_strided_slice %140 {offsets = [24, 0], sizes = [8, 384], strides = [1, 1]} : vector<64x384xf32> to vector<8x384xf32>
    %242 = vector.extract_strided_slice %126 {offsets = [24, 0], sizes = [8, 128], strides = [1, 1]} : vector<64x128xf32> to vector<8x128xf32>
    %243 = arith.mulf %242, %237 : vector<8x128xf32>
    %cst_98 = arith.constant dense<0.000000e+00> : vector<8x256xf32>
    %244 = tpu.matmul %243, %7, %cst_98 {dimension_numbers = #tpu.dot_dimension_numbers<[1], [0], [0], [1], [0, 0, 1, 1], [], []>} : vector<8x128xf32>, vector<128x256xf32>, vector<8x256xf32> -> vector<8x256xf32>
    %245 = vector.extract_strided_slice %241 {offsets = [0, 0], sizes = [8, 128], strides = [1, 1]} : vector<8x384xf32> to vector<8x128xf32>
    %246 = vector.extract_strided_slice %244 {offsets = [0, 0], sizes = [8, 128], strides = [1, 1]} : vector<8x256xf32> to vector<8x128xf32>
    %247 = arith.addf %245, %246 : vector<8x128xf32>
    %248 = arith.negf %247 : vector<8x128xf32>
    %249 = math.exp %248 : vector<8x128xf32>
    %cst_99 = arith.constant 1.000000e+00 : f32
    %250 = vector.broadcast %cst_99 : f32 to vector<8x128xf32>
    %251 = arith.addf %250, %249 : vector<8x128xf32>
    %252 = arith.divf %250, %251 : vector<8x128xf32>
    %253 = vector.extract_strided_slice %241 {offsets = [0, 128], sizes = [8, 128], strides = [1, 1]} : vector<8x384xf32> to vector<8x128xf32>
    %254 = vector.extract_strided_slice %244 {offsets = [0, 128], sizes = [8, 128], strides = [1, 1]} : vector<8x256xf32> to vector<8x128xf32>
    %255 = arith.addf %253, %254 : vector<8x128xf32>
    %256 = arith.negf %255 : vector<8x128xf32>
    %257 = math.exp %256 : vector<8x128xf32>
    %cst_100 = arith.constant 1.000000e+00 : f32
    %258 = vector.broadcast %cst_100 : f32 to vector<8x128xf32>
    %259 = arith.addf %258, %257 : vector<8x128xf32>
    %260 = arith.divf %258, %259 : vector<8x128xf32>
    %261 = vector.extract_strided_slice %241 {offsets = [0, 256], sizes = [8, 128], strides = [1, 1]} : vector<8x384xf32> to vector<8x128xf32>
    %262 = arith.mulf %260, %243 : vector<8x128xf32>
    %cst_101 = arith.constant dense<0.000000e+00> : vector<8x128xf32>
    %263 = tpu.matmul %262, %8, %cst_101 {dimension_numbers = #tpu.dot_dimension_numbers<[1], [0], [0], [1], [0, 0, 1, 1], [], []>} : vector<8x128xf32>, vector<128x128xf32>, vector<8x128xf32> -> vector<8x128xf32>
    %264 = arith.addf %261, %263 : vector<8x128xf32>
    %265 = math.tanh %264 : vector<8x128xf32>
    %cst_102 = arith.constant 1.000000e+00 : f32
    %266 = vector.broadcast %cst_102 : f32 to vector<8x128xf32>
    %267 = arith.subf %266, %252 : vector<8x128xf32>
    %268 = arith.mulf %267, %243 : vector<8x128xf32>
    %269 = arith.mulf %252, %265 : vector<8x128xf32>
    %270 = arith.addf %268, %269 : vector<8x128xf32>
    %c0_103 = arith.constant 0 : index
    %c3_104 = arith.constant 3 : index
    %c0_105 = arith.constant 0 : index
    %271 = vector.load %arg11[%c0_103, %c3_104, %c0_105] : memref<8x8x128xf32, #tpu.memory_space<vmem>>, vector<8x1x128xf32>
    %272 = vector.shape_cast %271 : vector<8x1x128xf32> to vector<8x128xf32>
    %273 = vector.shape_cast %270 : vector<8x128xf32> to vector<8x1x128xf32>
    tpu.vector_store %arg11[%c0_103, %c3_104, %c0_105], %273 {strides = array<i32>} : memref<8x8x128xf32, #tpu.memory_space<vmem>>, vector<8x1x128xf32>,
    %274 = vector.extract_strided_slice %140 {offsets = [32, 0], sizes = [8, 384], strides = [1, 1]} : vector<64x384xf32> to vector<8x384xf32>
    %275 = vector.extract_strided_slice %126 {offsets = [32, 0], sizes = [8, 128], strides = [1, 1]} : vector<64x128xf32> to vector<8x128xf32>
    %276 = arith.mulf %275, %270 : vector<8x128xf32>
    %cst_106 = arith.constant dense<0.000000e+00> : vector<8x256xf32>
    %277 = tpu.matmul %276, %7, %cst_106 {dimension_numbers = #tpu.dot_dimension_numbers<[1], [0], [0], [1], [0, 0, 1, 1], [], []>} : vector<8x128xf32>, vector<128x256xf32>, vector<8x256xf32> -> vector<8x256xf32>
    %278 = vector.extract_strided_slice %274 {offsets = [0, 0], sizes = [8, 128], strides = [1, 1]} : vector<8x384xf32> to vector<8x128xf32>
    %279 = vector.extract_strided_slice %277 {offsets = [0, 0], sizes = [8, 128], strides = [1, 1]} : vector<8x256xf32> to vector<8x128xf32>
    %280 = arith.addf %278, %279 : vector<8x128xf32>
    %281 = arith.negf %280 : vector<8x128xf32>
    %282 = math.exp %281 : vector<8x128xf32>
    %cst_107 = arith.constant 1.000000e+00 : f32
    %283 = vector.broadcast %cst_107 : f32 to vector<8x128xf32>
    %284 = arith.addf %283, %282 : vector<8x128xf32>
    %285 = arith.divf %283, %284 : vector<8x128xf32>
    %286 = vector.extract_strided_slice %274 {offsets = [0, 128], sizes = [8, 128], strides = [1, 1]} : vector<8x384xf32> to vector<8x128xf32>
    %287 = vector.extract_strided_slice %277 {offsets = [0, 128], sizes = [8, 128], strides = [1, 1]} : vector<8x256xf32> to vector<8x128xf32>
    %288 = arith.addf %286, %287 : vector<8x128xf32>
    %289 = arith.negf %288 : vector<8x128xf32>
    %290 = math.exp %289 : vector<8x128xf32>
    %cst_108 = arith.constant 1.000000e+00 : f32
    %291 = vector.broadcast %cst_108 : f32 to vector<8x128xf32>
    %292 = arith.addf %291, %290 : vector<8x128xf32>
    %293 = arith.divf %291, %292 : vector<8x128xf32>
    %294 = vector.extract_strided_slice %274 {offsets = [0, 256], sizes = [8, 128], strides = [1, 1]} : vector<8x384xf32> to vector<8x128xf32>
    %295 = arith.mulf %293, %276 : vector<8x128xf32>
    %cst_109 = arith.constant dense<0.000000e+00> : vector<8x128xf32>
    %296 = tpu.matmul %295, %8, %cst_109 {dimension_numbers = #tpu.dot_dimension_numbers<[1], [0], [0], [1], [0, 0, 1, 1], [], []>} : vector<8x128xf32>, vector<128x128xf32>, vector<8x128xf32> -> vector<8x128xf32>
    %297 = arith.addf %294, %296 : vector<8x128xf32>
    %298 = math.tanh %297 : vector<8x128xf32>
    %cst_110 = arith.constant 1.000000e+00 : f32
    %299 = vector.broadcast %cst_110 : f32 to vector<8x128xf32>
    %300 = arith.subf %299, %285 : vector<8x128xf32>
    %301 = arith.mulf %300, %276 : vector<8x128xf32>
    %302 = arith.mulf %285, %298 : vector<8x128xf32>
    %303 = arith.addf %301, %302 : vector<8x128xf32>
    %c0_111 = arith.constant 0 : index
    %c4_112 = arith.constant 4 : index
    %c0_113 = arith.constant 0 : index
    %304 = vector.load %arg11[%c0_111, %c4_112, %c0_113] : memref<8x8x128xf32, #tpu.memory_space<vmem>>, vector<8x1x128xf32>
    %305 = vector.shape_cast %304 : vector<8x1x128xf32> to vector<8x128xf32>
    %306 = vector.shape_cast %303 : vector<8x128xf32> to vector<8x1x128xf32>
    tpu.vector_store %arg11[%c0_111, %c4_112, %c0_113], %306 {strides = array<i32>} : memref<8x8x128xf32, #tpu.memory_space<vmem>>, vector<8x1x128xf32>,
    %307 = vector.extract_strided_slice %140 {offsets = [40, 0], sizes = [8, 384], strides = [1, 1]} : vector<64x384xf32> to vector<8x384xf32>
    %308 = vector.extract_strided_slice %126 {offsets = [40, 0], sizes = [8, 128], strides = [1, 1]} : vector<64x128xf32> to vector<8x128xf32>
    %309 = arith.mulf %308, %303 : vector<8x128xf32>
    %cst_114 = arith.constant dense<0.000000e+00> : vector<8x256xf32>
    %310 = tpu.matmul %309, %7, %cst_114 {dimension_numbers = #tpu.dot_dimension_numbers<[1], [0], [0], [1], [0, 0, 1, 1], [], []>} : vector<8x128xf32>, vector<128x256xf32>, vector<8x256xf32> -> vector<8x256xf32>
    %311 = vector.extract_strided_slice %307 {offsets = [0, 0], sizes = [8, 128], strides = [1, 1]} : vector<8x384xf32> to vector<8x128xf32>
    %312 = vector.extract_strided_slice %310 {offsets = [0, 0], sizes = [8, 128], strides = [1, 1]} : vector<8x256xf32> to vector<8x128xf32>
    %313 = arith.addf %311, %312 : vector<8x128xf32>
    %314 = arith.negf %313 : vector<8x128xf32>
    %315 = math.exp %314 : vector<8x128xf32>
    %cst_115 = arith.constant 1.000000e+00 : f32
    %316 = vector.broadcast %cst_115 : f32 to vector<8x128xf32>
    %317 = arith.addf %316, %315 : vector<8x128xf32>
    %318 = arith.divf %316, %317 : vector<8x128xf32>
    %319 = vector.extract_strided_slice %307 {offsets = [0, 128], sizes = [8, 128], strides = [1, 1]} : vector<8x384xf32> to vector<8x128xf32>
    %320 = vector.extract_strided_slice %310 {offsets = [0, 128], sizes = [8, 128], strides = [1, 1]} : vector<8x256xf32> to vector<8x128xf32>
    %321 = arith.addf %319, %320 : vector<8x128xf32>
    %322 = arith.negf %321 : vector<8x128xf32>
    %323 = math.exp %322 : vector<8x128xf32>
    %cst_116 = arith.constant 1.000000e+00 : f32
    %324 = vector.broadcast %cst_116 : f32 to vector<8x128xf32>
    %325 = arith.addf %324, %323 : vector<8x128xf32>
    %326 = arith.divf %324, %325 : vector<8x128xf32>
    %327 = vector.extract_strided_slice %307 {offsets = [0, 256], sizes = [8, 128], strides = [1, 1]} : vector<8x384xf32> to vector<8x128xf32>
    %328 = arith.mulf %326, %309 : vector<8x128xf32>
    %cst_117 = arith.constant dense<0.000000e+00> : vector<8x128xf32>
    %329 = tpu.matmul %328, %8, %cst_117 {dimension_numbers = #tpu.dot_dimension_numbers<[1], [0], [0], [1], [0, 0, 1, 1], [], []>} : vector<8x128xf32>, vector<128x128xf32>, vector<8x128xf32> -> vector<8x128xf32>
    %330 = arith.addf %327, %329 : vector<8x128xf32>
    %331 = math.tanh %330 : vector<8x128xf32>
    %cst_118 = arith.constant 1.000000e+00 : f32
    %332 = vector.broadcast %cst_118 : f32 to vector<8x128xf32>
    %333 = arith.subf %332, %318 : vector<8x128xf32>
    %334 = arith.mulf %333, %309 : vector<8x128xf32>
    %335 = arith.mulf %318, %331 : vector<8x128xf32>
    %336 = arith.addf %334, %335 : vector<8x128xf32>
    %c0_119 = arith.constant 0 : index
    %c5_120 = arith.constant 5 : index
    %c0_121 = arith.constant 0 : index
    %337 = vector.load %arg11[%c0_119, %c5_120, %c0_121] : memref<8x8x128xf32, #tpu.memory_space<vmem>>, vector<8x1x128xf32>
    %338 = vector.shape_cast %337 : vector<8x1x128xf32> to vector<8x128xf32>
    %339 = vector.shape_cast %336 : vector<8x128xf32> to vector<8x1x128xf32>
    tpu.vector_store %arg11[%c0_119, %c5_120, %c0_121], %339 {strides = array<i32>} : memref<8x8x128xf32, #tpu.memory_space<vmem>>, vector<8x1x128xf32>,
    %340 = vector.extract_strided_slice %140 {offsets = [48, 0], sizes = [8, 384], strides = [1, 1]} : vector<64x384xf32> to vector<8x384xf32>
    %341 = vector.extract_strided_slice %126 {offsets = [48, 0], sizes = [8, 128], strides = [1, 1]} : vector<64x128xf32> to vector<8x128xf32>
    %342 = arith.mulf %341, %336 : vector<8x128xf32>
    %cst_122 = arith.constant dense<0.000000e+00> : vector<8x256xf32>
    %343 = tpu.matmul %342, %7, %cst_122 {dimension_numbers = #tpu.dot_dimension_numbers<[1], [0], [0], [1], [0, 0, 1, 1], [], []>} : vector<8x128xf32>, vector<128x256xf32>, vector<8x256xf32> -> vector<8x256xf32>
    %344 = vector.extract_strided_slice %340 {offsets = [0, 0], sizes = [8, 128], strides = [1, 1]} : vector<8x384xf32> to vector<8x128xf32>
    %345 = vector.extract_strided_slice %343 {offsets = [0, 0], sizes = [8, 128], strides = [1, 1]} : vector<8x256xf32> to vector<8x128xf32>
    %346 = arith.addf %344, %345 : vector<8x128xf32>
    %347 = arith.negf %346 : vector<8x128xf32>
    %348 = math.exp %347 : vector<8x128xf32>
    %cst_123 = arith.constant 1.000000e+00 : f32
    %349 = vector.broadcast %cst_123 : f32 to vector<8x128xf32>
    %350 = arith.addf %349, %348 : vector<8x128xf32>
    %351 = arith.divf %349, %350 : vector<8x128xf32>
    %352 = vector.extract_strided_slice %340 {offsets = [0, 128], sizes = [8, 128], strides = [1, 1]} : vector<8x384xf32> to vector<8x128xf32>
    %353 = vector.extract_strided_slice %343 {offsets = [0, 128], sizes = [8, 128], strides = [1, 1]} : vector<8x256xf32> to vector<8x128xf32>
    %354 = arith.addf %352, %353 : vector<8x128xf32>
    %355 = arith.negf %354 : vector<8x128xf32>
    %356 = math.exp %355 : vector<8x128xf32>
    %cst_124 = arith.constant 1.000000e+00 : f32
    %357 = vector.broadcast %cst_124 : f32 to vector<8x128xf32>
    %358 = arith.addf %357, %356 : vector<8x128xf32>
    %359 = arith.divf %357, %358 : vector<8x128xf32>
    %360 = vector.extract_strided_slice %340 {offsets = [0, 256], sizes = [8, 128], strides = [1, 1]} : vector<8x384xf32> to vector<8x128xf32>
    %361 = arith.mulf %359, %342 : vector<8x128xf32>
    %cst_125 = arith.constant dense<0.000000e+00> : vector<8x128xf32>
    %362 = tpu.matmul %361, %8, %cst_125 {dimension_numbers = #tpu.dot_dimension_numbers<[1], [0], [0], [1], [0, 0, 1, 1], [], []>} : vector<8x128xf32>, vector<128x128xf32>, vector<8x128xf32> -> vector<8x128xf32>
    %363 = arith.addf %360, %362 : vector<8x128xf32>
    %364 = math.tanh %363 : vector<8x128xf32>
    %cst_126 = arith.constant 1.000000e+00 : f32
    %365 = vector.broadcast %cst_126 : f32 to vector<8x128xf32>
    %366 = arith.subf %365, %351 : vector<8x128xf32>
    %367 = arith.mulf %366, %342 : vector<8x128xf32>
    %368 = arith.mulf %351, %364 : vector<8x128xf32>
    %369 = arith.addf %367, %368 : vector<8x128xf32>
    %c0_127 = arith.constant 0 : index
    %c6_128 = arith.constant 6 : index
    %c0_129 = arith.constant 0 : index
    %370 = vector.load %arg11[%c0_127, %c6_128, %c0_129] : memref<8x8x128xf32, #tpu.memory_space<vmem>>, vector<8x1x128xf32>
    %371 = vector.shape_cast %370 : vector<8x1x128xf32> to vector<8x128xf32>
    %372 = vector.shape_cast %369 : vector<8x128xf32> to vector<8x1x128xf32>
    tpu.vector_store %arg11[%c0_127, %c6_128, %c0_129], %372 {strides = array<i32>} : memref<8x8x128xf32, #tpu.memory_space<vmem>>, vector<8x1x128xf32>,
    %373 = vector.extract_strided_slice %140 {offsets = [56, 0], sizes = [8, 384], strides = [1, 1]} : vector<64x384xf32> to vector<8x384xf32>
    %374 = vector.extract_strided_slice %126 {offsets = [56, 0], sizes = [8, 128], strides = [1, 1]} : vector<64x128xf32> to vector<8x128xf32>
    %375 = arith.mulf %374, %369 : vector<8x128xf32>
    %cst_130 = arith.constant dense<0.000000e+00> : vector<8x256xf32>
    %376 = tpu.matmul %375, %7, %cst_130 {dimension_numbers = #tpu.dot_dimension_numbers<[1], [0], [0], [1], [0, 0, 1, 1], [], []>} : vector<8x128xf32>, vector<128x256xf32>, vector<8x256xf32> -> vector<8x256xf32>
    %377 = vector.extract_strided_slice %373 {offsets = [0, 0], sizes = [8, 128], strides = [1, 1]} : vector<8x384xf32> to vector<8x128xf32>
    %378 = vector.extract_strided_slice %376 {offsets = [0, 0], sizes = [8, 128], strides = [1, 1]} : vector<8x256xf32> to vector<8x128xf32>
    %379 = arith.addf %377, %378 : vector<8x128xf32>
    %380 = arith.negf %379 : vector<8x128xf32>
    %381 = math.exp %380 : vector<8x128xf32>
    %cst_131 = arith.constant 1.000000e+00 : f32
    %382 = vector.broadcast %cst_131 : f32 to vector<8x128xf32>
    %383 = arith.addf %382, %381 : vector<8x128xf32>
    %384 = arith.divf %382, %383 : vector<8x128xf32>
    %385 = vector.extract_strided_slice %373 {offsets = [0, 128], sizes = [8, 128], strides = [1, 1]} : vector<8x384xf32> to vector<8x128xf32>
    %386 = vector.extract_strided_slice %376 {offsets = [0, 128], sizes = [8, 128], strides = [1, 1]} : vector<8x256xf32> to vector<8x128xf32>
    %387 = arith.addf %385, %386 : vector<8x128xf32>
    %388 = arith.negf %387 : vector<8x128xf32>
    %389 = math.exp %388 : vector<8x128xf32>
    %cst_132 = arith.constant 1.000000e+00 : f32
    %390 = vector.broadcast %cst_132 : f32 to vector<8x128xf32>
    %391 = arith.addf %390, %389 : vector<8x128xf32>
    %392 = arith.divf %390, %391 : vector<8x128xf32>
    %393 = vector.extract_strided_slice %373 {offsets = [0, 256], sizes = [8, 128], strides = [1, 1]} : vector<8x384xf32> to vector<8x128xf32>
    %394 = arith.mulf %392, %375 : vector<8x128xf32>
    %cst_133 = arith.constant dense<0.000000e+00> : vector<8x128xf32>
    %395 = tpu.matmul %394, %8, %cst_133 {dimension_numbers = #tpu.dot_dimension_numbers<[1], [0], [0], [1], [0, 0, 1, 1], [], []>} : vector<8x128xf32>, vector<128x128xf32>, vector<8x128xf32> -> vector<8x128xf32>
    %396 = arith.addf %393, %395 : vector<8x128xf32>
    %397 = math.tanh %396 : vector<8x128xf32>
    %cst_134 = arith.constant 1.000000e+00 : f32
    %398 = vector.broadcast %cst_134 : f32 to vector<8x128xf32>
    %399 = arith.subf %398, %384 : vector<8x128xf32>
    %400 = arith.mulf %399, %375 : vector<8x128xf32>
    %401 = arith.mulf %384, %397 : vector<8x128xf32>
    %402 = arith.addf %400, %401 : vector<8x128xf32>
    %c0_135 = arith.constant 0 : index
    %c7_136 = arith.constant 7 : index
    %c0_137 = arith.constant 0 : index
    %403 = vector.load %arg11[%c0_135, %c7_136, %c0_137] : memref<8x8x128xf32, #tpu.memory_space<vmem>>, vector<8x1x128xf32>
    %404 = vector.shape_cast %403 : vector<8x1x128xf32> to vector<8x128xf32>
    %405 = vector.shape_cast %402 : vector<8x128xf32> to vector<8x1x128xf32>
    tpu.vector_store %arg11[%c0_135, %c7_136, %c0_137], %405 {strides = array<i32>} : memref<8x8x128xf32, #tpu.memory_space<vmem>>, vector<8x1x128xf32>,
    %c0_138 = arith.constant 0 : index
    %c0_139 = arith.constant 0 : index
    %406 = vector.load %arg13[%c0_138, %c0_139] : memref<8x128xf32, #tpu.memory_space<vmem>>, vector<8x128xf32>
    tpu.vector_store %arg13[%c0_138, %c0_139], %402 {strides = array<i32>} : memref<8x128xf32, #tpu.memory_space<vmem>>, vector<8x128xf32>,
    %c0_i32_140 = arith.constant 0 : i32
    %407 = arith.cmpi eq, %arg1, %c0_i32_140 : i32
    %408 = arith.extui %407 : i1 to i32
    %c0_i32_141 = arith.constant 0 : i32
    %409 = arith.cmpi ne, %408, %c0_i32_141 : i32
    scf.if %409 {
      %c0_142 = arith.constant 0 : index
      %c0_143 = arith.constant 0 : index
      %410 = vector.load %arg12[%c0_142, %c0_143] : memref<8x128xf32, #tpu.memory_space<vmem>>, vector<8x128xf32>
      tpu.vector_store %arg12[%c0_142, %c0_143], %402 {strides = array<i32>} : memref<8x128xf32, #tpu.memory_space<vmem>>, vector<8x128xf32>,
    } else {
    }
    return
  }
  func.func @transform_0(%arg0: i32, %arg1: i32) -> (i32, i32, i32) {
    %c0_i32 = arith.constant 0 : i32
    %c0_i32_0 = arith.constant 0 : i32
    return %arg0, %arg1, %c0_i32 : i32, i32, i32
  }
  func.func @transform_1(%arg0: i32, %arg1: i32) -> (i32, i32) {
    %c0_i32 = arith.constant 0 : i32
    %c0_i32_0 = arith.constant 0 : i32
    return %arg0, %c0_i32 : i32, i32
  }
  func.func @transform_2(%arg0: i32, %arg1: i32) -> (i32, i32) {
    %c0_i32 = arith.constant 0 : i32
    %c0_i32_0 = arith.constant 0 : i32
    return %arg0, %c0_i32 : i32, i32
  }
  func.func @transform_3(%arg0: i32, %arg1: i32) -> (i32, i32) {
    %c0_i32 = arith.constant 0 : i32
    %c0_i32_0 = arith.constant 0 : i32
    %c0_i32_1 = arith.constant 0 : i32
    return %c0_i32, %c0_i32_0 : i32, i32
  }
  func.func @transform_4(%arg0: i32, %arg1: i32) -> (i32, i32) {
    %c0_i32 = arith.constant 0 : i32
    %c0_i32_0 = arith.constant 0 : i32
    %c0_i32_1 = arith.constant 0 : i32
    return %c0_i32, %c0_i32_0 : i32, i32
  }
  func.func @transform_5(%arg0: i32, %arg1: i32) -> (i32, i32) {
    %c0_i32 = arith.constant 0 : i32
    %c0_i32_0 = arith.constant 0 : i32
    %c0_i32_1 = arith.constant 0 : i32
    return %c0_i32, %c0_i32_0 : i32, i32
  }
  func.func @transform_6(%arg0: i32, %arg1: i32) -> (i32, i32) {
    %c0_i32 = arith.constant 0 : i32
    %c0_i32_0 = arith.constant 0 : i32
    %c0_i32_1 = arith.constant 0 : i32
    return %c0_i32, %c0_i32_0 : i32, i32
  }
  func.func @transform_7(%arg0: i32, %arg1: i32) -> (i32, i32) {
    %c0_i32 = arith.constant 0 : i32
    %c0_i32_0 = arith.constant 0 : i32
    %c0_i32_1 = arith.constant 0 : i32
    return %c0_i32, %c0_i32_0 : i32, i32
  }
  func.func @transform_8(%arg0: i32, %arg1: i32) -> (i32, i32) {
    %c0_i32 = arith.constant 0 : i32
    %c0_i32_0 = arith.constant 0 : i32
    %c0_i32_1 = arith.constant 0 : i32
    return %c0_i32, %c0_i32_0 : i32, i32
  }
  func.func @transform_9(%arg0: i32, %arg1: i32) -> (i32, i32, i32) {
    %c0_i32 = arith.constant 0 : i32
    %c0_i32_0 = arith.constant 0 : i32
    return %arg0, %arg1, %c0_i32 : i32, i32, i32
  }
  func.func @transform_10(%arg0: i32, %arg1: i32) -> (i32, i32) {
    %c0_i32 = arith.constant 0 : i32
    %c0_i32_0 = arith.constant 0 : i32
    return %arg0, %c0_i32 : i32, i32
  }
}

</mosaic_0001>

<bundles_post_ra>
// kernel: tpu_custom_call.1
= control target key start
LH: loop header
LB: loop body
LE: loop exit
PB: predicated region body
PF: predicated region fallthrough
CT: control target
= control target key end

     0   :  { %16 = vsyncpa [#allocation7], 0  ;;  %s7423_s0 = inlined_call_operand.hbm [shape: f32[8,8,128], index: 0, kind: input, shape index: {}]   ;;  %s7424_s1 = inlined_call_operand.hbm [shape: f32[8,128], index: 1, kind: input, shape index: {}]   ;;  %s7425_s2 = inlined_call_operand.hbm [shape: f32[8,128], index: 2, kind: input, shape index: {}]   ;;  %s7426_s3 = inlined_call_operand.hbm [shape: f32[128,256], index: 3, kind: input, shape index: {}]   ;;  %s7427_s4 = inlined_call_operand.vmem [shape: f32[1,256], index: 4, kind: input, shape index: {}]   ;;  %s7428_s5 = inlined_call_operand.hbm [shape: f32[256,384], index: 5, kind: input, shape index: {}]   ;;  %s7429_s6 = inlined_call_operand.hbm [shape: f32[128,256], index: 6, kind: input, shape index: {}]   ;;  %s7430_s7 = inlined_call_operand.hbm [shape: f32[128,128], index: 7, kind: input, shape index: {}]   ;;  %s7431_s8 = inlined_call_operand.vmem [shape: f32[1,384], index: 8, kind: input, shape index: {}]   ;;  %s7432_s9 = inlined_call_operand.hbm [shape: f32[8,8,128], index: 9, kind: output, shape index: {0}]   ;;  %s7433_s10 = inlined_call_operand.hbm [shape: f32[8,128], index: 10, kind: output, shape index: {1}]  }
   0x1   :  { %17 = vsyncpa [#allocation10], 0 }
   0x2   :  { %18 = vsyncpa [#allocation13], 0 }
   0x3   :  { %19 = vsyncpa [#allocation16], 0 }
   0x4   :  { %20 = vsyncpa [#allocation8], 0 }
   0x5   :  { %21 = vsyncpa [#allocation20], 0  ;;  %s5511_s13 = smov [#allocation9]   ;;  %s5512_s15 = smov [#allocation12]  }
   0x6   :  { %s40_s14 = sshll.u32 %s5511_s13, 4  ;;  %s59_s16 = sshll.u32 %s5512_s15, 4  ;;  %s41_s14 = int_to_ptr.vmem [resolvable:$true] %s40_s14  ;;  %s5585_s16 = int_to_ptr.vmem [resolvable:$true] %s59_s16 }
   0x7   :  { %s5301_s19 = scalar_lea.hbm %s7424_s1, 128 }
   0x8   :  { %p5302_p0 = scmp.ne.s32.totalorder %s7424_s1, %s5301_s19  ;;  %p5305_p1 = scmp.lt.u32.totalorder %s5301_s19, %s7424_s1 }
   0xa   :  { %p5307_p2 = pnand %p5305_p1, %p5302_p0 }
   0xc   :  { %5310 = shalt.err (!%p5307_p2)
}
   0xd   :  { %s5311_s24 = scalar_lea.vmem %s41_s14, 128  ;;  %p5316_p4 = scmp.lt.s32.totalorder %s41_s14, %s41_s14 }
   0xe   :  { %p5312_p3 = scmp.ne.s32.totalorder %s41_s14, %s5311_s24  ;;  %p5317_p5 = scmp.lt.s32.totalorder %s5311_s24, %s5311_s24 }
  0x10   :  { %p5318_p6 = por %p5317_p5, %p5316_p4 }
  0x12   :  { %p5319_p7 = pnand %p5318_p6, %p5312_p3 }
  0x14   :  { %5322 = shalt.err (!%p5319_p7)
}
  0x15   :  { %43 = dma.hbm_to_vmem [thread:$0]  %s7424_s1, 128, %s41_s14, [#allocation10]  }
  0x16   :  { %s5323_s29 = scalar_lea.hbm %s7426_s3, 4096 }
  0x17   :  { %p5324_p8 = scmp.ne.s32.totalorder %s7426_s3, %s5323_s29  ;;  %p5327_p9 = scmp.lt.u32.totalorder %s5323_s29, %s7426_s3 }
  0x19   :  { %p5329_p10 = pnand %p5327_p9, %p5324_p8 }
  0x1b   :  { %5332 = shalt.err (!%p5329_p10)
}
  0x1c   :  { %s5333_s15 = scalar_lea.vmem %s5585_s16, 4096  ;;  %p5338_p12 = scmp.lt.s32.totalorder %s5585_s16, %s5585_s16 }
  0x1d   :  { %p5334_p11 = scmp.ne.s32.totalorder %s5585_s16, %s5333_s15  ;;  %p5339_p13 = scmp.lt.s32.totalorder %s5333_s15, %s5333_s15 }
  0x1f   :  { %p5340_p0 = por %p5339_p13, %p5338_p12 }
  0x21   :  { %p5341_p1 = pnand %p5340_p0, %p5334_p11 }
  0x23   :  { %5344 = shalt.err (!%p5341_p1)
}
  0x24   :  { %s5513_s1 = smov 256   ;;  %s5514_s14 = smov 16  }
  0x25   :  { %65 = dma.hbm_to_vmem [thread:$0]  %s7426_s3, 4096, %s5585_s16, [#allocation13], %s5513_s1, %s5513_s1, %s5514_s14  }
  0x26   :  { %s5515_s19 = smov [#allocation15]   ;;  %s5516_s21 = smov [#allocation6]  }
  0x27   :  { %s85_s20 = sshll.u32 %s5515_s19, 4  ;;  %s27_s22 = sshll.u32 %s5516_s21, 4  ;;  %s86_s20 = int_to_ptr.vmem [resolvable:$true] %s85_s20  ;;  %s5616_s22 = int_to_ptr.vmem [resolvable:$true] %s27_s22 }
  0x28   :  { %s5345_s25 = scalar_lea.hbm %s7429_s6, 4096 }
  0x29   :  { %p5346_p2 = scmp.ne.s32.totalorder %s7429_s6, %s5345_s25  ;;  %p5349_p3 = scmp.lt.u32.totalorder %s5345_s25, %s7429_s6 }
  0x2b   :  { %p5351_p4 = pnand %p5349_p3, %p5346_p2 }
  0x2d   :  { %5354 = shalt.err (!%p5351_p4)
}
  0x2e   :  { %s5355_s3 = scalar_lea.vmem %s86_s20, 4096  ;;  %p5360_p6 = scmp.lt.s32.totalorder %s86_s20, %s86_s20 }
  0x2f   :  { %p5356_p5 = scmp.ne.s32.totalorder %s86_s20, %s5355_s3  ;;  %p5361_p7 = scmp.lt.s32.totalorder %s5355_s3, %s5355_s3 }
  0x31   :  { %p5362_p8 = por %p5361_p7, %p5360_p6 }
  0x33   :  { %p5363_p9 = pnand %p5362_p8, %p5356_p5 }
  0x35   :  { %5366 = shalt.err (!%p5363_p9)
}
  0x36   :  { %91 = dma.hbm_to_vmem [thread:$0]  %s7429_s6, 4096, %s86_s20, [#allocation16], %s5513_s1, %s5513_s1, %s5514_s14  }
  0x37   :  { %s5367_s13 = scalar_lea.hbm %s7423_s0, 1024 }
  0x38   :  { %p5368_p10 = scmp.ne.s32.totalorder %s7423_s0, %s5367_s13  ;;  %p5371_p11 = scmp.lt.u32.totalorder %s5367_s13, %s7423_s0 }
  0x3a   :  { %p5373_p12 = pnand %p5371_p11, %p5368_p10 }
  0x3c   :  { %5376 = shalt.err (!%p5373_p12)
}
  0x3d   :  { %s5377_s21 = scalar_lea.vmem %s5616_s22, 1024  ;;  %p5382_p0 = scmp.lt.s32.totalorder %s5616_s22, %s5616_s22 }
  0x3e   :  { %p5378_p13 = scmp.ne.s32.totalorder %s5616_s22, %s5377_s21  ;;  %p5383_p1 = scmp.lt.s32.totalorder %s5377_s21, %s5377_s21 }
  0x40   :  { %p5384_p2 = por %p5383_p1, %p5382_p0 }
  0x42   :  { %p5385_p3 = pnand %p5384_p2, %p5378_p13 }
  0x44   :  { %5388 = shalt.err (!%p5385_p3)
}
  0x45   :  { %s5517_s6 = smov 128   ;;  %s5518_s1 = smov 8  }
  0x46   :  { %33 = dma.hbm_to_vmem [thread:$0]  %s7423_s0, 1024, %s5616_s22, [#allocation7], %s5517_s6, %s5517_s6, %s5518_s1  }
  0x47   :  { %s5519_s23 = smov [#allocation11]   ;;  %s5520_s25 = smov [#allocation14]  }
  0x48   :  { %s50_s24 = sshll.u32 %s5519_s23, 4  ;;  %s73_s26 = sshll.u32 %s5520_s25, 4  ;;  %s51_s24 = int_to_ptr.vmem [resolvable:$true] %s50_s24  ;;  %s5650_s26 = int_to_ptr.vmem [resolvable:$true] %s73_s26 }
  0x49   :  { %s5389_s29 = scalar_lea.hbm %s7425_s2, 128 }
  0x4a   :  { %p5390_p4 = scmp.ne.s32.totalorder %s7425_s2, %s5389_s29  ;;  %p5393_p5 = scmp.lt.u32.totalorder %s5389_s29, %s7425_s2 }
  0x4c   :  { %p5395_p6 = pnand %p5393_p5, %p5390_p4 }
  0x4e   :  { %5398 = shalt.err (!%p5395_p6)
}
  0x4f   :  { %s5399_s0 = scalar_lea.vmem %s51_s24, 128  ;;  %p5404_p8 = scmp.lt.s32.totalorder %s51_s24, %s51_s24 }
  0x50   :  { %p5400_p7 = scmp.ne.s32.totalorder %s51_s24, %s5399_s0  ;;  %p5405_p9 = scmp.lt.s32.totalorder %s5399_s0, %s5399_s0 }
  0x52   :  { %p5406_p10 = por %p5405_p9, %p5404_p8 }
  0x54   :  { %p5407_p11 = pnand %p5406_p10, %p5400_p7 }
  0x56   :  { %5410 = shalt.err (!%p5407_p11)
}
  0x57   :  { %53 = dma.hbm_to_vmem [thread:$0]  %s7425_s2, 128, %s51_s24, [#allocation10]  }
  0x58   :  { %s5411_s17 = scalar_lea.hbm %s7428_s5, 12288 }
  0x59   :  { %p5412_p12 = scmp.ne.s32.totalorder %s7428_s5, %s5411_s17  ;;  %p5415_p13 = scmp.lt.u32.totalorder %s5411_s17, %s7428_s5 }
  0x5b   :  { %p5417_p0 = pnand %p5415_p13, %p5412_p12 }
  0x5d   :  { %5420 = shalt.err (!%p5417_p0)
}
  0x5e   :  { %s5421_s20 = scalar_lea.vmem %s5650_s26, 12288  ;;  %p5426_p2 = scmp.lt.s32.totalorder %s5650_s26, %s5650_s26 }
  0x5f   :  { %p5422_p1 = scmp.ne.s32.totalorder %s5650_s26, %s5421_s20  ;;  %p5427_p3 = scmp.lt.s32.totalorder %s5421_s20, %s5421_s20 }
  0x61   :  { %p5428_p4 = por %p5427_p3, %p5426_p2 }
  0x63   :  { %p5429_p5 = pnand %p5428_p4, %p5422_p1 }
  0x65   :  { %5432 = shalt.err (!%p5429_p5)
}
  0x66   :  { %s5521_s2 = smov 384   ;;  %s5522_s23 = smov 24  }
  0x67   :  { %79 = dma.hbm_to_vmem [thread:$0]  %s7428_s5, 12288, %s5650_s26, [#allocation13], %s5521_s2, %s5521_s2, %s5522_s23  }
  0x68   :  { %s5523_s27 = smov [#allocation17]   ;;  %s5433_s16 = scalar_lea.hbm %s7430_s7, 2048 }
  0x69   :  { %s97_s28 = sshll.u32 %s5523_s27, 4  ;;  %p5434_p6 = scmp.ne.s32.totalorder %s7430_s7, %s5433_s16  ;;  %s98_s28 = int_to_ptr.vmem [resolvable:$true] %s97_s28 }
  0x6a   :  { %p5437_p7 = scmp.lt.u32.totalorder %s5433_s16, %s7430_s7 }
  0x6c   :  { %p5439_p8 = pnand %p5437_p7, %p5434_p6 }
  0x6e   :  { %5442 = shalt.err (!%p5439_p8)
}
  0x6f   :  { %s5443_s12 = scalar_lea.vmem %s98_s28, 2048  ;;  %p5448_p10 = scmp.lt.s32.totalorder %s98_s28, %s98_s28 }
  0x70   :  { %p5444_p9 = scmp.ne.s32.totalorder %s98_s28, %s5443_s12  ;;  %p5449_p11 = scmp.lt.s32.totalorder %s5443_s12, %s5443_s12 }
  0x72   :  { %p5450_p12 = por %p5449_p11, %p5448_p10 }
  0x74   :  { %p5451_p13 = pnand %p5450_p12, %p5444_p9 }
  0x76   :  { %5454 = shalt.err (!%p5451_p13)
}
  0x77   :  { %103 = dma.hbm_to_vmem [thread:$0]  %s7430_s7, 2048, %s98_s28, [#allocation16], %s5517_s6, %s5517_s6, %s5518_s1  }
  0x78   :  { %5499 = dma.done.wait [#allocation7], 1024  }
  0x79   :  { %5500 = vsyncadd [#allocation7], 4294966272 }
  0x7a   :  { %5501 = dma.done.wait [#allocation10], 256  }
  0x7b   :  { %5502 = vsyncadd [#allocation10], 4294967040 }
  0x7c   :  { %5503 = dma.done.wait [#allocation13], 16384  }
  0x7d   :  { %5504 = vsyncadd [#allocation13], 4294950912 }
  0x7e   :  { %5505 = dma.done.wait [#allocation16], 6144  }
  0x7f   :  { %5506 = vsyncadd [#allocation16], 4294961152  ;;  %v7434_v0 = vmov 0.0   ;;  %v138_v1 = vld [vmem:[#allocation12 + $0x8] sm:$0xff]  ;;  %v140_v2 = vld [vmem:[#allocation12 + $0x18] sm:$0xff]  ;;  %vm850_vm8 = vcmask 1041409  }
  0x80   :  { %1639 = vmatprep.mubr.f32.mxu0 %v7434_v0  ;;  %v137_v3 = vld [vmem:[#allocation12] sm:$0xff]  ;;  %v4506_v4 = vpack.c.bf16 %v140_v2, %v138_v1  ;;  %v139_v5 = vld [vmem:[#allocation12 + $0x10] sm:$0xff]  ;;  %v142_v6 = vld [vmem:[#allocation12 + $0x28] sm:$0xff]  ;;  %v5720_v34 = vrot.slane %v7434_v0, 1  ;;  %v5723_v35 = vrot.slane %v7434_v0, 2  ;;  %v5732_v40 = vrot.slane %v7434_v0, 3 }
  0x81   :  { %v144_v7 = vld [vmem:[#allocation12 + $0x38] sm:$0xff]  ;;  %v4508_v8 = vpack.c.bf16 %v139_v5, %v137_v3  ;;  %v141_v10 = vld [vmem:[#allocation12 + $0x20] sm:$0xff]  ;;  %v143_v11 = vld [vmem:[#allocation12 + $0x30] sm:$0xff]  ;;  %v5735_v41 = vrot.slane %v7434_v0, 4  ;;  %v5738_v42 = vrot.slane %v7434_v0, 5  ;;  %v5745_v47 = vrot.slane %v7434_v0, 6 }
  0x82   :  { %v4510_v9 = vpack.c.bf16 %v144_v7, %v142_v6  ;;  %v146_v12 = vld [vmem:[#allocation12 + $0x48] sm:$0xff]  ;;  %4507 = vmatprep.subr.bf16.mxu0 %v4506_v4  ;;  %v148_v13 = vld [vmem:[#allocation12 + $0x58] sm:$0xff]  ;;  %v4512_v14 = vpack.c.bf16 %v143_v11, %v141_v10  ;;  %v145_v15 = vld [vmem:[#allocation12 + $0x40] sm:$0xff]  ;;  %v5748_v48 = vrot.slane %v7434_v0, 7  ;;  %vm853_vm9 = vcmask 1042434  }
  0x83   :  { %4509 = vmatpush1.bf16.msra.mxu0 %v4508_v8  ;;  %v147_v16 = vld [vmem:[#allocation12 + $0x50] sm:$0xff]  ;;  %v150_v17 = vld [vmem:[#allocation12 + $0x68] sm:$0xff]  ;;  %v4514_v18 = vpack.c.bf16 %v148_v13, %v146_v12  ;;  %v152_v19 = vld [vmem:[#allocation12 + $0x78] sm:$0xff]  ;;  %vm856_vm10 = vcmask 1043459   ;;  %vm859_vm11 = vcmask 1044484   ;;  %vm862_vm12 = vcmask 1045509  }
  0x84   :  { %4511 = vmatprep.subr.bf16.mxu0 %v4510_v9  ;;  %v149_v20 = vld [vmem:[#allocation12 + $0x60] sm:$0xff]  ;;  %v151_v21 = vld [vmem:[#allocation12 + $0x70] sm:$0xff]  ;;  %v5697_v22 = vld [vmem:[#allocation12 + $0x88] sm:$0xff]  ;;  %v4516_v30 = vpack.c.bf16 %v147_v16, %v145_v15  ;;  %v4518_v36 = vpack.c.bf16 %v152_v19, %v150_v17  ;;  %vm865_vm13 = vcmask 1046534   ;;  %vm868_vm14 = vcmask 1047559  }
  0x85   :  { %v5699_v23 = vld [vmem:[#allocation12 + $0x98] sm:$0xff]  ;;  %v5701_v24 = vld [vmem:[#allocation12 + $0x80] sm:$0xff]  ;;  %v5703_v25 = vld [vmem:[#allocation12 + $0x90] sm:$0xff]  ;;  %v4520_v43 = vpack.c.bf16 %v151_v21, %v149_v20 }
  0x86   :  { %v5705_v26 = vld [vmem:[#allocation12 + $0xa8] sm:$0xff]  ;;  %v5707_v27 = vld [vmem:[#allocation12 + $0xb8] sm:$0xff]  ;;  %v5709_v28 = vld [vmem:[#allocation12 + $0xa0] sm:$0xff]  ;;  %v4522_v49 = vpack.c.bf16 %v5699_v23, %v5697_v22  ;;  %v4524_v50 = vpack.c.bf16 %v5703_v25, %v5701_v24 }
  0x87   :  { %v5711_v29 = vld [vmem:[#allocation12 + $0xb0] sm:$0xff]  ;;  %4513 = vmatpush1.bf16.msra.mxu0 %v4512_v14  ;;  %v5713_v31 = vld [vmem:[#allocation12 + $0xc8] sm:$0xff]  ;;  %v5715_v32 = vld [vmem:[#allocation12 + $0xd8] sm:$0xff]  ;;  %v4526_v51 = vpack.c.bf16 %v5707_v27, %v5705_v26 }
  0x88   :  { %v5717_v33 = vld [vmem:[#allocation12 + $0xc0] sm:$0xff]  ;;  %4515 = vmatprep.subr.bf16.mxu0 %v4514_v18  ;;  %v5725_v37 = vld [vmem:[#allocation12 + $0xd0] sm:$0xff]  ;;  %v5727_v38 = vld [vmem:[#allocation12 + $0xe8] sm:$0xff]  ;;  %v4528_v52 = vpack.c.bf16 %v5711_v29, %v5709_v28  ;;  %v4530_v56 = vpack.c.bf16 %v5715_v32, %v5713_v31 }
  0x89   :  { %v5729_v39 = vld [vmem:[#allocation12 + $0xf8] sm:$0xff]  ;;  %v5740_v44 = vld [vmem:[#allocation12 + $0xe0] sm:$0xff]  ;;  %v5742_v45 = vld [vmem:[#allocation12 + $0xf0] sm:$0xff]  ;;  %v4532_v57 = vpack.c.bf16 %v5725_v37, %v5717_v33 }
  0x8a   :  { %v318_v46 = vld [vmem:[#allocation6] sm:$0x1]  ;;  %v319_v53 = vld [vmem:[#allocation6 + $0x8] sm:$0x1]  ;;  %v320_v54 = vld [vmem:[#allocation6 + $0x10] sm:$0x1]  ;;  %v4534_v58 = vpack.c.bf16 %v5729_v39, %v5727_v38  ;;  %v4536_v59 = vpack.c.bf16 %v5742_v45, %v5740_v44 }
  0x8b   :  { %v321_v55 = vld [vmem:[#allocation6 + $0x18] sm:$0x1]  ;;  %4517 = vmatpush1.bf16.msra.mxu0 %v4516_v30  ;;  %v322_v60 = vld [vmem:[#allocation6 + $0x20] sm:$0x1]  ;;  %v323_v61 = vld [vmem:[#allocation6 + $0x28] sm:$0x1] }
  0x8c   :  { %v324_v62 = vld [vmem:[#allocation6 + $0x30] sm:$0x1]  ;;  %4519 = vmatprep.subr.bf16.mxu0 %v4518_v36  ;;  %v325_v63 = vld [vmem:[#allocation6 + $0x38] sm:$0x1]  ;;  %vm329_vm0 = vcmp.ne.f32.partialorder %v318_v46, 0.0  ;;  %vm330_vm1 = vcmp.ne.f32.partialorder %v319_v53, 0.0 }
  0x8d   :  { %vm331_vm2 = vcmp.ne.f32.partialorder %v320_v54, 0.0  ;;  %vm332_vm3 = vcmp.ne.f32.partialorder %v321_v55, 0.0  ;;  %vm333_vm4 = vcmp.ne.f32.partialorder %v322_v60, 0.0  ;;  %vm334_vm5 = vcmp.ne.f32.partialorder %v323_v61, 0.0  ;;  %v377_v36 = vld [vmem:[#allocation6 + $0x1] sm:$0x1] }
  0x8e   :  { %vm335_vm6 = vcmp.ne.f32.partialorder %v324_v62, 0.0  ;;  %vm336_vm7 = vcmp.ne.f32.partialorder %v325_v63, 0.0  ;;  %v5768_v1 = vsel %vm329_vm0, 1.0, %v7434_v0  ;;  %v5772_v2 = vsel %vm330_vm1, 1.0, %v7434_v0  ;;  %v383_v29 = vld [vmem:[#allocation6 + $0x31] sm:$0x1] }
  0x8f   :  { %v5776_v3 = vsel %vm331_vm2, 1.0, %v7434_v0  ;;  %v5780_v4 = vsel %vm332_vm3, 1.0, %v7434_v0  ;;  %4521 = vmatpush1.bf16.msra.mxu0 %v4520_v43  ;;  %v5784_v5 = vsel %vm333_vm4, 1.0, %v7434_v0  ;;  %v5788_v6 = vsel %vm334_vm5, 1.0, %v7434_v0 }
  0x90   :  { %v5792_v7 = vsel %vm335_vm6, 1.0, %v7434_v0  ;;  %v5796_v8 = vsel %vm336_vm7, 1.0, %v7434_v0  ;;  %4523 = vmatprep.subr.bf16.mxu0 %v4522_v49  ;;  %v5799_v9 = vsel %vm329_vm0, %v318_v46, 0.0  ;;  %v5803_v10 = vsel %vm330_vm1, %v319_v53, %v5720_v34  ;;  %v378_v53 = vld [vmem:[#allocation6 + $0x9] sm:$0x1] }
  0x91   :  { %v5807_v11 = vsel %vm331_vm2, %v320_v54, %v5723_v35  ;;  %v5811_v12 = vsel %vm332_vm3, %v321_v55, %v5732_v40  ;;  %v5815_v13 = vsel %vm333_vm4, %v322_v60, %v5735_v41  ;;  %v5819_v14 = vsel %vm334_vm5, %v323_v61, %v5738_v42  ;;  %v380_v54 = vld [vmem:[#allocation6 + $0x19] sm:$0x1]  ;;  %v381_v60 = vld [vmem:[#allocation6 + $0x21] sm:$0x1]  ;;  %v382_v61 = vld [vmem:[#allocation6 + $0x29] sm:$0x1] }
  0x92   :  { %v5823_v15 = vsel %vm335_vm6, %v324_v62, %v5745_v47  ;;  %v5827_v16 = vsel %vm336_vm7, %v325_v63, %v5748_v48  ;;  %v385_v17 = vsub.f32 1.0, %v5768_v1  ;;  %v386_v18 = vsub.f32 1.0, %v5772_v2 }
  0x93   :  { %v387_v19 = vsub.f32 1.0, %v5776_v3  ;;  %v388_v20 = vsub.f32 1.0, %v5780_v4  ;;  %4525 = vmatpush1.bf16.msra.mxu0 %v4524_v50  ;;  %v389_v21 = vsub.f32 1.0, %v5784_v5  ;;  %v390_v22 = vsub.f32 1.0, %v5788_v6 }
  0x94   :  { %v391_v23 = vsub.f32 1.0, %v5792_v7  ;;  %v392_v24 = vsub.f32 1.0, %v5796_v8  ;;  %4527 = vmatprep.subr.bf16.mxu0 %v4526_v51  ;;  %v409_v25 = vmul.f32 0.0, %v385_v17  ;;  %v410_v26 = vmul.f32 %v386_v18, %v5720_v34  ;;  %v379_v51 = vld [vmem:[#allocation6 + $0x11] sm:$0x1] }
  0x95   :  { %v411_v27 = vmul.f32 %v387_v19, %v5723_v35  ;;  %v412_v30 = vmul.f32 %v388_v20, %v5732_v40  ;;  %v413_v43 = vmul.f32 %v389_v21, %v5735_v41  ;;  %v414_v46 = vmul.f32 %v390_v22, %v5738_v42  ;;  %v384_v20 = vld [vmem:[#allocation6 + $0x39] sm:$0x1] }
  0x96   :  { %v415_v49 = vmul.f32 %v391_v23, %v5745_v47  ;;  %v416_v50 = vmul.f32 %v392_v24, %v5748_v48  ;;  %v5844_v55 = vadd.f32 0.125, %v409_v25  ;;  %v5846_v34 = vadd.f32 0.125, %v410_v26 }
  0x97   :  { %v5848_v35 = vadd.f32 0.125, %v411_v27  ;;  %v5850_v40 = vadd.f32 0.125, %v412_v30  ;;  %4529 = vmatpush1.bf16.msra.mxu0 %v4528_v52  ;;  %v5855_v41 = vadd.f32 0.125, %v413_v43  ;;  %v5857_v42 = vadd.f32 0.125, %v414_v46 }
  0x98   :  { %v5859_v47 = vadd.f32 0.125, %v415_v49  ;;  %v5861_v48 = vadd.f32 0.125, %v416_v50  ;;  %4531 = vmatprep.subr.bf16.mxu0 %v4530_v56  ;;  %v1273_v62 = vrot.slane %v5846_v34, 7  ;;  %vm425_vm15 = vcmp.ne.f32.partialorder %v377_v36, 0.0 }
  0x99   :  { %v1275_v63 = vrot.slane %v5848_v35, 6  ;;  %v1277_v28 = vrot.slane %v5850_v40, 5  ;;  %v1279_v52 = vrot.slane %v5855_v41, 4  ;;  %v1281_v17 = vrot.slane %v5857_v42, 3 }
  0x9a   :  { %v1283_v18 = vrot.slane %v5859_v47, 2  ;;  %v1285_v19 = vrot.slane %v5861_v48, 1  ;;  %v1274_v31 = vsel %vm850_vm8, %v1273_v62, %v5844_v55  ;;  %vm426_vm0 = vcmp.ne.f32.partialorder %v378_v53, 0.0 }
  0x9b   :  { %vm427_vm1 = vcmp.ne.f32.partialorder %v379_v51, 0.0  ;;  %vm428_vm2 = vcmp.ne.f32.partialorder %v380_v54, 0.0  ;;  %4533 = vmatpush1.bf16.msra.mxu0 %v4532_v57  ;;  %v1276_v32 = vsel %vm853_vm9, %v1275_v63, %v1274_v31  ;;  %vm429_vm3 = vcmp.ne.f32.partialorder %v381_v60, 0.0 }
  0x9c   :  { %vm430_vm4 = vcmp.ne.f32.partialorder %v382_v61, 0.0  ;;  %vm431_vm5 = vcmp.ne.f32.partialorder %v383_v29, 0.0  ;;  %4535 = vmatprep.subr.bf16.mxu0 %v4534_v58  ;;  %v1278_v56 = vsel %vm856_vm10, %v1277_v28, %v1276_v32  ;;  %vm432_vm6 = vcmp.ne.f32.partialorder %v384_v20, 0.0 }
  0x9d   :  { %v5885_v21 = vsel %vm425_vm15, 1.0, %v7434_v0  ;;  %v5889_v33 = vsel %vm426_vm0, 1.0, %v7434_v0  ;;  %v1280_v37 = vsel %vm859_vm11, %v1279_v52, %v1278_v56  ;;  %v5894_v57 = vsel %vm427_vm1, 1.0, %v7434_v0 }
  0x9e   :  { %7525 = vst [vmem:[#allocation27_spill] sm:$0xff] %v5885_v21  ;;  %7526 = vst [vmem:[#allocation28_spill] sm:$0xff] %v5889_v33  ;;  %v5898_v38 = vsel %vm428_vm2, 1.0, %v7434_v0  ;;  %v5902_v39 = vsel %vm429_vm3, 1.0, %v7434_v0  ;;  %v1282_v58 = vsel %vm862_vm12, %v1281_v17, %v1280_v37  ;;  %v5907_v22 = vsel %vm430_vm4, 1.0, %v7434_v0 }
  0x9f   :  { %7527 = vst [vmem:[#allocation29_spill] sm:$0xff] %v5894_v57  ;;  %7528 = vst [vmem:[#allocation30_spill] sm:$0xff] %v5898_v38  ;;  %v5911_v23 = vsel %vm431_vm5, 1.0, %v7434_v0  ;;  %v5915_v24 = vsel %vm432_vm6, 1.0, %v7434_v0  ;;  %4537 = vmatpush1.bf16.msra.mxu0 %v4536_v59  ;;  %v1284_v25 = vsel %vm865_vm13, %v1283_v18, %v1282_v58  ;;  %v5923_v26 = vsel %vm425_vm15, %v377_v36, %v5799_v9  ;;  %v461_v58 = vld [vmem:[#allocation6 + $0x22] sm:$0x1] }
  0xa0   :  { %7529 = vst [vmem:[#allocation31_spill] sm:$0xff] %v5902_v39  ;;  %7530 = vst [vmem:[#allocation32_spill] sm:$0xff] %v5907_v22  ;;  %v5927_v27 = vsel %vm426_vm0, %v378_v53, %v5803_v10  ;;  %v5931_v30 = vsel %vm427_vm1, %v379_v51, %v5807_v11  ;;  %v1286_v43 = vsel %vm868_vm14, %v1285_v19, %v1284_v25  ;;  %v465_v49 = vsub.f32 1.0, %v5885_v21  ;;  %v457_v19 = vld [vmem:[#allocation6 + $0x2] sm:$0x1] }
  0xa1   :  { %7531 = vst [vmem:[#allocation33_spill] sm:$0xff] %v5911_v23  ;;  %7532 = vst [vmem:[#allocation34_spill] sm:$0xff] %v5915_v24  ;;  %v5936_v44 = vsel %vm428_vm2, %v380_v54, %v5811_v12  ;;  %v5940_v45 = vsel %vm429_vm3, %v381_v60, %v5815_v13  ;;  %v5944_v59 = vsel %vm430_vm4, %v382_v61, %v5819_v14  ;;  %v466_v50 = vsub.f32 1.0, %v5889_v33  ;;  %v523_v33 = vld [vmem:[#allocation6 + $0x13] sm:$0x1] }
  0xa2   :  { %7533 = vst [vmem:[#allocation35_spill] sm:$0xff] %v5936_v44  ;;  %7534 = vst [vmem:[#allocation36_spill] sm:$0xff] %v5940_v45  ;;  %v5948_v36 = vsel %vm431_vm5, %v383_v29, %v5823_v15  ;;  %v5952_v46 = vsel %vm432_vm6, %v384_v20, %v5827_v16  ;;  %1640 = vmatmul.mubr.f32.vlgmr.msra.gmra.mrb[0].mxu0 %v7434_v0  ;;  %v467_v53 = vsub.f32 1.0, %v5894_v57  ;;  %v468_v51 = vsub.f32 1.0, %v5898_v38  ;;  %v458_v20 = vld [vmem:[#allocation6 + $0xa] sm:$0x1] }
  0xa3   :  { %7535 = vst [vmem:[#allocation37_spill] sm:$0xff] %v5944_v59  ;;  %7536 = vst [vmem:[#allocation38_spill] sm:$0xff] %v5948_v36  ;;  %v469_v54 = vsub.f32 1.0, %v5902_v39  ;;  %v470_v60 = vsub.f32 1.0, %v5907_v22  ;;  %1645 = vmatprep.mubr.f32.mxu0 %v7434_v0  ;;  %v471_v61 = vsub.f32 1.0, %v5911_v23  ;;  %v472_v62 = vsub.f32 1.0, %v5915_v24 }
  0xa4   :  { %7537 = vst [vmem:[#allocation39_spill] sm:$0xff] %v5952_v46  ;;  %v473_v63 = vmul.f32 %v465_v49, %v5844_v55  ;;  %v474_v28 = vmul.f32 %v466_v50, %v5846_v34  ;;  %v475_v29 = vmul.f32 %v467_v53, %v5848_v35  ;;  %v476_v52 = vmul.f32 %v468_v51, %v5850_v40  ;;  %v459_v55 = vld [vmem:[#allocation6 + $0x12] sm:$0x1]  ;;  %v460_v34 = vld [vmem:[#allocation6 + $0x1a] sm:$0x1] }
  0xa5   :  { %v477_v17 = vmul.f32 %v469_v54, %v5855_v41  ;;  %v478_v18 = vmul.f32 %v470_v60, %v5857_v42  ;;  %v479_v31 = vmul.f32 %v471_v61, %v5859_v47  ;;  %v480_v32 = vmul.f32 %v472_v62, %v5861_v48  ;;  %v462_v49 = vld [vmem:[#allocation6 + $0x2a] sm:$0x1]  ;;  %v463_v48 = vld [vmem:[#allocation6 + $0x32] sm:$0x1]  ;;  %v464_v61 = vld [vmem:[#allocation6 + $0x3a] sm:$0x1] }
  0xa6   :  { %v5972_v56 = vadd.f32 0.125, %v473_v63  ;;  %v5974_v37 = vadd.f32 0.125, %v474_v28  ;;  %1646 = vmatmul.mubr.f32.gmra.mrb[2].mxu0 %v1286_v43  ;;  %v483_v35 = vadd.f32 0.125, %v475_v29  ;;  %v484_v40 = vadd.f32 0.125, %v476_v52  ;;  %v521_v38 = vld [vmem:[#allocation6 + $0x3] sm:$0x1] }
  0xa7   :  { %v485_v25 = vadd.f32 0.125, %v477_v17  ;;  %v486_v41 = vadd.f32 0.125, %v478_v18  ;;  %1651 = vmatprep.mubr.f32.mxu0 %v7434_v0  ;;  %v487_v42 = vadd.f32 0.125, %v479_v31  ;;  %v488_v50 = vadd.f32 0.125, %v480_v32 }
  0xa8   :  { %v1296_v47 = vrot.slane %v5974_v37, 7  ;;  %vm489_vm7 = vcmp.ne.f32.partialorder %v457_v19, 0.0  ;;  %v1298_v53 = vrot.slane %v483_v35, 6  ;;  %v1300_v51 = vrot.slane %v484_v40, 5 }
  0xa9   :  { %v1302_v54 = vrot.slane %v485_v25, 4  ;;  %v1304_v60 = vrot.slane %v486_v41, 3  ;;  %v1306_v62 = vrot.slane %v487_v42, 2  ;;  %v1308_v63 = vrot.slane %v488_v50, 1 }
  0xaa   :  { %v1297_v43 = vsel %vm850_vm8, %v1296_v47, %v5972_v56  ;;  %vm490_vm15 = vcmp.ne.f32.partialorder %v458_v20, 0.0  ;;  %vm491_vm0 = vcmp.ne.f32.partialorder %v459_v55, 0.0  ;;  %vm492_vm1 = vcmp.ne.f32.partialorder %v460_v34, 0.0 }
  0xab   :  { %v1299_v28 = vsel %vm853_vm9, %v1298_v53, %v1297_v43  ;;  %vm493_vm2 = vcmp.ne.f32.partialorder %v461_v58, 0.0  ;;  %vm494_vm3 = vcmp.ne.f32.partialorder %v462_v49, 0.0  ;;  %vm495_vm4 = vcmp.ne.f32.partialorder %v463_v48, 0.0 }
  0xac   :  { %v1301_v29 = vsel %vm856_vm10, %v1300_v51, %v1299_v28  ;;  %vm496_vm5 = vcmp.ne.f32.partialorder %v464_v61, 0.0  ;;  %v5985_v17 = vsel %vm489_vm7, 1.0, %v7434_v0  ;;  %v5989_v18 = vsel %vm490_vm15, 1.0, %v7434_v0 }
  0xad   :  { %v1303_v52 = vsel %vm859_vm11, %v1302_v54, %v1301_v29  ;;  %7538 = vst [vmem:[#allocation40_spill] sm:$0xff] %v5985_v17  ;;  %7539 = vst [vmem:[#allocation41_spill] sm:$0xff] %v5989_v18  ;;  %v5993_v31 = vsel %vm491_vm0, 1.0, %v7434_v0  ;;  %v5998_v47 = vsel %vm492_vm1, 1.0, %v7434_v0  ;;  %v6002_v53 = vsel %vm493_vm2, 1.0, %v7434_v0 }
  0xae   :  { %7540 = vst [vmem:[#allocation42_spill] sm:$0xff] %v5993_v31  ;;  %v1305_v32 = vsel %vm862_vm12, %v1304_v60, %v1303_v52  ;;  %7541 = vst [vmem:[#allocation43_spill] sm:$0xff] %v5998_v47  ;;  %v6006_v51 = vsel %vm494_vm3, 1.0, %v7434_v0  ;;  %v6011_v43 = vsel %vm495_vm4, 1.0, %v7434_v0  ;;  %v6015_v60 = vsel %vm496_vm5, 1.0, %v7434_v0 }
  0xaf   :  { %7542 = vst [vmem:[#allocation44_spill] sm:$0xff] %v6002_v53  ;;  %7543 = vst [vmem:[#allocation45_spill] sm:$0xff] %v6006_v51  ;;  %v1307_v54 = vsel %vm865_vm13, %v1306_v62, %v1305_v32  ;;  %v6019_v28 = vsel %vm489_vm7, %v457_v19, %v5923_v26  ;;  %v6024_v52 = vsel %vm490_vm15, %v458_v20, %v5927_v27  ;;  %v534_v24 = vsub.f32 1.0, %v6006_v51 }
  0xb0   :  { %7544 = vst [vmem:[#allocation46_spill] sm:$0xff] %v6011_v43  ;;  %7545 = vst [vmem:[#allocation47_spill] sm:$0xff] %v6015_v60  ;;  %v1309_v29 = vsel %vm868_vm14, %v1308_v63, %v1307_v54  ;;  %v6028_v62 = vsel %vm491_vm0, %v459_v55, %v5931_v30  ;;  %v6032_v32 = vsel %vm492_vm1, %v460_v34, %v5936_v44  ;;  %v7554_v63 = vmov 0.0  }
  0xb1   :  { %7546 = vst [vmem:[#allocation48_spill] sm:$0xff] %v6019_v28  ;;  %7547 = vst [vmem:[#allocation49_spill] sm:$0xff] %v6024_v52  ;;  %1652 = vmatmul.mubr.f32.gmra.mrb[4].mxu0 %v1309_v29  ;;  %v6036_v0 = vsel %vm493_vm2, %v461_v58, %v5940_v45  ;;  %v6040_v19 = vsel %vm494_vm3, %v462_v49, %v5944_v59  ;;  %v6044_v20 = vsel %vm495_vm4, %v463_v48, %v5948_v36  ;;  %v525_v59 = vld [vmem:[#allocation6 + $0x23] sm:$0x1] }
  0xb2   :  { %7548 = vst [vmem:[#allocation50_spill] sm:$0xff] %v6028_v62  ;;  %7549 = vst [vmem:[#allocation51_spill] sm:$0xff] %v6032_v32  ;;  %v6048_v55 = vsel %vm496_vm5, %v464_v61, %v5952_v46  ;;  %1657 = vmatprep.mubr.f32.mxu0 %v7554_v63  ;;  %v529_v34 = vsub.f32 1.0, %v5985_v17  ;;  %v530_v54 = vsub.f32 1.0, %v5989_v18  ;;  %v531_v58 = vsub.f32 1.0, %v5993_v31 }
  0xb3   :  { %7550 = vst [vmem:[#allocation52_spill] sm:$0xff] %v6036_v0  ;;  %7551 = vst [vmem:[#allocation53_spill] sm:$0xff] %v6040_v19  ;;  %v532_v29 = vsub.f32 1.0, %v5998_v47  ;;  %v533_v49 = vsub.f32 1.0, %v6002_v53  ;;  %v535_v48 = vsub.f32 1.0, %v6011_v43  ;;  %v536_v23 = vsub.f32 1.0, %v6015_v60 }
  0xb4   :  { %7552 = vst [vmem:[#allocation54_spill] sm:$0xff] %v6044_v20  ;;  %7553 = vst [vmem:[#allocation55_spill] sm:$0xff] %v6048_v55  ;;  %v537_v61 = vmul.f32 %v529_v34, %v5972_v56  ;;  %v538_v22 = vmul.f32 %v530_v54, %v5974_v37  ;;  %v539_v39 = vmul.f32 %v531_v58, %v483_v35  ;;  %v522_v47 = vld [vmem:[#allocation6 + $0xb] sm:$0x1]  ;;  %v524_v53 = vld [vmem:[#allocation6 + $0x1b] sm:$0x1] }
  0xb5   :  { %v540_v17 = vmul.f32 %v532_v29, %v484_v40  ;;  %v541_v18 = vmul.f32 %v533_v49, %v485_v25  ;;  %v542_v21 = vmul.f32 %v534_v24, %v486_v41  ;;  %v543_v31 = vmul.f32 %v535_v48, %v487_v42  ;;  %v526_v37 = vld [vmem:[#allocation6 + $0x2b] sm:$0x1]  ;;  %v527_v25 = vld [vmem:[#allocation6 + $0x33] sm:$0x1] }
  0xb6   :  { %v544_v57 = vmul.f32 %v536_v23, %v488_v50  ;;  %v545_v46 = vadd.f32 0.125, %v537_v61  ;;  %v546_v51 = vadd.f32 0.125, %v538_v22  ;;  %v547_v36 = vadd.f32 0.125, %v539_v39  ;;  %v528_v50 = vld [vmem:[#allocation6 + $0x3b] sm:$0x1] }
  0xb7   :  { %v548_v43 = vadd.f32 0.125, %v540_v17  ;;  %v549_v60 = vadd.f32 0.125, %v541_v18  ;;  %v550_v45 = vadd.f32 0.125, %v542_v21  ;;  %v551_v56 = vadd.f32 0.125, %v543_v31 }
  0xb8   :  { %v552_v34 = vadd.f32 0.125, %v544_v57  ;;  %v1319_v35 = vrot.slane %v546_v51, 7  ;;  %v1321_v40 = vrot.slane %v547_v36, 6  ;;  %vm553_vm6 = vcmp.ne.f32.partialorder %v521_v38, 0.0 }
  0xb9   :  { %v1323_v54 = vrot.slane %v548_v43, 5  ;;  %v1325_v24 = vrot.slane %v549_v60, 4  ;;  %v1327_v23 = vrot.slane %v550_v45, 3  ;;  %v1329_v41 = vrot.slane %v551_v56, 2 }
  0xba   :  { %v1331_v42 = vrot.slane %v552_v34, 1  ;;  %v1320_v22 = vsel %vm850_vm8, %v1319_v35, %v545_v46  ;;  %vm554_vm7 = vcmp.ne.f32.partialorder %v522_v47, 0.0  ;;  %vm555_vm15 = vcmp.ne.f32.partialorder %v523_v33, 0.0 }
  0xbb   :  { %vm556_vm0 = vcmp.ne.f32.partialorder %v524_v53, 0.0  ;;  %v1322_v21 = vsel %vm853_vm9, %v1321_v40, %v1320_v22  ;;  %vm557_vm1 = vcmp.ne.f32.partialorder %v525_v59, 0.0  ;;  %vm558_vm2 = vcmp.ne.f32.partialorder %v526_v37, 0.0 }
  0xbc   :  { %vm559_vm3 = vcmp.ne.f32.partialorder %v527_v25, 0.0  ;;  %v1324_v57 = vsel %vm856_vm10, %v1323_v54, %v1322_v21  ;;  %vm560_vm4 = vcmp.ne.f32.partialorder %v528_v50, 0.0  ;;  %v6066_v39 = vsel %vm553_vm6, 1.0, %v7554_v63 }
  0xbd   :  { %7555 = vst [vmem:[#allocation56_spill] sm:$0xff] %v6066_v39  ;;  %v6070_v17 = vsel %vm554_vm7, 1.0, %v7554_v63  ;;  %v1326_v18 = vsel %vm859_vm11, %v1325_v24, %v1324_v57  ;;  %v6075_v31 = vsel %vm555_vm15, 1.0, %v7554_v63  ;;  %v6079_v58 = vsel %vm556_vm0, 1.0, %v7554_v63 }
  0xbe   :  { %7556 = vst [vmem:[#allocation57_spill] sm:$0xff] %v6070_v17  ;;  %7557 = vst [vmem:[#allocation58_spill] sm:$0xff] %v6075_v31  ;;  %v6083_v29 = vsel %vm557_vm1, 1.0, %v7554_v63  ;;  %v1328_v49 = vsel %vm862_vm12, %v1327_v23, %v1326_v18  ;;  %v6088_v48 = vsel %vm558_vm2, 1.0, %v7554_v63  ;;  %v6092_v61 = vsel %vm559_vm3, 1.0, %v7554_v63 }
  0xbf   :  { %7558 = vst [vmem:[#allocation59_spill] sm:$0xff] %v6079_v58  ;;  %7559 = vst [vmem:[#allocation60_spill] sm:$0xff] %v6083_v29  ;;  %v6096_v35 = vsel %vm560_vm4, 1.0, %v7554_v63  ;;  %v1330_v40 = vsel %vm865_vm13, %v1329_v41, %v1328_v49  ;;  %v6101_v54 = vsel %vm553_vm6, %v521_v38, %v6019_v28  ;;  %v6105_v24 = vsel %vm554_vm7, %v522_v47, %v6024_v52 }
  0xc0   :  { %7560 = vst [vmem:[#allocation61_spill] sm:$0xff] %v6088_v48  ;;  %7561 = vst [vmem:[#allocation62_spill] sm:$0xff] %v6092_v61  ;;  %v6109_v23 = vsel %vm555_vm15, %v523_v33, %v6028_v62  ;;  %v1332_v22 = vsel %vm868_vm14, %v1331_v42, %v1330_v40  ;;  %v6114_v21 = vsel %vm556_vm0, %v524_v53, %v6032_v32  ;;  %v593_v53 = vsub.f32 1.0, %v6066_v39  ;;  %v587_v32 = vld [vmem:[#allocation6 + $0x14] sm:$0x1] }
  0xc1   :  { %7562 = vst [vmem:[#allocation63_spill] sm:$0xff] %v6096_v35  ;;  %7563 = vst [vmem:[#allocation64_spill] sm:$0xff] %v6101_v54  ;;  %v6118_v41 = vsel %vm557_vm1, %v525_v59, %v6036_v0  ;;  %v6122_v38 = vsel %vm558_vm2, %v526_v37, %v6040_v19  ;;  %1658 = vmatmul.mubr.f32.gmra.mrb[6].mxu0 %v1332_v22  ;;  %v6126_v47 = vsel %vm559_vm3, %v527_v25, %v6044_v20  ;;  %v585_v20 = vld [vmem:[#allocation6 + $0x4] sm:$0x1]  ;;  %v586_v19 = vld [vmem:[#allocation6 + $0xc] sm:$0x1] }
  0xc2   :  { %7564 = vst [vmem:[#allocation65_spill] sm:$0xff] %v6105_v24  ;;  %7565 = vst [vmem:[#allocation66_spill] sm:$0xff] %v6109_v23  ;;  %v6130_v33 = vsel %vm560_vm4, %v528_v50, %v6048_v55  ;;  %v594_v42 = vsub.f32 1.0, %v6070_v17  ;;  %1663 = vmatprep.mubr.f32.mxu0 %v7554_v63  ;;  %v595_v59 = vsub.f32 1.0, %v6075_v31  ;;  %v596_v37 = vsub.f32 1.0, %v6079_v58 }
  0xc3   :  { %7566 = vst [vmem:[#allocation67_spill] sm:$0xff] %v6114_v21  ;;  %7567 = vst [vmem:[#allocation68_spill] sm:$0xff] %v6118_v41  ;;  %v597_v57 = vsub.f32 1.0, %v6083_v29  ;;  %v598_v18 = vsub.f32 1.0, %v6088_v48  ;;  %v599_v25 = vsub.f32 1.0, %v6092_v61  ;;  %v600_v49 = vsub.f32 1.0, %v6096_v35 }
  0xc4   :  { %7568 = vst [vmem:[#allocation69_spill] sm:$0xff] %v6122_v38  ;;  %7569 = vst [vmem:[#allocation70_spill] sm:$0xff] %v6126_v47  ;;  %v601_v50 = vmul.f32 %v593_v53, %v545_v46  ;;  %v602_v40 = vmul.f32 %v594_v42, %v546_v51  ;;  %v603_v22 = vmul.f32 %v595_v59, %v547_v36  ;;  %v588_v29 = vld [vmem:[#allocation6 + $0x1c] sm:$0x1]  ;;  %v589_v62 = vld [vmem:[#allocation6 + $0x24] sm:$0x1] }
  0xc5   :  { %7570 = vst [vmem:[#allocation71_spill] sm:$0xff] %v6130_v33  ;;  %v604_v39 = vmul.f32 %v596_v37, %v548_v43  ;;  %v605_v55 = vmul.f32 %v597_v57, %v549_v60  ;;  %v606_v17 = vmul.f32 %v598_v18, %v550_v45  ;;  %v607_v0 = vmul.f32 %v599_v25, %v551_v56  ;;  %v590_v35 = vld [vmem:[#allocation6 + $0x2c] sm:$0x1]  ;;  %v591_v43 = vld [vmem:[#allocation6 + $0x34] sm:$0x1] }
  0xc6   :  { %v608_v31 = vmul.f32 %v600_v49, %v552_v34  ;;  %v609_v28 = vadd.f32 0.125, %v601_v50  ;;  %v610_v58 = vadd.f32 0.125, %v602_v40  ;;  %v611_v48 = vadd.f32 0.125, %v603_v22  ;;  %v592_v34 = vld [vmem:[#allocation6 + $0x3c] sm:$0x1] }
  0xc7   :  { %v612_v52 = vadd.f32 0.125, %v604_v39  ;;  %v613_v61 = vadd.f32 0.125, %v605_v55  ;;  %v614_v44 = vadd.f32 0.125, %v606_v17  ;;  %v615_v46 = vadd.f32 0.125, %v607_v0 }
  0xc8   :  { %v616_v51 = vadd.f32 0.125, %v608_v31  ;;  %v1342_v36 = vrot.slane %v610_v58, 7  ;;  %vm617_vm5 = vcmp.ne.f32.partialorder %v585_v20, 0.0  ;;  %v1344_v45 = vrot.slane %v611_v48, 6 }
  0xc9   :  { %v1346_v60 = vrot.slane %v612_v52, 5  ;;  %v1348_v53 = vrot.slane %v613_v61, 4  ;;  %v1350_v56 = vrot.slane %v614_v44, 3  ;;  %v1352_v59 = vrot.slane %v615_v46, 2 }
  0xca   :  { %v1343_v42 = vsel %vm850_vm8, %v1342_v36, %v609_v28  ;;  %v1354_v37 = vrot.slane %v616_v51, 1  ;;  %vm618_vm6 = vcmp.ne.f32.partialorder %v586_v19, 0.0  ;;  %vm619_vm7 = vcmp.ne.f32.partialorder %v587_v32, 0.0 }
  0xcb   :  { %v1345_v39 = vsel %vm853_vm9, %v1344_v45, %v1343_v42  ;;  %vm620_vm15 = vcmp.ne.f32.partialorder %v588_v29, 0.0  ;;  %vm621_vm0 = vcmp.ne.f32.partialorder %v589_v62, 0.0  ;;  %vm622_vm1 = vcmp.ne.f32.partialorder %v590_v35, 0.0 }
  0xcc   :  { %v1347_v0 = vsel %vm856_vm10, %v1346_v60, %v1345_v39  ;;  %vm623_vm2 = vcmp.ne.f32.partialorder %v591_v43, 0.0  ;;  %vm624_vm3 = vcmp.ne.f32.partialorder %v592_v34, 0.0  ;;  %v6147_v17 = vsel %vm617_vm5, 1.0, %v7554_v63 }
  0xcd   :  { %v1349_v55 = vsel %vm859_vm11, %v1348_v53, %v1347_v0  ;;  %7571 = vst [vmem:[#allocation72_spill] sm:$0xff] %v6147_v17  ;;  %v6151_v31 = vsel %vm618_vm6, 1.0, %v7554_v63  ;;  %v6155_v57 = vsel %vm619_vm7, 1.0, %v7554_v63  ;;  %v6160_v25 = vsel %vm620_vm15, 1.0, %v7554_v63 }
  0xce   :  { %7572 = vst [vmem:[#allocation73_spill] sm:$0xff] %v6151_v31  ;;  %7573 = vst [vmem:[#allocation74_spill] sm:$0xff] %v6155_v57  ;;  %v1351_v18 = vsel %vm862_vm12, %v1350_v56, %v1349_v55  ;;  %v6164_v49 = vsel %vm621_vm0, 1.0, %v7554_v63  ;;  %v6168_v50 = vsel %vm622_vm1, 1.0, %v7554_v63  ;;  %v6173_v22 = vsel %vm623_vm2, 1.0, %v7554_v63 }
  0xcf   :  { %7574 = vst [vmem:[#allocation75_spill] sm:$0xff] %v6160_v25  ;;  %7575 = vst [vmem:[#allocation76_spill] sm:$0xff] %v6164_v49  ;;  %v1353_v40 = vsel %vm865_vm13, %v1352_v59, %v1351_v18  ;;  %v6177_v36 = vsel %vm624_vm3, 1.0, %v7554_v63  ;;  %v6181_v45 = vsel %vm617_vm5, %v585_v20, %v6101_v54  ;;  %v6186_v53 = vsel %vm618_vm6, %v586_v19, %v6105_v24 }
  0xd0   :  { %7576 = vst [vmem:[#allocation77_spill] sm:$0xff] %v6168_v50  ;;  %7577 = vst [vmem:[#allocation78_spill] sm:$0xff] %v6173_v22  ;;  %v1355_v60 = vsel %vm868_vm14, %v1354_v37, %v1353_v40  ;;  %v6190_v56 = vsel %vm619_vm7, %v587_v32, %v6109_v23  ;;  %v6194_v42 = vsel %vm620_vm15, %v588_v29, %v6114_v21  ;;  %v657_v29 = vsub.f32 1.0, %v6147_v17  ;;  %v653_v23 = vld [vmem:[#allocation6 + $0x25] sm:$0x1] }
  0xd1   :  { %7578 = vst [vmem:[#allocation79_spill] sm:$0xff] %v6177_v36  ;;  %7579 = vst [vmem:[#allocation80_spill] sm:$0xff] %v6181_v45  ;;  %1664 = vmatmul.mubr.f32.gmra.mrb[8].mxu0 %v1355_v60  ;;  %v6198_v59 = vsel %vm621_vm0, %v589_v62, %v6118_v41  ;;  %v6202_v20 = vsel %vm622_vm1, %v590_v35, %v6122_v38  ;;  %v6206_v19 = vsel %vm623_vm2, %v591_v43, %v6126_v47  ;;  %v651_v41 = vld [vmem:[#allocation6 + $0x15] sm:$0x1] }
  0xd2   :  { %7580 = vst [vmem:[#allocation81_spill] sm:$0xff] %v6186_v53  ;;  %7581 = vst [vmem:[#allocation82_spill] sm:$0xff] %v6190_v56  ;;  %v6210_v32 = vsel %vm624_vm3, %v592_v34, %v6130_v33  ;;  %1669 = vmatprep.mubr.f32.mxu0 %v7554_v63  ;;  %v658_v37 = vsub.f32 1.0, %v6151_v31  ;;  %v659_v62 = vsub.f32 1.0, %v6155_v57  ;;  %v660_v39 = vsub.f32 1.0, %v6160_v25 }
  0xd3   :  { %7582 = vst [vmem:[#allocation83_spill] sm:$0xff] %v6194_v42  ;;  %7583 = vst [vmem:[#allocation84_spill] sm:$0xff] %v6198_v59  ;;  %v661_v35 = vsub.f32 1.0, %v6164_v49  ;;  %v662_v0 = vsub.f32 1.0, %v6168_v50  ;;  %v663_v43 = vsub.f32 1.0, %v6173_v22  ;;  %v664_v55 = vsub.f32 1.0, %v6177_v36 }
  0xd4   :  { %7584 = vst [vmem:[#allocation85_spill] sm:$0xff] %v6202_v20  ;;  %7585 = vst [vmem:[#allocation86_spill] sm:$0xff] %v6206_v19  ;;  %v665_v34 = vmul.f32 %v657_v29, %v609_v28  ;;  %v666_v18 = vmul.f32 %v658_v37, %v610_v58  ;;  %v667_v40 = vmul.f32 %v659_v62, %v611_v48  ;;  %v649_v33 = vld [vmem:[#allocation6 + $0x5] sm:$0x1]  ;;  %v650_v57 = vld [vmem:[#allocation6 + $0xd] sm:$0x1] }
  0xd5   :  { %7586 = vst [vmem:[#allocation87_spill] sm:$0xff] %v6210_v32  ;;  %v668_v60 = vmul.f32 %v660_v39, %v612_v52  ;;  %v669_v17 = vmul.f32 %v661_v35, %v613_v61  ;;  %v670_v47 = vmul.f32 %v662_v0, %v614_v44  ;;  %v671_v31 = vmul.f32 %v663_v43, %v615_v46  ;;  %v652_v25 = vld [vmem:[#allocation6 + $0x1d] sm:$0x1]  ;;  %v654_v58 = vld [vmem:[#allocation6 + $0x2d] sm:$0x1] }
  0xd6   :  { %v672_v38 = vmul.f32 %v664_v55, %v616_v51  ;;  %v673_v54 = vadd.f32 0.125, %v665_v34  ;;  %v674_v49 = vadd.f32 0.125, %v666_v18  ;;  %v675_v21 = vadd.f32 0.125, %v667_v40  ;;  %v655_v61 = vld [vmem:[#allocation6 + $0x35] sm:$0x1] }
  0xd7   :  { %v676_v50 = vadd.f32 0.125, %v668_v60  ;;  %v677_v22 = vadd.f32 0.125, %v669_v17  ;;  %v678_v24 = vadd.f32 0.125, %v670_v47  ;;  %v679_v36 = vadd.f32 0.125, %v671_v31  ;;  %v656_v62 = vld [vmem:[#allocation6 + $0x3d] sm:$0x1] }
  0xd8   :  { %v680_v28 = vadd.f32 0.125, %v672_v38  ;;  %v1365_v48 = vrot.slane %v674_v49, 7  ;;  %v1367_v52 = vrot.slane %v675_v21, 6  ;;  %vm681_vm4 = vcmp.ne.f32.partialorder %v649_v33, 0.0 }
  0xd9   :  { %v1369_v29 = vrot.slane %v676_v50, 5  ;;  %v1371_v44 = vrot.slane %v677_v22, 4  ;;  %v1373_v46 = vrot.slane %v678_v24, 3  ;;  %v1375_v51 = vrot.slane %v679_v36, 2 }
  0xda   :  { %v1377_v37 = vrot.slane %v680_v28, 1  ;;  %v1366_v39 = vsel %vm850_vm8, %v1365_v48, %v673_v54  ;;  %vm682_vm5 = vcmp.ne.f32.partialorder %v650_v57, 0.0  ;;  %vm683_vm6 = vcmp.ne.f32.partialorder %v651_v41, 0.0 }
  0xdb   :  { %vm684_vm7 = vcmp.ne.f32.partialorder %v652_v25, 0.0  ;;  %v1368_v47 = vsel %vm853_vm9, %v1367_v52, %v1366_v39  ;;  %vm685_vm15 = vcmp.ne.f32.partialorder %v653_v23, 0.0  ;;  %vm686_vm0 = vcmp.ne.f32.partialorder %v654_v58, 0.0 }
  0xdc   :  { %vm687_vm1 = vcmp.ne.f32.partialorder %v655_v61, 0.0  ;;  %v1370_v38 = vsel %vm856_vm10, %v1369_v29, %v1368_v47  ;;  %vm688_vm2 = vcmp.ne.f32.partialorder %v656_v62, 0.0  ;;  %v6226_v17 = vsel %vm681_vm4, 1.0, %v7554_v63 }
  0xdd   :  { %7587 = vst [vmem:[#allocation88_spill] sm:$0xff] %v6226_v17  ;;  %v6230_v31 = vsel %vm682_vm5, 1.0, %v7554_v63  ;;  %v1372_v35 = vsel %vm859_vm11, %v1371_v44, %v1370_v38  ;;  %v6235_v0 = vsel %vm683_vm6, 1.0, %v7554_v63  ;;  %v6239_v43 = vsel %vm684_vm7, 1.0, %v7554_v63 }
  0xde   :  { %7588 = vst [vmem:[#allocation89_spill] sm:$0xff] %v6230_v31  ;;  %7589 = vst [vmem:[#allocation90_spill] sm:$0xff] %v6235_v0  ;;  %v6243_v55 = vsel %vm685_vm15, 1.0, %v7554_v63  ;;  %v1374_v34 = vsel %vm862_vm12, %v1373_v46, %v1372_v35  ;;  %v6248_v18 = vsel %vm686_vm0, 1.0, %v7554_v63  ;;  %v6252_v40 = vsel %vm687_vm1, 1.0, %v7554_v63 }
  0xdf   :  { %7590 = vst [vmem:[#allocation91_spill] sm:$0xff] %v6239_v43  ;;  %7591 = vst [vmem:[#allocation92_spill] sm:$0xff] %v6243_v55  ;;  %v6256_v60 = vsel %vm688_vm2, 1.0, %v7554_v63  ;;  %v1376_v48 = vsel %vm865_vm13, %v1375_v51, %v1374_v34  ;;  %v6261_v52 = vsel %vm681_vm4, %v649_v33, %v6181_v45  ;;  %v6265_v29 = vsel %vm682_vm5, %v650_v57, %v6186_v53  ;;  %v717_v45 = vld [vmem:[#allocation6 + $0x26] sm:$0x1] }
  0xe0   :  { %7592 = vst [vmem:[#allocation93_spill] sm:$0xff] %v6248_v18  ;;  %7593 = vst [vmem:[#allocation94_spill] sm:$0xff] %v6252_v40  ;;  %v6269_v44 = vsel %vm683_vm6, %v651_v41, %v6190_v56  ;;  %v1378_v46 = vsel %vm868_vm14, %v1377_v37, %v1376_v48  ;;  %v6274_v39 = vsel %vm684_vm7, %v652_v25, %v6194_v42  ;;  %v721_v25 = vsub.f32 1.0, %v6226_v17  ;;  %v715_v42 = vld [vmem:[#allocation6 + $0x16] sm:$0x1] }
  0xe1   :  { %7594 = vst [vmem:[#allocation95_spill] sm:$0xff] %v6256_v60  ;;  %v6278_v51 = vsel %vm685_vm15, %v653_v23, %v6198_v59  ;;  %v6282_v33 = vsel %vm686_vm0, %v654_v58, %v6202_v20  ;;  %1670 = vmatmul.mubr.f32.gmra.mrb[10].mxu0 %v1378_v46  ;;  %v6286_v57 = vsel %vm687_vm1, %v655_v61, %v6206_v19  ;;  %v722_v37 = vsub.f32 1.0, %v6230_v31  ;;  %v714_v19 = vld [vmem:[#allocation6 + $0xe] sm:$0x1] }
  0xe2   :  { %7595 = vst [vmem:[#allocation96_spill] sm:$0xff] %v6282_v33  ;;  %7596 = vst [vmem:[#allocation97_spill] sm:$0xff] %v6286_v57  ;;  %v6290_v41 = vsel %vm688_vm2, %v656_v62, %v6210_v32  ;;  %1675 = vmatprep.mubr.f32.mxu0 %v7554_v63  ;;  %v723_v23 = vsub.f32 1.0, %v6235_v0  ;;  %v724_v58 = vsub.f32 1.0, %v6239_v43  ;;  %v725_v47 = vsub.f32 1.0, %v6243_v55 }
  0xe3   :  { %7597 = vst [vmem:[#allocation98_spill] sm:$0xff] %v6290_v41  ;;  %v726_v38 = vsub.f32 1.0, %v6248_v18  ;;  %v727_v61 = vsub.f32 1.0, %v6252_v40  ;;  %v728_v35 = vsub.f32 1.0, %v6256_v60  ;;  %v729_v62 = vmul.f32 %v721_v25, %v673_v54  ;;  %v713_v32 = vld [vmem:[#allocation6 + $0x6] sm:$0x1] }
  0xe4   :  { %v730_v34 = vmul.f32 %v722_v37, %v674_v49  ;;  %v731_v48 = vmul.f32 %v723_v23, %v675_v21  ;;  %v732_v46 = vmul.f32 %v724_v58, %v676_v50  ;;  %v733_v17 = vmul.f32 %v725_v47, %v677_v22  ;;  %v716_v55 = vld [vmem:[#allocation6 + $0x1e] sm:$0x1]  ;;  %v718_v60 = vld [vmem:[#allocation6 + $0x2e] sm:$0x1]  ;;  %v719_v50 = vld [vmem:[#allocation6 + $0x36] sm:$0x1] }
  0xe5   :  { %v734_v31 = vmul.f32 %v726_v38, %v678_v24  ;;  %v735_v20 = vmul.f32 %v727_v61, %v679_v36  ;;  %v736_v0 = vmul.f32 %v728_v35, %v680_v28  ;;  %v737_v59 = vadd.f32 0.125, %v729_v62  ;;  %v720_v28 = vld [vmem:[#allocation6 + $0x3e] sm:$0x1] }
  0xe6   :  { %v738_v43 = vadd.f32 0.125, %v730_v34  ;;  %v739_v18 = vadd.f32 0.125, %v731_v48  ;;  %v740_v56 = vadd.f32 0.125, %v732_v46  ;;  %v741_v40 = vadd.f32 0.125, %v733_v17 }
  0xe7   :  { %v742_v53 = vadd.f32 0.125, %v734_v31  ;;  %v743_v54 = vadd.f32 0.125, %v735_v20  ;;  %v744_v49 = vadd.f32 0.125, %v736_v0  ;;  %vm745_vm3 = vcmp.ne.f32.partialorder %v713_v32, 0.0 }
  0xe8   :  { %v1388_v21 = vrot.slane %v738_v43, 7  ;;  %v1390_v24 = vrot.slane %v739_v18, 6  ;;  %v1392_v22 = vrot.slane %v740_v56, 5  ;;  %v1394_v25 = vrot.slane %v741_v40, 4 }
  0xe9   :  { %v1396_v36 = vrot.slane %v742_v53, 3  ;;  %v1398_v23 = vrot.slane %v743_v54, 2  ;;  %v1400_v58 = vrot.slane %v744_v49, 1  ;;  %vm746_vm4 = vcmp.ne.f32.partialorder %v714_v19, 0.0 }
  0xea   :  { %v1389_v37 = vsel %vm850_vm8, %v1388_v21, %v737_v59  ;;  %vm747_vm5 = vcmp.ne.f32.partialorder %v715_v42, 0.0  ;;  %vm748_vm6 = vcmp.ne.f32.partialorder %v716_v55, 0.0  ;;  %vm749_vm7 = vcmp.ne.f32.partialorder %v717_v45, 0.0 }
  0xeb   :  { %v1391_v47 = vsel %vm853_vm9, %v1390_v24, %v1389_v37  ;;  %vm750_vm15 = vcmp.ne.f32.partialorder %v718_v60, 0.0  ;;  %vm751_vm0 = vcmp.ne.f32.partialorder %v719_v50, 0.0  ;;  %vm752_vm1 = vcmp.ne.f32.partialorder %v720_v28, 0.0 }
  0xec   :  { %v1393_v20 = vsel %vm856_vm10, %v1392_v22, %v1391_v47  ;;  %v6307_v31 = vsel %vm745_vm3, 1.0, %v7554_v63  ;;  %v6311_v0 = vsel %vm746_vm4, 1.0, %v7554_v63  ;;  %v6315_v38 = vsel %vm747_vm5, 1.0, %v7554_v63 }
  0xed   :  { %v1395_v17 = vsel %vm859_vm11, %v1394_v25, %v1393_v20  ;;  %7598 = vst [vmem:[#allocation99_spill] sm:$0xff] %v6307_v31  ;;  %7599 = vst [vmem:[#allocation100_spill] sm:$0xff] %v6311_v0  ;;  %v6320_v35 = vsel %vm748_vm6, 1.0, %v7554_v63  ;;  %v6324_v62 = vsel %vm749_vm7, 1.0, %v7554_v63  ;;  %v6328_v34 = vsel %vm750_vm15, 1.0, %v7554_v63 }
  0xee   :  { %7600 = vst [vmem:[#allocation101_spill] sm:$0xff] %v6315_v38  ;;  %v1397_v61 = vsel %vm862_vm12, %v1396_v36, %v1395_v17  ;;  %7601 = vst [vmem:[#allocation102_spill] sm:$0xff] %v6320_v35  ;;  %v6333_v46 = vsel %vm751_vm0, 1.0, %v7554_v63  ;;  %v6337_v21 = vsel %vm752_vm1, 1.0, %v7554_v63  ;;  %v6341_v24 = vsel %vm745_vm3, %v713_v32, %v6261_v52 }
  0xef   :  { %7602 = vst [vmem:[#allocation103_spill] sm:$0xff] %v6324_v62  ;;  %7603 = vst [vmem:[#allocation104_spill] sm:$0xff] %v6328_v34  ;;  %v1399_v48 = vsel %vm865_vm13, %v1398_v23, %v1397_v61  ;;  %v6346_v25 = vsel %vm746_vm4, %v714_v19, %v6265_v29  ;;  %v6350_v36 = vsel %vm747_vm5, %v715_v42, %v6269_v44  ;;  %v788_v47 = vsub.f32 1.0, %v6320_v35 }
  0xf0   :  { %7604 = vst [vmem:[#allocation105_spill] sm:$0xff] %v6333_v46  ;;  %7605 = vst [vmem:[#allocation106_spill] sm:$0xff] %v6337_v21  ;;  %v1401_v22 = vsel %vm868_vm14, %v1400_v58, %v1399_v48  ;;  %v6354_v37 = vsel %vm748_vm6, %v716_v55, %v6274_v39  ;;  %v6358_v23 = vsel %vm749_vm7, %v717_v45, %v6278_v51  ;;  %v785_v55 = vsub.f32 1.0, %v6307_v31 }
  0xf1   :  { %7606 = vst [vmem:[#allocation107_spill] sm:$0xff] %v6341_v24  ;;  %1676 = vmatmul.mubr.f32.gmra.mrb[12].mxu0 %v1401_v22  ;;  %v6362_v32 = vsel %vm750_vm15, %v718_v60, %v6282_v33  ;;  %v6366_v19 = vsel %vm751_vm0, %v719_v50, %v6286_v57  ;;  %v6370_v42 = vsel %vm752_vm1, %v720_v28, %v6290_v41  ;;  %v786_v58 = vsub.f32 1.0, %v6311_v0 }
  0xf2   :  { %7607 = vst [vmem:[#allocation108_spill] sm:$0xff] %v6362_v32  ;;  %7608 = vst [vmem:[#allocation109_spill] sm:$0xff] %v6366_v19  ;;  %1681 = vmatprep.mubr.f32.mxu0 %v7554_v63  ;;  %v787_v45 = vsub.f32 1.0, %v6315_v38  ;;  %v789_v60 = vsub.f32 1.0, %v6324_v62  ;;  %v790_v20 = vsub.f32 1.0, %v6328_v34  ;;  %v791_v50 = vsub.f32 1.0, %v6333_v46 }
  0xf3   :  { %7609 = vst [vmem:[#allocation110_spill] sm:$0xff] %v6370_v42  ;;  %v792_v17 = vsub.f32 1.0, %v6337_v21  ;;  %v793_v28 = vmul.f32 %v785_v55, %v737_v59  ;;  %v794_v61 = vmul.f32 %v786_v58, %v738_v43  ;;  %v796_v22 = vmul.f32 %v788_v47, %v740_v56  ;;  %v171_v21 = vld [vmem:[#allocation14 + $0x8] sm:$0xff]  ;;  %v174_v59 = vld [vmem:[#allocation14 + $0x20] sm:$0xff]  ;;  %v173_v56 = vld [vmem:[#allocation14 + $0x18] sm:$0xff] }
  0xf4   :  { %v795_v48 = vmul.f32 %v787_v45, %v739_v18  ;;  %v797_v63 = vmul.f32 %v789_v60, %v741_v40  ;;  %v798_v31 = vmul.f32 %v790_v20, %v742_v53  ;;  %v799_v24 = vmul.f32 %v791_v50, %v743_v54  ;;  %v170_v43 = vld [vmem:[#allocation14] sm:$0xff]  ;;  %v177_v40 = vld [vmem:[#allocation14 + $0x38] sm:$0xff]  ;;  %v180_v53 = vld [vmem:[#allocation14 + $0x50] sm:$0xff] }
  0xf5   :  { %v800_v0 = vmul.f32 %v792_v17, %v744_v49  ;;  %v801_v42 = vadd.f32 0.125, %v793_v28  ;;  %v802_v38 = vadd.f32 0.125, %v794_v61  ;;  %v804_v35 = vadd.f32 0.125, %v796_v22  ;;  %v186_v47 = vld [vmem:[#allocation14 + $0x80] sm:$0xff]  ;;  %v185_v50 = vld [vmem:[#allocation14 + $0x78] sm:$0xff]  ;;  %v192_v28 = vld [vmem:[#allocation14 + $0xb0] sm:$0xff] }
  0xf6   :  { %v803_v19 = vadd.f32 0.125, %v795_v48  ;;  %v805_v32 = vadd.f32 0.125, %v797_v63  ;;  %v806_v62 = vadd.f32 0.125, %v798_v31  ;;  %v807_v41 = vadd.f32 0.125, %v799_v24  ;;  %v182_v20 = vld [vmem:[#allocation14 + $0x60] sm:$0xff]  ;;  %v189_v17 = vld [vmem:[#allocation14 + $0x98] sm:$0xff] }
  0xf7   :  { %v808_v34 = vadd.f32 0.125, %v800_v0  ;;  %v849_v57 = vrot.slane %v802_v38, 7  ;;  %v855_v33 = vrot.slane %v804_v35, 5  ;;  %v4538_v0 = vpack.c.bf16 %v174_v59, %v171_v21  ;;  %v176_v35 = vld [vmem:[#allocation14 + $0x30] sm:$0xff] }
  0xf8   :  { %v852_v46 = vrot.slane %v803_v19, 6  ;;  %v858_v18 = vrot.slane %v805_v32, 4  ;;  %v861_v49 = vrot.slane %v806_v62, 3  ;;  %v864_v58 = vrot.slane %v807_v41, 2  ;;  %v179_v19 = vld [vmem:[#allocation14 + $0x48] sm:$0xff]  ;;  %v188_v59 = vld [vmem:[#allocation14 + $0x90] sm:$0xff] }
  0xf9   :  { %v851_v54 = vsel %vm850_vm8, %v849_v57, %v801_v42  ;;  %v867_v63 = vrot.slane %v808_v34, 1  ;;  %v4540_v38 = vpack.c.bf16 %v173_v56, %v170_v43  ;;  %v4542_v24 = vpack.c.bf16 %v180_v53, %v177_v40  ;;  %v183_v32 = vld [vmem:[#allocation14 + $0x68] sm:$0xff]  ;;  %4539 = vmatprep.subr.bf16.mxu1 %v4538_v0  ;;  %v220_v57 = vld [vmem:[#allocation14 + $0x190] sm:$0xff]  ;;  %v226_v43 = vld [vmem:[#allocation14 + $0x1c0] sm:$0xff] }
  0xfa   :  { %v854_v55 = vsel %vm853_vm9, %v852_v46, %v851_v54  ;;  %v223_v62 = vld [vmem:[#allocation14 + $0x1a8] sm:$0xff]  ;;  %v4544_v41 = vpack.c.bf16 %v179_v19, %v176_v35  ;;  %v172_v34 = vld [vmem:[#allocation14 + $0x10] sm:$0xff]  ;;  %v4546_v42 = vpack.c.bf16 %v186_v47, %v183_v32  ;;  %v4548_v22 = vpack.c.bf16 %v185_v50, %v182_v20  ;;  %v178_v54 = vld [vmem:[#allocation14 + $0x40] sm:$0xff] }
  0xfb   :  { %v857_v31 = vsel %vm856_vm10, %v855_v33, %v854_v55  ;;  %4541 = vmatpush1.bf16.msra.mxu1 %v4540_v38  ;;  %v175_v33 = vld [vmem:[#allocation14 + $0x28] sm:$0xff]  ;;  %v4602_v61 = vpack.c.bf16 %v223_v62, %v220_v57  ;;  %v4550_v56 = vpack.c.bf16 %v192_v28, %v189_v17  ;;  %v194_v0 = vld [vmem:[#allocation14 + $0xc0] sm:$0xff]  ;;  %v232_v38 = vld [vmem:[#allocation14 + $0x1f0] sm:$0xff] }
  0xfc   :  { %v860_v45 = vsel %vm859_vm11, %v858_v18, %v857_v31  ;;  %4543 = vmatprep.subr.bf16.mxu1 %v4542_v24  ;;  %v4604_v48 = vpack.c.bf16 %v175_v33, %v172_v34  ;;  %v229_v18 = vld [vmem:[#allocation14 + $0x1d8] sm:$0xff]  ;;  %v191_v40 = vld [vmem:[#allocation14 + $0xa8] sm:$0xff]  ;;  %v200_v34 = vld [vmem:[#allocation14 + $0xf0] sm:$0xff] }
  0xfd   :  { %v863_v60 = vsel %vm862_vm12, %v861_v49, %v860_v45  ;;  %4603 = vmatprep.subr.bf16.mxu0 %v4602_v61  ;;  %v4606_v53 = vpack.c.bf16 %v229_v18, %v226_v43  ;;  %v181_v49 = vld [vmem:[#allocation14 + $0x58] sm:$0xff]  ;;  %v195_v55 = vld [vmem:[#allocation14 + $0xc8] sm:$0xff]  ;;  %v4552_v31 = vpack.c.bf16 %v191_v40, %v188_v59  ;;  %v184_v45 = vld [vmem:[#allocation14 + $0x70] sm:$0xff] }
  0xfe   :  { %v866_v46 = vsel %vm865_vm13, %v864_v58, %v863_v60  ;;  %4605 = vmatpush3.bf16.msra.mxu0 %v4604_v48  ;;  %v198_v58 = vld [vmem:[#allocation14 + $0xe0] sm:$0xff]  ;;  %v235_v24 = vld [vmem:[#allocation14 + $0x208] sm:$0xff]  ;;  %v197_v19 = vld [vmem:[#allocation14 + $0xd8] sm:$0xff] }
  0xff   :  { %v869_v21 = vsel %vm868_vm14, %v867_v63, %v866_v46  ;;  %4545 = vmatpush1.bf16.msra.mxu1 %v4544_v41  ;;  %v4608_v63 = vpack.c.bf16 %v181_v49, %v178_v54  ;;  %4607 = vmatprep.subr.bf16.mxu0 %v4606_v53  ;;  %v4554_v35 = vpack.c.bf16 %v198_v58, %v195_v55  ;;  %v187_v32 = vld [vmem:[#allocation14 + $0x88] sm:$0xff]  ;;  %v201_v47 = vld [vmem:[#allocation14 + $0xf8] sm:$0xff]  ;;  %v204_v60 = vld [vmem:[#allocation14 + $0x110] sm:$0xff] }
 0x100   :  { %1682 = vmatmul.mubr.f32.gmra.mrb[14].mxu0 %v869_v21  ;;  %4547 = vmatprep.subr.bf16.mxu1 %v4546_v42  ;;  %v4610_v57 = vpack.c.bf16 %v235_v24, %v232_v38  ;;  %v4612_v62 = vpack.c.bf16 %v187_v32, %v184_v45  ;;  %v4556_v46 = vpack.c.bf16 %v197_v19, %v194_v0  ;;  %v203_v33 = vld [vmem:[#allocation14 + $0x108] sm:$0xff]  ;;  %v210_v42 = vld [vmem:[#allocation14 + $0x140] sm:$0xff]  ;;  %v209_v28 = vld [vmem:[#allocation14 + $0x138] sm:$0xff] }
 0x101   :  { %v4558_v41 = vpack.c.bf16 %v204_v60, %v201_v47  ;;  %v207_v21 = vld [vmem:[#allocation14 + $0x128] sm:$0xff]  ;;  %v4560_v20 = vpack.c.bf16 %v203_v33, %v200_v34  ;;  %v206_v17 = vld [vmem:[#allocation14 + $0x120] sm:$0xff]  ;;  %v213_v61 = vld [vmem:[#allocation14 + $0x158] sm:$0xff] }
 0x102   :  { %4609 = vmatpush3.bf16.msra.mxu0 %v4608_v63  ;;  %v4562_v50 = vpack.c.bf16 %v210_v42, %v207_v21  ;;  %v216_v48 = vld [vmem:[#allocation14 + $0x170] sm:$0xff]  ;;  %v241_v59 = vld [vmem:[#allocation14 + $0x238] sm:$0xff]  ;;  %v190_v18 = vld [vmem:[#allocation14 + $0xa0] sm:$0xff]  ;;  %v4564_v40 = vpack.c.bf16 %v209_v28, %v206_v17 }
 0x103   :  { %4549 = vmatpush1.bf16.msra.mxu1 %v4548_v22  ;;  %4611 = vmatprep.subr.bf16.mxu0 %v4610_v57  ;;  %v238_v22 = vld [vmem:[#allocation14 + $0x220] sm:$0xff]  ;;  %v4566_v54 = vpack.c.bf16 %v216_v48, %v213_v61  ;;  %v212_v49 = vld [vmem:[#allocation14 + $0x150] sm:$0xff]  ;;  %v215_v55 = vld [vmem:[#allocation14 + $0x168] sm:$0xff] }
 0x104   :  { %4551 = vmatprep.subr.bf16.mxu1 %v4550_v56  ;;  %v4614_v43 = vpack.c.bf16 %v241_v59, %v238_v22  ;;  %v193_v56 = vld [vmem:[#allocation14 + $0xb8] sm:$0xff]  ;;  %v219_v58 = vld [vmem:[#allocation14 + $0x188] sm:$0xff]  ;;  %v222_v63 = vld [vmem:[#allocation14 + $0x1a0] sm:$0xff] }
 0x105   :  { %v4616_v53 = vpack.c.bf16 %v193_v56, %v190_v18  ;;  %v4570_v0 = vpack.c.bf16 %v222_v63, %v219_v58  ;;  %v218_v38 = vld [vmem:[#allocation14 + $0x180] sm:$0xff]  ;;  %v221_v24 = vld [vmem:[#allocation14 + $0x198] sm:$0xff]  ;;  %v228_v19 = vld [vmem:[#allocation14 + $0x1d0] sm:$0xff] }
 0x106   :  { %4613 = vmatpush3.bf16.msra.mxu0 %v4612_v62  ;;  %v4572_v45 = vpack.c.bf16 %v221_v24, %v218_v38  ;;  %v224_v47 = vld [vmem:[#allocation14 + $0x1b0] sm:$0xff]  ;;  %v227_v60 = vld [vmem:[#allocation14 + $0x1c8] sm:$0xff]  ;;  %v234_v62 = vld [vmem:[#allocation14 + $0x200] sm:$0xff] }
 0x107   :  { %4553 = vmatpush1.bf16.msra.mxu1 %v4552_v31  ;;  %4615 = vmatprep.subr.bf16.mxu0 %v4614_v43  ;;  %v4568_v31 = vpack.c.bf16 %v215_v55, %v212_v49  ;;  %v231_v57 = vld [vmem:[#allocation14 + $0x1e8] sm:$0xff]  ;;  %v230_v34 = vld [vmem:[#allocation14 + $0x1e0] sm:$0xff]  ;;  %v233_v33 = vld [vmem:[#allocation14 + $0x1f8] sm:$0xff] }
 0x108   :  { %4555 = vmatprep.subr.bf16.mxu1 %v4554_v35  ;;  %v225_v35 = vld [vmem:[#allocation14 + $0x1b8] sm:$0xff]  ;;  %v240_v42 = vld [vmem:[#allocation14 + $0x230] sm:$0xff]  ;;  %v199_v61 = vld [vmem:[#allocation14 + $0xe8] sm:$0xff]  ;;  %v4580_v48 = vpack.c.bf16 %v233_v33, %v230_v34 }
 0x109   :  { %v4574_v32 = vpack.c.bf16 %v228_v19, %v225_v35  ;;  %v237_v21 = vld [vmem:[#allocation14 + $0x218] sm:$0xff]  ;;  %v196_v28 = vld [vmem:[#allocation14 + $0xd0] sm:$0xff]  ;;  %v239_v18 = vld [vmem:[#allocation14 + $0x228] sm:$0xff] }
 0x10a   :  { %4617 = vmatpush3.bf16.msra.mxu0 %v4616_v53  ;;  %v4620_v22 = vpack.c.bf16 %v199_v61, %v196_v28  ;;  %v4582_v59 = vpack.c.bf16 %v240_v42, %v237_v21  ;;  %v236_v43 = vld [vmem:[#allocation14 + $0x210] sm:$0xff]  ;;  %v243_v56 = vld [vmem:[#allocation14 + $0x248] sm:$0xff]  ;;  %v242_v49 = vld [vmem:[#allocation14 + $0x240] sm:$0xff] }
 0x10b   :  { %4557 = vmatpush1.bf16.msra.mxu1 %v4556_v46  ;;  %v4576_v46 = vpack.c.bf16 %v227_v60, %v224_v47  ;;  %v4584_v53 = vpack.c.bf16 %v239_v18, %v236_v43  ;;  %v245_v55 = vld [vmem:[#allocation14 + $0x258] sm:$0xff]  ;;  %v251_v24 = vld [vmem:[#allocation14 + $0x288] sm:$0xff]  ;;  %v250_v35 = vld [vmem:[#allocation14 + $0x280] sm:$0xff]  ;;  %v1415_v43 = vrot.slane %v5811_v12, 5  ;;  %v1116_v12 = vrot.slane %v5780_v4, 5 }
 0x10c   :  { %4559 = vmatprep.subr.bf16.mxu1 %v4558_v41  ;;  %v4578_v41 = vpack.c.bf16 %v234_v62, %v231_v57  ;;  %v4588_v58 = vpack.c.bf16 %v245_v55, %v242_v49  ;;  %v249_v63 = vld [vmem:[#allocation14 + $0x278] sm:$0xff]  ;;  %v202_v47 = vld [vmem:[#allocation14 + $0x100] sm:$0xff]  ;;  %v255_v62 = vld [vmem:[#allocation14 + $0x2a8] sm:$0xff]  ;;  %v1124_v4 = vrot.slane %v5796_v8, 1 }
 0x10d   :  { %v253_v19 = vld [vmem:[#allocation14 + $0x298] sm:$0xff]  ;;  %v256_v21 = vld [vmem:[#allocation14 + $0x2b0] sm:$0xff]  ;;  %v259_v42 = vld [vmem:[#allocation14 + $0x2c8] sm:$0xff] }
 0x10e   :  { %v205_v60 = vld [vmem:[#allocation14 + $0x118] sm:$0xff]  ;;  %v211_v28 = vld [vmem:[#allocation14 + $0x148] sm:$0xff] }
 0x10f   :  { %4561 = vmatpush1.bf16.msra.mxu1 %v4560_v20  ;;  %v244_v20 = vld [vmem:[#allocation14 + $0x250] sm:$0xff]  ;;  %v4624_v57 = vpack.c.bf16 %v205_v60, %v202_v47  ;;  %v257_v33 = vld [vmem:[#allocation14 + $0x2b8] sm:$0xff]  ;;  %v214_v60 = vld [vmem:[#allocation14 + $0x160] sm:$0xff] }
 0x110   :  { %4563 = vmatprep.subr.bf16.mxu1 %v4562_v50  ;;  %v247_v50 = vld [vmem:[#allocation14 + $0x268] sm:$0xff] }
 0x111   :  { %v4618_v17 = vpack.c.bf16 %v247_v50, %v244_v20  ;;  %v4626_v50 = vpack.c.bf16 %v259_v42, %v256_v21 }
 0x113   :  { %4565 = vmatpush1.bf16.msra.mxu1 %v4564_v40  ;;  %4619 = vmatprep.subr.bf16.mxu0 %v4618_v17  ;;  %v246_v40 = vld [vmem:[#allocation14 + $0x260] sm:$0xff]  ;;  %v208_v17 = vld [vmem:[#allocation14 + $0x130] sm:$0xff] }
 0x114   :  { %4567 = vmatprep.subr.bf16.mxu1 %v4566_v54  ;;  %4621 = vmatpush3.bf16.msra.mxu0 %v4620_v22  ;;  %v4586_v54 = vpack.c.bf16 %v246_v40, %v243_v56  ;;  %v4628_v61 = vpack.c.bf16 %v211_v28, %v208_v17  ;;  %v1413_v22 = vrot.slane %v5807_v11, 6  ;;  %v1417_v56 = vrot.slane %v5815_v13, 4  ;;  %v7611_v17 = vld [vmem:[#allocation36_spill] sm:$0xff] }
 0x115   :  { %v1112_v40 = vrot.slane %v5772_v2, 7  ;;  %v1421_v11 = vrot.slane %v5823_v15, 2  ;;  %v1118_v2 = vrot.slane %v5784_v5, 4  ;;  %v1122_v15 = vrot.slane %v5792_v7, 2 }
 0x116   :  { %v1423_v5 = vrot.slane %v5827_v16, 1  ;;  %v267_v16 = vld [vmem:[#allocation15 + $0x8] sm:$0xff]  ;;  %v1440_v28 = vrot.slane %v7611_v17, 4  ;;  %v5250_v17 = vld [vmem:[#allocation6 + $0x9] sm:$0x1] }
 0x117   :  { %4569 = vmatpush1.bf16.msra.mxu1 %v4568_v31  ;;  %v252_v31 = vld [vmem:[#allocation14 + $0x290] sm:$0xff] }
 0x118   :  { %4571 = vmatprep.subr.bf16.mxu1 %v4570_v0  ;;  %v248_v0 = vld [vmem:[#allocation14 + $0x270] sm:$0xff]  ;;  %v4590_v38 = vpack.c.bf16 %v252_v31, %v249_v63  ;;  %v261_v31 = vld [vmem:[#allocation14 + $0x2d8] sm:$0xff] }
 0x11b   :  { %4573 = vmatpush1.bf16.msra.mxu1 %v4572_v45  ;;  %v4592_v45 = vpack.c.bf16 %v251_v24, %v248_v0  ;;  %v264_v0 = vld [vmem:[#allocation14 + $0x2f0] sm:$0xff] }
 0x11c   :  { %4575 = vmatprep.subr.bf16.mxu1 %v4574_v32  ;;  %v4622_v32 = vpack.c.bf16 %v253_v19, %v250_v35  ;;  %v4598_v35 = vpack.c.bf16 %v264_v0, %v261_v31  ;;  %v263_v19 = vld [vmem:[#allocation14 + $0x2e8] sm:$0xff]  ;;  %v5247_v0 = vld [vmem:[#allocation6] sm:$0x1] }
 0x11e   :  { %4623 = vmatprep.subr.bf16.mxu0 %v4622_v32  ;;  %v265_v32 = vld [vmem:[#allocation14 + $0x2f8] sm:$0xff] }
 0x11f   :  { %4577 = vmatpush1.bf16.msra.mxu1 %v4576_v46  ;;  %4625 = vmatpush3.bf16.msra.mxu0 %v4624_v57  ;;  %v258_v46 = vld [vmem:[#allocation14 + $0x2c0] sm:$0xff]  ;;  %v217_v57 = vld [vmem:[#allocation14 + $0x178] sm:$0xff] }
 0x120   :  { %4579 = vmatprep.subr.bf16.mxu1 %v4578_v41  ;;  %v254_v41 = vld [vmem:[#allocation14 + $0x2a0] sm:$0xff]  ;;  %v4594_v34 = vpack.c.bf16 %v258_v46, %v255_v62  ;;  %4627 = vmatprep.subr.bf16.mxu0 %v4626_v50  ;;  %v4632_v8 = vpack.c.bf16 %v217_v57, %v214_v60  ;;  %v269_v46 = vld [vmem:[#allocation15 + $0x18] sm:$0xff] }
 0x121   :  { %v4596_v20 = vpack.c.bf16 %v257_v33, %v254_v41  ;;  %v1434_v41 = vrot.slane %v5927_v27, 7  ;;  %v1436_v33 = vrot.slane %v5931_v30, 6 }
 0x123   :  { %4581 = vmatpush1.bf16.msra.mxu1 %v4580_v48  ;;  %v1411_v48 = vrot.slane %v5803_v10, 7  ;;  %4629 = vmatpush3.bf16.msra.mxu0 %v4628_v61  ;;  %v1114_v10 = vrot.slane %v5776_v3, 6  ;;  %v1120_v3 = vrot.slane %v5788_v6, 3  ;;  %v1435_v21 = vsel %vm850_vm8, %v1434_v41, %v5923_v26  ;;  %v7612_v61 = vld [vmem:[#allocation37_spill] sm:$0xff]  ;;  %v5249_v41 = vld [vmem:[#allocation6 + $0x20] sm:$0x1] }
 0x124   :  { %4583 = vmatprep.subr.bf16.mxu1 %v4582_v59  ;;  %v1437_v42 = vsel %vm853_vm9, %v1436_v33, %v1435_v21  ;;  %v934_v33 = vrot.slane %v5249_v41, 4 }
 0x125   :  { %v1412_v59 = vsel %vm850_vm8, %v1411_v48, %v5799_v9  ;;  %v1113_v9 = vsel %vm850_vm8, %v1112_v40, %v5768_v1  ;;  %v1442_v48 = vrot.slane %v7612_v61, 3  ;;  %v7624_v61 = vld [vmem:[#allocation65_spill] sm:$0xff] }
 0x126   :  { %v1414_v18 = vsel %vm853_vm9, %v1413_v22, %v1412_v59  ;;  %v1115_v13 = vsel %vm853_vm9, %v1114_v10, %v1113_v9  ;;  %v7613_v22 = vld [vmem:[#allocation38_spill] sm:$0xff]  ;;  %v7615_v10 = vld [vmem:[#allocation49_spill] sm:$0xff] }
 0x127   :  { %4585 = vmatpush1.bf16.msra.mxu1 %v4584_v53  ;;  %v1416_v53 = vsel %vm856_vm10, %v1415_v43, %v1414_v18  ;;  %v1444_v59 = vrot.slane %v7613_v22, 2  ;;  %v7614_v43 = vld [vmem:[#allocation39_spill] sm:$0xff] }
 0x128   :  { %4587 = vmatprep.subr.bf16.mxu1 %v4586_v54  ;;  %v1419_v54 = vrot.slane %v5819_v14, 3  ;;  %v1418_v49 = vsel %vm859_vm11, %v1417_v56, %v1416_v53  ;;  %v1117_v14 = vsel %vm856_vm10, %v1116_v12, %v1115_v13  ;;  %v1446_v18 = vrot.slane %v7614_v43, 1  ;;  %v5245_v53 = vld [vmem:[#allocation6 + $0x8] sm:$0x1]  ;;  %v7617_v12 = vld [vmem:[#allocation51_spill] sm:$0xff]  ;;  %v7618_v13 = vld [vmem:[#allocation48_spill] sm:$0xff] }
 0x129   :  { %v1119_v63 = vsel %vm859_vm11, %v1118_v2, %v1117_v14  ;;  %v7625_v43 = vld [vmem:[#allocation66_spill] sm:$0xff] }
 0x12a   :  { %v1420_v55 = vsel %vm862_vm12, %v1419_v54, %v1418_v49  ;;  %v1121_v1 = vsel %vm862_vm12, %v1120_v3, %v1119_v63  ;;  %v928_v54 = vrot.slane %v5245_v53, 7  ;;  %v1457_v49 = vrot.slane %v7615_v10, 7  ;;  %v5246_v63 = vld [vmem:[#allocation6 + $0x10] sm:$0x1] }
 0x12b   :  { %4589 = vmatpush1.bf16.msra.mxu1 %v4588_v58  ;;  %v1422_v58 = vsel %vm865_vm13, %v1421_v11, %v1420_v55  ;;  %v1123_v24 = vsel %vm865_vm13, %v1122_v15, %v1121_v1  ;;  %v7616_v11 = vld [vmem:[#allocation50_spill] sm:$0xff]  ;;  %v1461_v55 = vrot.slane %v7617_v12, 5  ;;  %v1565_v3 = vlaneseq }
 0x12c   :  { %4591 = vmatprep.subr.bf16.mxu1 %v4590_v38  ;;  %v260_v38 = vld [vmem:[#allocation14 + $0x2d0] sm:$0xff]  ;;  %v6417_v6 = vsel %vm868_vm14, %v1124_v4, %v1123_v24  ;;  %v6422_v62 = vsel %vm868_vm14, %v1423_v5, %v1422_v58  ;;  %v1459_v9 = vrot.slane %v7616_v11, 6  ;;  %v1458_v2 = vsel %vm850_vm8, %v1457_v49, %v7618_v13  ;;  %v7620_v4 = vld [vmem:[#allocation53_spill] sm:$0xff]  ;;  %v7621_v5 = vld [vmem:[#allocation54_spill] sm:$0xff] }
 0x12d   :  { %v4600_v47 = vpack.c.bf16 %v263_v19, %v260_v38  ;;  %1896 = vmatprep.mubr.f32.mxu1 %v6417_v6  ;;  %2009 = vmatprep.mubr.f32.mxu0 %v6417_v6  ;;  %v7619_v58 = vld [vmem:[#allocation52_spill] sm:$0xff]  ;;  %v930_v15 = vrot.slane %v5246_v63, 6  ;;  %v1465_v31 = vrot.slane %v7620_v4, 3  ;;  %v929_v38 = vsel %vm850_vm8, %v928_v54, %v5247_v0  ;;  %v7622_v19 = vld [vmem:[#allocation55_spill] sm:$0xff]  ;;  %v7627_v54 = vld [vmem:[#allocation29_spill] sm:$0xff] }
 0x12e   :  { %v1463_v14 = vrot.slane %v7619_v58, 4  ;;  %v1460_v1 = vsel %vm853_vm9, %v1459_v9, %v1458_v2  ;;  %v1137_v10 = vrot.slane %v7627_v54, 6  ;;  %v7628_v49 = vld [vmem:[#allocation64_spill] sm:$0xff]  ;;  %v5253_v13 = vld [vmem:[#allocation6 + $0x11] sm:$0x1] }
 0x12f   :  { %4593 = vmatpush1.bf16.msra.mxu1 %v4592_v45  ;;  %v262_v45 = vld [vmem:[#allocation14 + $0x2e0] sm:$0xff]  ;;  %v1462_v24 = vsel %vm856_vm10, %v1461_v55, %v1460_v1  ;;  %v931_v57 = vsel %vm853_vm9, %v930_v15, %v929_v38  ;;  %v7629_v9 = vld [vmem:[#allocation68_spill] sm:$0xff]  ;;  %v953_v2 = vrot.slane %v5253_v13, 6  ;;  %v7632_v1 = vld [vmem:[#allocation27_spill] sm:$0xff] }
 0x130   :  { %4595 = vmatprep.subr.bf16.mxu1 %v4594_v34  ;;  %v4630_v7 = vpack.c.bf16 %v265_v32, %v262_v45  ;;  %v6425_v34 = vpack.c.bf16 %v269_v46, %v267_v16  ;;  %v1469_v45 = vrot.slane %v7622_v19, 1  ;;  %v1464_v32 = vsel %vm859_vm11, %v1463_v14, %v1462_v24  ;;  %v6479_v55 = vld [vmem:[%s7427_s4] sm:$0x3]  ;;  %v7630_v14 = vld [vmem:[#allocation69_spill] sm:$0xff]  ;;  %v7631_v63 = vld [vmem:[#allocation70_spill] sm:$0xff] }
 0x131   :  { %v1466_v60 = vsel %vm862_vm12, %v1465_v31, %v1464_v32  ;;  %v6460_v16 = vshrl.u32 %v1565_v3, 7  ;;  %v1486_v12 = vrot.slane %v7629_v9, 4  ;;  %v1488_v3 = vrot.slane %v7630_v14, 3  ;;  %v5254_v31 = vld [vmem:[#allocation6 + $0x1] sm:$0x1]  ;;  %v7633_v24 = vld [vmem:[#allocation71_spill] sm:$0xff] }
 0x132   :  { %4631 = vmatprep.subr.bf16.mxu0 %v4630_v7  ;;  %v1490_v15 = vrot.slane %v7631_v63, 2  ;;  %v7634_v32 = vld [vmem:[#allocation30_spill] sm:$0xff]  ;;  %v7637_v9 = vld [vmem:[#allocation32_spill] sm:$0xff]  ;;  %v7638_v13 = vld [vmem:[#allocation33_spill] sm:$0xff] }
 0x133   :  { %4597 = vmatpush1.bf16.msra.mxu1 %v4596_v20  ;;  %4633 = vmatpush3.bf16.msra.mxu0 %v4632_v8  ;;  %v7610_v20 = vld [vmem:[#allocation35_spill] sm:$0xff] }
 0x134   :  { %4599 = vmatprep.subr.bf16.mxu1 %v4598_v35  ;;  %v1438_v50 = vrot.slane %v7610_v20, 5  ;;  %v1467_v35 = vrot.slane %v7621_v5, 2  ;;  %v7623_v20 = vld [vmem:[#allocation28_spill] sm:$0xff]  ;;  %v1492_v5 = vrot.slane %v7633_v24, 1  ;;  %v7641_v24 = vld [vmem:[#allocation34_spill] sm:$0xff] }
 0x136   :  { %v1439_v27 = vsel %vm856_vm10, %v1438_v50, %v1437_v42  ;;  %v1468_v8 = vsel %vm865_vm13, %v1467_v35, %v1466_v60  ;;  %v7524_v42 = vsub.s32 0, %v6460_v16  ;;  %v1135_v50 = vrot.slane %v7623_v20, 7 }
 0x137   :  { %4601 = vmatpush1.bf16.msra.mxu1 %v4600_v47  ;;  %v1441_v30 = vsel %vm859_vm11, %v1440_v28, %v1439_v27  ;;  %v5248_v47 = vld [vmem:[#allocation6 + $0x18] sm:$0x1]  ;;  %v6463_v46 = vsel %vm868_vm14, %v1469_v45, %v1468_v8  ;;  %v951_v28 = vrot.slane %v5250_v17, 7 }
 0x138   :  { %4635 = vmatprep.subr.bf16.mxu1 %v6425_v34  ;;  %v1443_v56 = vsel %vm862_vm12, %v1442_v48, %v1441_v30  ;;  %v932_v7 = vrot.slane %v5248_v47, 5  ;;  %v1480_v48 = vrot.slane %v7624_v61, 7  ;;  %v7626_v30 = vld [vmem:[#allocation67_spill] sm:$0xff]  ;;  %v1136_v4 = vsel %vm850_vm8, %v1135_v50, %v7632_v1 }
 0x139   :  { %v1445_v26 = vsel %vm865_vm13, %v1444_v59, %v1443_v56  ;;  %v5251_v59 = vld [vmem:[#allocation6 + $0x28] sm:$0x1]  ;;  %v1484_v56 = vrot.slane %v7626_v30, 5  ;;  %v952_v0 = vsel %vm850_vm8, %v951_v28, %v5254_v31  ;;  %v6494_v45 = vrot.slane %v6479_v55, %v7524_v42  ;;  %v5256_v8 = vld [vmem:[#allocation6 + $0x38] sm:$0x1]  ;;  %v7640_v31 = vld [vmem:[#allocation82_spill] sm:$0xff] }
 0x13a   :  { %v6442_v40 = vsel %vm868_vm14, %v1446_v18, %v1445_v26  ;;  %v933_v21 = vsel %vm856_vm10, %v932_v7, %v931_v57  ;;  %v936_v27 = vrot.slane %v5251_v59, 3  ;;  %v1482_v18 = vrot.slane %v7625_v43, 6  ;;  %v5252_v26 = vld [vmem:[#allocation6 + $0x30] sm:$0x1]  ;;  %v5255_v7 = vld [vmem:[#allocation6 + $0x19] sm:$0x1] }
 0x13b   :  { %v935_v22 = vsel %vm859_vm11, %v934_v33, %v933_v21  ;;  %v938_v53 = vrot.slane %v5252_v26, 2  ;;  %v1481_v11 = vsel %vm850_vm8, %v1480_v48, %v7628_v49  ;;  %v1139_v47 = vrot.slane %v7634_v32, 5  ;;  %v7635_v61 = vld [vmem:[#allocation31_spill] sm:$0xff]  ;;  %v7636_v49 = vld [vmem:[#allocation41_spill] sm:$0xff]  ;;  %v7642_v32 = vld [vmem:[#allocation42_spill] sm:$0xff] }
 0x13c   :  { %v1483_v58 = vsel %vm853_vm9, %v1482_v18, %v1481_v11  ;;  %v937_v35 = vsel %vm862_vm12, %v936_v27, %v935_v22  ;;  %v955_v60 = vrot.slane %v5255_v7, 5  ;;  %v940_v41 = vrot.slane %v5256_v8, 1  ;;  %v5257_v22 = vld [vmem:[#allocation6 + $0x21] sm:$0x1] }
 0x13d   :  { %v1485_v38 = vsel %vm856_vm10, %v1484_v56, %v1483_v58  ;;  %v1138_v33 = vsel %vm853_vm9, %v1137_v10, %v1136_v4  ;;  %v954_v21 = vsel %vm853_vm9, %v953_v2, %v952_v0  ;;  %v939_v50 = vsel %vm865_vm13, %v938_v53, %v937_v35  ;;  %v5258_v58 = vld [vmem:[#allocation6 + $0x29] sm:$0x1]  ;;  %v5259_v35 = vld [vmem:[#allocation6 + $0x31] sm:$0x1]  ;;  %v7643_v7 = vld [vmem:[#allocation80_spill] sm:$0xff] }
 0x13e   :  { %v1487_v19 = vsel %vm859_vm11, %v1486_v12, %v1485_v38  ;;  %v1549_v28 = vrot.slane %v6346_v25, 7  ;;  %v1141_v48 = vrot.slane %v7635_v61, 4  ;;  %v957_v59 = vrot.slane %v5257_v22, 4 }
 0x13f   :  { %v1489_v57 = vsel %vm862_vm12, %v1488_v3, %v1487_v19  ;;  %v1551_v27 = vrot.slane %v6350_v36, 6  ;;  %v1553_v43 = vrot.slane %v6354_v37, 5  ;;  %v1140_v30 = vsel %vm856_vm10, %v1139_v47, %v1138_v33  ;;  %v7639_v3 = vld [vmem:[#allocation81_spill] sm:$0xff]  ;;  %v7645_v33 = vld [vmem:[#allocation40_spill] sm:$0xff] }
 0x140   :  { %v1491_v20 = vsel %vm865_vm13, %v1490_v15, %v1489_v57  ;;  %v956_v56 = vsel %vm856_vm10, %v955_v60, %v954_v21  ;;  %v1555_v26 = vrot.slane %v6358_v23, 4  ;;  %v6516_v10 = vsel %vm868_vm14, %v940_v41, %v939_v50 }
 0x141   :  { %v6503_v17 = vsel %vm868_vm14, %v1492_v5, %v1491_v20  ;;  %v1158_v11 = vrot.slane %v7636_v49, 7  ;;  %v1143_v12 = vrot.slane %v7637_v9, 3  ;;  %v1145_v2 = vrot.slane %v7638_v13, 2  ;;  %v7648_v9 = vld [vmem:[#allocation84_spill] sm:$0xff] }
 0x142   :  { %v959_v14 = vrot.slane %v5258_v58, 3  ;;  %v1503_v63 = vrot.slane %v7639_v3, 7  ;;  %v1142_v1 = vsel %vm859_vm11, %v1141_v48, %v1140_v30  ;;  %v958_v4 = vsel %vm859_vm11, %v957_v59, %v956_v56  ;;  %v5260_v48 = vld [vmem:[#allocation6 + $0x39] sm:$0x1]  ;;  %v5261_v3 = vld [vmem:[#allocation6 + $0xa] sm:$0x1] }
 0x143   :  { %v1505_v0 = vrot.slane %v7640_v31, 6  ;;  %v1147_v5 = vrot.slane %v7641_v24, 1  ;;  %v961_v19 = vrot.slane %v5259_v35, 2  ;;  %v1160_v47 = vrot.slane %v7642_v32, 6  ;;  %v7646_v59 = vld [vmem:[#allocation83_spill] sm:$0xff] }
 0x144   :  { %v1504_v60 = vsel %vm850_vm8, %v1503_v63, %v7643_v7  ;;  %v1159_v21 = vsel %vm850_vm8, %v1158_v11, %v7645_v33  ;;  %v1144_v50 = vsel %vm862_vm12, %v1143_v12, %v1142_v1  ;;  %v960_v61 = vsel %vm862_vm12, %v959_v14, %v958_v4  ;;  %v7650_v4 = vld [vmem:[#allocation86_spill] sm:$0xff]  ;;  %v7651_v35 = vld [vmem:[#allocation87_spill] sm:$0xff] }
 0x145   :  { %v1506_v20 = vsel %vm853_vm9, %v1505_v0, %v1504_v60  ;;  %v963_v22 = vrot.slane %v5260_v48, 1  ;;  %v1509_v13 = vrot.slane %v7648_v9, 4  ;;  %v1161_v58 = vsel %vm853_vm9, %v1160_v47, %v1159_v21  ;;  %v266_v7 = vld [vmem:[#allocation15] sm:$0xff]  ;;  %v268_v60 = vld [vmem:[#allocation15 + $0x10] sm:$0xff] }
 0x146   :  { %v974_v11 = vrot.slane %v5261_v3, 7  ;;  %v1513_v31 = vrot.slane %v7650_v4, 2  ;;  %v1146_v0 = vsel %vm865_vm13, %v1145_v2, %v1144_v50  ;;  %v1515_v32 = vrot.slane %v7651_v35, 1  ;;  %v5262_v33 = vld [vmem:[#allocation6 + $0x12] sm:$0x1]  ;;  %v272_v9 = vld [vmem:[#allocation15 + $0x30] sm:$0xff] }
 0x147   :  { %v976_v21 = vrot.slane %v5262_v33, 6  ;;  %v1760_v48 = vsub.f32 1.0, %v6417_v6  ;;  %v277_v35 = vld [vmem:[#allocation15 + $0x58] sm:$0xff]  ;;  %v5265_v33 = vld [vmem:[#allocation6 + $0x22] sm:$0x1] }
 0x175   :  { %v1641_v18 = vpop.f32.mrb[0].mxu0 }
 0x176   :  { %v1642_v53 = vadd.f32 %v1641_v18, %v6494_v45  ;;  %v6513_v54 = vpop.f32.mrb[1].mxu0  ;;  %v1507_v18 = vrot.slane %v7646_v59, 5  ;;  %v271_v59 = vld [vmem:[#allocation15 + $0x28] sm:$0xff] }
 0x178   :  { %v1688_v15 = vmax.f32 %v1642_v53, 0.0  ;;  %v7647_v53 = vld [vmem:[#allocation43_spill] sm:$0xff]  ;;  %v1508_v63 = vsel %vm856_vm10, %v1507_v18, %v1506_v20  ;;  %v273_v18 = vld [vmem:[#allocation15 + $0x38] sm:$0xff] }
 0x179   :  { %v1647_v38 = vpop.f32.mrb[2].mxu0  ;;  %v1162_v49 = vrot.slane %v7647_v53, 5  ;;  %v1510_v1 = vsel %vm859_vm11, %v1509_v13, %v1508_v63  ;;  %v270_v53 = vld [vmem:[#allocation15 + $0x20] sm:$0xff]  ;;  %v7653_v13 = vld [vmem:[#allocation57_spill] sm:$0xff] }
 0x17a   :  { %v1704_v57 = vsub.f32 0.0, %v1688_v15  ;;  %v1648_v8 = vadd.f32 %v1647_v38, %v6494_v45  ;;  %v6530_v41 = vpop.f32.mrb[3].mxu0  ;;  %v7649_v15 = vld [vmem:[#allocation85_spill] sm:$0xff]  ;;  %v962_v38 = vsel %vm865_vm13, %v961_v19, %v960_v61  ;;  %v5263_v19 = vld [vmem:[#allocation6 + $0x2] sm:$0x1]  ;;  %v1181_v3 = vrot.slane %v7653_v13, 7 }
 0x17b   :  { %7644 = vst [vmem:[#allocation35_spill] sm:$0xff] %v6530_v41  ;;  %v1511_v12 = vrot.slane %v7649_v15, 3  ;;  %v1163_v2 = vsel %vm856_vm10, %v1162_v49, %v1161_v58  ;;  %v975_v50 = vsel %vm850_vm8, %v974_v11, %v5263_v19  ;;  %v6564_v49 = vmul.f32 %v6417_v6, %v6516_v10  ;;  %v7654_v11 = vld [vmem:[#allocation45_spill] sm:$0xff] }
 0x17c   :  { %v1720_v30 = vmul.f32 1.442695, %v1704_v57  ;;  %v1690_v56 = vmax.f32 %v1648_v8, 0.0  ;;  %v7652_v57 = vld [vmem:[#allocation44_spill] sm:$0xff]  ;;  %v6566_v58 = vpack.c.bf16 %v268_v60, %v266_v7  ;;  %v1166_v15 = vrot.slane %v7654_v11, 3  ;;  %v7657_v60 = vld [vmem:[#allocation46_spill] sm:$0xff] }
 0x17d   :  { %v1512_v24 = vsel %vm862_vm12, %v1511_v12, %v1510_v1  ;;  %v1164_v8 = vrot.slane %v7652_v57, 4  ;;  %v5264_v12 = vld [vmem:[#allocation6 + $0x1a] sm:$0x1]  ;;  %v1168_v57 = vrot.slane %v7657_v60, 2  ;;  %v6589_v13 = vld [vmem:[#allocation11] sm:$0xff] }
 0x17e   :  { %5133 = vpow2.f32 %v1720_v30  ;;  %v1706_v14 = vsub.f32 0.0, %v1690_v56  ;;  %v1514_v20 = vsel %vm865_vm13, %v1513_v31, %v1512_v24  ;;  %v6558_v30 = vsel %vm868_vm14, %v1147_v5, %v1146_v0  ;;  %v275_v24 = vld [vmem:[#allocation15 + $0x48] sm:$0xff]  ;;  %v5267_v11 = vld [vmem:[#allocation6 + $0x2a] sm:$0x1] }
 0x17f   :  { %v6555_v61 = vsel %vm868_vm14, %v1515_v32, %v1514_v20  ;;  %v964_v56 = vsel %vm868_vm14, %v963_v22, %v962_v38  ;;  %v6572_v22 = vpack.c.bf16 %v273_v18, %v271_v59  ;;  %v1165_v4 = vsel %vm859_vm11, %v1164_v8, %v1163_v2  ;;  %v7656_v32 = vld [vmem:[#allocation58_spill] sm:$0xff]  ;;  %v7658_v59 = vld [vmem:[#allocation56_spill] sm:$0xff]  ;;  %v7659_v18 = vld [vmem:[#allocation47_spill] sm:$0xff] }
 0x180   :  { %v1724_v47 = vmul.f32 1.442695, %v1706_v14  ;;  %v978_v14 = vrot.slane %v5264_v12, 5  ;;  %v977_v31 = vsel %vm853_vm9, %v976_v21, %v975_v50  ;;  %v1761_v0 = vsub.f32 1.0, %v6558_v30  ;;  %v5266_v50 = vld [vmem:[#allocation6 + $0xb] sm:$0x1] }
 0x181   :  { %v6578_v10 = vmul.f32 %v6558_v30, %v964_v56  ;;  %v6580_v38 = vpack.c.bf16 %v272_v9, %v270_v53  ;;  %v980_v20 = vrot.slane %v5265_v33, 4  ;;  %v1182_v8 = vsel %vm850_vm8, %v1181_v3, %v7658_v59 }
 0x182   :  { %5135 = vpow2.f32 %v1724_v47  ;;  %v1183_v47 = vrot.slane %v7656_v32, 6  ;;  %v1167_v21 = vsel %vm862_vm12, %v1166_v15, %v1165_v4  ;;  %v1170_v2 = vrot.slane %v7659_v18, 1  ;;  %v6595_v15 = vld [vmem:[#allocation6 + $0x32] sm:$0x1] }
 0x183   :  { %v979_v19 = vsel %vm856_vm10, %v978_v14, %v977_v31  ;;  %v997_v56 = vrot.slane %v5266_v50, 7  ;;  %v982_v12 = vrot.slane %v5267_v11, 3  ;;  %v984_v4 = vrot.slane %v6595_v15, 2  ;;  %v7661_v50 = vld [vmem:[#allocation60_spill] sm:$0xff] }
 0x184   :  { %v1653_v63 = vpop.f32.mrb[4].mxu0  ;;  %v1184_v14 = vsel %vm853_vm9, %v1183_v47, %v1182_v8  ;;  %v981_v33 = vsel %vm859_vm11, %v980_v20, %v979_v19  ;;  %v1187_v11 = vrot.slane %v7661_v50, 4  ;;  %v1528_v8 = vrot.slane %v6269_v44, 6 }
 0x185   :  { %v1654_v5 = vadd.f32 %v1653_v63, %v6494_v45  ;;  %v6570_v1 = vpop.f32.mrb[5].mxu0  ;;  %v6591_v63 = vpack.c.bf16 %v277_v35, %v275_v24  ;;  %v5269_v24 = vld [vmem:[#allocation6 + $0x13] sm:$0x1] }
 0x186   :  { %7655 = vst [vmem:[#allocation36_spill] sm:$0xff] %v6570_v1  ;;  %v999_v35 = vrot.slane %v5269_v24, 6 }
 0x187   :  { %v1692_v7 = vmax.f32 %v1654_v5, 0.0  ;;  %v7660_v5 = vld [vmem:[#allocation59_spill] sm:$0xff] }
 0x188   :  { %v5134_v53 = vpop.eup %5133  ;;  %v1185_v32 = vrot.slane %v7660_v5, 5  ;;  %v5270_v5 = vld [vmem:[#allocation6 + $0x3] sm:$0x1] }
 0x189   :  { %v1708_v9 = vsub.f32 0.0, %v1692_v7  ;;  %v1768_v3 = vmul.f32 %v5134_v53, %v6422_v62  ;;  %v1776_v60 = vsub.f32 1.0, %v5134_v53  ;;  %v1169_v7 = vsel %vm865_vm13, %v1168_v57, %v1167_v21 }
 0x18a   :  { %v998_v62 = vsel %vm850_vm8, %v997_v56, %v5270_v5  ;;  %v1526_v53 = vrot.slane %v6265_v29, 7  ;;  %v1186_v47 = vsel %vm856_vm10, %v1185_v32, %v1184_v14  ;;  %v1530_v57 = vrot.slane %v6274_v39, 5 }
 0x18b   :  { %v1728_v31 = vmul.f32 1.442695, %v1708_v9  ;;  %v1784_v59 = vmul.f32 %v1776_v60, %v6589_v13  ;;  %v5271_v9 = vld [vmem:[#allocation6 + $0x1b] sm:$0x1]  ;;  %v1000_v24 = vsel %vm853_vm9, %v999_v35, %v998_v62  ;;  %v1532_v29 = vrot.slane %v6278_v51, 4 }
 0x18c   :  { %v5136_v42 = vpop.eup %5135  ;;  %v1001_v60 = vrot.slane %v5271_v9, 5  ;;  %v1527_v56 = vsel %vm850_vm8, %v1526_v53, %v6261_v52  ;;  %v7665_v52 = vld [vmem:[#allocation98_spill] sm:$0xff]  ;;  %v1188_v9 = vsel %vm859_vm11, %v1187_v11, %v1186_v47 }
 0x18d   :  { %5137 = vpow2.f32 %v1728_v31  ;;  %v1792_v20 = vadd.f32 %v1784_v59, %v1768_v3  ;;  %v1769_v21 = vmul.f32 %v5136_v42, %v6442_v40  ;;  %v1777_v19 = vsub.f32 1.0, %v5136_v42  ;;  %v7662_v31 = vld [vmem:[#allocation96_spill] sm:$0xff]  ;;  %v7663_v40 = vld [vmem:[#allocation97_spill] sm:$0xff] }
 0x18e   :  { %v1534_v50 = vrot.slane %v7662_v31, 3  ;;  %v1529_v32 = vsel %vm853_vm9, %v1528_v8, %v1527_v56  ;;  %v1536_v42 = vrot.slane %v7663_v40, 2  ;;  %v7664_v3 = vld [vmem:[#allocation61_spill] sm:$0xff]  ;;  %v5272_v59 = vld [vmem:[#allocation6 + $0x23] sm:$0x1]  ;;  %v1538_v62 = vrot.slane %v7665_v52, 1 }
 0x18f   :  { %v1800_v44 = vmul.f32 %v1792_v20, %v1760_v48  ;;  %v1785_v39 = vmul.f32 %v1777_v19, %v6589_v13  ;;  %v1189_v14 = vrot.slane %v7664_v3, 3  ;;  %v1003_v35 = vrot.slane %v5272_v59, 4  ;;  %v5273_v8 = vld [vmem:[#allocation6 + $0x3a] sm:$0x1] }
 0x190   :  { %v1531_v5 = vsel %vm856_vm10, %v1530_v57, %v1529_v32  ;;  %v1002_v6 = vsel %vm856_vm10, %v1001_v60, %v1000_v24  ;;  %v983_v20 = vsel %vm862_vm12, %v982_v12, %v981_v33  ;;  %v986_v19 = vrot.slane %v5273_v8, 1  ;;  %v276_v60 = vld [vmem:[#allocation15 + $0x50] sm:$0xff]  ;;  %v5274_v12 = vld [vmem:[#allocation6 + $0x2b] sm:$0x1] }
 0x191   :  { %v1808_v51 = vadd.f32 %v1800_v44, %v6564_v49  ;;  %v1793_v53 = vadd.f32 %v1785_v39, %v1769_v21  ;;  %v1533_v48 = vsel %vm859_vm11, %v1532_v29, %v1531_v5  ;;  %v6633_v49 = vsel %vm868_vm14, %v1170_v2, %v1169_v7  ;;  %v274_v21 = vld [vmem:[#allocation15 + $0x40] sm:$0xff]  ;;  %v7668_v39 = vld [vmem:[#allocation73_spill] sm:$0xff] }
 0x192   :  { %v1535_v56 = vsel %vm862_vm12, %v1534_v50, %v1533_v48  ;;  %v1005_v33 = vrot.slane %v5274_v12, 3  ;;  %v1004_v18 = vsel %vm859_vm11, %v1003_v35, %v1002_v6  ;;  %v985_v50 = vsel %vm865_vm13, %v984_v4, %v983_v20  ;;  %v279_v35 = vld [vmem:[#allocation15 + $0x68] sm:$0xff]  ;;  %v5275_v5 = vld [vmem:[#allocation6 + $0x33] sm:$0x1] }
 0x193   :  { %1897 = vmatmul.mubr.f32.vlgmr.msra.gmra.mrb[0].mxu1 %v1808_v51  ;;  %2010 = vmatmul.mubr.f32.vlgmr.msra.gmra.mrb[16].mxu0 %v1808_v51  ;;  %v1801_v57 = vmul.f32 %v1793_v53, %v1761_v0  ;;  %v1537_v24 = vsel %vm865_vm13, %v1536_v42, %v1535_v56  ;;  %v7667_v0 = vld [vmem:[#allocation62_spill] sm:$0xff]  ;;  %v1190_v44 = vsel %vm862_vm12, %v1189_v14, %v1188_v9  ;;  %v1204_v32 = vrot.slane %v7668_v39, 7  ;;  %v7669_v4 = vld [vmem:[#allocation63_spill] sm:$0xff] }
 0x194   :  { %v1659_v31 = vpop.f32.mrb[6].mxu0  ;;  %4637 = vmatpush1.bf16.msra.mxu1 %v6566_v58  ;;  %1902 = vmatprep.mubr.f32.mxu1 %v6558_v30  ;;  %v1191_v29 = vrot.slane %v7667_v0, 2  ;;  %v6644_v2 = vsel %vm868_vm14, %v1538_v62, %v1537_v24  ;;  %v1762_v3 = vsub.f32 1.0, %v6633_v49  ;;  %v6655_v59 = vpack.c.bf16 %v276_v60, %v274_v21  ;;  %v7670_v48 = vld [vmem:[#allocation74_spill] sm:$0xff]  ;;  %v5276_v9 = vld [vmem:[#allocation6 + $0x3b] sm:$0x1] }
 0x195   :  { %v1660_v11 = vadd.f32 %v1659_v31, %v6494_v45  ;;  %v6637_v47 = vpop.f32.mrb[7].mxu0  ;;  %2014 = vmatprep.mubr.f32.mxu0 %v6558_v30  ;;  %4639 = vmatprep.subr.bf16.mxu1 %v6572_v22  ;;  %v1809_v7 = vadd.f32 %v1801_v57, %v6578_v10  ;;  %v281_v30 = vld [vmem:[#allocation15 + $0x78] sm:$0xff]  ;;  %v1007_v52 = vrot.slane %v5275_v5, 2  ;;  %v1193_v62 = vrot.slane %v7669_v4, 1  ;;  %v278_v31 = vld [vmem:[#allocation15 + $0x60] sm:$0xff]  ;;  %v280_v57 = vld [vmem:[#allocation15 + $0x70] sm:$0xff] }
 0x196   :  { %7666 = vst [vmem:[#allocation37_spill] sm:$0xff] %v6637_v47  ;;  %v1006_v14 = vsel %vm862_vm12, %v1005_v33, %v1004_v18  ;;  %v987_v53 = vsel %vm868_vm14, %v986_v19, %v985_v50  ;;  %v1192_v6 = vsel %vm865_vm13, %v1191_v29, %v1190_v44  ;;  %v1206_v20 = vrot.slane %v7670_v48, 6  ;;  %v7671_v21 = vld [vmem:[#allocation72_spill] sm:$0xff]  ;;  %v7673_v33 = vld [vmem:[#allocation109_spill] sm:$0xff]  ;;  %v7674_v50 = vld [vmem:[#allocation75_spill] sm:$0xff] }
 0x197   :  { %v5138_v40 = vpop.eup %5137  ;;  %v1694_v42 = vmax.f32 %v1660_v11, 0.0  ;;  %1903 = vmatmul.mubr.f32.gmra.mrb[2].mxu1 %v1809_v7  ;;  %2015 = vmatmul.mubr.f32.gmra.mrb[18].mxu0 %v1809_v7  ;;  %v6668_v8 = vpack.c.bf16 %v281_v30, %v279_v35  ;;  %v1009_v56 = vrot.slane %v5276_v9, 1  ;;  %v1205_v60 = vsel %vm850_vm8, %v1204_v32, %v7671_v21  ;;  %v7672_v19 = vld [vmem:[#allocation108_spill] sm:$0xff]  ;;  %v283_v39 = vld [vmem:[#allocation15 + $0x88] sm:$0xff]  ;;  %v5277_v35 = vld [vmem:[#allocation6 + $0xc] sm:$0x1] }
 0x198   :  { %v1770_v10 = vmul.f32 %v5138_v40, %v6463_v46  ;;  %v1778_v15 = vsub.f32 1.0, %v5138_v40  ;;  %4641 = vmatpush1.bf16.msra.mxu1 %v6580_v38  ;;  %1908 = vmatprep.mubr.f32.mxu1 %v6633_v49  ;;  %v1557_v12 = vrot.slane %v7672_v19, 3  ;;  %v1559_v24 = vrot.slane %v7673_v33, 2  ;;  %v285_v40 = vld [vmem:[#allocation15 + $0x98] sm:$0xff]  ;;  %v7675_v5 = vld [vmem:[#allocation110_spill] sm:$0xff]  ;;  %v284_v4 = vld [vmem:[#allocation15 + $0x90] sm:$0xff] }
 0x199   :  { %v1710_v51 = vsub.f32 0.0, %v1694_v42  ;;  %2019 = vmatprep.mubr.f32.mxu0 %v6633_v49  ;;  %4643 = vmatprep.subr.bf16.mxu1 %v6591_v63  ;;  %v1008_v0 = vsel %vm865_vm13, %v1007_v52, %v1006_v14  ;;  %v1754_v29 = vmul.f32 %v6633_v49, %v987_v53  ;;  %v6677_v7 = vsel %vm868_vm14, %v1193_v62, %v1192_v6  ;;  %v7676_v62 = vld [vmem:[#allocation107_spill] sm:$0xff]  ;;  %v7677_v53 = vld [vmem:[#allocation76_spill] sm:$0xff] }
 0x19a   :  { %v1786_v46 = vmul.f32 %v1778_v15, %v6589_v13  ;;  %v1208_v44 = vrot.slane %v7674_v50, 5  ;;  %v6681_v32 = vpack.c.bf16 %v280_v57, %v278_v31  ;;  %v1207_v42 = vsel %vm853_vm9, %v1206_v20, %v1205_v60  ;;  %v282_v15 = vld [vmem:[#allocation15 + $0x80] sm:$0xff]  ;;  %v287_v20 = vld [vmem:[#allocation15 + $0xa8] sm:$0xff]  ;;  %v5279_v60 = vld [vmem:[#allocation6 + $0x4] sm:$0x1] }
 0x19b   :  { %v1732_v11 = vmul.f32 1.442695, %v1710_v51  ;;  %v1020_v30 = vrot.slane %v5277_v35, 7  ;;  %v1561_v52 = vrot.slane %v7675_v5, 1  ;;  %v1550_v14 = vsel %vm850_vm8, %v1549_v28, %v7676_v62  ;;  %v5278_v31 = vld [vmem:[#allocation6 + $0x14] sm:$0x1] }
 0x19c   :  { %v1794_v18 = vadd.f32 %v1786_v46, %v1770_v10  ;;  %4645 = vmatpush1.bf16.msra.mxu1 %v6655_v59  ;;  %v1010_v10 = vsel %vm868_vm14, %v1009_v56, %v1008_v0  ;;  %v1210_v6 = vrot.slane %v7677_v53, 4  ;;  %v6693_v48 = vpack.c.bf16 %v285_v40, %v283_v39  ;;  %v289_v46 = vld [vmem:[#allocation15 + $0xb8] sm:$0xff]  ;;  %v288_v35 = vld [vmem:[#allocation15 + $0xb0] sm:$0xff] }
 0x19d   :  { %5139 = vpow2.f32 %v1732_v11  ;;  %4647 = vmatprep.subr.bf16.mxu1 %v6668_v8  ;;  %v1209_v56 = vsel %vm856_vm10, %v1208_v44, %v1207_v42  ;;  %v1022_v57 = vrot.slane %v5278_v31, 6  ;;  %v6703_v21 = vmul.f32 %v6677_v7, %v1010_v10  ;;  %v7679_v44 = vld [vmem:[#allocation78_spill] sm:$0xff]  ;;  %v297_v51 = vld [vmem:[#allocation15 + $0xf8] sm:$0xff] }
 0x19e   :  { %v1802_v49 = vmul.f32 %v1794_v18, %v1762_v3  ;;  %v1552_v3 = vsel %vm853_vm9, %v1551_v27, %v1550_v14  ;;  %v1021_v11 = vsel %vm850_vm8, %v1020_v30, %v5279_v60  ;;  %v6707_v0 = vpack.c.bf16 %v284_v4, %v282_v15  ;;  %v6714_v18 = vld [vmem:[#allocation6 + $0x17] sm:$0x1]  ;;  %v291_v30 = vld [vmem:[#allocation15 + $0xc8] sm:$0xff] }
 0x19f   :  { %v1554_v28 = vsel %vm856_vm10, %v1553_v43, %v1552_v3  ;;  %v7678_v43 = vld [vmem:[#allocation77_spill] sm:$0xff]  ;;  %v1214_v39 = vrot.slane %v7679_v44, 2  ;;  %v6718_v40 = vpack.c.bf16 %v289_v46, %v287_v20  ;;  %v286_v42 = vld [vmem:[#allocation15 + $0xa0] sm:$0xff]  ;;  %v7680_v15 = vld [vmem:[#allocation79_spill] sm:$0xff]  ;;  %vm811_vm3 = vcmp.ne.f32.partialorder %v6714_v18, 0.0 }
 0x1a0   :  { %v1810_v9 = vadd.f32 %v1802_v49, %v1754_v29  ;;  %4649 = vmatpush1.bf16.msra.mxu1 %v6681_v32  ;;  %v1556_v27 = vsel %vm859_vm11, %v1555_v26, %v1554_v28  ;;  %v6712_v29 = vld [vmem:[#allocation6 + $0xf] sm:$0x1]  ;;  %v1212_v50 = vrot.slane %v7678_v43, 3  ;;  %v1211_v26 = vsel %vm859_vm11, %v1210_v6, %v1209_v56  ;;  %v5280_v14 = vld [vmem:[#allocation6 + $0x1c] sm:$0x1] }
 0x1a1   :  { %v1558_v49 = vsel %vm862_vm12, %v1557_v12, %v1556_v27  ;;  %v1024_v53 = vrot.slane %v5280_v14, 5  ;;  %v293_v3 = vld [vmem:[#allocation15 + $0xd8] sm:$0xff]  ;;  %v6726_v46 = vld [vmem:[#allocation6 + $0x7] sm:$0x1]  ;;  %4651 = vmatprep.subr.bf16.mxu1 %v6693_v48  ;;  %v1023_v12 = vsel %vm853_vm9, %v1022_v57, %v1021_v11  ;;  %v5281_v28 = vld [vmem:[#allocation6 + $0x24] sm:$0x1]  ;;  %v6747_v57 = vpack.c.bf16 %v288_v35, %v286_v42 }
 0x1a2   :  { %1909 = vmatmul.mubr.f32.gmra.mrb[4].mxu1 %v1810_v9  ;;  %2020 = vmatmul.mubr.f32.gmra.mrb[20].mxu0 %v1810_v9  ;;  %v1560_v20 = vsel %vm865_vm13, %v1559_v24, %v1558_v49  ;;  %v1026_v60 = vrot.slane %v5281_v28, 4  ;;  %v6736_v56 = vld [vmem:[#allocation6 + $0x1f] sm:$0x1]  ;;  %v6738_v27 = vld [vmem:[#allocation6 + $0x27] sm:$0x1]  ;;  %vm810_vm2 = vcmp.ne.f32.partialorder %v6712_v29, 0.0  ;;  %v1213_v11 = vsel %vm862_vm12, %v1212_v50, %v1211_v26 }
 0x1a3   :  { %1914 = vmatprep.mubr.f32.mxu1 %v6677_v7  ;;  %2024 = vmatprep.mubr.f32.mxu0 %v6677_v7  ;;  %v6734_v6 = vsel %vm868_vm14, %v1561_v52, %v1560_v20  ;;  %v6740_v24 = vld [vmem:[#allocation6 + $0x2c] sm:$0x1]  ;;  %v6743_v49 = vld [vmem:[#allocation6 + $0x34] sm:$0x1]  ;;  %v6752_v14 = vpack.c.bf16 %v293_v3, %v291_v30  ;;  %v292_v28 = vld [vmem:[#allocation15 + $0xd0] sm:$0xff]  ;;  %v1025_v4 = vsel %vm856_vm10, %v1024_v53, %v1023_v12  ;;  %vm809_vm4 = vcmp.ne.f32.partialorder %v6726_v46, 0.0 }
 0x1a4   :  { %v1665_v10 = vpop.f32.mrb[8].mxu0  ;;  %4653 = vmatpush1.bf16.msra.mxu1 %v6707_v0  ;;  %v290_v20 = vld [vmem:[#allocation15 + $0xc0] sm:$0xff]  ;;  %v6754_v43 = vld [vmem:[#allocation6 + $0x2f] sm:$0x1]  ;;  %vm812_vm5 = vcmp.ne.f32.partialorder %v6736_v56, 0.0  ;;  %vm813_vm6 = vcmp.ne.f32.partialorder %v6738_v27, 0.0  ;;  %v834_v3 = vsel %vm810_vm2, %v6712_v29, %v6346_v25 }
 0x1a5   :  { %v1666_v9 = vadd.f32 %v1665_v10, %v6494_v45  ;;  %v6729_v31 = vpop.f32.mrb[9].mxu0  ;;  %4655 = vmatprep.subr.bf16.mxu1 %v6718_v40  ;;  %v6758_v42 = vld [vmem:[#allocation6 + $0x37] sm:$0x1]  ;;  %v6764_v26 = vld [vmem:[#allocation6 + $0x3f] sm:$0x1]  ;;  %v7682_v53 = vld [vmem:[#allocation89_spill] sm:$0xff]  ;;  %v6772_v12 = vpack.c.bf16 %v292_v28, %v290_v20  ;;  %v836_v25 = vsel %vm812_vm5, %v6736_v56, %v6354_v37  ;;  %v833_v20 = vsel %vm809_vm4, %v6726_v46, %v7676_v62 }
 0x1a6   :  { %7681 = vst [vmem:[#allocation38_spill] sm:$0xff] %v6729_v31  ;;  %vm814_vm7 = vcmp.ne.f32.partialorder %v6754_v43, 0.0  ;;  %vm815_vm15 = vcmp.ne.f32.partialorder %v6758_v42, 0.0  ;;  %vm816_vm0 = vcmp.ne.f32.partialorder %v6764_v26, 0.0  ;;  %v880_v28 = vrot.slane %v834_v3, 7 }
 0x1a7   :  { %v1696_v52 = vmax.f32 %v1666_v9, 0.0  ;;  %v5140_v10 = vpop.eup %5139  ;;  %v1227_v9 = vrot.slane %v7682_v53, 7  ;;  %v838_v37 = vsel %vm814_vm7, %v6754_v43, %v7672_v19  ;;  %v295_v53 = vld [vmem:[#allocation15 + $0xe8] sm:$0xff]  ;;  %v1215_v62 = vsel %vm865_vm13, %v1214_v39, %v1213_v11 }
 0x1a8   :  { %v1771_v35 = vmul.f32 %v5140_v10, %v6503_v17  ;;  %v1779_v30 = vsub.f32 1.0, %v5140_v10  ;;  %4657 = vmatpush1.bf16.msra.mxu1 %v6747_v57  ;;  %v835_v17 = vsel %vm811_vm3, %v6714_v18, %v6350_v36  ;;  %v837_v36 = vsel %vm813_vm6, %v6738_v27, %v6358_v23 }
 0x1a9   :  { %v1712_v50 = vsub.f32 0.0, %v1696_v52  ;;  %4659 = vmatprep.subr.bf16.mxu1 %v6752_v14  ;;  %v1027_v31 = vsel %vm859_vm11, %v1026_v60, %v1025_v4  ;;  %v839_v23 = vsel %vm815_vm15, %v6758_v42, %v7673_v33  ;;  %v7683_v3 = vsub.f32 1.0, %v6677_v7  ;;  %v7685_v4 = vld [vmem:[#allocation88_spill] sm:$0xff]  ;;  %v5284_v7 = vld [vmem:[#allocation6 + $0xd] sm:$0x1] }
 0x1aa   :  { %v1787_v52 = vmul.f32 %v1779_v30, %v6589_v13  ;;  %v882_v30 = vrot.slane %v835_v17, 6  ;;  %v7684_v17 = vld [vmem:[#allocation90_spill] sm:$0xff]  ;;  %v840_v44 = vsel %vm816_vm0, %v6764_v26, %v7675_v5  ;;  %v886_v39 = vrot.slane %v837_v36, 4  ;;  %v7687_v36 = vld [vmem:[#allocation91_spill] sm:$0xff] }
 0x1ab   :  { %v1736_v10 = vmul.f32 1.442695, %v1712_v50  ;;  %v1228_v60 = vsel %vm850_vm8, %v1227_v9, %v7685_v4  ;;  %v888_v11 = vrot.slane %v838_v37, 3  ;;  %v881_v33 = vsel %vm850_vm8, %v880_v28, %v833_v20  ;;  %v296_v4 = vld [vmem:[#allocation15 + $0xf0] sm:$0xff] }
 0x1ac   :  { %v1795_v50 = vadd.f32 %v1787_v52, %v1771_v35  ;;  %4661 = vmatpush1.bf16.msra.mxu1 %v6772_v12  ;;  %v884_v35 = vrot.slane %v836_v25, 5  ;;  %v6817_v52 = vpack.c.bf16 %v297_v51, %v295_v53  ;;  %v7686_v47 = vrot.slane %v7680_v15, 1 }
 0x1ad   :  { %5141 = vpow2.f32 %v1736_v10  ;;  %v1229_v10 = vrot.slane %v7684_v17, 6  ;;  %v883_v17 = vsel %vm853_vm9, %v882_v30, %v881_v33  ;;  %v1231_v1 = vrot.slane %v7687_v36, 5  ;;  %v5286_v30 = vld [vmem:[#allocation6 + $0x15] sm:$0x1]  ;;  %v7691_v36 = vld [vmem:[#allocation93_spill] sm:$0xff] }
 0x1ae   :  { %v1803_v19 = vmul.f32 %v1795_v50, %v7683_v3  ;;  %v1043_v50 = vrot.slane %v5284_v7, 7  ;;  %v890_v3 = vrot.slane %v839_v23, 2  ;;  %v1217_v5 = vsel %vm868_vm14, %v7686_v47, %v1215_v62  ;;  %4663 = vmatprep.subr.bf16.mxu1 %v6817_v52  ;;  %v5285_v47 = vld [vmem:[#allocation6 + $0x3c] sm:$0x1] }
 0x1af   :  { %v892_v41 = vrot.slane %v840_v44, 1  ;;  %v885_v51 = vsel %vm856_vm10, %v884_v35, %v883_v17  ;;  %v1230_v20 = vsel %vm853_vm9, %v1229_v10, %v1228_v60  ;;  %v1032_v37 = vrot.slane %v5285_v47, 1 }
 0x1b0   :  { %v1811_v25 = vadd.f32 %v1803_v19, %v6703_v21  ;;  %v7688_v21 = vrot.slane %v6740_v24, 3  ;;  %v887_v28 = vsel %vm859_vm11, %v886_v39, %v885_v51  ;;  %v1045_v53 = vrot.slane %v5286_v30, 6  ;;  %v7689_v24 = vld [vmem:[#allocation92_spill] sm:$0xff]  ;;  %v294_v39 = vld [vmem:[#allocation15 + $0xe0] sm:$0xff] }
 0x1b1   :  { %v889_v62 = vsel %vm862_vm12, %v888_v11, %v887_v28  ;;  %v1233_v19 = vrot.slane %v7689_v24, 4  ;;  %v7690_v60 = vrot.slane %v6743_v49, 2  ;;  %v1235_v51 = vrot.slane %v7691_v36, 3  ;;  %v5289_v30 = vld [vmem:[#allocation6 + $0x25] sm:$0x1] }
 0x1b2   :  { %1915 = vmatmul.mubr.f32.gmra.mrb[6].mxu1 %v1811_v25  ;;  %2025 = vmatmul.mubr.f32.gmra.mrb[22].mxu0 %v1811_v25  ;;  %v1029_v9 = vsel %vm862_vm12, %v7688_v21, %v1027_v31  ;;  %v5287_v31 = vld [vmem:[#allocation6 + $0x5] sm:$0x1]  ;;  %v891_v44 = vsel %vm865_vm13, %v890_v3, %v889_v62  ;;  %v1232_v25 = vsel %vm856_vm10, %v1231_v1, %v1230_v20  ;;  %v5288_v21 = vld [vmem:[#allocation6 + $0x1d] sm:$0x1]  ;;  %v1049_v62 = vrot.slane %v5289_v30, 4 }
 0x1b3   :  { %1920 = vmatprep.mubr.f32.mxu1 %v1217_v5  ;;  %2029 = vmatprep.mubr.f32.mxu0 %v1217_v5  ;;  %v1044_v10 = vsel %vm850_vm8, %v1043_v50, %v5287_v31  ;;  %v1031_v33 = vsel %vm865_vm13, %v7690_v60, %v1029_v9  ;;  %v6845_v11 = vsel %vm868_vm14, %v892_v41, %v891_v44  ;;  %v1047_v28 = vrot.slane %v5288_v21, 5  ;;  %v7693_v31 = vld [vmem:[#allocation94_spill] sm:$0xff]  ;;  %v7694_v60 = vld [vmem:[#allocation101_spill] sm:$0xff]  ;;  %v7696_v21 = vld [vmem:[#allocation99_spill] sm:$0xff] }
 0x1b4   :  { %v1671_v15 = vpop.f32.mrb[10].mxu0  ;;  %v6850_v47 = vpack.c.bf16 %v296_v4, %v294_v39  ;;  %v1033_v9 = vsel %vm868_vm14, %v1032_v37, %v1031_v33  ;;  %v1234_v1 = vsel %vm859_vm11, %v1233_v19, %v1232_v25  ;;  %v1764_v41 = vsub.f32 1.0, %v1217_v5  ;;  %v5290_v39 = vld [vmem:[#allocation6 + $0x2d] sm:$0x1] }
 0x1b5   :  { %v1672_v23 = vadd.f32 %v1671_v15, %v6494_v45  ;;  %v6835_v35 = vpop.f32.mrb[11].mxu0  ;;  %v1046_v15 = vsel %vm853_vm9, %v1045_v53, %v1044_v10  ;;  %v1237_v44 = vrot.slane %v7693_v31, 2  ;;  %v1756_v10 = vmul.f32 %v1217_v5, %v1033_v9  ;;  %v5291_v5 = vld [vmem:[#allocation6 + $0x35] sm:$0x1] }
 0x1b6   :  { %4665 = vmatpush1.bf16.msra.mxu1 %v6850_v47  ;;  %v1048_v53 = vsel %vm856_vm10, %v1047_v28, %v1046_v15  ;;  %v1236_v19 = vsel %vm862_vm12, %v1235_v51, %v1234_v1  ;;  %v1051_v4 = vrot.slane %v5290_v39, 3  ;;  %v1252_v33 = vrot.slane %v7694_v60, 6  ;;  %v5295_v60 = vld [vmem:[#allocation6 + $0x6] sm:$0x1] }
 0x1b7   :  { %v5142_v7 = vpop.eup %5141  ;;  %v1698_v17 = vmax.f32 %v1672_v23, 0.0  ;;  %v7692_v23 = vld [vmem:[#allocation100_spill] sm:$0xff]  ;;  %4691 = vmatprep.subr.bf16.mxu1 %v6425_v34  ;;  %v1050_v36 = vsel %vm859_vm11, %v1049_v62, %v1048_v53  ;;  %v1238_v28 = vsel %vm865_vm13, %v1237_v44, %v1236_v19  ;;  %v5294_v19 = vld [vmem:[#allocation6 + $0x16] sm:$0x1] }
 0x1b8   :  { %v1772_v50 = vmul.f32 %v5142_v7, %v6555_v61  ;;  %v1780_v3 = vsub.f32 1.0, %v5142_v7  ;;  %v1250_v24 = vrot.slane %v7692_v23, 7  ;;  %v7695_v7 = vld [vmem:[#allocation95_spill] sm:$0xff]  ;;  %v1052_v9 = vsel %vm862_vm12, %v1051_v4, %v1050_v36  ;;  %v7699_v36 = vld [vmem:[#allocation104_spill] sm:$0xff] }
 0x1b9   :  { %v1714_v49 = vsub.f32 0.0, %v1698_v17  ;;  %v1239_v17 = vrot.slane %v7695_v7, 1  ;;  %v5293_v23 = vld [vmem:[#allocation6 + $0x3d] sm:$0x1]  ;;  %v1068_v39 = vrot.slane %v5294_v19, 6 }
 0x1ba   :  { %v1788_v20 = vmul.f32 %v1780_v3, %v6589_v13  ;;  %v1251_v3 = vsel %vm850_vm8, %v1250_v24, %v7696_v21  ;;  %v1055_v24 = vrot.slane %v5293_v23, 1  ;;  %v1258_v21 = vrot.slane %v7699_v36, 3  ;;  %v7701_v23 = vld [vmem:[#allocation105_spill] sm:$0xff] }
 0x1bb   :  { %v1740_v61 = vmul.f32 1.442695, %v1714_v49  ;;  %v7697_v49 = vld [vmem:[#allocation102_spill] sm:$0xff]  ;;  %v1253_v1 = vsel %vm853_vm9, %v1252_v33, %v1251_v3  ;;  %v5296_v3 = vld [vmem:[#allocation6 + $0x1e] sm:$0x1] }
 0x1bc   :  { %v1796_v37 = vadd.f32 %v1788_v20, %v1772_v50  ;;  %v1053_v50 = vrot.slane %v5291_v5, 2  ;;  %v1254_v51 = vrot.slane %v7697_v49, 5  ;;  %v5292_v20 = vld [vmem:[#allocation6 + $0xe] sm:$0x1]  ;;  %v7700_v49 = vmov 0.0  }
 0x1bd   :  { %5143 = vpow2.f32 %v1740_v61  ;;  %v1066_v30 = vrot.slane %v5292_v20, 7  ;;  %v7698_v61 = vld [vmem:[#allocation103_spill] sm:$0xff] }
 0x1be   :  { %v1804_v25 = vmul.f32 %v1796_v37, %v1764_v41  ;;  %v1240_v41 = vsel %vm868_vm14, %v1239_v17, %v1238_v28  ;;  %v1256_v31 = vrot.slane %v7698_v61, 4  ;;  %v1255_v37 = vsel %vm856_vm10, %v1254_v51, %v1253_v1 }
 0x1bf   :  { %v1067_v33 = vsel %vm850_vm8, %v1066_v30, %v5295_v60  ;;  %v1070_v28 = vrot.slane %v5296_v3, 5  ;;  %v3979_v51 = vsel %vm810_vm2, 1.0, %v7700_v49 }
 0x1c0   :  { %v1812_v15 = vadd.f32 %v1804_v25, %v1756_v10  ;;  %v1054_v10 = vsel %vm865_vm13, %v1053_v50, %v1052_v9  ;;  %v1257_v17 = vsel %vm859_vm11, %v1256_v31, %v1255_v37  ;;  %v1765_v9 = vsub.f32 1.0, %v1240_v41  ;;  %v5297_v31 = vld [vmem:[#allocation6 + $0x26] sm:$0x1] }
 0x1c1   :  { %v1056_v7 = vsel %vm868_vm14, %v1055_v24, %v1054_v10  ;;  %v1069_v1 = vsel %vm853_vm9, %v1068_v39, %v1067_v33  ;;  %v1260_v24 = vrot.slane %v7701_v23, 2  ;;  %v1259_v61 = vsel %vm862_vm12, %v1258_v21, %v1257_v17 }
 0x1c2   :  { %1921 = vmatmul.mubr.f32.gmra.mrb[8].mxu1 %v1812_v15  ;;  %2030 = vmatmul.mubr.f32.gmra.mrb[24].mxu0 %v1812_v15  ;;  %v1757_v30 = vmul.f32 %v1240_v41, %v1056_v7  ;;  %v904_v10 = vrot.slane %v3979_v51, 7  ;;  %v1071_v19 = vsel %vm856_vm10, %v1070_v28, %v1069_v1  ;;  %v1571_v39 = vsub.s32 1, %v6460_v16 }
 0x1c3   :  { %1926 = vmatprep.mubr.f32.mxu1 %v1240_v41  ;;  %2034 = vmatprep.mubr.f32.mxu0 %v1240_v41  ;;  %v3978_v41 = vsel %vm809_vm4, 1.0, %v7700_v49  ;;  %v3981_v17 = vsel %vm812_vm5, 1.0, %v7700_v49  ;;  %v1261_v21 = vsel %vm865_vm13, %v1260_v24, %v1259_v61  ;;  %v1089_v23 = vrot.slane %v6712_v29, 7 }
 0x1c4   :  { %v1677_v62 = vpop.f32.mrb[12].mxu0  ;;  %v905_v28 = vsel %vm850_vm8, %v904_v10, %v3978_v41  ;;  %v908_v1 = vrot.slane %v3981_v17, 5  ;;  %v1091_v29 = vrot.slane %v6714_v18, 6 }
 0x1c5   :  { %v1678_v44 = vadd.f32 %v1677_v62, %v6494_v45  ;;  %v6873_v53 = vpop.f32.mrb[13].mxu0 }
 0x1c7   :  { %v1700_v4 = vmax.f32 %v1678_v44, 0.0  ;;  %v5144_v25 = vpop.eup %5143  ;;  %v1072_v44 = vrot.slane %v5297_v31, 4  ;;  %v5300_v31 = vld [vmem:[#allocation6 + $0x3e] sm:$0x1] }
 0x1c8   :  { %v1773_v5 = vmul.f32 %v5144_v25, %v6644_v2  ;;  %v1781_v50 = vsub.f32 1.0, %v5144_v25  ;;  %v3980_v2 = vsel %vm811_vm3, 1.0, %v7700_v49  ;;  %v5298_v25 = vld [vmem:[#allocation6 + $0x2e] sm:$0x1] }
 0x1c9   :  { %v1716_v15 = vsub.f32 0.0, %v1700_v4  ;;  %v7702_v4 = vld [vmem:[#allocation106_spill] sm:$0xff]  ;;  %v1074_v7 = vrot.slane %v5298_v25, 3  ;;  %v906_v36 = vrot.slane %v3980_v2, 6  ;;  %v1073_v3 = vsel %vm859_vm11, %v1072_v44, %v1071_v19 }
 0x1ca   :  { %v1789_v62 = vmul.f32 %v1781_v50, %v6589_v13  ;;  %v1262_v60 = vrot.slane %v7702_v4, 1  ;;  %v5299_v50 = vld [vmem:[#allocation6 + $0x36] sm:$0x1]  ;;  %v1078_v44 = vrot.slane %v5300_v31, 1  ;;  %v3983_v2 = vsel %vm814_vm7, 1.0, %v7700_v49 }
 0x1cb   :  { %v1744_v20 = vmul.f32 1.442695, %v1716_v15  ;;  %v1076_v51 = vrot.slane %v5299_v50, 2  ;;  %v912_v17 = vrot.slane %v3983_v2, 3  ;;  %v3985_v50 = vsel %vm816_vm0, 1.0, %v7700_v49 }
 0x1cc   :  { %v1797_v37 = vadd.f32 %v1789_v62, %v1773_v5  ;;  %v6907_v5 = vrot.slane %v6479_v55, %v1571_v39  ;;  %v1075_v62 = vsel %vm862_vm12, %v1074_v7, %v1073_v3  ;;  %v3984_v7 = vsel %vm815_vm15, 1.0, %v7700_v49 }
 0x1cd   :  { %5145 = vpow2.f32 %v1744_v20  ;;  %v1263_v20 = vsel %vm868_vm14, %v1262_v60, %v1261_v21  ;;  %v1090_v60 = vsel %vm850_vm8, %v1089_v23, %v6726_v46  ;;  %v1093_v3 = vrot.slane %v6736_v56, 5 }
 0x1ce   :  { %v1805_v33 = vmul.f32 %v1797_v37, %v1765_v9  ;;  %v3982_v9 = vsel %vm813_vm6, 1.0, %v7700_v49  ;;  %v1077_v37 = vsel %vm865_vm13, %v1076_v51, %v1075_v62  ;;  %v1644_v4 = vadd.f32 %v6513_v54, %v6907_v5 }
 0x1cf   :  { %v910_v10 = vrot.slane %v3982_v9, 4  ;;  %v1079_v21 = vsel %vm868_vm14, %v1078_v44, %v1077_v37  ;;  %v1766_v54 = vsub.f32 1.0, %v1263_v20  ;;  %v1092_v46 = vsel %vm853_vm9, %v1091_v29, %v1090_v60 }
 0x1d0   :  { %v1813_v15 = vadd.f32 %v1805_v33, %v1757_v30  ;;  %v907_v30 = vsel %vm853_vm9, %v906_v36, %v905_v28  ;;  %v914_v51 = vrot.slane %v3984_v7, 2  ;;  %v1758_v9 = vmul.f32 %v1263_v20, %v1079_v21 }
 0x1d1   :  { %v909_v19 = vsel %vm856_vm10, %v908_v1, %v907_v30  ;;  %v1095_v30 = vrot.slane %v6738_v27, 4  ;;  %v1094_v56 = vsel %vm856_vm10, %v1093_v3, %v1092_v46  ;;  %v1097_v44 = vrot.slane %v6754_v43, 3  ;;  %v301_v46 = vld [vmem:[#allocation17 + $0x18] sm:$0xff] }
 0x1d2   :  { %1927 = vmatmul.mubr.f32.gmra.mrb[10].mxu1 %v1813_v15  ;;  %2035 = vmatmul.mubr.f32.gmra.mrb[26].mxu0 %v1813_v15  ;;  %v911_v18 = vsel %vm859_vm11, %v910_v10, %v909_v19  ;;  %v1689_v15 = vmax.f32 %v1644_v4, 0.0  ;;  %v1099_v37 = vrot.slane %v6758_v42, 2  ;;  %v1101_v29 = vrot.slane %v6764_v26, 1 }
 0x1d3   :  { %v1683_v24 = vpop.f32.mrb[14].mxu0  ;;  %1932 = vmatprep.mubr.f32.mxu1 %v1263_v20  ;;  %2039 = vmatprep.mubr.f32.mxu0 %v1263_v20  ;;  %v913_v62 = vsel %vm862_vm12, %v912_v17, %v911_v18  ;;  %v1096_v10 = vsel %vm859_vm11, %v1095_v30, %v1094_v56  ;;  %v131_v18 = vld [vmem:[#allocation9] sm:$0xff]  ;;  %v5525_v3 = vmov 0.0|0.0   ;;  %v306_v30 = vld [vmem:[#allocation17 + $0x40] sm:$0xff]  ;;  %v307_v56 = vld [vmem:[#allocation17 + $0x48] sm:$0xff]  ;;  %vm5526_vm8 = vmmov 0  }
 0x1d4   :  { %v1684_v55 = vadd.f32 %v1683_v24, %v6494_v45  ;;  %v6917_v61 = vpop.f32.mrb[15].mxu0  ;;  %v916_v24 = vrot.slane %v3985_v50, 1  ;;  %v915_v31 = vsel %vm865_vm13, %v914_v51, %v913_v62  ;;  %v1098_v19 = vsel %vm862_vm12, %v1097_v44, %v1096_v10  ;;  %4666 = vmatprep.subr.bf16.mxu0 %v5525_v3  ;;  %v303_v50 = vld [vmem:[#allocation17 + $0x28] sm:$0xff]  ;;  %v310_v44 = vld [vmem:[#allocation17 + $0x60] sm:$0xff] }
 0x1d6   :  { %v1702_v45 = vmax.f32 %v1684_v55, 0.0  ;;  %v1705_v55 = vsub.f32 0.0, %v1689_v15  ;;  %v917_v20 = vsel %vm868_vm14, %v916_v24, %v915_v31  ;;  %v308_v24 = vld [vmem:[#allocation17 + $0x50] sm:$0xff] }
 0x1d7   :  { %v5146_v41 = vpop.eup %5145 }
 0x1d8   :  { %v1774_v33 = vmul.f32 %v5146_v41, %v6734_v6  ;;  %v1782_v25 = vsub.f32 1.0, %v5146_v41  ;;  %v1718_v36 = vsub.f32 0.0, %v1702_v45  ;;  %v1722_v27 = vmul.f32 1.442695, %v1705_v55  ;;  %v309_v55 = vld [vmem:[#allocation17 + $0x58] sm:$0xff] }
 0x1d9   :  { %v1100_v41 = vsel %vm865_vm13, %v1099_v37, %v1098_v19  ;;  %v6997_v31 = vpack.c.bf16 %v309_v55, %v308_v24  ;;  %v313_v37 = vld [vmem:[#allocation17 + $0x78] sm:$0xff] }
 0x1da   :  { %v1790_v28 = vmul.f32 %v1782_v25, %v6589_v13  ;;  %v1748_v6 = vmul.f32 1.442695, %v1718_v36  ;;  %v1102_v60 = vsel %vm868_vm14, %v1101_v29, %v1100_v41 }
 0x1db   :  { %v1759_v42 = vmul.f32 %v1102_v60, %v917_v20 }
 0x1dc   :  { %v1798_v1 = vadd.f32 %v1790_v28, %v1774_v33  ;;  %5147 = vpow2.f32 %v1748_v6  ;;  %v1767_v33 = vsub.f32 1.0, %v917_v20  ;;  %v300_v28 = vld [vmem:[#allocation17 + $0x10] sm:$0xff]  ;;  %v302_v6 = vld [vmem:[#allocation17 + $0x20] sm:$0xff] }
 0x1dd   :  { %5149 = vpow2.f32 %v1722_v27  ;;  %v6981_v15 = vpack.c.bf16 %v301_v46, %v300_v28  ;;  %v6985_v51 = vpack.c.bf16 %v303_v50, %v302_v6 }
 0x1de   :  { %v1806_v23 = vmul.f32 %v1798_v1, %v1766_v54  ;;  %v305_v1 = vld [vmem:[#allocation17 + $0x38] sm:$0xff] }
 0x1e0   :  { %v1814_v2 = vadd.f32 %v1806_v23, %v1758_v9  ;;  %v304_v9 = vld [vmem:[#allocation17 + $0x30] sm:$0xff]  ;;  %v6993_v23 = vpack.c.bf16 %v307_v56, %v306_v30 }
 0x1e1   :  { %v6989_v62 = vpack.c.bf16 %v305_v1, %v304_v9  ;;  %v314_v30 = vld [vmem:[%s7431_s8] sm:$0x7]  ;;  %s5528_s8 = smov [#allocation19]  }
 0x1e2   :  { %1933 = vmatmul.mubr.f32.gmra.mrb[12].mxu1 %v1814_v2  ;;  %2040 = vmatmul.mubr.f32.gmra.mrb[28].mxu0 %v1814_v2  ;;  %v311_v2 = vld [vmem:[#allocation17 + $0x68] sm:$0xff]  ;;  %v7032_v24 = vrot.slane %v314_v30, %v1571_v39  ;;  %v7703_v39 = vsub.s32 0, %v6460_v16  ;;  %s3906_s17 = sshll.u32 %s5528_s8, 4  ;;  %s3907_s17 = int_to_ptr.vmem [resolvable:$true] %s3906_s17 }
 0x1e3   :  { %1938 = vmatprep.mubr.f32.mxu1 %v917_v20  ;;  %2044 = vmatprep.mubr.f32.mxu0 %v917_v20  ;;  %v7001_v10 = vpack.c.bf16 %v311_v2, %v310_v44  ;;  %v312_v20 = vld [vmem:[#allocation17 + $0x70] sm:$0xff]  ;;  %s5455_s18 = scalar_lea.vmem %s3907_s17, 128  ;;  %p5460_p1 = scmp.lt.s32.totalorder %s3907_s17, %s3907_s17 }
 0x1e4   :  { %v7005_v27 = vpack.c.bf16 %v313_v37, %v312_v20  ;;  %p5456_p0 = scmp.ne.s32.totalorder %s3907_s17, %s5455_s18  ;;  %p5461_p2 = scmp.lt.s32.totalorder %s5455_s18, %s5455_s18 }
 0x1e6   :  { %v5148_v4 = vpop.eup %5147  ;;  %p5462_p3 = por %p5461_p2, %p5460_p1 }
 0x1e7   :  { %v1775_v43 = vmul.f32 %v5148_v4, %v6845_v11  ;;  %v1783_v45 = vsub.f32 1.0, %v5148_v4  ;;  %v5150_v21 = vpop.eup %5149  ;;  %v299_v11 = vld [vmem:[#allocation17 + $0x8] sm:$0xff] }
 0x1e8   :  { %v6956_v26 = vmul.f32 %v5150_v21, %v131_v18  ;;  %p5463_p4 = pnand %p5462_p3, %p5456_p0 }
 0x1e9   :  { %v1791_v25 = vmul.f32 %v1783_v45, %v6589_v13  ;;  %v298_v13 = vld [vmem:[#allocation17] sm:$0xff] }
 0x1ea   :  { %v6977_v54 = vpack.c.bf16 %v299_v11, %v298_v13 }
 0x1eb   :  { %v1799_v7 = vadd.f32 %v1791_v25, %v1775_v43 }
 0x1ec   :  { %4668 = vmatpush3.bf16.msra.mxu0 %v6977_v54 }
 0x1ed   :  { %v1807_v17 = vmul.f32 %v1799_v7, %v1767_v33  ;;  %4669 = vmatprep.subr.bf16.mxu0 %v5525_v3 }
 0x1ef   :  { %v1815_v36 = vadd.f32 %v1807_v17, %v1759_v42 }
 0x1f0   :  { %4671 = vmatpush3.bf16.msra.mxu0 %v6981_v15 }
 0x1f1   :  { %1939 = vmatmul.mubr.f32.gmra.mrb[14].mxu1 %v1815_v36  ;;  %2045 = vmatmul.mubr.f32.gmra.mrb[30].mxu0 %v1815_v36 }
 0x1f2   :  { %2116 = vmatprep.mubr.f32.mxu1 %v7700_v49  ;;  %4672 = vmatprep.subr.bf16.mxu0 %v5525_v3 }
 0x1f3   :  { %4258 = vmatprep.mubr.msk.f32.mxu0 %vm5526_vm8, %v7700_v49 }
 0x1f4   :  { %4674 = vmatpush3.bf16.msra.mxu0 %v6985_v51 }
 0x1f5   :  { %2117 = vmatmul.mubr.f32.vlgmr.msra.gmra.mrb[0].mxu1 %v6956_v26  ;;  %4675 = vmatprep.subr.bf16.mxu0 %v5525_v3 }
 0x1f6   :  { %4693 = vmatpush1.bf16.msra.mxu1 %v6566_v58  ;;  %2345 = vmatprep.mubr.f32.mxu1 %v7700_v49 }
 0x1f7   :  { %4695 = vmatprep.subr.bf16.mxu1 %v6572_v22 }
 0x1f8   :  { %4677 = vmatpush3.bf16.msra.mxu0 %v6989_v62 }
 0x1f9   :  { %4678 = vmatprep.subr.bf16.mxu0 %v5525_v3 }
 0x1fa   :  { %4697 = vmatpush1.bf16.msra.mxu1 %v6580_v38 }
 0x1fb   :  { %4699 = vmatprep.subr.bf16.mxu1 %v6591_v63 }
 0x1fc   :  { %4680 = vmatpush3.bf16.msra.mxu0 %v6993_v23 }
 0x1fd   :  { %4681 = vmatprep.subr.bf16.mxu0 %v5525_v3 }
 0x1fe   :  { %4701 = vmatpush1.bf16.msra.mxu1 %v6655_v59 }
 0x1ff   :  { %4703 = vmatprep.subr.bf16.mxu1 %v6668_v8 }
 0x200   :  { %4683 = vmatpush3.bf16.msra.mxu0 %v6997_v31 }
 0x201   :  { %4684 = vmatprep.subr.bf16.mxu0 %v5525_v3 }
 0x202   :  { %4705 = vmatpush1.bf16.msra.mxu1 %v6681_v32 }
 0x203   :  { %4707 = vmatprep.subr.bf16.mxu1 %v6693_v48 }
 0x204   :  { %4686 = vmatpush3.bf16.msra.mxu0 %v7001_v10 }
 0x205   :  { %4687 = vmatprep.subr.bf16.mxu0 %v5525_v3 }
 0x206   :  { %4709 = vmatpush1.bf16.msra.mxu1 %v6707_v0 }
 0x207   :  { %4711 = vmatprep.subr.bf16.mxu1 %v6718_v40 }
 0x208   :  { %4689 = vmatpush3.bf16.msra.mxu0 %v7005_v27 }
 0x209   :  { %4722 = vmatprep.subr.bf16.mxu0 %v5525_v3 }
 0x20a   :  { %4713 = vmatpush1.bf16.msra.mxu1 %v6747_v57 }
 0x20b   :  { %4715 = vmatprep.subr.bf16.mxu1 %v6752_v14 }
 0x20e   :  { %4717 = vmatpush1.bf16.msra.mxu1 %v6772_v12 }
 0x20f   :  { %4719 = vmatprep.subr.bf16.mxu1 %v6817_v52 }
 0x212   :  { %4721 = vmatpush1.bf16.msra.mxu1 %v6850_v47 }
 0x213   :  { %4747 = vmatprep.subr.bf16.mxu1 %v6425_v34 }
 0x266   :  { %v4066_v19 = vpop.f32.mrb[16].mxu0 }
 0x267   :  { %v4067_v29 = vpop.f32.mrb[17].mxu0 }
 0x268   :  { %v7011_v41 = vadd.f32 %v4067_v29, %v4066_v19 }
 0x26a   :  { %v4069_v4 = vpop.f32.mrb[18].mxu0 }
 0x26b   :  { %v4070_v43 = vpop.f32.mrb[19].mxu0 }
 0x26c   :  { %v7013_v45 = vadd.f32 %v4070_v43, %v4069_v4  ;;  %v7056_v43 = vrot.slane %v314_v30, %v7703_v39 }
 0x275   :  { %v4072_v60 = vpop.f32.mrb[20].mxu0 }
 0x276   :  { %v4073_v33 = vpop.f32.mrb[21].mxu0 }
 0x277   :  { %v7015_v25 = vadd.f32 %v4073_v33, %v4072_v60 }
 0x285   :  { %v4075_v42 = vpop.f32.mrb[22].mxu0 }
 0x286   :  { %v4076_v7 = vpop.f32.mrb[23].mxu0 }
 0x287   :  { %v7017_v17 = vadd.f32 %v4076_v7, %v4075_v42  ;;  %v7704_v7 = vld [vmem:[#allocation35_spill] sm:$0xff] }
 0x295   :  { %v4078_v36 = vpop.f32.mrb[24].mxu0 }
 0x296   :  { %v4079_v21 = vpop.f32.mrb[25].mxu0 }
 0x297   :  { %v7019_v18 = vadd.f32 %v4079_v21, %v4078_v36  ;;  %v1650_v36 = vadd.f32 %v7704_v7, %v6907_v5  ;;  %v1827_v21 = vsub.s32 2, %v6460_v16 }
 0x2a5   :  { %v4081_v13 = vpop.f32.mrb[26].mxu0 }
 0x2a6   :  { %v4082_v11 = vpop.f32.mrb[27].mxu0 }
 0x2a7   :  { %v7021_v28 = vadd.f32 %v4082_v11, %v4081_v13  ;;  %v1691_v11 = vmax.f32 %v1650_v36, 0.0 }
 0x2b5   :  { %v4084_v46 = vpop.f32.mrb[28].mxu0 }
 0x2b6   :  { %v4085_v6 = vpop.f32.mrb[29].mxu0 }
 0x2b7   :  { %v7023_v50 = vadd.f32 %v4085_v6, %v4084_v46  ;;  %v7062_v46 = vrot.slane %v314_v30, %v1827_v21  ;;  %v1707_v6 = vsub.f32 0.0, %v1691_v11 }
 0x2c4   :  { %v4087_v9 = vpop.f32.mrb[30].mxu0 }
 0x2c5   :  { %v4088_v1 = vpop.f32.mrb[31].mxu0 }
 0x2c6   :  { %v7028_v56 = vadd.f32 %v4088_v1, %v4087_v9  ;;  %v2012_v9 = vadd.f32 %v7011_v41, %v7062_v46 }
 0x2c8   :  { %v2118_v55 = vpop.f32.mrb[0].mxu1 }
 0x2c9   :  { %v2120_v44 = vpop.f32.mrb[1].mxu1  ;;  %v5082_v60 = vadd.f32 %v2118_v55, %v7056_v43 }
 0x2ca   :  { %v5083_v2 = vadd.f32 %v2120_v44, %v7032_v24 }
 0x2cb   :  { %v3986_v33 = vmul.f32 -1.442695, %v5082_v60 }
 0x2cc   :  { %v3987_v20 = vmul.f32 -1.442695, %v5083_v2  ;;  %v1726_v2 = vmul.f32 1.442695, %v1707_v6 }
 0x2ce   :  { %5151 = vpow2.f32 %v3987_v20  ;;  %v5527_v20 = vmov 1966171168  }
 0x2d8   :  { %v5152_v37 = vpop.eup %5151 }
 0x2d9   :  { %v2134_v19 = vadd.f32 1.0, %v5152_v37  ;;  %v2217_v37 = vunpack.c.l.s4 %v5527_v20 }
 0x2db   :  { %5153 = vrcp.f32 %v2134_v19 }
 0x2dc   :  { %5155 = vpow2.f32 %v3986_v33 }
 0x2e5   :  { %v5154_v29 = vpop.eup %5153 }
 0x2e6   :  { %v2137_v4 = vmul.f32 %v5154_v29, %v6956_v26  ;;  %v5156_v42 = vpop.eup %5155  ;;  %v2218_v29 = vunpack.c.0.s8 %v2217_v37 }
 0x2e7   :  { %v2127_v13 = vadd.f32 1.0, %v5156_v42 }
 0x2e8   :  { %4259 = vmatmul.mubr.f32.vlgmr.msra.gmra.mrb[32].mxu0 %v2137_v4  ;;  %v7067_v30 = vsub.s32 %v2218_v29, %v6460_v16 }
 0x2e9   :  { %4724 = vmatpush3.bf16.msra.mxu0 %v6977_v54  ;;  %4293 = vmatprep.mubr.msk.f32.mxu0 %vm5526_vm8, %v7700_v49  ;;  %5157 = vrcp.f32 %v2127_v13 }
 0x2ea   :  { %4725 = vmatprep.subr.bf16.mxu0 %v5525_v3 }
 0x2ed   :  { %4727 = vmatpush3.bf16.msra.mxu0 %v6981_v15 }
 0x2ee   :  { %4728 = vmatprep.subr.bf16.mxu0 %v5525_v3 }
 0x2f1   :  { %4730 = vmatpush3.bf16.msra.mxu0 %v6985_v51 }
 0x2f2   :  { %4731 = vmatprep.subr.bf16.mxu0 %v5525_v3 }
 0x2f3   :  { %v5158_v19 = vpop.eup %5157 }
 0x2f4   :  { %v2210_v4 = vsub.f32 1.0, %v5158_v19 }
 0x2f5   :  { %4733 = vmatpush3.bf16.msra.mxu0 %v6989_v62 }
 0x2f6   :  { %4734 = vmatprep.subr.bf16.mxu0 %v5525_v3  ;;  %v2211_v33 = vmul.f32 %v2210_v4, %v6956_v26 }
 0x2f9   :  { %4736 = vmatpush3.bf16.msra.mxu0 %v6993_v23 }
 0x2fa   :  { %4737 = vmatprep.subr.bf16.mxu0 %v5525_v3 }
 0x2fd   :  { %4739 = vmatpush3.bf16.msra.mxu0 %v6997_v31 }
 0x2fe   :  { %4740 = vmatprep.subr.bf16.mxu0 %v5525_v3 }
 0x301   :  { %4742 = vmatpush3.bf16.msra.mxu0 %v7001_v10 }
 0x302   :  { %4743 = vmatprep.subr.bf16.mxu0 %v5525_v3 }
 0x305   :  { %4745 = vmatpush3.bf16.msra.mxu0 %v7005_v27 }
 0x306   :  { %4778 = vmatprep.subr.bf16.mxu0 %v5525_v3 }
 0x3bb   :  { %v2204_v1 = vpop.f32.mrb[32].mxu0 }
 0x3bc   :  { %v2208_v44 = vadd.f32 %v2204_v1, %v2012_v9  ;;  %v4260_v55 = vpop.f32.mrb[33].mxu0 }
 0x3be   :  { %5159 = vtanh.f32 %v2208_v44 }
 0x3bf   :  { %5161 = vpow2.f32 %v1726_v2 }
 0x3c8   :  { %v5160_v39 = vpop.eup %5159 }
 0x3c9   :  { %v2212_v60 = vmul.f32 %v5160_v39, %v5158_v19  ;;  %v5162_v41 = vpop.eup %5161 }
 0x3cb   :  { %v2213_v42 = vadd.f32 %v2212_v60, %v2211_v33 }
 0x3cd   :  { %v2215_v7 = vcombine.high %v2213_v42, %v2213_v42  ;;  %v2222_v36 = vrot.slane %v2213_v42, %v7067_v30  ;;  %v7071_v21 = vmul.f32 %v5162_v41, %v2213_v42 }
 0x3cf   :  { %v2229_v13 = vrot.slane %v2215_v7, %v7067_v30  ;;  %v2230_v11 = vcombine.high %v2222_v36, %v2222_v36  ;;  %v2238_v6 = vrot.slane %v2222_v36, %v7067_v30  ;;  %3988 = vst.sshfl [vmem:[#allocation18] sm:$0x1 pattern:$0x73625140] %v2222_v36  ;;  %2346 = vmatmul.mubr.f32.vlgmr.msra.gmra.mrb[2].mxu1 %v7071_v21 }
 0x3d0   :  { %4749 = vmatpush1.bf16.msra.mxu1 %v6566_v58  ;;  %2574 = vmatprep.mubr.f32.mxu1 %v7700_v49 }
 0x3d1   :  { %v2231_v16 = vcombine.high %v2229_v13, %v2229_v13  ;;  %v2245_v26 = vrot.slane %v2229_v13, %v7067_v30  ;;  %v2252_v9 = vrot.slane %v2230_v11, %v7067_v30  ;;  %v2260_v1 = vcombine.high %v2238_v6, %v2238_v6  ;;  %3989 = vst.sshfl [vmem:[#allocation18 + $0x8] sm:$0x1 pattern:$0x73625140] %v2230_v11 }
 0x3d2   :  { %3990 = vst.sshfl [vmem:[#allocation18 + $0x20] sm:$0x1 pattern:$0x73625140] %v2229_v13  ;;  %4751 = vmatprep.subr.bf16.mxu1 %v6572_v22  ;;  %v7705_v13 = vld [vmem:[#allocation36_spill] sm:$0xff] }
 0x3d3   :  { %v2259_v44 = vrot.slane %v2231_v16, %v7067_v30  ;;  %v2261_v55 = vcombine.high %v2245_v26, %v2245_v26  ;;  %v2262_v2 = vcombine.high %v2252_v9, %v2252_v9  ;;  %2274 = vst [vmem:[#allocation18 + $0x10] sm:$0x1] %v2260_v1  ;;  %3991 = vst.sshfl [vmem:[#allocation18 + $0x28] sm:$0x1 pattern:$0x73625140] %v2231_v16 }
 0x3d4   :  { %4753 = vmatpush1.bf16.msra.mxu1 %v6580_v38  ;;  %v1656_v11 = vadd.f32 %v7705_v13, %v6907_v5  ;;  %v2017_v9 = vadd.f32 %v7013_v45, %v7062_v46 }
 0x3d5   :  { %v2263_v20 = vcombine.high %v2259_v44, %v2259_v44  ;;  %2275 = vst [vmem:[#allocation18 + $0x18] sm:$0x1] %v2262_v2  ;;  %2278 = vst [vmem:[#allocation18 + $0x30] sm:$0x1] %v2261_v55  ;;  %4755 = vmatprep.subr.bf16.mxu1 %v6591_v63 }
 0x3d6   :  { %v1693_v16 = vmax.f32 %v1656_v11, 0.0 }
 0x3d7   :  { %2279 = vst [vmem:[#allocation18 + $0x38] sm:$0x1] %v2263_v20 }
 0x3d8   :  { %4757 = vmatpush1.bf16.msra.mxu1 %v6655_v59  ;;  %v1709_v26 = vsub.f32 0.0, %v1693_v16 }
 0x3d9   :  { %4759 = vmatprep.subr.bf16.mxu1 %v6668_v8 }
 0x3da   :  { %v1730_v2 = vmul.f32 1.442695, %v1709_v26 }
 0x3dc   :  { %4761 = vmatpush1.bf16.msra.mxu1 %v6681_v32 }
 0x3dd   :  { %4763 = vmatprep.subr.bf16.mxu1 %v6693_v48 }
 0x3e0   :  { %4765 = vmatpush1.bf16.msra.mxu1 %v6707_v0 }
 0x3e1   :  { %4767 = vmatprep.subr.bf16.mxu1 %v6718_v40 }
 0x3e4   :  { %4769 = vmatpush1.bf16.msra.mxu1 %v6747_v57 }
 0x3e5   :  { %4771 = vmatprep.subr.bf16.mxu1 %v6752_v14 }
 0x3e8   :  { %4773 = vmatpush1.bf16.msra.mxu1 %v6772_v12 }
 0x3e9   :  { %4775 = vmatprep.subr.bf16.mxu1 %v6817_v52 }
 0x3ec   :  { %4777 = vmatpush1.bf16.msra.mxu1 %v6850_v47 }
 0x3ed   :  { %4803 = vmatprep.subr.bf16.mxu1 %v6425_v34 }
 0x4a2   :  { %v2347_v37 = vpop.f32.mrb[2].mxu1 }
 0x4a3   :  { %v2349_v19 = vpop.f32.mrb[3].mxu1  ;;  %v5084_v41 = vadd.f32 %v2347_v37, %v7056_v43 }
 0x4a4   :  { %v5085_v29 = vadd.f32 %v2349_v19, %v7032_v24 }
 0x4a5   :  { %v3992_v7 = vmul.f32 -1.442695, %v5084_v41 }
 0x4a6   :  { %v3993_v4 = vmul.f32 -1.442695, %v5085_v29 }
 0x4a8   :  { %5163 = vpow2.f32 %v3993_v4 }
 0x4b2   :  { %v5164_v39 = vpop.eup %5163 }
 0x4b3   :  { %v2363_v60 = vadd.f32 1.0, %v5164_v39 }
 0x4b5   :  { %5165 = vrcp.f32 %v2363_v60 }
 0x4b6   :  { %5167 = vpow2.f32 %v3992_v7 }
 0x4bf   :  { %v5166_v33 = vpop.eup %5165 }
 0x4c0   :  { %v2366_v42 = vmul.f32 %v5166_v33, %v7071_v21  ;;  %v5168_v36 = vpop.eup %5167 }
 0x4c1   :  { %v2356_v6 = vadd.f32 1.0, %v5168_v36 }
 0x4c2   :  { %4294 = vmatmul.mubr.f32.vlgmr.msra.gmra.mrb[34].mxu0 %v2366_v42 }
 0x4c3   :  { %4780 = vmatpush3.bf16.msra.mxu0 %v6977_v54  ;;  %4328 = vmatprep.mubr.msk.f32.mxu0 %vm5526_vm8, %v7700_v49  ;;  %5169 = vrcp.f32 %v2356_v6 }
 0x4c4   :  { %4781 = vmatprep.subr.bf16.mxu0 %v5525_v3 }
 0x4c7   :  { %4783 = vmatpush3.bf16.msra.mxu0 %v6981_v15 }
 0x4c8   :  { %4784 = vmatprep.subr.bf16.mxu0 %v5525_v3 }
 0x4cb   :  { %4786 = vmatpush3.bf16.msra.mxu0 %v6985_v51 }
 0x4cc   :  { %4787 = vmatprep.subr.bf16.mxu0 %v5525_v3 }
 0x4cd   :  { %v5170_v20 = vpop.eup %5169 }
 0x4ce   :  { %v2439_v37 = vsub.f32 1.0, %v5170_v20 }
 0x4cf   :  { %4789 = vmatpush3.bf16.msra.mxu0 %v6989_v62 }
 0x4d0   :  { %4790 = vmatprep.subr.bf16.mxu0 %v5525_v3  ;;  %v2440_v4 = vmul.f32 %v2439_v37, %v7071_v21 }
 0x4d3   :  { %4792 = vmatpush3.bf16.msra.mxu0 %v6993_v23 }
 0x4d4   :  { %4793 = vmatprep.subr.bf16.mxu0 %v5525_v3 }
 0x4d7   :  { %4795 = vmatpush3.bf16.msra.mxu0 %v6997_v31 }
 0x4d8   :  { %4796 = vmatprep.subr.bf16.mxu0 %v5525_v3 }
 0x4db   :  { %4798 = vmatpush3.bf16.msra.mxu0 %v7001_v10 }
 0x4dc   :  { %4799 = vmatprep.subr.bf16.mxu0 %v5525_v3 }
 0x4df   :  { %4801 = vmatpush3.bf16.msra.mxu0 %v7005_v27 }
 0x4e0   :  { %4834 = vmatprep.subr.bf16.mxu0 %v5525_v3 }
 0x595   :  { %v2433_v1 = vpop.f32.mrb[34].mxu0 }
 0x596   :  { %v2437_v44 = vadd.f32 %v2433_v1, %v2017_v9  ;;  %v4295_v55 = vpop.f32.mrb[35].mxu0 }
 0x598   :  { %5171 = vtanh.f32 %v2437_v44 }
 0x599   :  { %5173 = vpow2.f32 %v1730_v2 }
 0x5a2   :  { %v5172_v19 = vpop.eup %5171 }
 0x5a3   :  { %v2441_v29 = vmul.f32 %v5172_v19, %v5170_v20  ;;  %v5174_v60 = vpop.eup %5173 }
 0x5a5   :  { %v2442_v39 = vadd.f32 %v2441_v29, %v2440_v4 }
 0x5a7   :  { %v2444_v33 = vcombine.high %v2442_v39, %v2442_v39  ;;  %v2451_v42 = vrot.slane %v2442_v39, %v7067_v30  ;;  %v7123_v41 = vmul.f32 %v5174_v60, %v2442_v39 }
 0x5a9   :  { %v2458_v45 = vrot.slane %v2444_v33, %v7067_v30  ;;  %v2459_v7 = vcombine.high %v2451_v42, %v2451_v42  ;;  %v2467_v36 = vrot.slane %v2451_v42, %v7067_v30  ;;  %3994 = vst.sshfl [vmem:[#allocation18 + $0x1] sm:$0x1 pattern:$0x73625140] %v2451_v42  ;;  %2575 = vmatmul.mubr.f32.vlgmr.msra.gmra.mrb[4].mxu1 %v7123_v41  ;;  %v7706_v42 = vld [vmem:[#allocation37_spill] sm:$0xff] }
 0x5aa   :  { %4805 = vmatpush1.bf16.msra.mxu1 %v6566_v58  ;;  %2803 = vmatprep.mubr.f32.mxu1 %v7700_v49 }
 0x5ab   :  { %v2460_v21 = vcombine.high %v2458_v45, %v2458_v45  ;;  %v2474_v13 = vrot.slane %v2458_v45, %v7067_v30  ;;  %v2481_v11 = vrot.slane %v2459_v7, %v7067_v30  ;;  %v2489_v6 = vcombine.high %v2467_v36, %v2467_v36  ;;  %3995 = vst.sshfl [vmem:[#allocation18 + $0x9] sm:$0x1 pattern:$0x73625140] %v2459_v7 }
 0x5ac   :  { %3996 = vst.sshfl [vmem:[#allocation18 + $0x21] sm:$0x1 pattern:$0x73625140] %v2458_v45  ;;  %4807 = vmatprep.subr.bf16.mxu1 %v6572_v22  ;;  %v1662_v45 = vadd.f32 %v7706_v42, %v6907_v5 }
 0x5ad   :  { %v2488_v16 = vrot.slane %v2460_v21, %v7067_v30  ;;  %v2490_v26 = vcombine.high %v2474_v13, %v2474_v13  ;;  %v2491_v9 = vcombine.high %v2481_v11, %v2481_v11  ;;  %2503 = vst [vmem:[#allocation18 + $0x11] sm:$0x1] %v2489_v6  ;;  %3997 = vst.sshfl [vmem:[#allocation18 + $0x29] sm:$0x1 pattern:$0x73625140] %v2460_v21 }
 0x5ae   :  { %4809 = vmatpush1.bf16.msra.mxu1 %v6580_v38  ;;  %v1695_v36 = vmax.f32 %v1662_v45, 0.0  ;;  %v2022_v13 = vadd.f32 %v7015_v25, %v7062_v46 }
 0x5af   :  { %v2492_v1 = vcombine.high %v2488_v16, %v2488_v16  ;;  %2504 = vst [vmem:[#allocation18 + $0x19] sm:$0x1] %v2491_v9  ;;  %2507 = vst [vmem:[#allocation18 + $0x31] sm:$0x1] %v2490_v26  ;;  %4811 = vmatprep.subr.bf16.mxu1 %v6591_v63 }
 0x5b0   :  { %v1711_v21 = vsub.f32 0.0, %v1695_v36 }
 0x5b1   :  { %2508 = vst [vmem:[#allocation18 + $0x39] sm:$0x1] %v2492_v1 }
 0x5b2   :  { %4813 = vmatpush1.bf16.msra.mxu1 %v6655_v59  ;;  %v1734_v26 = vmul.f32 1.442695, %v1711_v21 }
 0x5b3   :  { %4815 = vmatprep.subr.bf16.mxu1 %v6668_v8 }
 0x5b6   :  { %4817 = vmatpush1.bf16.msra.mxu1 %v6681_v32 }
 0x5b7   :  { %4819 = vmatprep.subr.bf16.mxu1 %v6693_v48 }
 0x5ba   :  { %4821 = vmatpush1.bf16.msra.mxu1 %v6707_v0 }
 0x5bb   :  { %4823 = vmatprep.subr.bf16.mxu1 %v6718_v40 }
 0x5be   :  { %4825 = vmatpush1.bf16.msra.mxu1 %v6747_v57 }
 0x5bf   :  { %4827 = vmatprep.subr.bf16.mxu1 %v6752_v14 }
 0x5c2   :  { %4829 = vmatpush1.bf16.msra.mxu1 %v6772_v12 }
 0x5c3   :  { %4831 = vmatprep.subr.bf16.mxu1 %v6817_v52 }
 0x5c6   :  { %4833 = vmatpush1.bf16.msra.mxu1 %v6850_v47 }
 0x5c7   :  { %4859 = vmatprep.subr.bf16.mxu1 %v6425_v34 }
 0x67c   :  { %v2576_v44 = vpop.f32.mrb[4].mxu1 }
 0x67d   :  { %v2578_v55 = vpop.f32.mrb[5].mxu1  ;;  %v5086_v39 = vadd.f32 %v2576_v44, %v7056_v43 }
 0x67e   :  { %v5087_v2 = vadd.f32 %v2578_v55, %v7032_v24 }
 0x67f   :  { %v3998_v60 = vmul.f32 -1.442695, %v5086_v39 }
 0x680   :  { %v3999_v20 = vmul.f32 -1.442695, %v5087_v2 }
 0x682   :  { %5175 = vpow2.f32 %v3999_v20 }
 0x68c   :  { %v5176_v37 = vpop.eup %5175 }
 0x68d   :  { %v2592_v19 = vadd.f32 1.0, %v5176_v37 }
 0x68f   :  { %5177 = vrcp.f32 %v2592_v19 }
 0x690   :  { %5179 = vpow2.f32 %v3998_v60 }
 0x699   :  { %v5178_v29 = vpop.eup %5177 }
 0x69a   :  { %v2595_v4 = vmul.f32 %v5178_v29, %v7123_v41  ;;  %v5180_v33 = vpop.eup %5179 }
 0x69b   :  { %v2585_v7 = vadd.f32 1.0, %v5180_v33 }
 0x69c   :  { %4329 = vmatmul.mubr.f32.vlgmr.msra.gmra.mrb[36].mxu0 %v2595_v4 }
 0x69d   :  { %4836 = vmatpush3.bf16.msra.mxu0 %v6977_v54  ;;  %4363 = vmatprep.mubr.msk.f32.mxu0 %vm5526_vm8, %v7700_v49  ;;  %5181 = vrcp.f32 %v2585_v7 }
 0x69e   :  { %4837 = vmatprep.subr.bf16.mxu0 %v5525_v3 }
 0x6a1   :  { %4839 = vmatpush3.bf16.msra.mxu0 %v6981_v15 }
 0x6a2   :  { %4840 = vmatprep.subr.bf16.mxu0 %v5525_v3 }
 0x6a5   :  { %4842 = vmatpush3.bf16.msra.mxu0 %v6985_v51 }
 0x6a6   :  { %4843 = vmatprep.subr.bf16.mxu0 %v5525_v3 }
 0x6a7   :  { %v5182_v9 = vpop.eup %5181 }
 0x6a8   :  { %v2668_v1 = vsub.f32 1.0, %v5182_v9 }
 0x6a9   :  { %4845 = vmatpush3.bf16.msra.mxu0 %v6989_v62 }
 0x6aa   :  { %4846 = vmatprep.subr.bf16.mxu0 %v5525_v3  ;;  %v2669_v2 = vmul.f32 %v2668_v1, %v7123_v41 }
 0x6ad   :  { %4848 = vmatpush3.bf16.msra.mxu0 %v6993_v23 }
 0x6ae   :  { %4849 = vmatprep.subr.bf16.mxu0 %v5525_v3 }
 0x6b1   :  { %4851 = vmatpush3.bf16.msra.mxu0 %v6997_v31 }
 0x6b2   :  { %4852 = vmatprep.subr.bf16.mxu0 %v5525_v3 }
 0x6b5   :  { %4854 = vmatpush3.bf16.msra.mxu0 %v7001_v10 }
 0x6b6   :  { %4855 = vmatprep.subr.bf16.mxu0 %v5525_v3 }
 0x6b9   :  { %4857 = vmatpush3.bf16.msra.mxu0 %v7005_v27 }
 0x6ba   :  { %4890 = vmatprep.subr.bf16.mxu0 %v5525_v3 }
 0x76f   :  { %v2662_v11 = vpop.f32.mrb[36].mxu0 }
 0x770   :  { %v2666_v6 = vadd.f32 %v2662_v11, %v2022_v13  ;;  %v4330_v16 = vpop.f32.mrb[37].mxu0 }
 0x772   :  { %5183 = vtanh.f32 %v2666_v6 }
 0x773   :  { %5185 = vpow2.f32 %v1734_v26 }
 0x77c   :  { %v5184_v44 = vpop.eup %5183 }
 0x77d   :  { %v2670_v55 = vmul.f32 %v5184_v44, %v5182_v9  ;;  %v5186_v37 = vpop.eup %5185 }
 0x77f   :  { %v2671_v20 = vadd.f32 %v2670_v55, %v2669_v2 }
 0x781   :  { %v2673_v19 = vcombine.high %v2671_v20, %v2671_v20  ;;  %v2680_v29 = vrot.slane %v2671_v20, %v7067_v30  ;;  %v7175_v4 = vmul.f32 %v5186_v37, %v2671_v20 }
 0x783   :  { %v2687_v25 = vrot.slane %v2673_v19, %v7067_v30  ;;  %v2688_v39 = vcombine.high %v2680_v29, %v2680_v29  ;;  %v2696_v60 = vrot.slane %v2680_v29, %v7067_v30  ;;  %4000 = vst.sshfl [vmem:[#allocation18 + $0x2] sm:$0x1 pattern:$0x73625140] %v2680_v29  ;;  %2804 = vmatmul.mubr.f32.vlgmr.msra.gmra.mrb[6].mxu1 %v7175_v4  ;;  %v7707_v19 = vld [vmem:[#allocation38_spill] sm:$0xff] }
 0x784   :  { %4861 = vmatpush1.bf16.msra.mxu1 %v6566_v58  ;;  %3032 = vmatprep.mubr.f32.mxu1 %v7700_v49  ;;  %v1668_v29 = vadd.f32 %v7707_v19, %v6907_v5 }
 0x785   :  { %v2689_v41 = vcombine.high %v2687_v25, %v2687_v25  ;;  %v2703_v33 = vrot.slane %v2687_v25, %v7067_v30  ;;  %v2710_v42 = vrot.slane %v2688_v39, %v7067_v30  ;;  %v2718_v45 = vcombine.high %v2696_v60, %v2696_v60  ;;  %4001 = vst.sshfl [vmem:[#allocation18 + $0xa] sm:$0x1 pattern:$0x73625140] %v2688_v39 }
 0x786   :  { %4002 = vst.sshfl [vmem:[#allocation18 + $0x22] sm:$0x1 pattern:$0x73625140] %v2687_v25  ;;  %4863 = vmatprep.subr.bf16.mxu1 %v6572_v22  ;;  %v1697_v39 = vmax.f32 %v1668_v29, 0.0 }
 0x787   :  { %v2717_v7 = vrot.slane %v2689_v41, %v7067_v30  ;;  %v2719_v36 = vcombine.high %v2703_v33, %v2703_v33  ;;  %v2720_v21 = vcombine.high %v2710_v42, %v2710_v42  ;;  %2732 = vst [vmem:[#allocation18 + $0x12] sm:$0x1] %v2718_v45  ;;  %4003 = vst.sshfl [vmem:[#allocation18 + $0x2a] sm:$0x1 pattern:$0x73625140] %v2689_v41 }
 0x788   :  { %4865 = vmatpush1.bf16.msra.mxu1 %v6580_v38  ;;  %v1713_v60 = vsub.f32 0.0, %v1697_v39  ;;  %v2027_v41 = vadd.f32 %v7017_v17, %v7062_v46 }
 0x789   :  { %v2721_v13 = vcombine.high %v2717_v7, %v2717_v7  ;;  %2733 = vst [vmem:[#allocation18 + $0x1a] sm:$0x1] %v2720_v21  ;;  %2736 = vst [vmem:[#allocation18 + $0x32] sm:$0x1] %v2719_v36  ;;  %4867 = vmatprep.subr.bf16.mxu1 %v6591_v63 }
 0x78a   :  { %v1738_v7 = vmul.f32 1.442695, %v1713_v60 }
 0x78b   :  { %2737 = vst [vmem:[#allocation18 + $0x3a] sm:$0x1] %v2721_v13 }
 0x78c   :  { %4869 = vmatpush1.bf16.msra.mxu1 %v6655_v59 }
 0x78d   :  { %4871 = vmatprep.subr.bf16.mxu1 %v6668_v8 }
 0x790   :  { %4873 = vmatpush1.bf16.msra.mxu1 %v6681_v32 }
 0x791   :  { %4875 = vmatprep.subr.bf16.mxu1 %v6693_v48 }
 0x794   :  { %4877 = vmatpush1.bf16.msra.mxu1 %v6707_v0 }
 0x795   :  { %4879 = vmatprep.subr.bf16.mxu1 %v6718_v40 }
 0x798   :  { %4881 = vmatpush1.bf16.msra.mxu1 %v6747_v57 }
 0x799   :  { %4883 = vmatprep.subr.bf16.mxu1 %v6752_v14 }
 0x79c   :  { %4885 = vmatpush1.bf16.msra.mxu1 %v6772_v12 }
 0x79d   :  { %4887 = vmatprep.subr.bf16.mxu1 %v6817_v52 }
 0x7a0   :  { %4889 = vmatpush1.bf16.msra.mxu1 %v6850_v47 }
 0x7a1   :  { %4915 = vmatprep.subr.bf16.mxu1 %v6425_v34 }
 0x856   :  { %v2805_v11 = vpop.f32.mrb[6].mxu1 }
 0x857   :  { %v2807_v6 = vpop.f32.mrb[7].mxu1  ;;  %v5088_v2 = vadd.f32 %v2805_v11, %v7056_v43 }
 0x858   :  { %v5089_v16 = vadd.f32 %v2807_v6, %v7032_v24 }
 0x859   :  { %v4004_v20 = vmul.f32 -1.442695, %v5088_v2 }
 0x85a   :  { %v4005_v26 = vmul.f32 -1.442695, %v5089_v16 }
 0x85c   :  { %5187 = vpow2.f32 %v4005_v26 }
 0x866   :  { %v5188_v9 = vpop.eup %5187 }
 0x867   :  { %v2821_v1 = vadd.f32 1.0, %v5188_v9 }
 0x869   :  { %5189 = vrcp.f32 %v2821_v1 }
 0x86a   :  { %5191 = vpow2.f32 %v4004_v20 }
 0x873   :  { %v5190_v44 = vpop.eup %5189 }
 0x874   :  { %v2824_v55 = vmul.f32 %v5190_v44, %v7175_v4  ;;  %v5192_v37 = vpop.eup %5191 }
 0x875   :  { %v2814_v25 = vadd.f32 1.0, %v5192_v37 }
 0x876   :  { %4364 = vmatmul.mubr.f32.vlgmr.msra.gmra.mrb[38].mxu0 %v2824_v55 }
 0x877   :  { %4892 = vmatpush3.bf16.msra.mxu0 %v6977_v54  ;;  %4398 = vmatprep.mubr.msk.f32.mxu0 %vm5526_vm8, %v7700_v49  ;;  %5193 = vrcp.f32 %v2814_v25 }
 0x878   :  { %4893 = vmatprep.subr.bf16.mxu0 %v5525_v3 }
 0x87b   :  { %4895 = vmatpush3.bf16.msra.mxu0 %v6981_v15 }
 0x87c   :  { %4896 = vmatprep.subr.bf16.mxu0 %v5525_v3 }
 0x87f   :  { %4898 = vmatpush3.bf16.msra.mxu0 %v6985_v51 }
 0x880   :  { %4899 = vmatprep.subr.bf16.mxu0 %v5525_v3 }
 0x881   :  { %v5194_v36 = vpop.eup %5193 }
 0x882   :  { %v2897_v21 = vsub.f32 1.0, %v5194_v36 }
 0x883   :  { %4901 = vmatpush3.bf16.msra.mxu0 %v6989_v62 }
 0x884   :  { %4902 = vmatprep.subr.bf16.mxu0 %v5525_v3  ;;  %v2898_v6 = vmul.f32 %v2897_v21, %v7175_v4 }
 0x887   :  { %4904 = vmatpush3.bf16.msra.mxu0 %v6993_v23 }
 0x888   :  { %4905 = vmatprep.subr.bf16.mxu0 %v5525_v3 }
 0x88b   :  { %4907 = vmatpush3.bf16.msra.mxu0 %v6997_v31 }
 0x88c   :  { %4908 = vmatprep.subr.bf16.mxu0 %v5525_v3 }
 0x88f   :  { %4910 = vmatpush3.bf16.msra.mxu0 %v7001_v10 }
 0x890   :  { %4911 = vmatprep.subr.bf16.mxu0 %v5525_v3 }
 0x893   :  { %4913 = vmatpush3.bf16.msra.mxu0 %v7005_v27 }
 0x894   :  { %4946 = vmatprep.subr.bf16.mxu0 %v5525_v3 }
 0x949   :  { %v2891_v33 = vpop.f32.mrb[38].mxu0 }
 0x94a   :  { %v2895_v42 = vadd.f32 %v2891_v33, %v2027_v41  ;;  %v4365_v45 = vpop.f32.mrb[39].mxu0 }
 0x94c   :  { %5195 = vtanh.f32 %v2895_v42 }
 0x94d   :  { %5197 = vpow2.f32 %v1738_v7 }
 0x956   :  { %v5196_v13 = vpop.eup %5195 }
 0x957   :  { %v2899_v11 = vmul.f32 %v5196_v13, %v5194_v36  ;;  %v5198_v26 = vpop.eup %5197 }
 0x959   :  { %v2900_v16 = vadd.f32 %v2899_v11, %v2898_v6 }
 0x95b   :  { %v2902_v9 = vcombine.high %v2900_v16, %v2900_v16  ;;  %v2909_v1 = vrot.slane %v2900_v16, %v7067_v30  ;;  %v7227_v44 = vmul.f32 %v5198_v26, %v2900_v16  ;;  %v1674_v26 = vadd.f32 %v6835_v35, %v6907_v5 }
 0x95d   :  { %v2916_v17 = vrot.slane %v2902_v9, %v7067_v30  ;;  %v2917_v55 = vcombine.high %v2909_v1, %v2909_v1  ;;  %v2925_v2 = vrot.slane %v2909_v1, %v7067_v30  ;;  %4006 = vst.sshfl [vmem:[#allocation18 + $0x3] sm:$0x1 pattern:$0x73625140] %v2909_v1  ;;  %3033 = vmatmul.mubr.f32.vlgmr.msra.gmra.mrb[8].mxu1 %v7227_v44  ;;  %v1699_v1 = vmax.f32 %v1674_v26, 0.0 }
 0x95e   :  { %4917 = vmatpush1.bf16.msra.mxu1 %v6566_v58  ;;  %3261 = vmatprep.mubr.f32.mxu1 %v7700_v49 }
 0x95f   :  { %v2918_v4 = vcombine.high %v2916_v17, %v2916_v17  ;;  %v2932_v20 = vrot.slane %v2916_v17, %v7067_v30  ;;  %v2939_v37 = vrot.slane %v2917_v55, %v7067_v30  ;;  %v2947_v19 = vcombine.high %v2925_v2, %v2925_v2  ;;  %4007 = vst.sshfl [vmem:[#allocation18 + $0xb] sm:$0x1 pattern:$0x73625140] %v2917_v55 }
 0x960   :  { %4008 = vst.sshfl [vmem:[#allocation18 + $0x23] sm:$0x1 pattern:$0x73625140] %v2916_v17  ;;  %4919 = vmatprep.subr.bf16.mxu1 %v6572_v22  ;;  %v1715_v17 = vsub.f32 0.0, %v1699_v1  ;;  %v2032_v55 = vadd.f32 %v7019_v18, %v7062_v46 }
 0x961   :  { %v2946_v29 = vrot.slane %v2918_v4, %v7067_v30  ;;  %v2948_v25 = vcombine.high %v2932_v20, %v2932_v20  ;;  %v2949_v39 = vcombine.high %v2939_v37, %v2939_v37  ;;  %2961 = vst [vmem:[#allocation18 + $0x13] sm:$0x1] %v2947_v19  ;;  %4009 = vst.sshfl [vmem:[#allocation18 + $0x2b] sm:$0x1 pattern:$0x73625140] %v2918_v4 }
 0x962   :  { %4921 = vmatpush1.bf16.msra.mxu1 %v6580_v38  ;;  %v1742_v37 = vmul.f32 1.442695, %v1715_v17 }
 0x963   :  { %v2950_v60 = vcombine.high %v2946_v29, %v2946_v29  ;;  %2962 = vst [vmem:[#allocation18 + $0x1b] sm:$0x1] %v2949_v39  ;;  %2965 = vst [vmem:[#allocation18 + $0x33] sm:$0x1] %v2948_v25  ;;  %4923 = vmatprep.subr.bf16.mxu1 %v6591_v63 }
 0x965   :  { %2966 = vst [vmem:[#allocation18 + $0x3b] sm:$0x1] %v2950_v60 }
 0x966   :  { %4925 = vmatpush1.bf16.msra.mxu1 %v6655_v59 }
 0x967   :  { %4927 = vmatprep.subr.bf16.mxu1 %v6668_v8 }
 0x96a   :  { %4929 = vmatpush1.bf16.msra.mxu1 %v6681_v32 }
 0x96b   :  { %4931 = vmatprep.subr.bf16.mxu1 %v6693_v48 }
 0x96e   :  { %4933 = vmatpush1.bf16.msra.mxu1 %v6707_v0 }
 0x96f   :  { %4935 = vmatprep.subr.bf16.mxu1 %v6718_v40 }
 0x972   :  { %4937 = vmatpush1.bf16.msra.mxu1 %v6747_v57 }
 0x973   :  { %4939 = vmatprep.subr.bf16.mxu1 %v6752_v14 }
 0x976   :  { %4941 = vmatpush1.bf16.msra.mxu1 %v6772_v12 }
 0x977   :  { %4943 = vmatprep.subr.bf16.mxu1 %v6817_v52 }
 0x97a   :  { %4945 = vmatpush1.bf16.msra.mxu1 %v6850_v47 }
 0x97b   :  { %4971 = vmatprep.subr.bf16.mxu1 %v6425_v34 }
 0xa30   :  { %v3034_v41 = vpop.f32.mrb[8].mxu1 }
 0xa31   :  { %v3036_v33 = vpop.f32.mrb[9].mxu1  ;;  %v5090_v11 = vadd.f32 %v3034_v41, %v7056_v43 }
 0xa32   :  { %v5091_v42 = vadd.f32 %v3036_v33, %v7032_v24 }
 0xa33   :  { %v4010_v6 = vmul.f32 -1.442695, %v5090_v11 }
 0xa34   :  { %v4011_v45 = vmul.f32 -1.442695, %v5091_v42 }
 0xa36   :  { %5199 = vpow2.f32 %v4011_v45 }
 0xa40   :  { %v5200_v7 = vpop.eup %5199 }
 0xa41   :  { %v3050_v36 = vadd.f32 1.0, %v5200_v7 }
 0xa43   :  { %5201 = vrcp.f32 %v3050_v36 }
 0xa44   :  { %5203 = vpow2.f32 %v4010_v6 }
 0xa4d   :  { %v5202_v21 = vpop.eup %5201 }
 0xa4e   :  { %v3053_v13 = vmul.f32 %v5202_v21, %v7227_v44  ;;  %v5204_v16 = vpop.eup %5203 }
 0xa4f   :  { %v3043_v9 = vadd.f32 1.0, %v5204_v16 }
 0xa50   :  { %4399 = vmatmul.mubr.f32.vlgmr.msra.gmra.mrb[40].mxu0 %v3053_v13 }
 0xa51   :  { %4948 = vmatpush3.bf16.msra.mxu0 %v6977_v54  ;;  %4433 = vmatprep.mubr.msk.f32.mxu0 %vm5526_vm8, %v7700_v49  ;;  %5205 = vrcp.f32 %v3043_v9 }
 0xa52   :  { %4949 = vmatprep.subr.bf16.mxu0 %v5525_v3 }
 0xa55   :  { %4951 = vmatpush3.bf16.msra.mxu0 %v6981_v15 }
 0xa56   :  { %4952 = vmatprep.subr.bf16.mxu0 %v5525_v3 }
 0xa59   :  { %4954 = vmatpush3.bf16.msra.mxu0 %v6985_v51 }
 0xa5a   :  { %4955 = vmatprep.subr.bf16.mxu0 %v5525_v3 }
 0xa5b   :  { %v5206_v19 = vpop.eup %5205 }
 0xa5c   :  { %v3126_v29 = vsub.f32 1.0, %v5206_v19 }
 0xa5d   :  { %4957 = vmatpush3.bf16.msra.mxu0 %v6989_v62 }
 0xa5e   :  { %4958 = vmatprep.subr.bf16.mxu0 %v5525_v3  ;;  %v3127_v60 = vmul.f32 %v3126_v29, %v7227_v44 }
 0xa61   :  { %4960 = vmatpush3.bf16.msra.mxu0 %v6993_v23 }
 0xa62   :  { %4961 = vmatprep.subr.bf16.mxu0 %v5525_v3 }
 0xa65   :  { %4963 = vmatpush3.bf16.msra.mxu0 %v6997_v31 }
 0xa66   :  { %4964 = vmatprep.subr.bf16.mxu0 %v5525_v3 }
 0xa69   :  { %4966 = vmatpush3.bf16.msra.mxu0 %v7001_v10 }
 0xa6a   :  { %4967 = vmatprep.subr.bf16.mxu0 %v5525_v3 }
 0xa6d   :  { %4969 = vmatpush3.bf16.msra.mxu0 %v7005_v27 }
 0xa6e   :  { %5002 = vmatprep.subr.bf16.mxu0 %v5525_v3 }
 0xb23   :  { %v3120_v2 = vpop.f32.mrb[40].mxu0 }
 0xb24   :  { %v3124_v4 = vadd.f32 %v3120_v2, %v2032_v55  ;;  %v4400_v20 = vpop.f32.mrb[41].mxu0 }
 0xb26   :  { %5207 = vtanh.f32 %v3124_v4 }
 0xb27   :  { %5209 = vpow2.f32 %v1742_v37 }
 0xb30   :  { %v5208_v25 = vpop.eup %5207 }
 0xb31   :  { %v3128_v39 = vmul.f32 %v5208_v25, %v5206_v19  ;;  %v5210_v41 = vpop.eup %5209 }
 0xb33   :  { %v3129_v35 = vadd.f32 %v3128_v39, %v3127_v60  ;;  %v1680_v39 = vadd.f32 %v6873_v53, %v6907_v5 }
 0xb35   :  { %v3131_v33 = vcombine.high %v3129_v35, %v3129_v35  ;;  %v3138_v42 = vrot.slane %v3129_v35, %v7067_v30  ;;  %v7279_v45 = vmul.f32 %v5210_v41, %v3129_v35  ;;  %v1701_v35 = vmax.f32 %v1680_v39, 0.0 }
 0xb37   :  { %v3145_v18 = vrot.slane %v3131_v33, %v7067_v30  ;;  %v3146_v7 = vcombine.high %v3138_v42, %v3138_v42  ;;  %v3154_v36 = vrot.slane %v3138_v42, %v7067_v30  ;;  %4012 = vst.sshfl [vmem:[#allocation18 + $0x4] sm:$0x1 pattern:$0x73625140] %v3138_v42  ;;  %3262 = vmatmul.mubr.f32.vlgmr.msra.gmra.mrb[10].mxu1 %v7279_v45  ;;  %v1717_v41 = vsub.f32 0.0, %v1701_v35 }
 0xb38   :  { %4973 = vmatpush1.bf16.msra.mxu1 %v6566_v58  ;;  %3490 = vmatprep.mubr.f32.mxu1 %v7700_v49  ;;  %v2037_v33 = vadd.f32 %v7021_v28, %v7062_v46 }
 0xb39   :  { %v3147_v44 = vcombine.high %v3145_v18, %v3145_v18  ;;  %v3161_v21 = vrot.slane %v3145_v18, %v7067_v30  ;;  %v3168_v13 = vrot.slane %v3146_v7, %v7067_v30  ;;  %v3176_v11 = vcombine.high %v3154_v36, %v3154_v36  ;;  %4013 = vst.sshfl [vmem:[#allocation18 + $0xc] sm:$0x1 pattern:$0x73625140] %v3146_v7 }
 0xb3a   :  { %4014 = vst.sshfl [vmem:[#allocation18 + $0x24] sm:$0x1 pattern:$0x73625140] %v3145_v18  ;;  %4975 = vmatprep.subr.bf16.mxu1 %v6572_v22  ;;  %v1746_v36 = vmul.f32 1.442695, %v1717_v41 }
 0xb3b   :  { %v3175_v6 = vrot.slane %v3147_v44, %v7067_v30  ;;  %v3177_v16 = vcombine.high %v3161_v21, %v3161_v21  ;;  %v3178_v26 = vcombine.high %v3168_v13, %v3168_v13  ;;  %3190 = vst [vmem:[#allocation18 + $0x14] sm:$0x1] %v3176_v11  ;;  %4015 = vst.sshfl [vmem:[#allocation18 + $0x2c] sm:$0x1 pattern:$0x73625140] %v3147_v44 }
 0xb3c   :  { %4977 = vmatpush1.bf16.msra.mxu1 %v6580_v38 }
 0xb3d   :  { %v3179_v9 = vcombine.high %v3175_v6, %v3175_v6  ;;  %3191 = vst [vmem:[#allocation18 + $0x1c] sm:$0x1] %v3178_v26  ;;  %3194 = vst [vmem:[#allocation18 + $0x34] sm:$0x1] %v3177_v16  ;;  %4979 = vmatprep.subr.bf16.mxu1 %v6591_v63 }
 0xb3f   :  { %3195 = vst [vmem:[#allocation18 + $0x3c] sm:$0x1] %v3179_v9 }
 0xb40   :  { %4981 = vmatpush1.bf16.msra.mxu1 %v6655_v59 }
 0xb41   :  { %4983 = vmatprep.subr.bf16.mxu1 %v6668_v8 }
 0xb44   :  { %4985 = vmatpush1.bf16.msra.mxu1 %v6681_v32 }
 0xb45   :  { %4987 = vmatprep.subr.bf16.mxu1 %v6693_v48 }
 0xb48   :  { %4989 = vmatpush1.bf16.msra.mxu1 %v6707_v0 }
 0xb49   :  { %4991 = vmatprep.subr.bf16.mxu1 %v6718_v40 }
 0xb4c   :  { %4993 = vmatpush1.bf16.msra.mxu1 %v6747_v57 }
 0xb4d   :  { %4995 = vmatprep.subr.bf16.mxu1 %v6752_v14 }
 0xb50   :  { %4997 = vmatpush1.bf16.msra.mxu1 %v6772_v12 }
 0xb51   :  { %4999 = vmatprep.subr.bf16.mxu1 %v6817_v52 }
 0xb54   :  { %5001 = vmatpush1.bf16.msra.mxu1 %v6850_v47 }
 0xb55   :  { %5027 = vmatprep.subr.bf16.mxu1 %v6425_v34 }
 0xc0a   :  { %v3263_v1 = vpop.f32.mrb[10].mxu1 }
 0xc0b   :  { %v3265_v17 = vpop.f32.mrb[11].mxu1  ;;  %v5092_v34 = vadd.f32 %v3263_v1, %v7056_v43 }
 0xc0c   :  { %v5093_v55 = vadd.f32 %v3265_v17, %v7032_v24 }
 0xc0d   :  { %v4016_v29 = vmul.f32 -1.442695, %v5092_v34 }
 0xc0e   :  { %v4017_v2 = vmul.f32 -1.442695, %v5093_v55 }
 0xc10   :  { %5211 = vpow2.f32 %v4017_v2 }
 0xc1a   :  { %v5212_v4 = vpop.eup %5211 }
 0xc1b   :  { %v3279_v20 = vadd.f32 1.0, %v5212_v4 }
 0xc1d   :  { %5213 = vrcp.f32 %v3279_v20 }
 0xc1e   :  { %5215 = vpow2.f32 %v4016_v29 }
 0xc27   :  { %v5214_v37 = vpop.eup %5213 }
 0xc28   :  { %v3282_v19 = vmul.f32 %v5214_v37, %v7279_v45  ;;  %v5216_v25 = vpop.eup %5215 }
 0xc29   :  { %v3272_v60 = vadd.f32 1.0, %v5216_v25 }
 0xc2a   :  { %4434 = vmatmul.mubr.f32.vlgmr.msra.gmra.mrb[42].mxu0 %v3282_v19 }
 0xc2b   :  { %5004 = vmatpush3.bf16.msra.mxu0 %v6977_v54  ;;  %4468 = vmatprep.mubr.msk.f32.mxu0 %vm5526_vm8, %v7700_v49  ;;  %5217 = vrcp.f32 %v3272_v60 }
 0xc2c   :  { %5005 = vmatprep.subr.bf16.mxu0 %v5525_v3 }
 0xc2f   :  { %5007 = vmatpush3.bf16.msra.mxu0 %v6981_v15 }
 0xc30   :  { %5008 = vmatprep.subr.bf16.mxu0 %v5525_v3 }
 0xc33   :  { %5010 = vmatpush3.bf16.msra.mxu0 %v6985_v51 }
 0xc34   :  { %5011 = vmatprep.subr.bf16.mxu0 %v5525_v3 }
 0xc35   :  { %v5218_v44 = vpop.eup %5217 }
 0xc36   :  { %v3355_v21 = vsub.f32 1.0, %v5218_v44 }
 0xc37   :  { %5013 = vmatpush3.bf16.msra.mxu0 %v6989_v62 }
 0xc38   :  { %5014 = vmatprep.subr.bf16.mxu0 %v5525_v3  ;;  %v3356_v6 = vmul.f32 %v3355_v21, %v7279_v45 }
 0xc3b   :  { %5016 = vmatpush3.bf16.msra.mxu0 %v6993_v23 }
 0xc3c   :  { %5017 = vmatprep.subr.bf16.mxu0 %v5525_v3 }
 0xc3f   :  { %5019 = vmatpush3.bf16.msra.mxu0 %v6997_v31 }
 0xc40   :  { %5020 = vmatprep.subr.bf16.mxu0 %v5525_v3 }
 0xc43   :  { %5022 = vmatpush3.bf16.msra.mxu0 %v7001_v10 }
 0xc44   :  { %5023 = vmatprep.subr.bf16.mxu0 %v5525_v3 }
 0xc47   :  { %5025 = vmatpush3.bf16.msra.mxu0 %v7005_v27 }
 0xc48   :  { %5058 = vmatprep.subr.bf16.mxu0 %v5525_v3 }
 0xcfd   :  { %v3349_v42 = vpop.f32.mrb[42].mxu0 }
 0xcfe   :  { %v3353_v18 = vadd.f32 %v3349_v42, %v2037_v33  ;;  %v4435_v7 = vpop.f32.mrb[43].mxu0 }
 0xd00   :  { %5219 = vtanh.f32 %v3353_v18 }
 0xd01   :  { %5221 = vpow2.f32 %v1746_v36 }
 0xd0a   :  { %v5220_v13 = vpop.eup %5219 }
 0xd0b   :  { %v3357_v11 = vmul.f32 %v5220_v13, %v5218_v44  ;;  %v5222_v16 = vpop.eup %5221 }
 0xd0d   :  { %v3358_v53 = vadd.f32 %v3357_v11, %v3356_v6 }
 0xd0f   :  { %v3360_v26 = vcombine.high %v3358_v53, %v3358_v53  ;;  %v3367_v9 = vrot.slane %v3358_v53, %v7067_v30  ;;  %v7331_v1 = vmul.f32 %v5222_v16, %v3358_v53 }
 0xd11   :  { %v3374_v28 = vrot.slane %v3360_v26, %v7067_v30  ;;  %v3375_v17 = vcombine.high %v3367_v9, %v3367_v9  ;;  %v3383_v55 = vrot.slane %v3367_v9, %v7067_v30  ;;  %4018 = vst.sshfl [vmem:[#allocation18 + $0x5] sm:$0x1 pattern:$0x73625140] %v3367_v9  ;;  %3491 = vmatmul.mubr.f32.vlgmr.msra.gmra.mrb[12].mxu1 %v7331_v1 }
 0xd12   :  { %5029 = vmatpush1.bf16.msra.mxu1 %v6566_v58  ;;  %3719 = vmatprep.mubr.f32.mxu1 %v7700_v49 }
 0xd13   :  { %v3376_v45 = vcombine.high %v3374_v28, %v3374_v28  ;;  %v3390_v2 = vrot.slane %v3374_v28, %v7067_v30  ;;  %v3397_v4 = vrot.slane %v3375_v17, %v7067_v30  ;;  %v3405_v20 = vcombine.high %v3383_v55, %v3383_v55  ;;  %4019 = vst.sshfl [vmem:[#allocation18 + $0xd] sm:$0x1 pattern:$0x73625140] %v3375_v17 }
 0xd14   :  { %4020 = vst.sshfl [vmem:[#allocation18 + $0x25] sm:$0x1 pattern:$0x73625140] %v3374_v28  ;;  %5031 = vmatprep.subr.bf16.mxu1 %v6572_v22 }
 0xd15   :  { %v3404_v37 = vrot.slane %v3376_v45, %v7067_v30  ;;  %v3406_v19 = vcombine.high %v3390_v2, %v3390_v2  ;;  %v3407_v34 = vcombine.high %v3397_v4, %v3397_v4  ;;  %3419 = vst [vmem:[#allocation18 + $0x15] sm:$0x1] %v3405_v20  ;;  %4021 = vst.sshfl [vmem:[#allocation18 + $0x2d] sm:$0x1 pattern:$0x73625140] %v3376_v45 }
 0xd16   :  { %5033 = vmatpush1.bf16.msra.mxu1 %v6580_v38  ;;  %v2047_v4 = vadd.f32 %v7028_v56, %v7062_v46 }
 0xd17   :  { %v3408_v58 = vcombine.high %v3404_v37, %v3404_v37  ;;  %3420 = vst [vmem:[#allocation18 + $0x1d] sm:$0x1] %v3407_v34  ;;  %3423 = vst [vmem:[#allocation18 + $0x35] sm:$0x1] %v3406_v19  ;;  %5035 = vmatprep.subr.bf16.mxu1 %v6591_v63 }
 0xd19   :  { %3424 = vst [vmem:[#allocation18 + $0x3d] sm:$0x1] %v3408_v58 }
 0xd1a   :  { %5037 = vmatpush1.bf16.msra.mxu1 %v6655_v59 }
 0xd1b   :  { %5039 = vmatprep.subr.bf16.mxu1 %v6668_v8 }
 0xd1e   :  { %5041 = vmatpush1.bf16.msra.mxu1 %v6681_v32 }
 0xd1f   :  { %5043 = vmatprep.subr.bf16.mxu1 %v6693_v48 }
 0xd22   :  { %5045 = vmatpush1.bf16.msra.mxu1 %v6707_v0 }
 0xd23   :  { %5047 = vmatprep.subr.bf16.mxu1 %v6718_v40 }
 0xd26   :  { %5049 = vmatpush1.bf16.msra.mxu1 %v6747_v57 }
 0xd27   :  { %5051 = vmatprep.subr.bf16.mxu1 %v6752_v14 }
 0xd2a   :  { %5053 = vmatpush1.bf16.msra.mxu1 %v6772_v12  ;;  %v1686_v12 = vadd.f32 %v6917_v61, %v6907_v5 }
 0xd2b   :  { %5055 = vmatprep.subr.bf16.mxu1 %v6817_v52 }
 0xd2e   :  { %5057 = vmatpush1.bf16.msra.mxu1 %v6850_v47  ;;  %v1703_v47 = vmax.f32 %v1686_v12, 0.0 }
 0xde4   :  { %v3492_v22 = vpop.f32.mrb[12].mxu1 }
 0xde5   :  { %v3494_v38 = vpop.f32.mrb[13].mxu1  ;;  %v5094_v40 = vadd.f32 %v3492_v22, %v7056_v43 }
 0xde6   :  { %v5095_v63 = vadd.f32 %v3494_v38, %v7032_v24 }
 0xde7   :  { %v4022_v57 = vmul.f32 -1.442695, %v5094_v40 }
 0xde8   :  { %v4023_v59 = vmul.f32 -1.442695, %v5095_v63 }
 0xdea   :  { %5223 = vpow2.f32 %v4023_v59 }
 0xdf4   :  { %v5224_v8 = vpop.eup %5223 }
 0xdf5   :  { %v3508_v32 = vadd.f32 1.0, %v5224_v8 }
 0xdf7   :  { %5225 = vrcp.f32 %v3508_v32 }
 0xdf8   :  { %5227 = vpow2.f32 %v4022_v57 }
 0xe01   :  { %v5226_v48 = vpop.eup %5225 }
 0xe02   :  { %v3511_v0 = vmul.f32 %v5226_v48, %v7331_v1  ;;  %v5228_v14 = vpop.eup %5227 }
 0xe03   :  { %v3501_v52 = vadd.f32 1.0, %v5228_v14 }
 0xe04   :  { %4469 = vmatmul.mubr.f32.vlgmr.msra.gmra.mrb[44].mxu0 %v3511_v0 }
 0xe05   :  { %5060 = vmatpush3.bf16.msra.mxu0 %v6977_v54  ;;  %4503 = vmatprep.mubr.msk.f32.mxu0 %vm5526_vm8, %v7700_v49  ;;  %5229 = vrcp.f32 %v3501_v52  ;;  %v1719_v49 = vsub.f32 0.0, %v1703_v47  ;;  %v2042_v54 = vadd.f32 %v7023_v50, %v7062_v46 }
 0xe06   :  { %5061 = vmatprep.subr.bf16.mxu0 %v5525_v3 }
 0xe09   :  { %5063 = vmatpush3.bf16.msra.mxu0 %v6981_v15 }
 0xe0a   :  { %5064 = vmatprep.subr.bf16.mxu0 %v5525_v3 }
 0xe0d   :  { %5066 = vmatpush3.bf16.msra.mxu0 %v6985_v51 }
 0xe0e   :  { %5067 = vmatprep.subr.bf16.mxu0 %v5525_v3 }
 0xe11   :  { %5069 = vmatpush3.bf16.msra.mxu0 %v6989_v62  ;;  %v1750_v62 = vmul.f32 1.442695, %v1719_v49 }
 0xe12   :  { %5070 = vmatprep.subr.bf16.mxu0 %v5525_v3 }
 0xe15   :  { %5072 = vmatpush3.bf16.msra.mxu0 %v6993_v23  ;;  %v5230_v23 = vpop.eup %5229 }
 0xe16   :  { %5073 = vmatprep.subr.bf16.mxu0 %v5525_v3 }
 0xe19   :  { %5075 = vmatpush3.bf16.msra.mxu0 %v6997_v31  ;;  %v3584_v31 = vsub.f32 1.0, %v5230_v23 }
 0xe1a   :  { %5076 = vmatprep.subr.bf16.mxu0 %v5525_v3 }
 0xe1b   :  { %v3585_v29 = vmul.f32 %v3584_v31, %v7331_v1 }
 0xe1d   :  { %5078 = vmatpush3.bf16.msra.mxu0 %v7001_v10 }
 0xe1e   :  { %5079 = vmatprep.subr.bf16.mxu0 %v5525_v3 }
 0xe21   :  { %5081 = vmatpush3.bf16.msra.mxu0 %v7005_v27 }
 0xed7   :  { %v3578_v15 = vpop.f32.mrb[44].mxu0 }
 0xed8   :  { %v3582_v51 = vadd.f32 %v3578_v15, %v2042_v54  ;;  %v4470_v3 = vpop.f32.mrb[45].mxu0 }
 0xeda   :  { %5231 = vtanh.f32 %v3582_v51 }
 0xedb   :  { %5233 = vpow2.f32 %v1750_v62 }
 0xee4   :  { %v5232_v10 = vpop.eup %5231 }
 0xee5   :  { %v3586_v27 = vmul.f32 %v5232_v10, %v5230_v23  ;;  %v5234_v61 = vpop.eup %5233 }
 0xee7   :  { %v3587_v5 = vadd.f32 %v3586_v27, %v3585_v29 }
 0xee9   :  { %v3589_v25 = vcombine.high %v3587_v5, %v3587_v5  ;;  %v3596_v39 = vrot.slane %v3587_v5, %v7067_v30  ;;  %v3654_v60 = vmul.f32 %v5234_v61, %v3587_v5 }
 0xeeb   :  { %v3603_v50 = vrot.slane %v3589_v25, %v7067_v30  ;;  %v3604_v35 = vcombine.high %v3596_v39, %v3596_v39  ;;  %v3612_v41 = vrot.slane %v3596_v39, %v7067_v30  ;;  %4024 = vst.sshfl [vmem:[#allocation18 + $0x6] sm:$0x1 pattern:$0x73625140] %v3596_v39  ;;  %3720 = vmatmul.mubr.f32.vlgmr.msra.gmra.mrb[14].mxu1 %v3654_v60 }
 0xeed   :  { %v3605_v33 = vcombine.high %v3603_v50, %v3603_v50  ;;  %v3619_v42 = vrot.slane %v3603_v50, %v7067_v30  ;;  %v3626_v18 = vrot.slane %v3604_v35, %v7067_v30  ;;  %v3634_v7 = vcombine.high %v3612_v41, %v3612_v41  ;;  %4025 = vst.sshfl [vmem:[#allocation18 + $0xe] sm:$0x1 pattern:$0x73625140] %v3604_v35 }
 0xeee   :  { %4026 = vst.sshfl [vmem:[#allocation18 + $0x26] sm:$0x1 pattern:$0x73625140] %v3603_v50 }
 0xeef   :  { %v3633_v36 = vrot.slane %v3605_v33, %v7067_v30  ;;  %v3635_v44 = vcombine.high %v3619_v42, %v3619_v42  ;;  %v3636_v21 = vcombine.high %v3626_v18, %v3626_v18  ;;  %3648 = vst [vmem:[#allocation18 + $0x16] sm:$0x1] %v3634_v7  ;;  %4027 = vst.sshfl [vmem:[#allocation18 + $0x2e] sm:$0x1 pattern:$0x73625140] %v3605_v33 }
 0xef1   :  { %v3637_v13 = vcombine.high %v3633_v36, %v3633_v36  ;;  %3649 = vst [vmem:[#allocation18 + $0x1e] sm:$0x1] %v3636_v21  ;;  %3652 = vst [vmem:[#allocation18 + $0x36] sm:$0x1] %v3635_v44 }
 0xef3   :  { %3653 = vst [vmem:[#allocation18 + $0x3e] sm:$0x1] %v3637_v13 }
 0xfbe   :  { %v3721_v11 = vpop.f32.mrb[14].mxu1 }
 0xfbf   :  { %v3723_v6 = vpop.f32.mrb[15].mxu1  ;;  %v5096_v17 = vadd.f32 %v3721_v11, %v7056_v43 }
 0xfc0   :  { %v5097_v53 = vadd.f32 %v3723_v6, %v7032_v24 }
 0xfc1   :  { %v4028_v55 = vmul.f32 -1.442695, %v5096_v17 }
 0xfc2   :  { %v4029_v16 = vmul.f32 -1.442695, %v5097_v53 }
 0xfc4   :  { %5235 = vpow2.f32 %v4029_v16 }
 0xfce   :  { %v5236_v26 = vpop.eup %5235 }
 0xfcf   :  { %v3737_v9 = vadd.f32 1.0, %v5236_v26 }
 0xfd1   :  { %5237 = vrcp.f32 %v3737_v9 }
 0xfd2   :  { %5239 = vpow2.f32 %v4028_v55 }
 0xfdb   :  { %v5238_v1 = vpop.eup %5237 }
 0xfdc   :  { %v3740_v28 = vmul.f32 %v5238_v1, %v3654_v60  ;;  %v5240_v45 = vpop.eup %5239 }
 0xfdd   :  { %v3730_v2 = vadd.f32 1.0, %v5240_v45 }
 0xfde   :  { %4504 = vmatmul.mubr.f32.vlgmr.msra.gmra.mrb[46].mxu0 %v3740_v28 }
 0xfdf   :  { %5241 = vrcp.f32 %v3730_v2 }
 0xfe9   :  { %v5242_v19 = vpop.eup %5241 }
 0xfea   :  { %v3813_v34 = vsub.f32 1.0, %v5242_v19 }
 0xfec   :  { %v3814_v22 = vmul.f32 %v3813_v34, %v3654_v60 }
0x10b1   :  { %v3807_v20 = vpop.f32.mrb[46].mxu0 }
0x10b2   :  { %v3811_v24 = vadd.f32 %v3807_v20, %v2047_v4  ;;  %v4505_v37 = vpop.f32.mrb[47].mxu0 }
0x10b4   :  { %5243 = vtanh.f32 %v3811_v24 }
0x10be   :  { %v5244_v58 = vpop.eup %5243 }
0x10bf   :  { %v3815_v38 = vmul.f32 %v5244_v58, %v5242_v19 }
0x10c1   :  { %v3816_v43 = vadd.f32 %v3815_v38, %v3814_v22 }
0x10c3   :  { %v3818_v63 = vcombine.high %v3816_v43, %v3816_v43  ;;  %v3825_v59 = vrot.slane %v3816_v43, %v7067_v30  ;;  %3887 = vst [vmem:[#allocation19] sm:$0xff] %v3816_v43 }
0x10c4   :  { %5466 = shalt.err (!%p5463_p4)
}
0x10c5   :  { %s5467_s14 = scalar_lea.hbm %s7433_s10, 128 }
0x10c6   :  { %p5468_p5 = scmp.ne.s32.totalorder %s7433_s10, %s5467_s14  ;;  %p5471_p6 = scmp.lt.u32.totalorder %s5467_s14, %s7433_s10 }
0x10c8   :  { %p5473_p7 = pnand %p5471_p6, %p5468_p5 }
0x10ca   :  { %5476 = shalt.err (!%p5473_p7)
}
0x10cb   :  { %3909 = dma.vmem_to_hbm [thread:$0]  %s3907_s17, 128, %s7433_s10, [#allocation20]   ;;  %v3832_v56 = vrot.slane %v3818_v63, %v7067_v30  ;;  %v3833_v46 = vcombine.high %v3825_v59, %v3825_v59  ;;  %v3841_v8 = vrot.slane %v3825_v59, %v7067_v30  ;;  %4030 = vst.sshfl [vmem:[#allocation18 + $0x7] sm:$0x1 pattern:$0x73625140] %v3825_v59 }
0x10cc   :  { %s5529_s28 = smov [#allocation18]  }
0x10cd   :  { %v3834_v32 = vcombine.high %v3832_v56, %v3832_v56  ;;  %v3848_v48 = vrot.slane %v3832_v56, %v7067_v30  ;;  %v3855_v0 = vrot.slane %v3833_v46, %v7067_v30  ;;  %v3863_v40 = vcombine.high %v3841_v8, %v3841_v8  ;;  %4031 = vst.sshfl [vmem:[#allocation18 + $0xf] sm:$0x1 pattern:$0x73625140] %v3833_v46  ;;  %s3893_s29 = sshll.u32 %s5529_s28, 4  ;;  %s3894_s29 = int_to_ptr.vmem [resolvable:$true] %s3893_s29 }
0x10ce   :  { %4032 = vst.sshfl [vmem:[#allocation18 + $0x27] sm:$0x1 pattern:$0x73625140] %v3832_v56  ;;  %s5477_s10 = scalar_lea.vmem %s3894_s29, 1024  ;;  %p5482_p9 = scmp.lt.s32.totalorder %s3894_s29, %s3894_s29 }
0x10cf   :  { %v3862_v57 = vrot.slane %v3834_v32, %v7067_v30  ;;  %v3864_v14 = vcombine.high %v3848_v48, %v3848_v48  ;;  %v3865_v12 = vcombine.high %v3855_v0, %v3855_v0  ;;  %3877 = vst [vmem:[#allocation18 + $0x17] sm:$0x1] %v3863_v40  ;;  %4033 = vst.sshfl [vmem:[#allocation18 + $0x2f] sm:$0x1 pattern:$0x73625140] %v3834_v32  ;;  %p5478_p8 = scmp.ne.s32.totalorder %s3894_s29, %s5477_s10  ;;  %p5483_p10 = scmp.lt.s32.totalorder %s5477_s10, %s5477_s10 }
0x10d1   :  { %v3866_v52 = vcombine.high %v3862_v57, %v3862_v57  ;;  %3878 = vst [vmem:[#allocation18 + $0x1f] sm:$0x1] %v3865_v12  ;;  %3881 = vst [vmem:[#allocation18 + $0x37] sm:$0x1] %v3864_v14  ;;  %p5484_p11 = por %p5483_p10, %p5482_p9 }
0x10d3   :  { %3882 = vst [vmem:[#allocation18 + $0x3f] sm:$0x1] %v3866_v52  ;;  %p5485_p12 = pnand %p5484_p11, %p5478_p8 }
0x10d5   :  { %5488 = shalt.err (!%p5485_p12)
}
0x10d6   :  { %s5489_s30 = scalar_lea.hbm %s7432_s9, 1024 }
0x10d7   :  { %p5490_p13 = scmp.ne.s32.totalorder %s7432_s9, %s5489_s30  ;;  %p5493_p0 = scmp.lt.u32.totalorder %s5489_s30, %s7432_s9 }
0x10d9   :  { %p5495_p1 = pnand %p5493_p0, %p5490_p13 }
0x10db   :  { %5498 = shalt.err (!%p5495_p1)
}
0x10dc   :  { %3899 = dma.vmem_to_hbm [thread:$0]  %s3894_s29, 1024, %s7432_s9, [#allocation8], %s5517_s6, %s5517_s6, %s5518_s1  }
0x10dd   :  { %5507 = dma.done.wait [#allocation8], 1024  }
0x10de   :  { %5508 = vsyncadd [#allocation8], 4294966272 }
0x10df   :  { %5509 = dma.done.wait [#allocation20], 128  }
0x10e0   :  { %5510 = vsyncadd [#allocation20], 4294967168 }
0x10e1   :  { %3916 = vsyncpa [#allocation7], 1 }
0x10e2   :  { %3917 = vsyncpa [#allocation10], 1 }
0x10e3   :  { %3918 = vsyncpa [#allocation13], 1 }
0x10e4   :  { %3919 = vsyncpa [#allocation16], 1 }
0x10e5   :  { %3920 = vsyncpa [#allocation8], 1 }
0x10e6   :  { %3921 = vsyncpa [#allocation20], 1 }

// kernel: tpu_custom_call.1
= control target key start
LH: loop header
LB: loop body
LE: loop exit
PB: predicated region body
PF: predicated region fallthrough
CT: control target
= control target key end

     0   :  { %16 = vsyncpa [#allocation7], 0  ;;  %s7423_s0 = inlined_call_operand.hbm [shape: f32[8,8,128], index: 0, kind: input, shape index: {}]   ;;  %s7424_s1 = inlined_call_operand.hbm [shape: f32[8,128], index: 1, kind: input, shape index: {}]   ;;  %s7425_s2 = inlined_call_operand.hbm [shape: f32[8,128], index: 2, kind: input, shape index: {}]   ;;  %s7426_s3 = inlined_call_operand.hbm [shape: f32[128,256], index: 3, kind: input, shape index: {}]   ;;  %s7427_s4 = inlined_call_operand.vmem [shape: f32[1,256], index: 4, kind: input, shape index: {}]   ;;  %s7428_s5 = inlined_call_operand.hbm [shape: f32[256,384], index: 5, kind: input, shape index: {}]   ;;  %s7429_s6 = inlined_call_operand.hbm [shape: f32[128,256], index: 6, kind: input, shape index: {}]   ;;  %s7430_s7 = inlined_call_operand.hbm [shape: f32[128,128], index: 7, kind: input, shape index: {}]   ;;  %s7431_s8 = inlined_call_operand.vmem [shape: f32[1,384], index: 8, kind: input, shape index: {}]   ;;  %s7432_s9 = inlined_call_operand.hbm [shape: f32[8,8,128], index: 9, kind: output, shape index: {0}]   ;;  %s7433_s10 = inlined_call_operand.hbm [shape: f32[8,128], index: 10, kind: output, shape index: {1}]  }
   0x1   :  { %17 = vsyncpa [#allocation10], 0 }
   0x2   :  { %18 = vsyncpa [#allocation13], 0 }
   0x3   :  { %19 = vsyncpa [#allocation16], 0 }
   0x4   :  { %20 = vsyncpa [#allocation8], 0 }
   0x5   :  { %21 = vsyncpa [#allocation20], 0  ;;  %s5511_s13 = smov [#allocation9]   ;;  %s5512_s15 = smov [#allocation12]  }
   0x6   :  { %s40_s14 = sshll.u32 %s5511_s13, 4  ;;  %s59_s16 = sshll.u32 %s5512_s15, 4  ;;  %s41_s14 = int_to_ptr.vmem [resolvable:$true] %s40_s14  ;;  %s5585_s16 = int_to_ptr.vmem [resolvable:$true] %s59_s16 }
   0x7   :  { %s5301_s19 = scalar_lea.hbm %s7424_s1, 128 }
   0x8   :  { %p5302_p0 = scmp.ne.s32.totalorder %s7424_s1, %s5301_s19  ;;  %p5305_p1 = scmp.lt.u32.totalorder %s5301_s19, %s7424_s1 }
   0xa   :  { %p5307_p2 = pnand %p5305_p1, %p5302_p0 }
   0xc   :  { %5310 = shalt.err (!%p5307_p2)
}
   0xd   :  { %s5311_s24 = scalar_lea.vmem %s41_s14, 128  ;;  %p5316_p4 = scmp.lt.s32.totalorder %s41_s14, %s41_s14 }
   0xe   :  { %p5312_p3 = scmp.ne.s32.totalorder %s41_s14, %s5311_s24  ;;  %p5317_p5 = scmp.lt.s32.totalorder %s5311_s24, %s5311_s24 }
  0x10   :  { %p5318_p6 = por %p5317_p5, %p5316_p4 }
  0x12   :  { %p5319_p7 = pnand %p5318_p6, %p5312_p3 }
  0x14   :  { %5322 = shalt.err (!%p5319_p7)
}
  0x15   :  { %43 = dma.hbm_to_vmem [thread:$0]  %s7424_s1, 128, %s41_s14, [#allocation10]  }
  0x16   :  { %s5323_s29 = scalar_lea.hbm %s7426_s3, 4096 }
  0x17   :  { %p5324_p8 = scmp.ne.s32.totalorder %s7426_s3, %s5323_s29  ;;  %p5327_p9 = scmp.lt.u32.totalorder %s5323_s29, %s7426_s3 }
  0x19   :  { %p5329_p10 = pnand %p5327_p9, %p5324_p8 }
  0x1b   :  { %5332 = shalt.err (!%p5329_p10)
}
  0x1c   :  { %s5333_s15 = scalar_lea.vmem %s5585_s16, 4096  ;;  %p5338_p12 = scmp.lt.s32.totalorder %s5585_s16, %s5585_s16 }
  0x1d   :  { %p5334_p11 = scmp.ne.s32.totalorder %s5585_s16, %s5333_s15  ;;  %p5339_p13 = scmp.lt.s32.totalorder %s5333_s15, %s5333_s15 }
  0x1f   :  { %p5340_p0 = por %p5339_p13, %p5338_p12 }
  0x21   :  { %p5341_p1 = pnand %p5340_p0, %p5334_p11 }
  0x23   :  { %5344 = shalt.err (!%p5341_p1)
}
  0x24   :  { %s5513_s1 = smov 256   ;;  %s5514_s14 = smov 16  }
  0x25   :  { %65 = dma.hbm_to_vmem [thread:$0]  %s7426_s3, 4096, %s5585_s16, [#allocation13], %s5513_s1, %s5513_s1, %s5514_s14  }
  0x26   :  { %s5515_s19 = smov [#allocation15]   ;;  %s5516_s21 = smov [#allocation6]  }
  0x27   :  { %s85_s20 = sshll.u32 %s5515_s19, 4  ;;  %s27_s22 = sshll.u32 %s5516_s21, 4  ;;  %s86_s20 = int_to_ptr.vmem [resolvable:$true] %s85_s20  ;;  %s5616_s22 = int_to_ptr.vmem [resolvable:$true] %s27_s22 }
  0x28   :  { %s5345_s25 = scalar_lea.hbm %s7429_s6, 4096 }
  0x29   :  { %p5346_p2 = scmp.ne.s32.totalorder %s7429_s6, %s5345_s25  ;;  %p5349_p3 = scmp.lt.u32.totalorder %s5345_s25, %s7429_s6 }
  0x2b   :  { %p5351_p4 = pnand %p5349_p3, %p5346_p2 }
  0x2d   :  { %5354 = shalt.err (!%p5351_p4)
}
  0x2e   :  { %s5355_s3 = scalar_lea.vmem %s86_s20, 4096  ;;  %p5360_p6 = scmp.lt.s32.totalorder %s86_s20, %s86_s20 }
  0x2f   :  { %p5356_p5 = scmp.ne.s32.totalorder %s86_s20, %s5355_s3  ;;  %p5361_p7 = scmp.lt.s32.totalorder %s5355_s3, %s5355_s3 }
  0x31   :  { %p5362_p8 = por %p5361_p7, %p5360_p6 }
  0x33   :  { %p5363_p9 = pnand %p5362_p8, %p5356_p5 }
  0x35   :  { %5366 = shalt.err (!%p5363_p9)
}
  0x36   :  { %91 = dma.hbm_to_vmem [thread:$0]  %s7429_s6, 4096, %s86_s20, [#allocation16], %s5513_s1, %s5513_s1, %s5514_s14  }
  0x37   :  { %s5367_s13 = scalar_lea.hbm %s7423_s0, 1024 }
  0x38   :  { %p5368_p10 = scmp.ne.s32.totalorder %s7423_s0, %s5367_s13  ;;  %p5371_p11 = scmp.lt.u32.totalorder %s5367_s13, %s7423_s0 }
  0x3a   :  { %p5373_p12 = pnand %p5371_p11, %p5368_p10 }
  0x3c   :  { %5376 = shalt.err (!%p5373_p12)
}
  0x3d   :  { %s5377_s21 = scalar_lea.vmem %s5616_s22, 1024  ;;  %p5382_p0 = scmp.lt.s32.totalorder %s5616_s22, %s5616_s22 }
  0x3e   :  { %p5378_p13 = scmp.ne.s32.totalorder %s5616_s22, %s5377_s21  ;;  %p5383_p1 = scmp.lt.s32.totalorder %s5377_s21, %s5377_s21 }
  0x40   :  { %p5384_p2 = por %p5383_p1, %p5382_p0 }
  0x42   :  { %p5385_p3 = pnand %p5384_p2, %p5378_p13 }
  0x44   :  { %5388 = shalt.err (!%p5385_p3)
}
  0x45   :  { %s5517_s6 = smov 128   ;;  %s5518_s1 = smov 8  }
  0x46   :  { %33 = dma.hbm_to_vmem [thread:$0]  %s7423_s0, 1024, %s5616_s22, [#allocation7], %s5517_s6, %s5517_s6, %s5518_s1  }
  0x47   :  { %s5519_s23 = smov [#allocation11]   ;;  %s5520_s25 = smov [#allocation14]  }
  0x48   :  { %s50_s24 = sshll.u32 %s5519_s23, 4  ;;  %s73_s26 = sshll.u32 %s5520_s25, 4  ;;  %s51_s24 = int_to_ptr.vmem [resolvable:$true] %s50_s24  ;;  %s5650_s26 = int_to_ptr.vmem [resolvable:$true] %s73_s26 }
  0x49   :  { %s5389_s29 = scalar_lea.hbm %s7425_s2, 128 }
  0x4a   :  { %p5390_p4 = scmp.ne.s32.totalorder %s7425_s2, %s5389_s29  ;;  %p5393_p5 = scmp.lt.u32.totalorder %s5389_s29, %s7425_s2 }
  0x4c   :  { %p5395_p6 = pnand %p5393_p5, %p5390_p4 }
  0x4e   :  { %5398 = shalt.err (!%p5395_p6)
}
  0x4f   :  { %s5399_s0 = scalar_lea.vmem %s51_s24, 128  ;;  %p5404_p8 = scmp.lt.s32.totalorder %s51_s24, %s51_s24 }
  0x50   :  { %p5400_p7 = scmp.ne.s32.totalorder %s51_s24, %s5399_s0  ;;  %p5405_p9 = scmp.lt.s32.totalorder %s5399_s0, %s5399_s0 }
  0x52   :  { %p5406_p10 = por %p5405_p9, %p5404_p8 }
  0x54   :  { %p5407_p11 = pnand %p5406_p10, %p5400_p7 }
  0x56   :  { %5410 = shalt.err (!%p5407_p11)
}
  0x57   :  { %53 = dma.hbm_to_vmem [thread:$0]  %s7425_s2, 128, %s51_s24, [#allocation10]  }
  0x58   :  { %s5411_s17 = scalar_lea.hbm %s7428_s5, 12288 }
  0x59   :  { %p5412_p12 = scmp.ne.s32.totalorder %s7428_s5, %s5411_s17  ;;  %p5415_p13 = scmp.lt.u32.totalorder %s5411_s17, %s7428_s5 }
  0x5b   :  { %p5417_p0 = pnand %p5415_p13, %p5412_p12 }
  0x5d   :  { %5420 = shalt.err (!%p5417_p0)
}
  0x5e   :  { %s5421_s20 = scalar_lea.vmem %s5650_s26, 12288  ;;  %p5426_p2 = scmp.lt.s32.totalorder %s5650_s26, %s5650_s26 }
  0x5f   :  { %p5422_p1 = scmp.ne.s32.totalorder %s5650_s26, %s5421_s20  ;;  %p5427_p3 = scmp.lt.s32.totalorder %s5421_s20, %s5421_s20 }
  0x61   :  { %p5428_p4 = por %p5427_p3, %p5426_p2 }
  0x63   :  { %p5429_p5 = pnand %p5428_p4, %p5422_p1 }
  0x65   :  { %5432 = shalt.err (!%p5429_p5)
}
  0x66   :  { %s5521_s2 = smov 384   ;;  %s5522_s23 = smov 24  }
  0x67   :  { %79 = dma.hbm_to_vmem [thread:$0]  %s7428_s5, 12288, %s5650_s26, [#allocation13], %s5521_s2, %s5521_s2, %s5522_s23  }
  0x68   :  { %s5523_s27 = smov [#allocation17]   ;;  %s5433_s16 = scalar_lea.hbm %s7430_s7, 2048 }
  0x69   :  { %s97_s28 = sshll.u32 %s5523_s27, 4  ;;  %p5434_p6 = scmp.ne.s32.totalorder %s7430_s7, %s5433_s16  ;;  %s98_s28 = int_to_ptr.vmem [resolvable:$true] %s97_s28 }
  0x6a   :  { %p5437_p7 = scmp.lt.u32.totalorder %s5433_s16, %s7430_s7 }
  0x6c   :  { %p5439_p8 = pnand %p5437_p7, %p5434_p6 }
  0x6e   :  { %5442 = shalt.err (!%p5439_p8)
}
  0x6f   :  { %s5443_s12 = scalar_lea.vmem %s98_s28, 2048  ;;  %p5448_p10 = scmp.lt.s32.totalorder %s98_s28, %s98_s28 }
  0x70   :  { %p5444_p9 = scmp.ne.s32.totalorder %s98_s28, %s5443_s12  ;;  %p5449_p11 = scmp.lt.s32.totalorder %s5443_s12, %s5443_s12 }
  0x72   :  { %p5450_p12 = por %p5449_p11, %p5448_p10 }
  0x74   :  { %p5451_p13 = pnand %p5450_p12, %p5444_p9 }
  0x76   :  { %5454 = shalt.err (!%p5451_p13)
}
  0x77   :  { %103 = dma.hbm_to_vmem [thread:$0]  %s7430_s7, 2048, %s98_s28, [#allocation16], %s5517_s6, %s5517_s6, %s5518_s1  }
  0x78   :  { %5499 = dma.done.wait [#allocation7], 1024  }
  0x79   :  { %5500 = vsyncadd [#allocation7], 4294966272 }
  0x7a   :  { %5501 = dma.done.wait [#allocation10], 256  }
  0x7b   :  { %5502 = vsyncadd [#allocation10], 4294967040 }
  0x7c   :  { %5503 = dma.done.wait [#allocation13], 16384  }
  0x7d   :  { %5504 = vsyncadd [#allocation13], 4294950912 }
  0x7e   :  { %5505 = dma.done.wait [#allocation16], 6144  }
  0x7f   :  { %5506 = vsyncadd [#allocation16], 4294961152  ;;  %v7434_v0 = vmov 0.0   ;;  %v138_v1 = vld [vmem:[#allocation12 + $0x8] sm:$0xff]  ;;  %v140_v2 = vld [vmem:[#allocation12 + $0x18] sm:$0xff]  ;;  %vm850_vm8 = vcmask 1041409  }
  0x80   :  { %1639 = vmatprep.mubr.f32.mxu0 %v7434_v0  ;;  %v137_v3 = vld [vmem:[#allocation12] sm:$0xff]  ;;  %v4506_v4 = vpack.c.bf16 %v140_v2, %v138_v1  ;;  %v139_v5 = vld [vmem:[#allocation12 + $0x10] sm:$0xff]  ;;  %v142_v6 = vld [vmem:[#allocation12 + $0x28] sm:$0xff]  ;;  %v5720_v34 = vrot.slane %v7434_v0, 1  ;;  %v5723_v35 = vrot.slane %v7434_v0, 2  ;;  %v5732_v40 = vrot.slane %v7434_v0, 3 }
  0x81   :  { %v144_v7 = vld [vmem:[#allocation12 + $0x38] sm:$0xff]  ;;  %v4508_v8 = vpack.c.bf16 %v139_v5, %v137_v3  ;;  %v141_v10 = vld [vmem:[#allocation12 + $0x20] sm:$0xff]  ;;  %v143_v11 = vld [vmem:[#allocation12 + $0x30] sm:$0xff]  ;;  %v5735_v41 = vrot.slane %v7434_v0, 4  ;;  %v5738_v42 = vrot.slane %v7434_v0, 5  ;;  %v5745_v47 = vrot.slane %v7434_v0, 6 }
  0x82   :  { %v4510_v9 = vpack.c.bf16 %v144_v7, %v142_v6  ;;  %v146_v12 = vld [vmem:[#allocation12 + $0x48] sm:$0xff]  ;;  %4507 = vmatprep.subr.bf16.mxu0 %v4506_v4  ;;  %v148_v13 = vld [vmem:[#allocation12 + $0x58] sm:$0xff]  ;;  %v4512_v14 = vpack.c.bf16 %v143_v11, %v141_v10  ;;  %v145_v15 = vld [vmem:[#allocation12 + $0x40] sm:$0xff]  ;;  %v5748_v48 = vrot.slane %v7434_v0, 7  ;;  %vm853_vm9 = vcmask 1042434  }
  0x83   :  { %4509 = vmatpush1.bf16.msra.mxu0 %v4508_v8  ;;  %v147_v16 = vld [vmem:[#allocation12 + $0x50] sm:$0xff]  ;;  %v150_v17 = vld [vmem:[#allocation12 + $0x68] sm:$0xff]  ;;  %v4514_v18 = vpack.c.bf16 %v148_v13, %v146_v12  ;;  %v152_v19 = vld [vmem:[#allocation12 + $0x78] sm:$0xff]  ;;  %vm856_vm10 = vcmask 1043459   ;;  %vm859_vm11 = vcmask 1044484   ;;  %vm862_vm12 = vcmask 1045509  }
  0x84   :  { %4511 = vmatprep.subr.bf16.mxu0 %v4510_v9  ;;  %v149_v20 = vld [vmem:[#allocation12 + $0x60] sm:$0xff]  ;;  %v151_v21 = vld [vmem:[#allocation12 + $0x70] sm:$0xff]  ;;  %v5697_v22 = vld [vmem:[#allocation12 + $0x88] sm:$0xff]  ;;  %v4516_v30 = vpack.c.bf16 %v147_v16, %v145_v15  ;;  %v4518_v36 = vpack.c.bf16 %v152_v19, %v150_v17  ;;  %vm865_vm13 = vcmask 1046534   ;;  %vm868_vm14 = vcmask 1047559  }
  0x85   :  { %v5699_v23 = vld [vmem:[#allocation12 + $0x98] sm:$0xff]  ;;  %v5701_v24 = vld [vmem:[#allocation12 + $0x80] sm:$0xff]  ;;  %v5703_v25 = vld [vmem:[#allocation12 + $0x90] sm:$0xff]  ;;  %v4520_v43 = vpack.c.bf16 %v151_v21, %v149_v20 }
  0x86   :  { %v5705_v26 = vld [vmem:[#allocation12 + $0xa8] sm:$0xff]  ;;  %v5707_v27 = vld [vmem:[#allocation12 + $0xb8] sm:$0xff]  ;;  %v5709_v28 = vld [vmem:[#allocation12 + $0xa0] sm:$0xff]  ;;  %v4522_v49 = vpack.c.bf16 %v5699_v23, %v5697_v22  ;;  %v4524_v50 = vpack.c.bf16 %v5703_v25, %v5701_v24 }
  0x87   :  { %v5711_v29 = vld [vmem:[#allocation12 + $0xb0] sm:$0xff]  ;;  %4513 = vmatpush1.bf16.msra.mxu0 %v4512_v14  ;;  %v5713_v31 = vld [vmem:[#allocation12 + $0xc8] sm:$0xff]  ;;  %v5715_v32 = vld [vmem:[#allocation12 + $0xd8] sm:$0xff]  ;;  %v4526_v51 = vpack.c.bf16 %v5707_v27, %v5705_v26 }
  0x88   :  { %v5717_v33 = vld [vmem:[#allocation12 + $0xc0] sm:$0xff]  ;;  %4515 = vmatprep.subr.bf16.mxu0 %v4514_v18  ;;  %v5725_v37 = vld [vmem:[#allocation12 + $0xd0] sm:$0xff]  ;;  %v5727_v38 = vld [vmem:[#allocation12 + $0xe8] sm:$0xff]  ;;  %v4528_v52 = vpack.c.bf16 %v5711_v29, %v5709_v28  ;;  %v4530_v56 = vpack.c.bf16 %v5715_v32, %v5713_v31 }
  0x89   :  { %v5729_v39 = vld [vmem:[#allocation12 + $0xf8] sm:$0xff]  ;;  %v5740_v44 = vld [vmem:[#allocation12 + $0xe0] sm:$0xff]  ;;  %v5742_v45 = vld [vmem:[#allocation12 + $0xf0] sm:$0xff]  ;;  %v4532_v57 = vpack.c.bf16 %v5725_v37, %v5717_v33 }
  0x8a   :  { %v318_v46 = vld [vmem:[#allocation6] sm:$0x1]  ;;  %v319_v53 = vld [vmem:[#allocation6 + $0x8] sm:$0x1]  ;;  %v320_v54 = vld [vmem:[#allocation6 + $0x10] sm:$0x1]  ;;  %v4534_v58 = vpack.c.bf16 %v5729_v39, %v5727_v38  ;;  %v4536_v59 = vpack.c.bf16 %v5742_v45, %v5740_v44 }
  0x8b   :  { %v321_v55 = vld [vmem:[#allocation6 + $0x18] sm:$0x1]  ;;  %4517 = vmatpush1.bf16.msra.mxu0 %v4516_v30  ;;  %v322_v60 = vld [vmem:[#allocation6 + $0x20] sm:$0x1]  ;;  %v323_v61 = vld [vmem:[#allocation6 + $0x28] sm:$0x1] }
  0x8c   :  { %v324_v62 = vld [vmem:[#allocation6 + $0x30] sm:$0x1]  ;;  %4519 = vmatprep.subr.bf16.mxu0 %v4518_v36  ;;  %v325_v63 = vld [vmem:[#allocation6 + $0x38] sm:$0x1]  ;;  %vm329_vm0 = vcmp.ne.f32.partialorder %v318_v46, 0.0  ;;  %vm330_vm1 = vcmp.ne.f32.partialorder %v319_v53, 0.0 }
  0x8d   :  { %vm331_vm2 = vcmp.ne.f32.partialorder %v320_v54, 0.0  ;;  %vm332_vm3 = vcmp.ne.f32.partialorder %v321_v55, 0.0  ;;  %vm333_vm4 = vcmp.ne.f32.partialorder %v322_v60, 0.0  ;;  %vm334_vm5 = vcmp.ne.f32.partialorder %v323_v61, 0.0  ;;  %v377_v36 = vld [vmem:[#allocation6 + $0x1] sm:$0x1] }
  0x8e   :  { %vm335_vm6 = vcmp.ne.f32.partialorder %v324_v62, 0.0  ;;  %vm336_vm7 = vcmp.ne.f32.partialorder %v325_v63, 0.0  ;;  %v5768_v1 = vsel %vm329_vm0, 1.0, %v7434_v0  ;;  %v5772_v2 = vsel %vm330_vm1, 1.0, %v7434_v0  ;;  %v383_v29 = vld [vmem:[#allocation6 + $0x31] sm:$0x1] }
  0x8f   :  { %v5776_v3 = vsel %vm331_vm2, 1.0, %v7434_v0  ;;  %v5780_v4 = vsel %vm332_vm3, 1.0, %v7434_v0  ;;  %4521 = vmatpush1.bf16.msra.mxu0 %v4520_v43  ;;  %v5784_v5 = vsel %vm333_vm4, 1.0, %v7434_v0  ;;  %v5788_v6 = vsel %vm334_vm5, 1.0, %v7434_v0 }
  0x90   :  { %v5792_v7 = vsel %vm335_vm6, 1.0, %v7434_v0  ;;  %v5796_v8 = vsel %vm336_vm7, 1.0, %v7434_v0  ;;  %4523 = vmatprep.subr.bf16.mxu0 %v4522_v49  ;;  %v5799_v9 = vsel %vm329_vm0, %v318_v46, 0.0  ;;  %v5803_v10 = vsel %vm330_vm1, %v319_v53, %v5720_v34  ;;  %v378_v53 = vld [vmem:[#allocation6 + $0x9] sm:$0x1] }
  0x91   :  { %v5807_v11 = vsel %vm331_vm2, %v320_v54, %v5723_v35  ;;  %v5811_v12 = vsel %vm332_vm3, %v321_v55, %v5732_v40  ;;  %v5815_v13 = vsel %vm333_vm4, %v322_v60, %v5735_v41  ;;  %v5819_v14 = vsel %vm334_vm5, %v323_v61, %v5738_v42  ;;  %v380_v54 = vld [vmem:[#allocation6 + $0x19] sm:$0x1]  ;;  %v381_v60 = vld [vmem:[#allocation6 + $0x21] sm:$0x1]  ;;  %v382_v61 = vld [vmem:[#allocation6 + $0x29] sm:$0x1] }
  0x92   :  { %v5823_v15 = vsel %vm335_vm6, %v324_v62, %v5745_v47  ;;  %v5827_v16 = vsel %vm336_vm7, %v325_v63, %v5748_v48  ;;  %v385_v17 = vsub.f32 1.0, %v5768_v1  ;;  %v386_v18 = vsub.f32 1.0, %v5772_v2 }
  0x93   :  { %v387_v19 = vsub.f32 1.0, %v5776_v3  ;;  %v388_v20 = vsub.f32 1.0, %v5780_v4  ;;  %4525 = vmatpush1.bf16.msra.mxu0 %v4524_v50  ;;  %v389_v21 = vsub.f32 1.0, %v5784_v5  ;;  %v390_v22 = vsub.f32 1.0, %v5788_v6 }
  0x94   :  { %v391_v23 = vsub.f32 1.0, %v5792_v7  ;;  %v392_v24 = vsub.f32 1.0, %v5796_v8  ;;  %4527 = vmatprep.subr.bf16.mxu0 %v4526_v51  ;;  %v409_v25 = vmul.f32 0.0, %v385_v17  ;;  %v410_v26 = vmul.f32 %v386_v18, %v5720_v34  ;;  %v379_v51 = vld [vmem:[#allocation6 + $0x11] sm:$0x1] }
  0x95   :  { %v411_v27 = vmul.f32 %v387_v19, %v5723_v35  ;;  %v412_v30 = vmul.f32 %v388_v20, %v5732_v40  ;;  %v413_v43 = vmul.f32 %v389_v21, %v5735_v41  ;;  %v414_v46 = vmul.f32 %v390_v22, %v5738_v42  ;;  %v384_v20 = vld [vmem:[#allocation6 + $0x39] sm:$0x1] }
  0x96   :  { %v415_v49 = vmul.f32 %v391_v23, %v5745_v47  ;;  %v416_v50 = vmul.f32 %v392_v24, %v5748_v48  ;;  %v5844_v55 = vadd.f32 0.125, %v409_v25  ;;  %v5846_v34 = vadd.f32 0.125, %v410_v26 }
  0x97   :  { %v5848_v35 = vadd.f32 0.125, %v411_v27  ;;  %v5850_v40 = vadd.f32 0.125, %v412_v30  ;;  %4529 = vmatpush1.bf16.msra.mxu0 %v4528_v52  ;;  %v5855_v41 = vadd.f32 0.125, %v413_v43  ;;  %v5857_v42 = vadd.f32 0.125, %v414_v46 }
  0x98   :  { %v5859_v47 = vadd.f32 0.125, %v415_v49  ;;  %v5861_v48 = vadd.f32 0.125, %v416_v50  ;;  %4531 = vmatprep.subr.bf16.mxu0 %v4530_v56  ;;  %v1273_v62 = vrot.slane %v5846_v34, 7  ;;  %vm425_vm15 = vcmp.ne.f32.partialorder %v377_v36, 0.0 }
  0x99   :  { %v1275_v63 = vrot.slane %v5848_v35, 6  ;;  %v1277_v28 = vrot.slane %v5850_v40, 5  ;;  %v1279_v52 = vrot.slane %v5855_v41, 4  ;;  %v1281_v17 = vrot.slane %v5857_v42, 3 }
  0x9a   :  { %v1283_v18 = vrot.slane %v5859_v47, 2  ;;  %v1285_v19 = vrot.slane %v5861_v48, 1  ;;  %v1274_v31 = vsel %vm850_vm8, %v1273_v62, %v5844_v55  ;;  %vm426_vm0 = vcmp.ne.f32.partialorder %v378_v53, 0.0 }
  0x9b   :  { %vm427_vm1 = vcmp.ne.f32.partialorder %v379_v51, 0.0  ;;  %vm428_vm2 = vcmp.ne.f32.partialorder %v380_v54, 0.0  ;;  %4533 = vmatpush1.bf16.msra.mxu0 %v4532_v57  ;;  %v1276_v32 = vsel %vm853_vm9, %v1275_v63, %v1274_v31  ;;  %vm429_vm3 = vcmp.ne.f32.partialorder %v381_v60, 0.0 }
  0x9c   :  { %vm430_vm4 = vcmp.ne.f32.partialorder %v382_v61, 0.0  ;;  %vm431_vm5 = vcmp.ne.f32.partialorder %v383_v29, 0.0  ;;  %4535 = vmatprep.subr.bf16.mxu0 %v4534_v58  ;;  %v1278_v56 = vsel %vm856_vm10, %v1277_v28, %v1276_v32  ;;  %vm432_vm6 = vcmp.ne.f32.partialorder %v384_v20, 0.0 }
  0x9d   :  { %v5885_v21 = vsel %vm425_vm15, 1.0, %v7434_v0  ;;  %v5889_v33 = vsel %vm426_vm0, 1.0, %v7434_v0  ;;  %v1280_v37 = vsel %vm859_vm11, %v1279_v52, %v1278_v56  ;;  %v5894_v57 = vsel %vm427_vm1, 1.0, %v7434_v0 }
  0x9e   :  { %7525 = vst [vmem:[#allocation27_spill] sm:$0xff] %v5885_v21  ;;  %7526 = vst [vmem:[#allocation28_spill] sm:$0xff] %v5889_v33  ;;  %v5898_v38 = vsel %vm428_vm2, 1.0, %v7434_v0  ;;  %v5902_v39 = vsel %vm429_vm3, 1.0, %v7434_v0  ;;  %v1282_v58 = vsel %vm862_vm12, %v1281_v17, %v1280_v37  ;;  %v5907_v22 = vsel %vm430_vm4, 1.0, %v7434_v0 }
  0x9f   :  { %7527 = vst [vmem:[#allocation29_spill] sm:$0xff] %v5894_v57  ;;  %7528 = vst [vmem:[#allocation30_spill] sm:$0xff] %v5898_v38  ;;  %v5911_v23 = vsel %vm431_vm5, 1.0, %v7434_v0  ;;  %v5915_v24 = vsel %vm432_vm6, 1.0, %v7434_v0  ;;  %4537 = vmatpush1.bf16.msra.mxu0 %v4536_v59  ;;  %v1284_v25 = vsel %vm865_vm13, %v1283_v18, %v1282_v58  ;;  %v5923_v26 = vsel %vm425_vm15, %v377_v36, %v5799_v9  ;;  %v461_v58 = vld [vmem:[#allocation6 + $0x22] sm:$0x1] }
  0xa0   :  { %7529 = vst [vmem:[#allocation31_spill] sm:$0xff] %v5902_v39  ;;  %7530 = vst [vmem:[#allocation32_spill] sm:$0xff] %v5907_v22  ;;  %v5927_v27 = vsel %vm426_vm0, %v378_v53, %v5803_v10  ;;  %v5931_v30 = vsel %vm427_vm1, %v379_v51, %v5807_v11  ;;  %v1286_v43 = vsel %vm868_vm14, %v1285_v19, %v1284_v25  ;;  %v465_v49 = vsub.f32 1.0, %v5885_v21  ;;  %v457_v19 = vld [vmem:[#allocation6 + $0x2] sm:$0x1] }
  0xa1   :  { %7531 = vst [vmem:[#allocation33_spill] sm:$0xff] %v5911_v23  ;;  %7532 = vst [vmem:[#allocation34_spill] sm:$0xff] %v5915_v24  ;;  %v5936_v44 = vsel %vm428_vm2, %v380_v54, %v5811_v12  ;;  %v5940_v45 = vsel %vm429_vm3, %v381_v60, %v5815_v13  ;;  %v5944_v59 = vsel %vm430_vm4, %v382_v61, %v5819_v14  ;;  %v466_v50 = vsub.f32 1.0, %v5889_v33  ;;  %v523_v33 = vld [vmem:[#allocation6 + $0x13] sm:$0x1] }
  0xa2   :  { %7533 = vst [vmem:[#allocation35_spill] sm:$0xff] %v5936_v44  ;;  %7534 = vst [vmem:[#allocation36_spill] sm:$0xff] %v5940_v45  ;;  %v5948_v36 = vsel %vm431_vm5, %v383_v29, %v5823_v15  ;;  %v5952_v46 = vsel %vm432_vm6, %v384_v20, %v5827_v16  ;;  %1640 = vmatmul.mubr.f32.vlgmr.msra.gmra.mrb[0].mxu0 %v7434_v0  ;;  %v467_v53 = vsub.f32 1.0, %v5894_v57  ;;  %v468_v51 = vsub.f32 1.0, %v5898_v38  ;;  %v458_v20 = vld [vmem:[#allocation6 + $0xa] sm:$0x1] }
  0xa3   :  { %7535 = vst [vmem:[#allocation37_spill] sm:$0xff] %v5944_v59  ;;  %7536 = vst [vmem:[#allocation38_spill] sm:$0xff] %v5948_v36  ;;  %v469_v54 = vsub.f32 1.0, %v5902_v39  ;;  %v470_v60 = vsub.f32 1.0, %v5907_v22  ;;  %1645 = vmatprep.mubr.f32.mxu0 %v7434_v0  ;;  %v471_v61 = vsub.f32 1.0, %v5911_v23  ;;  %v472_v62 = vsub.f32 1.0, %v5915_v24 }
  0xa4   :  { %7537 = vst [vmem:[#allocation39_spill] sm:$0xff] %v5952_v46  ;;  %v473_v63 = vmul.f32 %v465_v49, %v5844_v55  ;;  %v474_v28 = vmul.f32 %v466_v50, %v5846_v34  ;;  %v475_v29 = vmul.f32 %v467_v53, %v5848_v35  ;;  %v476_v52 = vmul.f32 %v468_v51, %v5850_v40  ;;  %v459_v55 = vld [vmem:[#allocation6 + $0x12] sm:$0x1]  ;;  %v460_v34 = vld [vmem:[#allocation6 + $0x1a] sm:$0x1] }
  0xa5   :  { %v477_v17 = vmul.f32 %v469_v54, %v5855_v41  ;;  %v478_v18 = vmul.f32 %v470_v60, %v5857_v42  ;;  %v479_v31 = vmul.f32 %v471_v61, %v5859_v47  ;;  %v480_v32 = vmul.f32 %v472_v62, %v5861_v48  ;;  %v462_v49 = vld [vmem:[#allocation6 + $0x2a] sm:$0x1]  ;;  %v463_v48 = vld [vmem:[#allocation6 + $0x32] sm:$0x1]  ;;  %v464_v61 = vld [vmem:[#allocation6 + $0x3a] sm:$0x1] }
  0xa6   :  { %v5972_v56 = vadd.f32 0.125, %v473_v63  ;;  %v5974_v37 = vadd.f32 0.125, %v474_v28  ;;  %1646 = vmatmul.mubr.f32.gmra.mrb[2].mxu0 %v1286_v43  ;;  %v483_v35 = vadd.f32 0.125, %v475_v29  ;;  %v484_v40 = vadd.f32 0.125, %v476_v52  ;;  %v521_v38 = vld [vmem:[#allocation6 + $0x3] sm:$0x1] }
  0xa7   :  { %v485_v25 = vadd.f32 0.125, %v477_v17  ;;  %v486_v41 = vadd.f32 0.125, %v478_v18  ;;  %1651 = vmatprep.mubr.f32.mxu0 %v7434_v0  ;;  %v487_v42 = vadd.f32 0.125, %v479_v31  ;;  %v488_v50 = vadd.f32 0.125, %v480_v32 }
  0xa8   :  { %v1296_v47 = vrot.slane %v5974_v37, 7  ;;  %vm489_vm7 = vcmp.ne.f32.partialorder %v457_v19, 0.0  ;;  %v1298_v53 = vrot.slane %v483_v35, 6  ;;  %v1300_v51 = vrot.slane %v484_v40, 5 }
  0xa9   :  { %v1302_v54 = vrot.slane %v485_v25, 4  ;;  %v1304_v60 = vrot.slane %v486_v41, 3  ;;  %v1306_v62 = vrot.slane %v487_v42, 2  ;;  %v1308_v63 = vrot.slane %v488_v50, 1 }
  0xaa   :  { %v1297_v43 = vsel %vm850_vm8, %v1296_v47, %v5972_v56  ;;  %vm490_vm15 = vcmp.ne.f32.partialorder %v458_v20, 0.0  ;;  %vm491_vm0 = vcmp.ne.f32.partialorder %v459_v55, 0.0  ;;  %vm492_vm1 = vcmp.ne.f32.partialorder %v460_v34, 0.0 }
  0xab   :  { %v1299_v28 = vsel %vm853_vm9, %v1298_v53, %v1297_v43  ;;  %vm493_vm2 = vcmp.ne.f32.partialorder %v461_v58, 0.0  ;;  %vm494_vm3 = vcmp.ne.f32.partialorder %v462_v49, 0.0  ;;  %vm495_vm4 = vcmp.ne.f32.partialorder %v463_v48, 0.0 }
  0xac   :  { %v1301_v29 = vsel %vm856_vm10, %v1300_v51, %v1299_v28  ;;  %vm496_vm5 = vcmp.ne.f32.partialorder %v464_v61, 0.0  ;;  %v5985_v17 = vsel %vm489_vm7, 1.0, %v7434_v0  ;;  %v5989_v18 = vsel %vm490_vm15, 1.0, %v7434_v0 }
  0xad   :  { %v1303_v52 = vsel %vm859_vm11, %v1302_v54, %v1301_v29  ;;  %7538 = vst [vmem:[#allocation40_spill] sm:$0xff] %v5985_v17  ;;  %7539 = vst [vmem:[#allocation41_spill] sm:$0xff] %v5989_v18  ;;  %v5993_v31 = vsel %vm491_vm0, 1.0, %v7434_v0  ;;  %v5998_v47 = vsel %vm492_vm1, 1.0, %v7434_v0  ;;  %v6002_v53 = vsel %vm493_vm2, 1.0, %v7434_v0 }
  0xae   :  { %7540 = vst [vmem:[#allocation42_spill] sm:$0xff] %v5993_v31  ;;  %v1305_v32 = vsel %vm862_vm12, %v1304_v60, %v1303_v52  ;;  %7541 = vst [vmem:[#allocation43_spill] sm:$0xff] %v5998_v47  ;;  %v6006_v51 = vsel %vm494_vm3, 1.0, %v7434_v0  ;;  %v6011_v43 = vsel %vm495_vm4, 1.0, %v7434_v0  ;;  %v6015_v60 = vsel %vm496_vm5, 1.0, %v7434_v0 }
  0xaf   :  { %7542 = vst [vmem:[#allocation44_spill] sm:$0xff] %v6002_v53  ;;  %7543 = vst [vmem:[#allocation45_spill] sm:$0xff] %v6006_v51  ;;  %v1307_v54 = vsel %vm865_vm13, %v1306_v62, %v1305_v32  ;;  %v6019_v28 = vsel %vm489_vm7, %v457_v19, %v5923_v26  ;;  %v6024_v52 = vsel %vm490_vm15, %v458_v20, %v5927_v27  ;;  %v534_v24 = vsub.f32 1.0, %v6006_v51 }
  0xb0   :  { %7544 = vst [vmem:[#allocation46_spill] sm:$0xff] %v6011_v43  ;;  %7545 = vst [vmem:[#allocation47_spill] sm:$0xff] %v6015_v60  ;;  %v1309_v29 = vsel %vm868_vm14, %v1308_v63, %v1307_v54  ;;  %v6028_v62 = vsel %vm491_vm0, %v459_v55, %v5931_v30  ;;  %v6032_v32 = vsel %vm492_vm1, %v460_v34, %v5936_v44  ;;  %v7554_v63 = vmov 0.0  }
  0xb1   :  { %7546 = vst [vmem:[#allocation48_spill] sm:$0xff] %v6019_v28  ;;  %7547 = vst [vmem:[#allocation49_spill] sm:$0xff] %v6024_v52  ;;  %1652 = vmatmul.mubr.f32.gmra.mrb[4].mxu0 %v1309_v29  ;;  %v6036_v0 = vsel %vm493_vm2, %v461_v58, %v5940_v45  ;;  %v6040_v19 = vsel %vm494_vm3, %v462_v49, %v5944_v59  ;;  %v6044_v20 = vsel %vm495_vm4, %v463_v48, %v5948_v36  ;;  %v525_v59 = vld [vmem:[#allocation6 + $0x23] sm:$0x1] }
  0xb2   :  { %7548 = vst [vmem:[#allocation50_spill] sm:$0xff] %v6028_v62  ;;  %7549 = vst [vmem:[#allocation51_spill] sm:$0xff] %v6032_v32  ;;  %v6048_v55 = vsel %vm496_vm5, %v464_v61, %v5952_v46  ;;  %1657 = vmatprep.mubr.f32.mxu0 %v7554_v63  ;;  %v529_v34 = vsub.f32 1.0, %v5985_v17  ;;  %v530_v54 = vsub.f32 1.0, %v5989_v18  ;;  %v531_v58 = vsub.f32 1.0, %v5993_v31 }
  0xb3   :  { %7550 = vst [vmem:[#allocation52_spill] sm:$0xff] %v6036_v0  ;;  %7551 = vst [vmem:[#allocation53_spill] sm:$0xff] %v6040_v19  ;;  %v532_v29 = vsub.f32 1.0, %v5998_v47  ;;  %v533_v49 = vsub.f32 1.0, %v6002_v53  ;;  %v535_v48 = vsub.f32 1.0, %v6011_v43  ;;  %v536_v23 = vsub.f32 1.0, %v6015_v60 }
  0xb4   :  { %7552 = vst [vmem:[#allocation54_spill] sm:$0xff] %v6044_v20  ;;  %7553 = vst [vmem:[#allocation55_spill] sm:$0xff] %v6048_v55  ;;  %v537_v61 = vmul.f32 %v529_v34, %v5972_v56  ;;  %v538_v22 = vmul.f32 %v530_v54, %v5974_v37  ;;  %v539_v39 = vmul.f32 %v531_v58, %v483_v35  ;;  %v522_v47 = vld [vmem:[#allocation6 + $0xb] sm:$0x1]  ;;  %v524_v53 = vld [vmem:[#allocation6 + $0x1b] sm:$0x1] }
  0xb5   :  { %v540_v17 = vmul.f32 %v532_v29, %v484_v40  ;;  %v541_v18 = vmul.f32 %v533_v49, %v485_v25  ;;  %v542_v21 = vmul.f32 %v534_v24, %v486_v41  ;;  %v543_v31 = vmul.f32 %v535_v48, %v487_v42  ;;  %v526_v37 = vld [vmem:[#allocation6 + $0x2b] sm:$0x1]  ;;  %v527_v25 = vld [vmem:[#allocation6 + $0x33] sm:$0x1] }
  0xb6   :  { %v544_v57 = vmul.f32 %v536_v23, %v488_v50  ;;  %v545_v46 = vadd.f32 0.125, %v537_v61  ;;  %v546_v51 = vadd.f32 0.125, %v538_v22  ;;  %v547_v36 = vadd.f32 0.125, %v539_v39  ;;  %v528_v50 = vld [vmem:[#allocation6 + $0x3b] sm:$0x1] }
  0xb7   :  { %v548_v43 = vadd.f32 0.125, %v540_v17  ;;  %v549_v60 = vadd.f32 0.125, %v541_v18  ;;  %v550_v45 = vadd.f32 0.125, %v542_v21  ;;  %v551_v56 = vadd.f32 0.125, %v543_v31 }
  0xb8   :  { %v552_v34 = vadd.f32 0.125, %v544_v57  ;;  %v1319_v35 = vrot.slane %v546_v51, 7  ;;  %v1321_v40 = vrot.slane %v547_v36, 6  ;;  %vm553_vm6 = vcmp.ne.f32.partialorder %v521_v38, 0.0 }
  0xb9   :  { %v1323_v54 = vrot.slane %v548_v43, 5  ;;  %v1325_v24 = vrot.slane %v549_v60, 4  ;;  %v1327_v23 = vrot.slane %v550_v45, 3  ;;  %v1329_v41 = vrot.slane %v551_v56, 2 }
  0xba   :  { %v1331_v42 = vrot.slane %v552_v34, 1  ;;  %v1320_v22 = vsel %vm850_vm8, %v1319_v35, %v545_v46  ;;  %vm554_vm7 = vcmp.ne.f32.partialorder %v522_v47, 0.0  ;;  %vm555_vm15 = vcmp.ne.f32.partialorder %v523_v33, 0.0 }
  0xbb   :  { %vm556_vm0 = vcmp.ne.f32.partialorder %v524_v53, 0.0  ;;  %v1322_v21 = vsel %vm853_vm9, %v1321_v40, %v1320_v22  ;;  %vm557_vm1 = vcmp.ne.f32.partialorder %v525_v59, 0.0  ;;  %vm558_vm2 = vcmp.ne.f32.partialorder %v526_v37, 0.0 }
  0xbc   :  { %vm559_vm3 = vcmp.ne.f32.partialorder %v527_v25, 0.0  ;;  %v1324_v57 = vsel %vm856_vm10, %v1323_v54, %v1322_v21  ;;  %vm560_vm4 = vcmp.ne.f32.partialorder %v528_v50, 0.0  ;;  %v6066_v39 = vsel %vm553_vm6, 1.0, %v7554_v63 }
  0xbd   :  { %7555 = vst [vmem:[#allocation56_spill] sm:$0xff] %v6066_v39  ;;  %v6070_v17 = vsel %vm554_vm7, 1.0, %v7554_v63  ;;  %v1326_v18 = vsel %vm859_vm11, %v1325_v24, %v1324_v57  ;;  %v6075_v31 = vsel %vm555_vm15, 1.0, %v7554_v63  ;;  %v6079_v58 = vsel %vm556_vm0, 1.0, %v7554_v63 }
  0xbe   :  { %7556 = vst [vmem:[#allocation57_spill] sm:$0xff] %v6070_v17  ;;  %7557 = vst [vmem:[#allocation58_spill] sm:$0xff] %v6075_v31  ;;  %v6083_v29 = vsel %vm557_vm1, 1.0, %v7554_v63  ;;  %v1328_v49 = vsel %vm862_vm12, %v1327_v23, %v1326_v18  ;;  %v6088_v48 = vsel %vm558_vm2, 1.0, %v7554_v63  ;;  %v6092_v61 = vsel %vm559_vm3, 1.0, %v7554_v63 }
  0xbf   :  { %7558 = vst [vmem:[#allocation59_spill] sm:$0xff] %v6079_v58  ;;  %7559 = vst [vmem:[#allocation60_spill] sm:$0xff] %v6083_v29  ;;  %v6096_v35 = vsel %vm560_vm4, 1.0, %v7554_v63  ;;  %v1330_v40 = vsel %vm865_vm13, %v1329_v41, %v1328_v49  ;;  %v6101_v54 = vsel %vm553_vm6, %v521_v38, %v6019_v28  ;;  %v6105_v24 = vsel %vm554_vm7, %v522_v47, %v6024_v52 }
  0xc0   :  { %7560 = vst [vmem:[#allocation61_spill] sm:$0xff] %v6088_v48  ;;  %7561 = vst [vmem:[#allocation62_spill] sm:$0xff] %v6092_v61  ;;  %v6109_v23 = vsel %vm555_vm15, %v523_v33, %v6028_v62  ;;  %v1332_v22 = vsel %vm868_vm14, %v1331_v42, %v1330_v40  ;;  %v6114_v21 = vsel %vm556_vm0, %v524_v53, %v6032_v32  ;;  %v593_v53 = vsub.f32 1.0, %v6066_v39  ;;  %v587_v32 = vld [vmem:[#allocation6 + $0x14] sm:$0x1] }
  0xc1   :  { %7562 = vst [vmem:[#allocation63_spill] sm:$0xff] %v6096_v35  ;;  %7563 = vst [vmem:[#allocation64_spill] sm:$0xff] %v6101_v54  ;;  %v6118_v41 = vsel %vm557_vm1, %v525_v59, %v6036_v0  ;;  %v6122_v38 = vsel %vm558_vm2, %v526_v37, %v6040_v19  ;;  %1658 = vmatmul.mubr.f32.gmra.mrb[6].mxu0 %v1332_v22  ;;  %v6126_v47 = vsel %vm559_vm3, %v527_v25, %v6044_v20  ;;  %v585_v20 = vld [vmem:[#allocation6 + $0x4] sm:$0x1]  ;;  %v586_v19 = vld [vmem:[#allocation6 + $0xc] sm:$0x1] }
  0xc2   :  { %7564 = vst [vmem:[#allocation65_spill] sm:$0xff] %v6105_v24  ;;  %7565 = vst [vmem:[#allocation66_spill] sm:$0xff] %v6109_v23  ;;  %v6130_v33 = vsel %vm560_vm4, %v528_v50, %v6048_v55  ;;  %v594_v42 = vsub.f32 1.0, %v6070_v17  ;;  %1663 = vmatprep.mubr.f32.mxu0 %v7554_v63  ;;  %v595_v59 = vsub.f32 1.0, %v6075_v31  ;;  %v596_v37 = vsub.f32 1.0, %v6079_v58 }
  0xc3   :  { %7566 = vst [vmem:[#allocation67_spill] sm:$0xff] %v6114_v21  ;;  %7567 = vst [vmem:[#allocation68_spill] sm:$0xff] %v6118_v41  ;;  %v597_v57 = vsub.f32 1.0, %v6083_v29  ;;  %v598_v18 = vsub.f32 1.0, %v6088_v48  ;;  %v599_v25 = vsub.f32 1.0, %v6092_v61  ;;  %v600_v49 = vsub.f32 1.0, %v6096_v35 }
  0xc4   :  { %7568 = vst [vmem:[#allocation69_spill] sm:$0xff] %v6122_v38  ;;  %7569 = vst [vmem:[#allocation70_spill] sm:$0xff] %v6126_v47  ;;  %v601_v50 = vmul.f32 %v593_v53, %v545_v46  ;;  %v602_v40 = vmul.f32 %v594_v42, %v546_v51  ;;  %v603_v22 = vmul.f32 %v595_v59, %v547_v36  ;;  %v588_v29 = vld [vmem:[#allocation6 + $0x1c] sm:$0x1]  ;;  %v589_v62 = vld [vmem:[#allocation6 + $0x24] sm:$0x1] }
  0xc5   :  { %7570 = vst [vmem:[#allocation71_spill] sm:$0xff] %v6130_v33  ;;  %v604_v39 = vmul.f32 %v596_v37, %v548_v43  ;;  %v605_v55 = vmul.f32 %v597_v57, %v549_v60  ;;  %v606_v17 = vmul.f32 %v598_v18, %v550_v45  ;;  %v607_v0 = vmul.f32 %v599_v25, %v551_v56  ;;  %v590_v35 = vld [vmem:[#allocation6 + $0x2c] sm:$0x1]  ;;  %v591_v43 = vld [vmem:[#allocation6 + $0x34] sm:$0x1] }
  0xc6   :  { %v608_v31 = vmul.f32 %v600_v49, %v552_v34  ;;  %v609_v28 = vadd.f32 0.125, %v601_v50  ;;  %v610_v58 = vadd.f32 0.125, %v602_v40  ;;  %v611_v48 = vadd.f32 0.125, %v603_v22  ;;  %v592_v34 = vld [vmem:[#allocation6 + $0x3c] sm:$0x1] }
  0xc7   :  { %v612_v52 = vadd.f32 0.125, %v604_v39  ;;  %v613_v61 = vadd.f32 0.125, %v605_v55  ;;  %v614_v44 = vadd.f32 0.125, %v606_v17  ;;  %v615_v46 = vadd.f32 0.125, %v607_v0 }
  0xc8   :  { %v616_v51 = vadd.f32 0.125, %v608_v31  ;;  %v1342_v36 = vrot.slane %v610_v58, 7  ;;  %vm617_vm5 = vcmp.ne.f32.partialorder %v585_v20, 0.0  ;;  %v1344_v45 = vrot.slane %v611_v48, 6 }
  0xc9   :  { %v1346_v60 = vrot.slane %v612_v52, 5  ;;  %v1348_v53 = vrot.slane %v613_v61, 4  ;;  %v1350_v56 = vrot.slane %v614_v44, 3  ;;  %v1352_v59 = vrot.slane %v615_v46, 2 }
  0xca   :  { %v1343_v42 = vsel %vm850_vm8, %v1342_v36, %v609_v28  ;;  %v1354_v37 = vrot.slane %v616_v51, 1  ;;  %vm618_vm6 = vcmp.ne.f32.partialorder %v586_v19, 0.0  ;;  %vm619_vm7 = vcmp.ne.f32.partialorder %v587_v32, 0.0 }
  0xcb   :  { %v1345_v39 = vsel %vm853_vm9, %v1344_v45, %v1343_v42  ;;  %vm620_vm15 = vcmp.ne.f32.partialorder %v588_v29, 0.0  ;;  %vm621_vm0 = vcmp.ne.f32.partialorder %v589_v62, 0.0  ;;  %vm622_vm1 = vcmp.ne.f32.partialorder %v590_v35, 0.0 }
  0xcc   :  { %v1347_v0 = vsel %vm856_vm10, %v1346_v60, %v1345_v39  ;;  %vm623_vm2 = vcmp.ne.f32.partialorder %v591_v43, 0.0  ;;  %vm624_vm3 = vcmp.ne.f32.partialorder %v592_v34, 0.0  ;;  %v6147_v17 = vsel %vm617_vm5, 1.0, %v7554_v63 }
  0xcd   :  { %v1349_v55 = vsel %vm859_vm11, %v1348_v53, %v1347_v0  ;;  %7571 = vst [vmem:[#allocation72_spill] sm:$0xff] %v6147_v17  ;;  %v6151_v31 = vsel %vm618_vm6, 1.0, %v7554_v63  ;;  %v6155_v57 = vsel %vm619_vm7, 1.0, %v7554_v63  ;;  %v6160_v25 = vsel %vm620_vm15, 1.0, %v7554_v63 }
  0xce   :  { %7572 = vst [vmem:[#allocation73_spill] sm:$0xff] %v6151_v31  ;;  %7573 = vst [vmem:[#allocation74_spill] sm:$0xff] %v6155_v57  ;;  %v1351_v18 = vsel %vm862_vm12, %v1350_v56, %v1349_v55  ;;  %v6164_v49 = vsel %vm621_vm0, 1.0, %v7554_v63  ;;  %v6168_v50 = vsel %vm622_vm1, 1.0, %v7554_v63  ;;  %v6173_v22 = vsel %vm623_vm2, 1.0, %v7554_v63 }
  0xcf   :  { %7574 = vst [vmem:[#allocation75_spill] sm:$0xff] %v6160_v25  ;;  %7575 = vst [vmem:[#allocation76_spill] sm:$0xff] %v6164_v49  ;;  %v1353_v40 = vsel %vm865_vm13, %v1352_v59, %v1351_v18  ;;  %v6177_v36 = vsel %vm624_vm3, 1.0, %v7554_v63  ;;  %v6181_v45 = vsel %vm617_vm5, %v585_v20, %v6101_v54  ;;  %v6186_v53 = vsel %vm618_vm6, %v586_v19, %v6105_v24 }
  0xd0   :  { %7576 = vst [vmem:[#allocation77_spill] sm:$0xff] %v6168_v50  ;;  %7577 = vst [vmem:[#allocation78_spill] sm:$0xff] %v6173_v22  ;;  %v1355_v60 = vsel %vm868_vm14, %v1354_v37, %v1353_v40  ;;  %v6190_v56 = vsel %vm619_vm7, %v587_v32, %v6109_v23  ;;  %v6194_v42 = vsel %vm620_vm15, %v588_v29, %v6114_v21  ;;  %v657_v29 = vsub.f32 1.0, %v6147_v17  ;;  %v653_v23 = vld [vmem:[#allocation6 + $0x25] sm:$0x1] }
  0xd1   :  { %7578 = vst [vmem:[#allocation79_spill] sm:$0xff] %v6177_v36  ;;  %7579 = vst [vmem:[#allocation80_spill] sm:$0xff] %v6181_v45  ;;  %1664 = vmatmul.mubr.f32.gmra.mrb[8].mxu0 %v1355_v60  ;;  %v6198_v59 = vsel %vm621_vm0, %v589_v62, %v6118_v41  ;;  %v6202_v20 = vsel %vm622_vm1, %v590_v35, %v6122_v38  ;;  %v6206_v19 = vsel %vm623_vm2, %v591_v43, %v6126_v47  ;;  %v651_v41 = vld [vmem:[#allocation6 + $0x15] sm:$0x1] }
  0xd2   :  { %7580 = vst [vmem:[#allocation81_spill] sm:$0xff] %v6186_v53  ;;  %7581 = vst [vmem:[#allocation82_spill] sm:$0xff] %v6190_v56  ;;  %v6210_v32 = vsel %vm624_vm3, %v592_v34, %v6130_v33  ;;  %1669 = vmatprep.mubr.f32.mxu0 %v7554_v63  ;;  %v658_v37 = vsub.f32 1.0, %v6151_v31  ;;  %v659_v62 = vsub.f32 1.0, %v6155_v57  ;;  %v660_v39 = vsub.f32 1.0, %v6160_v25 }
  0xd3   :  { %7582 = vst [vmem:[#allocation83_spill] sm:$0xff] %v6194_v42  ;;  %7583 = vst [vmem:[#allocation84_spill] sm:$0xff] %v6198_v59  ;;  %v661_v35 = vsub.f32 1.0, %v6164_v49  ;;  %v662_v0 = vsub.f32 1.0, %v6168_v50  ;;  %v663_v43 = vsub.f32 1.0, %v6173_v22  ;;  %v664_v55 = vsub.f32 1.0, %v6177_v36 }
  0xd4   :  { %7584 = vst [vmem:[#allocation85_spill] sm:$0xff] %v6202_v20  ;;  %7585 = vst [vmem:[#allocation86_spill] sm:$0xff] %v6206_v19  ;;  %v665_v34 = vmul.f32 %v657_v29, %v609_v28  ;;  %v666_v18 = vmul.f32 %v658_v37, %v610_v58  ;;  %v667_v40 = vmul.f32 %v659_v62, %v611_v48  ;;  %v649_v33 = vld [vmem:[#allocation6 + $0x5] sm:$0x1]  ;;  %v650_v57 = vld [vmem:[#allocation6 + $0xd] sm:$0x1] }
  0xd5   :  { %7586 = vst [vmem:[#allocation87_spill] sm:$0xff] %v6210_v32  ;;  %v668_v60 = vmul.f32 %v660_v39, %v612_v52  ;;  %v669_v17 = vmul.f32 %v661_v35, %v613_v61  ;;  %v670_v47 = vmul.f32 %v662_v0, %v614_v44  ;;  %v671_v31 = vmul.f32 %v663_v43, %v615_v46  ;;  %v652_v25 = vld [vmem:[#allocation6 + $0x1d] sm:$0x1]  ;;  %v654_v58 = vld [vmem:[#allocation6 + $0x2d] sm:$0x1] }
  0xd6   :  { %v672_v38 = vmul.f32 %v664_v55, %v616_v51  ;;  %v673_v54 = vadd.f32 0.125, %v665_v34  ;;  %v674_v49 = vadd.f32 0.125, %v666_v18  ;;  %v675_v21 = vadd.f32 0.125, %v667_v40  ;;  %v655_v61 = vld [vmem:[#allocation6 + $0x35] sm:$0x1] }
  0xd7   :  { %v676_v50 = vadd.f32 0.125, %v668_v60  ;;  %v677_v22 = vadd.f32 0.125, %v669_v17  ;;  %v678_v24 = vadd.f32 0.125, %v670_v47  ;;  %v679_v36 = vadd.f32 0.125, %v671_v31  ;;  %v656_v62 = vld [vmem:[#allocation6 + $0x3d] sm:$0x1] }
  0xd8   :  { %v680_v28 = vadd.f32 0.125, %v672_v38  ;;  %v1365_v48 = vrot.slane %v674_v49, 7  ;;  %v1367_v52 = vrot.slane %v675_v21, 6  ;;  %vm681_vm4 = vcmp.ne.f32.partialorder %v649_v33, 0.0 }
  0xd9   :  { %v1369_v29 = vrot.slane %v676_v50, 5  ;;  %v1371_v44 = vrot.slane %v677_v22, 4  ;;  %v1373_v46 = vrot.slane %v678_v24, 3  ;;  %v1375_v51 = vrot.slane %v679_v36, 2 }
  0xda   :  { %v1377_v37 = vrot.slane %v680_v28, 1  ;;  %v1366_v39 = vsel %vm850_vm8, %v1365_v48, %v673_v54  ;;  %vm682_vm5 = vcmp.ne.f32.partialorder %v650_v57, 0.0  ;;  %vm683_vm6 = vcmp.ne.f32.partialorder %v651_v41, 0.0 }
  0xdb   :  { %vm684_vm7 = vcmp.ne.f32.partialorder %v652_v25, 0.0  ;;  %v1368_v47 = vsel %vm853_vm9, %v1367_v52, %v1366_v39  ;;  %vm685_vm15 = vcmp.ne.f32.partialorder %v653_v23, 0.0  ;;  %vm686_vm0 = vcmp.ne.f32.partialorder %v654_v58, 0.0 }
  0xdc   :  { %vm687_vm1 = vcmp.ne.f32.partialorder %v655_v61, 0.0  ;;  %v1370_v38 = vsel %vm856_vm10, %v1369_v29, %v1368_v47  ;;  %vm688_vm2 = vcmp.ne.f32.partialorder %v656_v62, 0.0  ;;  %v6226_v17 = vsel %vm681_vm4, 1.0, %v7554_v63 }
  0xdd   :  { %7587 = vst [vmem:[#allocation88_spill] sm:$0xff] %v6226_v17  ;;  %v6230_v31 = vsel %vm682_vm5, 1.0, %v7554_v63  ;;  %v1372_v35 = vsel %vm859_vm11, %v1371_v44, %v1370_v38  ;;  %v6235_v0 = vsel %vm683_vm6, 1.0, %v7554_v63  ;;  %v6239_v43 = vsel %vm684_vm7, 1.0, %v7554_v63 }
  0xde   :  { %7588 = vst [vmem:[#allocation89_spill] sm:$0xff] %v6230_v31  ;;  %7589 = vst [vmem:[#allocation90_spill] sm:$0xff] %v6235_v0  ;;  %v6243_v55 = vsel %vm685_vm15, 1.0, %v7554_v63  ;;  %v1374_v34 = vsel %vm862_vm12, %v1373_v46, %v1372_v35  ;;  %v6248_v18 = vsel %vm686_vm0, 1.0, %v7554_v63  ;;  %v6252_v40 = vsel %vm687_vm1, 1.0, %v7554_v63 }
  0xdf   :  { %7590 = vst [vmem:[#allocation91_spill] sm:$0xff] %v6239_v43  ;;  %7591 = vst [vmem:[#allocation92_spill] sm:$0xff] %v6243_v55  ;;  %v6256_v60 = vsel %vm688_vm2, 1.0, %v7554_v63  ;;  %v1376_v48 = vsel %vm865_vm13, %v1375_v51, %v1374_v34  ;;  %v6261_v52 = vsel %vm681_vm4, %v649_v33, %v6181_v45  ;;  %v6265_v29 = vsel %vm682_vm5, %v650_v57, %v6186_v53  ;;  %v717_v45 = vld [vmem:[#allocation6 + $0x26] sm:$0x1] }
  0xe0   :  { %7592 = vst [vmem:[#allocation93_spill] sm:$0xff] %v6248_v18  ;;  %7593 = vst [vmem:[#allocation94_spill] sm:$0xff] %v6252_v40  ;;  %v6269_v44 = vsel %vm683_vm6, %v651_v41, %v6190_v56  ;;  %v1378_v46 = vsel %vm868_vm14, %v1377_v37, %v1376_v48  ;;  %v6274_v39 = vsel %vm684_vm7, %v652_v25, %v6194_v42  ;;  %v721_v25 = vsub.f32 1.0, %v6226_v17  ;;  %v715_v42 = vld [vmem:[#allocation6 + $0x16] sm:$0x1] }
  0xe1   :  { %7594 = vst [vmem:[#allocation95_spill] sm:$0xff] %v6256_v60  ;;  %v6278_v51 = vsel %vm685_vm15, %v653_v23, %v6198_v59  ;;  %v6282_v33 = vsel %vm686_vm0, %v654_v58, %v6202_v20  ;;  %1670 = vmatmul.mubr.f32.gmra.mrb[10].mxu0 %v1378_v46  ;;  %v6286_v57 = vsel %vm687_vm1, %v655_v61, %v6206_v19  ;;  %v722_v37 = vsub.f32 1.0, %v6230_v31  ;;  %v714_v19 = vld [vmem:[#allocation6 + $0xe] sm:$0x1] }
  0xe2   :  { %7595 = vst [vmem:[#allocation96_spill] sm:$0xff] %v6282_v33  ;;  %7596 = vst [vmem:[#allocation97_spill] sm:$0xff] %v6286_v57  ;;  %v6290_v41 = vsel %vm688_vm2, %v656_v62, %v6210_v32  ;;  %1675 = vmatprep.mubr.f32.mxu0 %v7554_v63  ;;  %v723_v23 = vsub.f32 1.0, %v6235_v0  ;;  %v724_v58 = vsub.f32 1.0, %v6239_v43  ;;  %v725_v47 = vsub.f32 1.0, %v6243_v55 }
  0xe3   :  { %7597 = vst [vmem:[#allocation98_spill] sm:$0xff] %v6290_v41  ;;  %v726_v38 = vsub.f32 1.0, %v6248_v18  ;;  %v727_v61 = vsub.f32 1.0, %v6252_v40  ;;  %v728_v35 = vsub.f32 1.0, %v6256_v60  ;;  %v729_v62 = vmul.f32 %v721_v25, %v673_v54  ;;  %v713_v32 = vld [vmem:[#allocation6 + $0x6] sm:$0x1] }
  0xe4   :  { %v730_v34 = vmul.f32 %v722_v37, %v674_v49  ;;  %v731_v48 = vmul.f32 %v723_v23, %v675_v21  ;;  %v732_v46 = vmul.f32 %v724_v58, %v676_v50  ;;  %v733_v17 = vmul.f32 %v725_v47, %v677_v22  ;;  %v716_v55 = vld [vmem:[#allocation6 + $0x1e] sm:$0x1]  ;;  %v718_v60 = vld [vmem:[#allocation6 + $0x2e] sm:$0x1]  ;;  %v719_v50 = vld [vmem:[#allocation6 + $0x36] sm:$0x1] }
  0xe5   :  { %v734_v31 = vmul.f32 %v726_v38, %v678_v24  ;;  %v735_v20 = vmul.f32 %v727_v61, %v679_v36  ;;  %v736_v0 = vmul.f32 %v728_v35, %v680_v28  ;;  %v737_v59 = vadd.f32 0.125, %v729_v62  ;;  %v720_v28 = vld [vmem:[#allocation6 + $0x3e] sm:$0x1] }
  0xe6   :  { %v738_v43 = vadd.f32 0.125, %v730_v34  ;;  %v739_v18 = vadd.f32 0.125, %v731_v48  ;;  %v740_v56 = vadd.f32 0.125, %v732_v46  ;;  %v741_v40 = vadd.f32 0.125, %v733_v17 }
  0xe7   :  { %v742_v53 = vadd.f32 0.125, %v734_v31  ;;  %v743_v54 = vadd.f32 0.125, %v735_v20  ;;  %v744_v49 = vadd.f32 0.125, %v736_v0  ;;  %vm745_vm3 = vcmp.ne.f32.partialorder %v713_v32, 0.0 }
  0xe8   :  { %v1388_v21 = vrot.slane %v738_v43, 7  ;;  %v1390_v24 = vrot.slane %v739_v18, 6  ;;  %v1392_v22 = vrot.slane %v740_v56, 5  ;;  %v1394_v25 = vrot.slane %v741_v40, 4 }
  0xe9   :  { %v1396_v36 = vrot.slane %v742_v53, 3  ;;  %v1398_v23 = vrot.slane %v743_v54, 2  ;;  %v1400_v58 = vrot.slane %v744_v49, 1  ;;  %vm746_vm4 = vcmp.ne.f32.partialorder %v714_v19, 0.0 }
  0xea   :  { %v1389_v37 = vsel %vm850_vm8, %v1388_v21, %v737_v59  ;;  %vm747_vm5 = vcmp.ne.f32.partialorder %v715_v42, 0.0  ;;  %vm748_vm6 = vcmp.ne.f32.partialorder %v716_v55, 0.0  ;;  %vm749_vm7 = vcmp.ne.f32.partialorder %v717_v45, 0.0 }
  0xeb   :  { %v1391_v47 = vsel %vm853_vm9, %v1390_v24, %v1389_v37  ;;  %vm750_vm15 = vcmp.ne.f32.partialorder %v718_v60, 0.0  ;;  %vm751_vm0 = vcmp.ne.f32.partialorder %v719_v50, 0.0  ;;  %vm752_vm1 = vcmp.ne.f32.partialorder %v720_v28, 0.0 }
  0xec   :  { %v1393_v20 = vsel %vm856_vm10, %v1392_v22, %v1391_v47  ;;  %v6307_v31 = vsel %vm745_vm3, 1.0, %v7554_v63  ;;  %v6311_v0 = vsel %vm746_vm4, 1.0, %v7554_v63  ;;  %v6315_v38 = vsel %vm747_vm5, 1.0, %v7554_v63 }
  0xed   :  { %v1395_v17 = vsel %vm859_vm11, %v1394_v25, %v1393_v20  ;;  %7598 = vst [vmem:[#allocation99_spill] sm:$0xff] %v6307_v31  ;;  %7599 = vst [vmem:[#allocation100_spill] sm:$0xff] %v6311_v0  ;;  %v6320_v35 = vsel %vm748_vm6, 1.0, %v7554_v63  ;;  %v6324_v62 = vsel %vm749_vm7, 1.0, %v7554_v63  ;;  %v6328_v34 = vsel %vm750_vm15, 1.0, %v7554_v63 }
  0xee   :  { %7600 = vst [vmem:[#allocation101_spill] sm:$0xff] %v6315_v38  ;;  %v1397_v61 = vsel %vm862_vm12, %v1396_v36, %v1395_v17  ;;  %7601 = vst [vmem:[#allocation102_spill] sm:$0xff] %v6320_v35  ;;  %v6333_v46 = vsel %vm751_vm0, 1.0, %v7554_v63  ;;  %v6337_v21 = vsel %vm752_vm1, 1.0, %v7554_v63  ;;  %v6341_v24 = vsel %vm745_vm3, %v713_v32, %v6261_v52 }
  0xef   :  { %7602 = vst [vmem:[#allocation103_spill] sm:$0xff] %v6324_v62  ;;  %7603 = vst [vmem:[#allocation104_spill] sm:$0xff] %v6328_v34  ;;  %v1399_v48 = vsel %vm865_vm13, %v1398_v23, %v1397_v61  ;;  %v6346_v25 = vsel %vm746_vm4, %v714_v19, %v6265_v29  ;;  %v6350_v36 = vsel %vm747_vm5, %v715_v42, %v6269_v44  ;;  %v788_v47 = vsub.f32 1.0, %v6320_v35 }
  0xf0   :  { %7604 = vst [vmem:[#allocation105_spill] sm:$0xff] %v6333_v46  ;;  %7605 = vst [vmem:[#allocation106_spill] sm:$0xff] %v6337_v21  ;;  %v1401_v22 = vsel %vm868_vm14, %v1400_v58, %v1399_v48  ;;  %v6354_v37 = vsel %vm748_vm6, %v716_v55, %v6274_v39  ;;  %v6358_v23 = vsel %vm749_vm7, %v717_v45, %v6278_v51  ;;  %v785_v55 = vsub.f32 1.0, %v6307_v31 }
  0xf1   :  { %7606 = vst [vmem:[#allocation107_spill] sm:$0xff] %v6341_v24  ;;  %1676 = vmatmul.mubr.f32.gmra.mrb[12].mxu0 %v1401_v22  ;;  %v6362_v32 = vsel %vm750_vm15, %v718_v60, %v6282_v33  ;;  %v6366_v19 = vsel %vm751_vm0, %v719_v50, %v6286_v57  ;;  %v6370_v42 = vsel %vm752_vm1, %v720_v28, %v6290_v41  ;;  %v786_v58 = vsub.f32 1.0, %v6311_v0 }
  0xf2   :  { %7607 = vst [vmem:[#allocation108_spill] sm:$0xff] %v6362_v32  ;;  %7608 = vst [vmem:[#allocation109_spill] sm:$0xff] %v6366_v19  ;;  %1681 = vmatprep.mubr.f32.mxu0 %v7554_v63  ;;  %v787_v45 = vsub.f32 1.0, %v6315_v38  ;;  %v789_v60 = vsub.f32 1.0, %v6324_v62  ;;  %v790_v20 = vsub.f32 1.0, %v6328_v34  ;;  %v791_v50 = vsub.f32 1.0, %v6333_v46 }
  0xf3   :  { %7609 = vst [vmem:[#allocation110_spill] sm:$0xff] %v6370_v42  ;;  %v792_v17 = vsub.f32 1.0, %v6337_v21  ;;  %v793_v28 = vmul.f32 %v785_v55, %v737_v59  ;;  %v794_v61 = vmul.f32 %v786_v58, %v738_v43  ;;  %v796_v22 = vmul.f32 %v788_v47, %v740_v56  ;;  %v171_v21 = vld [vmem:[#allocation14 + $0x8] sm:$0xff]  ;;  %v174_v59 = vld [vmem:[#allocation14 + $0x20] sm:$0xff]  ;;  %v173_v56 = vld [vmem:[#allocation14 + $0x18] sm:$0xff] }
  0xf4   :  { %v795_v48 = vmul.f32 %v787_v45, %v739_v18  ;;  %v797_v63 = vmul.f32 %v789_v60, %v741_v40  ;;  %v798_v31 = vmul.f32 %v790_v20, %v742_v53  ;;  %v799_v24 = vmul.f32 %v791_v50, %v743_v54  ;;  %v170_v43 = vld [vmem:[#allocation14] sm:$0xff]  ;;  %v177_v40 = vld [vmem:[#allocation14 + $0x38] sm:$0xff]  ;;  %v180_v53 = vld [vmem:[#allocation14 + $0x50] sm:$0xff] }
  0xf5   :  { %v800_v0 = vmul.f32 %v792_v17, %v744_v49  ;;  %v801_v42 = vadd.f32 0.125, %v793_v28  ;;  %v802_v38 = vadd.f32 0.125, %v794_v61  ;;  %v804_v35 = vadd.f32 0.125, %v796_v22  ;;  %v186_v47 = vld [vmem:[#allocation14 + $0x80] sm:$0xff]  ;;  %v185_v50 = vld [vmem:[#allocation14 + $0x78] sm:$0xff]  ;;  %v192_v28 = vld [vmem:[#allocation14 + $0xb0] sm:$0xff] }
  0xf6   :  { %v803_v19 = vadd.f32 0.125, %v795_v48  ;;  %v805_v32 = vadd.f32 0.125, %v797_v63  ;;  %v806_v62 = vadd.f32 0.125, %v798_v31  ;;  %v807_v41 = vadd.f32 0.125, %v799_v24  ;;  %v182_v20 = vld [vmem:[#allocation14 + $0x60] sm:$0xff]  ;;  %v189_v17 = vld [vmem:[#allocation14 + $0x98] sm:$0xff] }
  0xf7   :  { %v808_v34 = vadd.f32 0.125, %v800_v0  ;;  %v849_v57 = vrot.slane %v802_v38, 7  ;;  %v855_v33 = vrot.slane %v804_v35, 5  ;;  %v4538_v0 = vpack.c.bf16 %v174_v59, %v171_v21  ;;  %v176_v35 = vld [vmem:[#allocation14 + $0x30] sm:$0xff] }
  0xf8   :  { %v852_v46 = vrot.slane %v803_v19, 6  ;;  %v858_v18 = vrot.slane %v805_v32, 4  ;;  %v861_v49 = vrot.slane %v806_v62, 3  ;;  %v864_v58 = vrot.slane %v807_v41, 2  ;;  %v179_v19 = vld [vmem:[#allocation14 + $0x48] sm:$0xff]  ;;  %v188_v59 = vld [vmem:[#allocation14 + $0x90] sm:$0xff] }
  0xf9   :  { %v851_v54 = vsel %vm850_vm8, %v849_v57, %v801_v42  ;;  %v867_v63 = vrot.slane %v808_v34, 1  ;;  %v4540_v38 = vpack.c.bf16 %v173_v56, %v170_v43  ;;  %v4542_v24 = vpack.c.bf16 %v180_v53, %v177_v40  ;;  %v183_v32 = vld [vmem:[#allocation14 + $0x68] sm:$0xff]  ;;  %4539 = vmatprep.subr.bf16.mxu1 %v4538_v0  ;;  %v220_v57 = vld [vmem:[#allocation14 + $0x190] sm:$0xff]  ;;  %v226_v43 = vld [vmem:[#allocation14 + $0x1c0] sm:$0xff] }
  0xfa   :  { %v854_v55 = vsel %vm853_vm9, %v852_v46, %v851_v54  ;;  %v223_v62 = vld [vmem:[#allocation14 + $0x1a8] sm:$0xff]  ;;  %v4544_v41 = vpack.c.bf16 %v179_v19, %v176_v35  ;;  %v172_v34 = vld [vmem:[#allocation14 + $0x10] sm:$0xff]  ;;  %v4546_v42 = vpack.c.bf16 %v186_v47, %v183_v32  ;;  %v4548_v22 = vpack.c.bf16 %v185_v50, %v182_v20  ;;  %v178_v54 = vld [vmem:[#allocation14 + $0x40] sm:$0xff] }
  0xfb   :  { %v857_v31 = vsel %vm856_vm10, %v855_v33, %v854_v55  ;;  %4541 = vmatpush1.bf16.msra.mxu1 %v4540_v38  ;;  %v175_v33 = vld [vmem:[#allocation14 + $0x28] sm:$0xff]  ;;  %v4602_v61 = vpack.c.bf16 %v223_v62, %v220_v57  ;;  %v4550_v56 = vpack.c.bf16 %v192_v28, %v189_v17  ;;  %v194_v0 = vld [vmem:[#allocation14 + $0xc0] sm:$0xff]  ;;  %v232_v38 = vld [vmem:[#allocation14 + $0x1f0] sm:$0xff] }
  0xfc   :  { %v860_v45 = vsel %vm859_vm11, %v858_v18, %v857_v31  ;;  %4543 = vmatprep.subr.bf16.mxu1 %v4542_v24  ;;  %v4604_v48 = vpack.c.bf16 %v175_v33, %v172_v34  ;;  %v229_v18 = vld [vmem:[#allocation14 + $0x1d8] sm:$0xff]  ;;  %v191_v40 = vld [vmem:[#allocation14 + $0xa8] sm:$0xff]  ;;  %v200_v34 = vld [vmem:[#allocation14 + $0xf0] sm:$0xff] }
  0xfd   :  { %v863_v60 = vsel %vm862_vm12, %v861_v49, %v860_v45  ;;  %4603 = vmatprep.subr.bf16.mxu0 %v4602_v61  ;;  %v4606_v53 = vpack.c.bf16 %v229_v18, %v226_v43  ;;  %v181_v49 = vld [vmem:[#allocation14 + $0x58] sm:$0xff]  ;;  %v195_v55 = vld [vmem:[#allocation14 + $0xc8] sm:$0xff]  ;;  %v4552_v31 = vpack.c.bf16 %v191_v40, %v188_v59  ;;  %v184_v45 = vld [vmem:[#allocation14 + $0x70] sm:$0xff] }
  0xfe   :  { %v866_v46 = vsel %vm865_vm13, %v864_v58, %v863_v60  ;;  %4605 = vmatpush3.bf16.msra.mxu0 %v4604_v48  ;;  %v198_v58 = vld [vmem:[#allocation14 + $0xe0] sm:$0xff]  ;;  %v235_v24 = vld [vmem:[#allocation14 + $0x208] sm:$0xff]  ;;  %v197_v19 = vld [vmem:[#allocation14 + $0xd8] sm:$0xff] }
  0xff   :  { %v869_v21 = vsel %vm868_vm14, %v867_v63, %v866_v46  ;;  %4545 = vmatpush1.bf16.msra.mxu1 %v4544_v41  ;;  %v4608_v63 = vpack.c.bf16 %v181_v49, %v178_v54  ;;  %4607 = vmatprep.subr.bf16.mxu0 %v4606_v53  ;;  %v4554_v35 = vpack.c.bf16 %v198_v58, %v195_v55  ;;  %v187_v32 = vld [vmem:[#allocation14 + $0x88] sm:$0xff]  ;;  %v201_v47 = vld [vmem:[#allocation14 + $0xf8] sm:$0xff]  ;;  %v204_v60 = vld [vmem:[#allocation14 + $0x110] sm:$0xff] }
 0x100   :  { %1682 = vmatmul.mubr.f32.gmra.mrb[14].mxu0 %v869_v21  ;;  %4547 = vmatprep.subr.bf16.mxu1 %v4546_v42  ;;  %v4610_v57 = vpack.c.bf16 %v235_v24, %v232_v38  ;;  %v4612_v62 = vpack.c.bf16 %v187_v32, %v184_v45  ;;  %v4556_v46 = vpack.c.bf16 %v197_v19, %v194_v0  ;;  %v203_v33 = vld [vmem:[#allocation14 + $0x108] sm:$0xff]  ;;  %v210_v42 = vld [vmem:[#allocation14 + $0x140] sm:$0xff]  ;;  %v209_v28 = vld [vmem:[#allocation14 + $0x138] sm:$0xff] }
 0x101   :  { %v4558_v41 = vpack.c.bf16 %v204_v60, %v201_v47  ;;  %v207_v21 = vld [vmem:[#allocation14 + $0x128] sm:$0xff]  ;;  %v4560_v20 = vpack.c.bf16 %v203_v33, %v200_v34  ;;  %v206_v17 = vld [vmem:[#allocation14 + $0x120] sm:$0xff]  ;;  %v213_v61 = vld [vmem:[#allocation14 + $0x158] sm:$0xff] }
 0x102   :  { %4609 = vmatpush3.bf16.msra.mxu0 %v4608_v63  ;;  %v4562_v50 = vpack.c.bf16 %v210_v42, %v207_v21  ;;  %v216_v48 = vld [vmem:[#allocation14 + $0x170] sm:$0xff]  ;;  %v241_v59 = vld [vmem:[#allocation14 + $0x238] sm:$0xff]  ;;  %v190_v18 = vld [vmem:[#allocation14 + $0xa0] sm:$0xff]  ;;  %v4564_v40 = vpack.c.bf16 %v209_v28, %v206_v17 }
 0x103   :  { %4549 = vmatpush1.bf16.msra.mxu1 %v4548_v22  ;;  %4611 = vmatprep.subr.bf16.mxu0 %v4610_v57  ;;  %v238_v22 = vld [vmem:[#allocation14 + $0x220] sm:$0xff]  ;;  %v4566_v54 = vpack.c.bf16 %v216_v48, %v213_v61  ;;  %v212_v49 = vld [vmem:[#allocation14 + $0x150] sm:$0xff]  ;;  %v215_v55 = vld [vmem:[#allocation14 + $0x168] sm:$0xff] }
 0x104   :  { %4551 = vmatprep.subr.bf16.mxu1 %v4550_v56  ;;  %v4614_v43 = vpack.c.bf16 %v241_v59, %v238_v22  ;;  %v193_v56 = vld [vmem:[#allocation14 + $0xb8] sm:$0xff]  ;;  %v219_v58 = vld [vmem:[#allocation14 + $0x188] sm:$0xff]  ;;  %v222_v63 = vld [vmem:[#allocation14 + $0x1a0] sm:$0xff] }
 0x105   :  { %v4616_v53 = vpack.c.bf16 %v193_v56, %v190_v18  ;;  %v4570_v0 = vpack.c.bf16 %v222_v63, %v219_v58  ;;  %v218_v38 = vld [vmem:[#allocation14 + $0x180] sm:$0xff]  ;;  %v221_v24 = vld [vmem:[#allocation14 + $0x198] sm:$0xff]  ;;  %v228_v19 = vld [vmem:[#allocation14 + $0x1d0] sm:$0xff] }
 0x106   :  { %4613 = vmatpush3.bf16.msra.mxu0 %v4612_v62  ;;  %v4572_v45 = vpack.c.bf16 %v221_v24, %v218_v38  ;;  %v224_v47 = vld [vmem:[#allocation14 + $0x1b0] sm:$0xff]  ;;  %v227_v60 = vld [vmem:[#allocation14 + $0x1c8] sm:$0xff]  ;;  %v234_v62 = vld [vmem:[#allocation14 + $0x200] sm:$0xff] }
 0x107   :  { %4553 = vmatpush1.bf16.msra.mxu1 %v4552_v31  ;;  %4615 = vmatprep.subr.bf16.mxu0 %v4614_v43  ;;  %v4568_v31 = vpack.c.bf16 %v215_v55, %v212_v49  ;;  %v231_v57 = vld [vmem:[#allocation14 + $0x1e8] sm:$0xff]  ;;  %v230_v34 = vld [vmem:[#allocation14 + $0x1e0] sm:$0xff]  ;;  %v233_v33 = vld [vmem:[#allocation14 + $0x1f8] sm:$0xff] }
 0x108   :  { %4555 = vmatprep.subr.bf16.mxu1 %v4554_v35  ;;  %v225_v35 = vld [vmem:[#allocation14 + $0x1b8] sm:$0xff]  ;;  %v240_v42 = vld [vmem:[#allocation14 + $0x230] sm:$0xff]  ;;  %v199_v61 = vld [vmem:[#allocation14 + $0xe8] sm:$0xff]  ;;  %v4580_v48 = vpack.c.bf16 %v233_v33, %v230_v34 }
 0x109   :  { %v4574_v32 = vpack.c.bf16 %v228_v19, %v225_v35  ;;  %v237_v21 = vld [vmem:[#allocation14 + $0x218] sm:$0xff]  ;;  %v196_v28 = vld [vmem:[#allocation14 + $0xd0] sm:$0xff]  ;;  %v239_v18 = vld [vmem:[#allocation14 + $0x228] sm:$0xff] }
 0x10a   :  { %4617 = vmatpush3.bf16.msra.mxu0 %v4616_v53  ;;  %v4620_v22 = vpack.c.bf16 %v199_v61, %v196_v28  ;;  %v4582_v59 = vpack.c.bf16 %v240_v42, %v237_v21  ;;  %v236_v43 = vld [vmem:[#allocation14 + $0x210] sm:$0xff]  ;;  %v243_v56 = vld [vmem:[#allocation14 + $0x248] sm:$0xff]  ;;  %v242_v49 = vld [vmem:[#allocation14 + $0x240] sm:$0xff] }
 0x10b   :  { %4557 = vmatpush1.bf16.msra.mxu1 %v4556_v46  ;;  %v4576_v46 = vpack.c.bf16 %v227_v60, %v224_v47  ;;  %v4584_v53 = vpack.c.bf16 %v239_v18, %v236_v43  ;;  %v245_v55 = vld [vmem:[#allocation14 + $0x258] sm:$0xff]  ;;  %v251_v24 = vld [vmem:[#allocation14 + $0x288] sm:$0xff]  ;;  %v250_v35 = vld [vmem:[#allocation14 + $0x280] sm:$0xff]  ;;  %v1415_v43 = vrot.slane %v5811_v12, 5  ;;  %v1116_v12 = vrot.slane %v5780_v4, 5 }
 0x10c   :  { %4559 = vmatprep.subr.bf16.mxu1 %v4558_v41  ;;  %v4578_v41 = vpack.c.bf16 %v234_v62, %v231_v57  ;;  %v4588_v58 = vpack.c.bf16 %v245_v55, %v242_v49  ;;  %v249_v63 = vld [vmem:[#allocation14 + $0x278] sm:$0xff]  ;;  %v202_v47 = vld [vmem:[#allocation14 + $0x100] sm:$0xff]  ;;  %v255_v62 = vld [vmem:[#allocation14 + $0x2a8] sm:$0xff]  ;;  %v1124_v4 = vrot.slane %v5796_v8, 1 }
 0x10d   :  { %v253_v19 = vld [vmem:[#allocation14 + $0x298] sm:$0xff]  ;;  %v256_v21 = vld [vmem:[#allocation14 + $0x2b0] sm:$0xff]  ;;  %v259_v42 = vld [vmem:[#allocation14 + $0x2c8] sm:$0xff] }
 0x10e   :  { %v205_v60 = vld [vmem:[#allocation14 + $0x118] sm:$0xff]  ;;  %v211_v28 = vld [vmem:[#allocation14 + $0x148] sm:$0xff] }
 0x10f   :  { %4561 = vmatpush1.bf16.msra.mxu1 %v4560_v20  ;;  %v244_v20 = vld [vmem:[#allocation14 + $0x250] sm:$0xff]  ;;  %v4624_v57 = vpack.c.bf16 %v205_v60, %v202_v47  ;;  %v257_v33 = vld [vmem:[#allocation14 + $0x2b8] sm:$0xff]  ;;  %v214_v60 = vld [vmem:[#allocation14 + $0x160] sm:$0xff] }
 0x110   :  { %4563 = vmatprep.subr.bf16.mxu1 %v4562_v50  ;;  %v247_v50 = vld [vmem:[#allocation14 + $0x268] sm:$0xff] }
 0x111   :  { %v4618_v17 = vpack.c.bf16 %v247_v50, %v244_v20  ;;  %v4626_v50 = vpack.c.bf16 %v259_v42, %v256_v21 }
 0x113   :  { %4565 = vmatpush1.bf16.msra.mxu1 %v4564_v40  ;;  %4619 = vmatprep.subr.bf16.mxu0 %v4618_v17  ;;  %v246_v40 = vld [vmem:[#allocation14 + $0x260] sm:$0xff]  ;;  %v208_v17 = vld [vmem:[#allocation14 + $0x130] sm:$0xff] }
 0x114   :  { %4567 = vmatprep.subr.bf16.mxu1 %v4566_v54  ;;  %4621 = vmatpush3.bf16.msra.mxu0 %v4620_v22  ;;  %v4586_v54 = vpack.c.bf16 %v246_v40, %v243_v56  ;;  %v4628_v61 = vpack.c.bf16 %v211_v28, %v208_v17  ;;  %v1413_v22 = vrot.slane %v5807_v11, 6  ;;  %v1417_v56 = vrot.slane %v5815_v13, 4  ;;  %v7611_v17 = vld [vmem:[#allocation36_spill] sm:$0xff] }
 0x115   :  { %v1112_v40 = vrot.slane %v5772_v2, 7  ;;  %v1421_v11 = vrot.slane %v5823_v15, 2  ;;  %v1118_v2 = vrot.slane %v5784_v5, 4  ;;  %v1122_v15 = vrot.slane %v5792_v7, 2 }
 0x116   :  { %v1423_v5 = vrot.slane %v5827_v16, 1  ;;  %v267_v16 = vld [vmem:[#allocation15 + $0x8] sm:$0xff]  ;;  %v1440_v28 = vrot.slane %v7611_v17, 4  ;;  %v5250_v17 = vld [vmem:[#allocation6 + $0x9] sm:$0x1] }
 0x117   :  { %4569 = vmatpush1.bf16.msra.mxu1 %v4568_v31  ;;  %v252_v31 = vld [vmem:[#allocation14 + $0x290] sm:$0xff] }
 0x118   :  { %4571 = vmatprep.subr.bf16.mxu1 %v4570_v0  ;;  %v248_v0 = vld [vmem:[#allocation14 + $0x270] sm:$0xff]  ;;  %v4590_v38 = vpack.c.bf16 %v252_v31, %v249_v63  ;;  %v261_v31 = vld [vmem:[#allocation14 + $0x2d8] sm:$0xff] }
 0x11b   :  { %4573 = vmatpush1.bf16.msra.mxu1 %v4572_v45  ;;  %v4592_v45 = vpack.c.bf16 %v251_v24, %v248_v0  ;;  %v264_v0 = vld [vmem:[#allocation14 + $0x2f0] sm:$0xff] }
 0x11c   :  { %4575 = vmatprep.subr.bf16.mxu1 %v4574_v32  ;;  %v4622_v32 = vpack.c.bf16 %v253_v19, %v250_v35  ;;  %v4598_v35 = vpack.c.bf16 %v264_v0, %v261_v31  ;;  %v263_v19 = vld [vmem:[#allocation14 + $0x2e8] sm:$0xff]  ;;  %v5247_v0 = vld [vmem:[#allocation6] sm:$0x1] }
 0x11e   :  { %4623 = vmatprep.subr.bf16.mxu0 %v4622_v32  ;;  %v265_v32 = vld [vmem:[#allocation14 + $0x2f8] sm:$0xff] }
 0x11f   :  { %4577 = vmatpush1.bf16.msra.mxu1 %v4576_v46  ;;  %4625 = vmatpush3.bf16.msra.mxu0 %v4624_v57  ;;  %v258_v46 = vld [vmem:[#allocation14 + $0x2c0] sm:$0xff]  ;;  %v217_v57 = vld [vmem:[#allocation14 + $0x178] sm:$0xff] }
 0x120   :  { %4579 = vmatprep.subr.bf16.mxu1 %v4578_v41  ;;  %v254_v41 = vld [vmem:[#allocation14 + $0x2a0] sm:$0xff]  ;;  %v4594_v34 = vpack.c.bf16 %v258_v46, %v255_v62  ;;  %4627 = vmatprep.subr.bf16.mxu0 %v4626_v50  ;;  %v4632_v8 = vpack.c.bf16 %v217_v57, %v214_v60  ;;  %v269_v46 = vld [vmem:[#allocation15 + $0x18] sm:$0xff] }
 0x121   :  { %v4596_v20 = vpack.c.bf16 %v257_v33, %v254_v41  ;;  %v1434_v41 = vrot.slane %v5927_v27, 7  ;;  %v1436_v33 = vrot.slane %v5931_v30, 6 }
 0x123   :  { %4581 = vmatpush1.bf16.msra.mxu1 %v4580_v48  ;;  %v1411_v48 = vrot.slane %v5803_v10, 7  ;;  %4629 = vmatpush3.bf16.msra.mxu0 %v4628_v61  ;;  %v1114_v10 = vrot.slane %v5776_v3, 6  ;;  %v1120_v3 = vrot.slane %v5788_v6, 3  ;;  %v1435_v21 = vsel %vm850_vm8, %v1434_v41, %v5923_v26  ;;  %v7612_v61 = vld [vmem:[#allocation37_spill] sm:$0xff]  ;;  %v5249_v41 = vld [vmem:[#allocation6 + $0x20] sm:$0x1] }
 0x124   :  { %4583 = vmatprep.subr.bf16.mxu1 %v4582_v59  ;;  %v1437_v42 = vsel %vm853_vm9, %v1436_v33, %v1435_v21  ;;  %v934_v33 = vrot.slane %v5249_v41, 4 }
 0x125   :  { %v1412_v59 = vsel %vm850_vm8, %v1411_v48, %v5799_v9  ;;  %v1113_v9 = vsel %vm850_vm8, %v1112_v40, %v5768_v1  ;;  %v1442_v48 = vrot.slane %v7612_v61, 3  ;;  %v7624_v61 = vld [vmem:[#allocation65_spill] sm:$0xff] }
 0x126   :  { %v1414_v18 = vsel %vm853_vm9, %v1413_v22, %v1412_v59  ;;  %v1115_v13 = vsel %vm853_vm9, %v1114_v10, %v1113_v9  ;;  %v7613_v22 = vld [vmem:[#allocation38_spill] sm:$0xff]  ;;  %v7615_v10 = vld [vmem:[#allocation49_spill] sm:$0xff] }
 0x127   :  { %4585 = vmatpush1.bf16.msra.mxu1 %v4584_v53  ;;  %v1416_v53 = vsel %vm856_vm10, %v1415_v43, %v1414_v18  ;;  %v1444_v59 = vrot.slane %v7613_v22, 2  ;;  %v7614_v43 = vld [vmem:[#allocation39_spill] sm:$0xff] }
 0x128   :  { %4587 = vmatprep.subr.bf16.mxu1 %v4586_v54  ;;  %v1419_v54 = vrot.slane %v5819_v14, 3  ;;  %v1418_v49 = vsel %vm859_vm11, %v1417_v56, %v1416_v53  ;;  %v1117_v14 = vsel %vm856_vm10, %v1116_v12, %v1115_v13  ;;  %v1446_v18 = vrot.slane %v7614_v43, 1  ;;  %v5245_v53 = vld [vmem:[#allocation6 + $0x8] sm:$0x1]  ;;  %v7617_v12 = vld [vmem:[#allocation51_spill] sm:$0xff]  ;;  %v7618_v13 = vld [vmem:[#allocation48_spill] sm:$0xff] }
 0x129   :  { %v1119_v63 = vsel %vm859_vm11, %v1118_v2, %v1117_v14  ;;  %v7625_v43 = vld [vmem:[#allocation66_spill] sm:$0xff] }
 0x12a   :  { %v1420_v55 = vsel %vm862_vm12, %v1419_v54, %v1418_v49  ;;  %v1121_v1 = vsel %vm862_vm12, %v1120_v3, %v1119_v63  ;;  %v928_v54 = vrot.slane %v5245_v53, 7  ;;  %v1457_v49 = vrot.slane %v7615_v10, 7  ;;  %v5246_v63 = vld [vmem:[#allocation6 + $0x10] sm:$0x1] }
 0x12b   :  { %4589 = vmatpush1.bf16.msra.mxu1 %v4588_v58  ;;  %v1422_v58 = vsel %vm865_vm13, %v1421_v11, %v1420_v55  ;;  %v1123_v24 = vsel %vm865_vm13, %v1122_v15, %v1121_v1  ;;  %v7616_v11 = vld [vmem:[#allocation50_spill] sm:$0xff]  ;;  %v1461_v55 = vrot.slane %v7617_v12, 5  ;;  %v1565_v3 = vlaneseq }
 0x12c   :  { %4591 = vmatprep.subr.bf16.mxu1 %v4590_v38  ;;  %v260_v38 = vld [vmem:[#allocation14 + $0x2d0] sm:$0xff]  ;;  %v6417_v6 = vsel %vm868_vm14, %v1124_v4, %v1123_v24  ;;  %v6422_v62 = vsel %vm868_vm14, %v1423_v5, %v1422_v58  ;;  %v1459_v9 = vrot.slane %v7616_v11, 6  ;;  %v1458_v2 = vsel %vm850_vm8, %v1457_v49, %v7618_v13  ;;  %v7620_v4 = vld [vmem:[#allocation53_spill] sm:$0xff]  ;;  %v7621_v5 = vld [vmem:[#allocation54_spill] sm:$0xff] }
 0x12d   :  { %v4600_v47 = vpack.c.bf16 %v263_v19, %v260_v38  ;;  %1896 = vmatprep.mubr.f32.mxu1 %v6417_v6  ;;  %2009 = vmatprep.mubr.f32.mxu0 %v6417_v6  ;;  %v7619_v58 = vld [vmem:[#allocation52_spill] sm:$0xff]  ;;  %v930_v15 = vrot.slane %v5246_v63, 6  ;;  %v1465_v31 = vrot.slane %v7620_v4, 3  ;;  %v929_v38 = vsel %vm850_vm8, %v928_v54, %v5247_v0  ;;  %v7622_v19 = vld [vmem:[#allocation55_spill] sm:$0xff]  ;;  %v7627_v54 = vld [vmem:[#allocation29_spill] sm:$0xff] }
 0x12e   :  { %v1463_v14 = vrot.slane %v7619_v58, 4  ;;  %v1460_v1 = vsel %vm853_vm9, %v1459_v9, %v1458_v2  ;;  %v1137_v10 = vrot.slane %v7627_v54, 6  ;;  %v7628_v49 = vld [vmem:[#allocation64_spill] sm:$0xff]  ;;  %v5253_v13 = vld [vmem:[#allocation6 + $0x11] sm:$0x1] }
 0x12f   :  { %4593 = vmatpush1.bf16.msra.mxu1 %v4592_v45  ;;  %v262_v45 = vld [vmem:[#allocation14 + $0x2e0] sm:$0xff]  ;;  %v1462_v24 = vsel %vm856_vm10, %v1461_v55, %v1460_v1  ;;  %v931_v57 = vsel %vm853_vm9, %v930_v15, %v929_v38  ;;  %v7629_v9 = vld [vmem:[#allocation68_spill] sm:$0xff]  ;;  %v953_v2 = vrot.slane %v5253_v13, 6  ;;  %v7632_v1 = vld [vmem:[#allocation27_spill] sm:$0xff] }
 0x130   :  { %4595 = vmatprep.subr.bf16.mxu1 %v4594_v34  ;;  %v4630_v7 = vpack.c.bf16 %v265_v32, %v262_v45  ;;  %v6425_v34 = vpack.c.bf16 %v269_v46, %v267_v16  ;;  %v1469_v45 = vrot.slane %v7622_v19, 1  ;;  %v1464_v32 = vsel %vm859_vm11, %v1463_v14, %v1462_v24  ;;  %v6479_v55 = vld [vmem:[%s7427_s4] sm:$0x3]  ;;  %v7630_v14 = vld [vmem:[#allocation69_spill] sm:$0xff]  ;;  %v7631_v63 = vld [vmem:[#allocation70_spill] sm:$0xff] }
 0x131   :  { %v1466_v60 = vsel %vm862_vm12, %v1465_v31, %v1464_v32  ;;  %v6460_v16 = vshrl.u32 %v1565_v3, 7  ;;  %v1486_v12 = vrot.slane %v7629_v9, 4  ;;  %v1488_v3 = vrot.slane %v7630_v14, 3  ;;  %v5254_v31 = vld [vmem:[#allocation6 + $0x1] sm:$0x1]  ;;  %v7633_v24 = vld [vmem:[#allocation71_spill] sm:$0xff] }
 0x132   :  { %4631 = vmatprep.subr.bf16.mxu0 %v4630_v7  ;;  %v1490_v15 = vrot.slane %v7631_v63, 2  ;;  %v7634_v32 = vld [vmem:[#allocation30_spill] sm:$0xff]  ;;  %v7637_v9 = vld [vmem:[#allocation32_spill] sm:$0xff]  ;;  %v7638_v13 = vld [vmem:[#allocation33_spill] sm:$0xff] }
 0x133   :  { %4597 = vmatpush1.bf16.msra.mxu1 %v4596_v20  ;;  %4633 = vmatpush3.bf16.msra.mxu0 %v4632_v8  ;;  %v7610_v20 = vld [vmem:[#allocation35_spill] sm:$0xff] }
 0x134   :  { %4599 = vmatprep.subr.bf16.mxu1 %v4598_v35  ;;  %v1438_v50 = vrot.slane %v7610_v20, 5  ;;  %v1467_v35 = vrot.slane %v7621_v5, 2  ;;  %v7623_v20 = vld [vmem:[#allocation28_spill] sm:$0xff]  ;;  %v1492_v5 = vrot.slane %v7633_v24, 1  ;;  %v7641_v24 = vld [vmem:[#allocation34_spill] sm:$0xff] }
 0x136   :  { %v1439_v27 = vsel %vm856_vm10, %v1438_v50, %v1437_v42  ;;  %v1468_v8 = vsel %vm865_vm13, %v1467_v35, %v1466_v60  ;;  %v7524_v42 = vsub.s32 0, %v6460_v16  ;;  %v1135_v50 = vrot.slane %v7623_v20, 7 }
 0x137   :  { %4601 = vmatpush1.bf16.msra.mxu1 %v4600_v47  ;;  %v1441_v30 = vsel %vm859_vm11, %v1440_v28, %v1439_v27  ;;  %v5248_v47 = vld [vmem:[#allocation6 + $0x18] sm:$0x1]  ;;  %v6463_v46 = vsel %vm868_vm14, %v1469_v45, %v1468_v8  ;;  %v951_v28 = vrot.slane %v5250_v17, 7 }
 0x138   :  { %4635 = vmatprep.subr.bf16.mxu1 %v6425_v34  ;;  %v1443_v56 = vsel %vm862_vm12, %v1442_v48, %v1441_v30  ;;  %v932_v7 = vrot.slane %v5248_v47, 5  ;;  %v1480_v48 = vrot.slane %v7624_v61, 7  ;;  %v7626_v30 = vld [vmem:[#allocation67_spill] sm:$0xff]  ;;  %v1136_v4 = vsel %vm850_vm8, %v1135_v50, %v7632_v1 }
 0x139   :  { %v1445_v26 = vsel %vm865_vm13, %v1444_v59, %v1443_v56  ;;  %v5251_v59 = vld [vmem:[#allocation6 + $0x28] sm:$0x1]  ;;  %v1484_v56 = vrot.slane %v7626_v30, 5  ;;  %v952_v0 = vsel %vm850_vm8, %v951_v28, %v5254_v31  ;;  %v6494_v45 = vrot.slane %v6479_v55, %v7524_v42  ;;  %v5256_v8 = vld [vmem:[#allocation6 + $0x38] sm:$0x1]  ;;  %v7640_v31 = vld [vmem:[#allocation82_spill] sm:$0xff] }
 0x13a   :  { %v6442_v40 = vsel %vm868_vm14, %v1446_v18, %v1445_v26  ;;  %v933_v21 = vsel %vm856_vm10, %v932_v7, %v931_v57  ;;  %v936_v27 = vrot.slane %v5251_v59, 3  ;;  %v1482_v18 = vrot.slane %v7625_v43, 6  ;;  %v5252_v26 = vld [vmem:[#allocation6 + $0x30] sm:$0x1]  ;;  %v5255_v7 = vld [vmem:[#allocation6 + $0x19] sm:$0x1] }
 0x13b   :  { %v935_v22 = vsel %vm859_vm11, %v934_v33, %v933_v21  ;;  %v938_v53 = vrot.slane %v5252_v26, 2  ;;  %v1481_v11 = vsel %vm850_vm8, %v1480_v48, %v7628_v49  ;;  %v1139_v47 = vrot.slane %v7634_v32, 5  ;;  %v7635_v61 = vld [vmem:[#allocation31_spill] sm:$0xff]  ;;  %v7636_v49 = vld [vmem:[#allocation41_spill] sm:$0xff]  ;;  %v7642_v32 = vld [vmem:[#allocation42_spill] sm:$0xff] }
 0x13c   :  { %v1483_v58 = vsel %vm853_vm9, %v1482_v18, %v1481_v11  ;;  %v937_v35 = vsel %vm862_vm12, %v936_v27, %v935_v22  ;;  %v955_v60 = vrot.slane %v5255_v7, 5  ;;  %v940_v41 = vrot.slane %v5256_v8, 1  ;;  %v5257_v22 = vld [vmem:[#allocation6 + $0x21] sm:$0x1] }
 0x13d   :  { %v1485_v38 = vsel %vm856_vm10, %v1484_v56, %v1483_v58  ;;  %v1138_v33 = vsel %vm853_vm9, %v1137_v10, %v1136_v4  ;;  %v954_v21 = vsel %vm853_vm9, %v953_v2, %v952_v0  ;;  %v939_v50 = vsel %vm865_vm13, %v938_v53, %v937_v35  ;;  %v5258_v58 = vld [vmem:[#allocation6 + $0x29] sm:$0x1]  ;;  %v5259_v35 = vld [vmem:[#allocation6 + $0x31] sm:$0x1]  ;;  %v7643_v7 = vld [vmem:[#allocation80_spill] sm:$0xff] }
 0x13e   :  { %v1487_v19 = vsel %vm859_vm11, %v1486_v12, %v1485_v38  ;;  %v1549_v28 = vrot.slane %v6346_v25, 7  ;;  %v1141_v48 = vrot.slane %v7635_v61, 4  ;;  %v957_v59 = vrot.slane %v5257_v22, 4 }
 0x13f   :  { %v1489_v57 = vsel %vm862_vm12, %v1488_v3, %v1487_v19  ;;  %v1551_v27 = vrot.slane %v6350_v36, 6  ;;  %v1553_v43 = vrot.slane %v6354_v37, 5  ;;  %v1140_v30 = vsel %vm856_vm10, %v1139_v47, %v1138_v33  ;;  %v7639_v3 = vld [vmem:[#allocation81_spill] sm:$0xff]  ;;  %v7645_v33 = vld [vmem:[#allocation40_spill] sm:$0xff] }
 0x140   :  { %v1491_v20 = vsel %vm865_vm13, %v1490_v15, %v1489_v57  ;;  %v956_v56 = vsel %vm856_vm10, %v955_v60, %v954_v21  ;;  %v1555_v26 = vrot.slane %v6358_v23, 4  ;;  %v6516_v10 = vsel %vm868_vm14, %v940_v41, %v939_v50 }
 0x141   :  { %v6503_v17 = vsel %vm868_vm14, %v1492_v5, %v1491_v20  ;;  %v1158_v11 = vrot.slane %v7636_v49, 7  ;;  %v1143_v12 = vrot.slane %v7637_v9, 3  ;;  %v1145_v2 = vrot.slane %v7638_v13, 2  ;;  %v7648_v9 = vld [vmem:[#allocation84_spill] sm:$0xff] }
 0x142   :  { %v959_v14 = vrot.slane %v5258_v58, 3  ;;  %v1503_v63 = vrot.slane %v7639_v3, 7  ;;  %v1142_v1 = vsel %vm859_vm11, %v1141_v48, %v1140_v30  ;;  %v958_v4 = vsel %vm859_vm11, %v957_v59, %v956_v56  ;;  %v5260_v48 = vld [vmem:[#allocation6 + $0x39] sm:$0x1]  ;;  %v5261_v3 = vld [vmem:[#allocation6 + $0xa] sm:$0x1] }
 0x143   :  { %v1505_v0 = vrot.slane %v7640_v31, 6  ;;  %v1147_v5 = vrot.slane %v7641_v24, 1  ;;  %v961_v19 = vrot.slane %v5259_v35, 2  ;;  %v1160_v47 = vrot.slane %v7642_v32, 6  ;;  %v7646_v59 = vld [vmem:[#allocation83_spill] sm:$0xff] }
 0x144   :  { %v1504_v60 = vsel %vm850_vm8, %v1503_v63, %v7643_v7  ;;  %v1159_v21 = vsel %vm850_vm8, %v1158_v11, %v7645_v33  ;;  %v1144_v50 = vsel %vm862_vm12, %v1143_v12, %v1142_v1  ;;  %v960_v61 = vsel %vm862_vm12, %v959_v14, %v958_v4  ;;  %v7650_v4 = vld [vmem:[#allocation86_spill] sm:$0xff]  ;;  %v7651_v35 = vld [vmem:[#allocation87_spill] sm:$0xff] }
 0x145   :  { %v1506_v20 = vsel %vm853_vm9, %v1505_v0, %v1504_v60  ;;  %v963_v22 = vrot.slane %v5260_v48, 1  ;;  %v1509_v13 = vrot.slane %v7648_v9, 4  ;;  %v1161_v58 = vsel %vm853_vm9, %v1160_v47, %v1159_v21  ;;  %v266_v7 = vld [vmem:[#allocation15] sm:$0xff]  ;;  %v268_v60 = vld [vmem:[#allocation15 + $0x10] sm:$0xff] }
 0x146   :  { %v974_v11 = vrot.slane %v5261_v3, 7  ;;  %v1513_v31 = vrot.slane %v7650_v4, 2  ;;  %v1146_v0 = vsel %vm865_vm13, %v1145_v2, %v1144_v50  ;;  %v1515_v32 = vrot.slane %v7651_v35, 1  ;;  %v5262_v33 = vld [vmem:[#allocation6 + $0x12] sm:$0x1]  ;;  %v272_v9 = vld [vmem:[#allocation15 + $0x30] sm:$0xff] }
 0x147   :  { %v976_v21 = vrot.slane %v5262_v33, 6  ;;  %v1760_v48 = vsub.f32 1.0, %v6417_v6  ;;  %v277_v35 = vld [vmem:[#allocation15 + $0x58] sm:$0xff]  ;;  %v5265_v33 = vld [vmem:[#allocation6 + $0x22] sm:$0x1] }
 0x175   :  { %v1641_v18 = vpop.f32.mrb[0].mxu0 }
 0x176   :  { %v1642_v53 = vadd.f32 %v1641_v18, %v6494_v45  ;;  %v6513_v54 = vpop.f32.mrb[1].mxu0  ;;  %v1507_v18 = vrot.slane %v7646_v59, 5  ;;  %v271_v59 = vld [vmem:[#allocation15 + $0x28] sm:$0xff] }
 0x178   :  { %v1688_v15 = vmax.f32 %v1642_v53, 0.0  ;;  %v7647_v53 = vld [vmem:[#allocation43_spill] sm:$0xff]  ;;  %v1508_v63 = vsel %vm856_vm10, %v1507_v18, %v1506_v20  ;;  %v273_v18 = vld [vmem:[#allocation15 + $0x38] sm:$0xff] }
 0x179   :  { %v1647_v38 = vpop.f32.mrb[2].mxu0  ;;  %v1162_v49 = vrot.slane %v7647_v53, 5  ;;  %v1510_v1 = vsel %vm859_vm11, %v1509_v13, %v1508_v63  ;;  %v270_v53 = vld [vmem:[#allocation15 + $0x20] sm:$0xff]  ;;  %v7653_v13 = vld [vmem:[#allocation57_spill] sm:$0xff] }
 0x17a   :  { %v1704_v57 = vsub.f32 0.0, %v1688_v15  ;;  %v1648_v8 = vadd.f32 %v1647_v38, %v6494_v45  ;;  %v6530_v41 = vpop.f32.mrb[3].mxu0  ;;  %v7649_v15 = vld [vmem:[#allocation85_spill] sm:$0xff]  ;;  %v962_v38 = vsel %vm865_vm13, %v961_v19, %v960_v61  ;;  %v5263_v19 = vld [vmem:[#allocation6 + $0x2] sm:$0x1]  ;;  %v1181_v3 = vrot.slane %v7653_v13, 7 }
 0x17b   :  { %7644 = vst [vmem:[#allocation35_spill] sm:$0xff] %v6530_v41  ;;  %v1511_v12 = vrot.slane %v7649_v15, 3  ;;  %v1163_v2 = vsel %vm856_vm10, %v1162_v49, %v1161_v58  ;;  %v975_v50 = vsel %vm850_vm8, %v974_v11, %v5263_v19  ;;  %v6564_v49 = vmul.f32 %v6417_v6, %v6516_v10  ;;  %v7654_v11 = vld [vmem:[#allocation45_spill] sm:$0xff] }
 0x17c   :  { %v1720_v30 = vmul.f32 1.442695, %v1704_v57  ;;  %v1690_v56 = vmax.f32 %v1648_v8, 0.0  ;;  %v7652_v57 = vld [vmem:[#allocation44_spill] sm:$0xff]  ;;  %v6566_v58 = vpack.c.bf16 %v268_v60, %v266_v7  ;;  %v1166_v15 = vrot.slane %v7654_v11, 3  ;;  %v7657_v60 = vld [vmem:[#allocation46_spill] sm:$0xff] }
 0x17d   :  { %v1512_v24 = vsel %vm862_vm12, %v1511_v12, %v1510_v1  ;;  %v1164_v8 = vrot.slane %v7652_v57, 4  ;;  %v5264_v12 = vld [vmem:[#allocation6 + $0x1a] sm:$0x1]  ;;  %v1168_v57 = vrot.slane %v7657_v60, 2  ;;  %v6589_v13 = vld [vmem:[#allocation11] sm:$0xff] }
 0x17e   :  { %5133 = vpow2.f32 %v1720_v30  ;;  %v1706_v14 = vsub.f32 0.0, %v1690_v56  ;;  %v1514_v20 = vsel %vm865_vm13, %v1513_v31, %v1512_v24  ;;  %v6558_v30 = vsel %vm868_vm14, %v1147_v5, %v1146_v0  ;;  %v275_v24 = vld [vmem:[#allocation15 + $0x48] sm:$0xff]  ;;  %v5267_v11 = vld [vmem:[#allocation6 + $0x2a] sm:$0x1] }
 0x17f   :  { %v6555_v61 = vsel %vm868_vm14, %v1515_v32, %v1514_v20  ;;  %v964_v56 = vsel %vm868_vm14, %v963_v22, %v962_v38  ;;  %v6572_v22 = vpack.c.bf16 %v273_v18, %v271_v59  ;;  %v1165_v4 = vsel %vm859_vm11, %v1164_v8, %v1163_v2  ;;  %v7656_v32 = vld [vmem:[#allocation58_spill] sm:$0xff]  ;;  %v7658_v59 = vld [vmem:[#allocation56_spill] sm:$0xff]  ;;  %v7659_v18 = vld [vmem:[#allocation47_spill] sm:$0xff] }
 0x180   :  { %v1724_v47 = vmul.f32 1.442695, %v1706_v14  ;;  %v978_v14 = vrot.slane %v5264_v12, 5  ;;  %v977_v31 = vsel %vm853_vm9, %v976_v21, %v975_v50  ;;  %v1761_v0 = vsub.f32 1.0, %v6558_v30  ;;  %v5266_v50 = vld [vmem:[#allocation6 + $0xb] sm:$0x1] }
 0x181   :  { %v6578_v10 = vmul.f32 %v6558_v30, %v964_v56  ;;  %v6580_v38 = vpack.c.bf16 %v272_v9, %v270_v53  ;;  %v980_v20 = vrot.slane %v5265_v33, 4  ;;  %v1182_v8 = vsel %vm850_vm8, %v1181_v3, %v7658_v59 }
 0x182   :  { %5135 = vpow2.f32 %v1724_v47  ;;  %v1183_v47 = vrot.slane %v7656_v32, 6  ;;  %v1167_v21 = vsel %vm862_vm12, %v1166_v15, %v1165_v4  ;;  %v1170_v2 = vrot.slane %v7659_v18, 1  ;;  %v6595_v15 = vld [vmem:[#allocation6 + $0x32] sm:$0x1] }
 0x183   :  { %v979_v19 = vsel %vm856_vm10, %v978_v14, %v977_v31  ;;  %v997_v56 = vrot.slane %v5266_v50, 7  ;;  %v982_v12 = vrot.slane %v5267_v11, 3  ;;  %v984_v4 = vrot.slane %v6595_v15, 2  ;;  %v7661_v50 = vld [vmem:[#allocation60_spill] sm:$0xff] }
 0x184   :  { %v1653_v63 = vpop.f32.mrb[4].mxu0  ;;  %v1184_v14 = vsel %vm853_vm9, %v1183_v47, %v1182_v8  ;;  %v981_v33 = vsel %vm859_vm11, %v980_v20, %v979_v19  ;;  %v1187_v11 = vrot.slane %v7661_v50, 4  ;;  %v1528_v8 = vrot.slane %v6269_v44, 6 }
 0x185   :  { %v1654_v5 = vadd.f32 %v1653_v63, %v6494_v45  ;;  %v6570_v1 = vpop.f32.mrb[5].mxu0  ;;  %v6591_v63 = vpack.c.bf16 %v277_v35, %v275_v24  ;;  %v5269_v24 = vld [vmem:[#allocation6 + $0x13] sm:$0x1] }
 0x186   :  { %7655 = vst [vmem:[#allocation36_spill] sm:$0xff] %v6570_v1  ;;  %v999_v35 = vrot.slane %v5269_v24, 6 }
 0x187   :  { %v1692_v7 = vmax.f32 %v1654_v5, 0.0  ;;  %v7660_v5 = vld [vmem:[#allocation59_spill] sm:$0xff] }
 0x188   :  { %v5134_v53 = vpop.eup %5133  ;;  %v1185_v32 = vrot.slane %v7660_v5, 5  ;;  %v5270_v5 = vld [vmem:[#allocation6 + $0x3] sm:$0x1] }
 0x189   :  { %v1708_v9 = vsub.f32 0.0, %v1692_v7  ;;  %v1768_v3 = vmul.f32 %v5134_v53, %v6422_v62  ;;  %v1776_v60 = vsub.f32 1.0, %v5134_v53  ;;  %v1169_v7 = vsel %vm865_vm13, %v1168_v57, %v1167_v21 }
 0x18a   :  { %v998_v62 = vsel %vm850_vm8, %v997_v56, %v5270_v5  ;;  %v1526_v53 = vrot.slane %v6265_v29, 7  ;;  %v1186_v47 = vsel %vm856_vm10, %v1185_v32, %v1184_v14  ;;  %v1530_v57 = vrot.slane %v6274_v39, 5 }
 0x18b   :  { %v1728_v31 = vmul.f32 1.442695, %v1708_v9  ;;  %v1784_v59 = vmul.f32 %v1776_v60, %v6589_v13  ;;  %v5271_v9 = vld [vmem:[#allocation6 + $0x1b] sm:$0x1]  ;;  %v1000_v24 = vsel %vm853_vm9, %v999_v35, %v998_v62  ;;  %v1532_v29 = vrot.slane %v6278_v51, 4 }
 0x18c   :  { %v5136_v42 = vpop.eup %5135  ;;  %v1001_v60 = vrot.slane %v5271_v9, 5  ;;  %v1527_v56 = vsel %vm850_vm8, %v1526_v53, %v6261_v52  ;;  %v7665_v52 = vld [vmem:[#allocation98_spill] sm:$0xff]  ;;  %v1188_v9 = vsel %vm859_vm11, %v1187_v11, %v1186_v47 }
 0x18d   :  { %5137 = vpow2.f32 %v1728_v31  ;;  %v1792_v20 = vadd.f32 %v1784_v59, %v1768_v3  ;;  %v1769_v21 = vmul.f32 %v5136_v42, %v6442_v40  ;;  %v1777_v19 = vsub.f32 1.0, %v5136_v42  ;;  %v7662_v31 = vld [vmem:[#allocation96_spill] sm:$0xff]  ;;  %v7663_v40 = vld [vmem:[#allocation97_spill] sm:$0xff] }
 0x18e   :  { %v1534_v50 = vrot.slane %v7662_v31, 3  ;;  %v1529_v32 = vsel %vm853_vm9, %v1528_v8, %v1527_v56  ;;  %v1536_v42 = vrot.slane %v7663_v40, 2  ;;  %v7664_v3 = vld [vmem:[#allocation61_spill] sm:$0xff]  ;;  %v5272_v59 = vld [vmem:[#allocation6 + $0x23] sm:$0x1]  ;;  %v1538_v62 = vrot.slane %v7665_v52, 1 }
 0x18f   :  { %v1800_v44 = vmul.f32 %v1792_v20, %v1760_v48  ;;  %v1785_v39 = vmul.f32 %v1777_v19, %v6589_v13  ;;  %v1189_v14 = vrot.slane %v7664_v3, 3  ;;  %v1003_v35 = vrot.slane %v5272_v59, 4  ;;  %v5273_v8 = vld [vmem:[#allocation6 + $0x3a] sm:$0x1] }
 0x190   :  { %v1531_v5 = vsel %vm856_vm10, %v1530_v57, %v1529_v32  ;;  %v1002_v6 = vsel %vm856_vm10, %v1001_v60, %v1000_v24  ;;  %v983_v20 = vsel %vm862_vm12, %v982_v12, %v981_v33  ;;  %v986_v19 = vrot.slane %v5273_v8, 1  ;;  %v276_v60 = vld [vmem:[#allocation15 + $0x50] sm:$0xff]  ;;  %v5274_v12 = vld [vmem:[#allocation6 + $0x2b] sm:$0x1] }
 0x191   :  { %v1808_v51 = vadd.f32 %v1800_v44, %v6564_v49  ;;  %v1793_v53 = vadd.f32 %v1785_v39, %v1769_v21  ;;  %v1533_v48 = vsel %vm859_vm11, %v1532_v29, %v1531_v5  ;;  %v6633_v49 = vsel %vm868_vm14, %v1170_v2, %v1169_v7  ;;  %v274_v21 = vld [vmem:[#allocation15 + $0x40] sm:$0xff]  ;;  %v7668_v39 = vld [vmem:[#allocation73_spill] sm:$0xff] }
 0x192   :  { %v1535_v56 = vsel %vm862_vm12, %v1534_v50, %v1533_v48  ;;  %v1005_v33 = vrot.slane %v5274_v12, 3  ;;  %v1004_v18 = vsel %vm859_vm11, %v1003_v35, %v1002_v6  ;;  %v985_v50 = vsel %vm865_vm13, %v984_v4, %v983_v20  ;;  %v279_v35 = vld [vmem:[#allocation15 + $0x68] sm:$0xff]  ;;  %v5275_v5 = vld [vmem:[#allocation6 + $0x33] sm:$0x1] }
 0x193   :  { %1897 = vmatmul.mubr.f32.vlgmr.msra.gmra.mrb[0].mxu1 %v1808_v51  ;;  %2010 = vmatmul.mubr.f32.vlgmr.msra.gmra.mrb[16].mxu0 %v1808_v51  ;;  %v1801_v57 = vmul.f32 %v1793_v53, %v1761_v0  ;;  %v1537_v24 = vsel %vm865_vm13, %v1536_v42, %v1535_v56  ;;  %v7667_v0 = vld [vmem:[#allocation62_spill] sm:$0xff]  ;;  %v1190_v44 = vsel %vm862_vm12, %v1189_v14, %v1188_v9  ;;  %v1204_v32 = vrot.slane %v7668_v39, 7  ;;  %v7669_v4 = vld [vmem:[#allocation63_spill] sm:$0xff] }
 0x194   :  { %v1659_v31 = vpop.f32.mrb[6].mxu0  ;;  %4637 = vmatpush1.bf16.msra.mxu1 %v6566_v58  ;;  %1902 = vmatprep.mubr.f32.mxu1 %v6558_v30  ;;  %v1191_v29 = vrot.slane %v7667_v0, 2  ;;  %v6644_v2 = vsel %vm868_vm14, %v1538_v62, %v1537_v24  ;;  %v1762_v3 = vsub.f32 1.0, %v6633_v49  ;;  %v6655_v59 = vpack.c.bf16 %v276_v60, %v274_v21  ;;  %v7670_v48 = vld [vmem:[#allocation74_spill] sm:$0xff]  ;;  %v5276_v9 = vld [vmem:[#allocation6 + $0x3b] sm:$0x1] }
 0x195   :  { %v1660_v11 = vadd.f32 %v1659_v31, %v6494_v45  ;;  %v6637_v47 = vpop.f32.mrb[7].mxu0  ;;  %2014 = vmatprep.mubr.f32.mxu0 %v6558_v30  ;;  %4639 = vmatprep.subr.bf16.mxu1 %v6572_v22  ;;  %v1809_v7 = vadd.f32 %v1801_v57, %v6578_v10  ;;  %v281_v30 = vld [vmem:[#allocation15 + $0x78] sm:$0xff]  ;;  %v1007_v52 = vrot.slane %v5275_v5, 2  ;;  %v1193_v62 = vrot.slane %v7669_v4, 1  ;;  %v278_v31 = vld [vmem:[#allocation15 + $0x60] sm:$0xff]  ;;  %v280_v57 = vld [vmem:[#allocation15 + $0x70] sm:$0xff] }
 0x196   :  { %7666 = vst [vmem:[#allocation37_spill] sm:$0xff] %v6637_v47  ;;  %v1006_v14 = vsel %vm862_vm12, %v1005_v33, %v1004_v18  ;;  %v987_v53 = vsel %vm868_vm14, %v986_v19, %v985_v50  ;;  %v1192_v6 = vsel %vm865_vm13, %v1191_v29, %v1190_v44  ;;  %v1206_v20 = vrot.slane %v7670_v48, 6  ;;  %v7671_v21 = vld [vmem:[#allocation72_spill] sm:$0xff]  ;;  %v7673_v33 = vld [vmem:[#allocation109_spill] sm:$0xff]  ;;  %v7674_v50 = vld [vmem:[#allocation75_spill] sm:$0xff] }
 0x197   :  { %v5138_v40 = vpop.eup %5137  ;;  %v1694_v42 = vmax.f32 %v1660_v11, 0.0  ;;  %1903 = vmatmul.mubr.f32.gmra.mrb[2].mxu1 %v1809_v7  ;;  %2015 = vmatmul.mubr.f32.gmra.mrb[18].mxu0 %v1809_v7  ;;  %v6668_v8 = vpack.c.bf16 %v281_v30, %v279_v35  ;;  %v1009_v56 = vrot.slane %v5276_v9, 1  ;;  %v1205_v60 = vsel %vm850_vm8, %v1204_v32, %v7671_v21  ;;  %v7672_v19 = vld [vmem:[#allocation108_spill] sm:$0xff]  ;;  %v283_v39 = vld [vmem:[#allocation15 + $0x88] sm:$0xff]  ;;  %v5277_v35 = vld [vmem:[#allocation6 + $0xc] sm:$0x1] }
 0x198   :  { %v1770_v10 = vmul.f32 %v5138_v40, %v6463_v46  ;;  %v1778_v15 = vsub.f32 1.0, %v5138_v40  ;;  %4641 = vmatpush1.bf16.msra.mxu1 %v6580_v38  ;;  %1908 = vmatprep.mubr.f32.mxu1 %v6633_v49  ;;  %v1557_v12 = vrot.slane %v7672_v19, 3  ;;  %v1559_v24 = vrot.slane %v7673_v33, 2  ;;  %v285_v40 = vld [vmem:[#allocation15 + $0x98] sm:$0xff]  ;;  %v7675_v5 = vld [vmem:[#allocation110_spill] sm:$0xff]  ;;  %v284_v4 = vld [vmem:[#allocation15 + $0x90] sm:$0xff] }
 0x199   :  { %v1710_v51 = vsub.f32 0.0, %v1694_v42  ;;  %2019 = vmatprep.mubr.f32.mxu0 %v6633_v49  ;;  %4643 = vmatprep.subr.bf16.mxu1 %v6591_v63  ;;  %v1008_v0 = vsel %vm865_vm13, %v1007_v52, %v1006_v14  ;;  %v1754_v29 = vmul.f32 %v6633_v49, %v987_v53  ;;  %v6677_v7 = vsel %vm868_vm14, %v1193_v62, %v1192_v6  ;;  %v7676_v62 = vld [vmem:[#allocation107_spill] sm:$0xff]  ;;  %v7677_v53 = vld [vmem:[#allocation76_spill] sm:$0xff] }
 0x19a   :  { %v1786_v46 = vmul.f32 %v1778_v15, %v6589_v13  ;;  %v1208_v44 = vrot.slane %v7674_v50, 5  ;;  %v6681_v32 = vpack.c.bf16 %v280_v57, %v278_v31  ;;  %v1207_v42 = vsel %vm853_vm9, %v1206_v20, %v1205_v60  ;;  %v282_v15 = vld [vmem:[#allocation15 + $0x80] sm:$0xff]  ;;  %v287_v20 = vld [vmem:[#allocation15 + $0xa8] sm:$0xff]  ;;  %v5279_v60 = vld [vmem:[#allocation6 + $0x4] sm:$0x1] }
 0x19b   :  { %v1732_v11 = vmul.f32 1.442695, %v1710_v51  ;;  %v1020_v30 = vrot.slane %v5277_v35, 7  ;;  %v1561_v52 = vrot.slane %v7675_v5, 1  ;;  %v1550_v14 = vsel %vm850_vm8, %v1549_v28, %v7676_v62  ;;  %v5278_v31 = vld [vmem:[#allocation6 + $0x14] sm:$0x1] }
 0x19c   :  { %v1794_v18 = vadd.f32 %v1786_v46, %v1770_v10  ;;  %4645 = vmatpush1.bf16.msra.mxu1 %v6655_v59  ;;  %v1010_v10 = vsel %vm868_vm14, %v1009_v56, %v1008_v0  ;;  %v1210_v6 = vrot.slane %v7677_v53, 4  ;;  %v6693_v48 = vpack.c.bf16 %v285_v40, %v283_v39  ;;  %v289_v46 = vld [vmem:[#allocation15 + $0xb8] sm:$0xff]  ;;  %v288_v35 = vld [vmem:[#allocation15 + $0xb0] sm:$0xff] }
 0x19d   :  { %5139 = vpow2.f32 %v1732_v11  ;;  %4647 = vmatprep.subr.bf16.mxu1 %v6668_v8  ;;  %v1209_v56 = vsel %vm856_vm10, %v1208_v44, %v1207_v42  ;;  %v1022_v57 = vrot.slane %v5278_v31, 6  ;;  %v6703_v21 = vmul.f32 %v6677_v7, %v1010_v10  ;;  %v7679_v44 = vld [vmem:[#allocation78_spill] sm:$0xff]  ;;  %v297_v51 = vld [vmem:[#allocation15 + $0xf8] sm:$0xff] }
 0x19e   :  { %v1802_v49 = vmul.f32 %v1794_v18, %v1762_v3  ;;  %v1552_v3 = vsel %vm853_vm9, %v1551_v27, %v1550_v14  ;;  %v1021_v11 = vsel %vm850_vm8, %v1020_v30, %v5279_v60  ;;  %v6707_v0 = vpack.c.bf16 %v284_v4, %v282_v15  ;;  %v6714_v18 = vld [vmem:[#allocation6 + $0x17] sm:$0x1]  ;;  %v291_v30 = vld [vmem:[#allocation15 + $0xc8] sm:$0xff] }
 0x19f   :  { %v1554_v28 = vsel %vm856_vm10, %v1553_v43, %v1552_v3  ;;  %v7678_v43 = vld [vmem:[#allocation77_spill] sm:$0xff]  ;;  %v1214_v39 = vrot.slane %v7679_v44, 2  ;;  %v6718_v40 = vpack.c.bf16 %v289_v46, %v287_v20  ;;  %v286_v42 = vld [vmem:[#allocation15 + $0xa0] sm:$0xff]  ;;  %v7680_v15 = vld [vmem:[#allocation79_spill] sm:$0xff]  ;;  %vm811_vm3 = vcmp.ne.f32.partialorder %v6714_v18, 0.0 }
 0x1a0   :  { %v1810_v9 = vadd.f32 %v1802_v49, %v1754_v29  ;;  %4649 = vmatpush1.bf16.msra.mxu1 %v6681_v32  ;;  %v1556_v27 = vsel %vm859_vm11, %v1555_v26, %v1554_v28  ;;  %v6712_v29 = vld [vmem:[#allocation6 + $0xf] sm:$0x1]  ;;  %v1212_v50 = vrot.slane %v7678_v43, 3  ;;  %v1211_v26 = vsel %vm859_vm11, %v1210_v6, %v1209_v56  ;;  %v5280_v14 = vld [vmem:[#allocation6 + $0x1c] sm:$0x1] }
 0x1a1   :  { %v1558_v49 = vsel %vm862_vm12, %v1557_v12, %v1556_v27  ;;  %v1024_v53 = vrot.slane %v5280_v14, 5  ;;  %v293_v3 = vld [vmem:[#allocation15 + $0xd8] sm:$0xff]  ;;  %v6726_v46 = vld [vmem:[#allocation6 + $0x7] sm:$0x1]  ;;  %4651 = vmatprep.subr.bf16.mxu1 %v6693_v48  ;;  %v1023_v12 = vsel %vm853_vm9, %v1022_v57, %v1021_v11  ;;  %v5281_v28 = vld [vmem:[#allocation6 + $0x24] sm:$0x1]  ;;  %v6747_v57 = vpack.c.bf16 %v288_v35, %v286_v42 }
 0x1a2   :  { %1909 = vmatmul.mubr.f32.gmra.mrb[4].mxu1 %v1810_v9  ;;  %2020 = vmatmul.mubr.f32.gmra.mrb[20].mxu0 %v1810_v9  ;;  %v1560_v20 = vsel %vm865_vm13, %v1559_v24, %v1558_v49  ;;  %v1026_v60 = vrot.slane %v5281_v28, 4  ;;  %v6736_v56 = vld [vmem:[#allocation6 + $0x1f] sm:$0x1]  ;;  %v6738_v27 = vld [vmem:[#allocation6 + $0x27] sm:$0x1]  ;;  %vm810_vm2 = vcmp.ne.f32.partialorder %v6712_v29, 0.0  ;;  %v1213_v11 = vsel %vm862_vm12, %v1212_v50, %v1211_v26 }
 0x1a3   :  { %1914 = vmatprep.mubr.f32.mxu1 %v6677_v7  ;;  %2024 = vmatprep.mubr.f32.mxu0 %v6677_v7  ;;  %v6734_v6 = vsel %vm868_vm14, %v1561_v52, %v1560_v20  ;;  %v6740_v24 = vld [vmem:[#allocation6 + $0x2c] sm:$0x1]  ;;  %v6743_v49 = vld [vmem:[#allocation6 + $0x34] sm:$0x1]  ;;  %v6752_v14 = vpack.c.bf16 %v293_v3, %v291_v30  ;;  %v292_v28 = vld [vmem:[#allocation15 + $0xd0] sm:$0xff]  ;;  %v1025_v4 = vsel %vm856_vm10, %v1024_v53, %v1023_v12  ;;  %vm809_vm4 = vcmp.ne.f32.partialorder %v6726_v46, 0.0 }
 0x1a4   :  { %v1665_v10 = vpop.f32.mrb[8].mxu0  ;;  %4653 = vmatpush1.bf16.msra.mxu1 %v6707_v0  ;;  %v290_v20 = vld [vmem:[#allocation15 + $0xc0] sm:$0xff]  ;;  %v6754_v43 = vld [vmem:[#allocation6 + $0x2f] sm:$0x1]  ;;  %vm812_vm5 = vcmp.ne.f32.partialorder %v6736_v56, 0.0  ;;  %vm813_vm6 = vcmp.ne.f32.partialorder %v6738_v27, 0.0  ;;  %v834_v3 = vsel %vm810_vm2, %v6712_v29, %v6346_v25 }
 0x1a5   :  { %v1666_v9 = vadd.f32 %v1665_v10, %v6494_v45  ;;  %v6729_v31 = vpop.f32.mrb[9].mxu0  ;;  %4655 = vmatprep.subr.bf16.mxu1 %v6718_v40  ;;  %v6758_v42 = vld [vmem:[#allocation6 + $0x37] sm:$0x1]  ;;  %v6764_v26 = vld [vmem:[#allocation6 + $0x3f] sm:$0x1]  ;;  %v7682_v53 = vld [vmem:[#allocation89_spill] sm:$0xff]  ;;  %v6772_v12 = vpack.c.bf16 %v292_v28, %v290_v20  ;;  %v836_v25 = vsel %vm812_vm5, %v6736_v56, %v6354_v37  ;;  %v833_v20 = vsel %vm809_vm4, %v6726_v46, %v7676_v62 }
 0x1a6   :  { %7681 = vst [vmem:[#allocation38_spill] sm:$0xff] %v6729_v31  ;;  %vm814_vm7 = vcmp.ne.f32.partialorder %v6754_v43, 0.0  ;;  %vm815_vm15 = vcmp.ne.f32.partialorder %v6758_v42, 0.0  ;;  %vm816_vm0 = vcmp.ne.f32.partialorder %v6764_v26, 0.0  ;;  %v880_v28 = vrot.slane %v834_v3, 7 }
 0x1a7   :  { %v1696_v52 = vmax.f32 %v1666_v9, 0.0  ;;  %v5140_v10 = vpop.eup %5139  ;;  %v1227_v9 = vrot.slane %v7682_v53, 7  ;;  %v838_v37 = vsel %vm814_vm7, %v6754_v43, %v7672_v19  ;;  %v295_v53 = vld [vmem:[#allocation15 + $0xe8] sm:$0xff]  ;;  %v1215_v62 = vsel %vm865_vm13, %v1214_v39, %v1213_v11 }
 0x1a8   :  { %v1771_v35 = vmul.f32 %v5140_v10, %v6503_v17  ;;  %v1779_v30 = vsub.f32 1.0, %v5140_v10  ;;  %4657 = vmatpush1.bf16.msra.mxu1 %v6747_v57  ;;  %v835_v17 = vsel %vm811_vm3, %v6714_v18, %v6350_v36  ;;  %v837_v36 = vsel %vm813_vm6, %v6738_v27, %v6358_v23 }
 0x1a9   :  { %v1712_v50 = vsub.f32 0.0, %v1696_v52  ;;  %4659 = vmatprep.subr.bf16.mxu1 %v6752_v14  ;;  %v1027_v31 = vsel %vm859_vm11, %v1026_v60, %v1025_v4  ;;  %v839_v23 = vsel %vm815_vm15, %v6758_v42, %v7673_v33  ;;  %v7683_v3 = vsub.f32 1.0, %v6677_v7  ;;  %v7685_v4 = vld [vmem:[#allocation88_spill] sm:$0xff]  ;;  %v5284_v7 = vld [vmem:[#allocation6 + $0xd] sm:$0x1] }
 0x1aa   :  { %v1787_v52 = vmul.f32 %v1779_v30, %v6589_v13  ;;  %v882_v30 = vrot.slane %v835_v17, 6  ;;  %v7684_v17 = vld [vmem:[#allocation90_spill] sm:$0xff]  ;;  %v840_v44 = vsel %vm816_vm0, %v6764_v26, %v7675_v5  ;;  %v886_v39 = vrot.slane %v837_v36, 4  ;;  %v7687_v36 = vld [vmem:[#allocation91_spill] sm:$0xff] }
 0x1ab   :  { %v1736_v10 = vmul.f32 1.442695, %v1712_v50  ;;  %v1228_v60 = vsel %vm850_vm8, %v1227_v9, %v7685_v4  ;;  %v888_v11 = vrot.slane %v838_v37, 3  ;;  %v881_v33 = vsel %vm850_vm8, %v880_v28, %v833_v20  ;;  %v296_v4 = vld [vmem:[#allocation15 + $0xf0] sm:$0xff] }
 0x1ac   :  { %v1795_v50 = vadd.f32 %v1787_v52, %v1771_v35  ;;  %4661 = vmatpush1.bf16.msra.mxu1 %v6772_v12  ;;  %v884_v35 = vrot.slane %v836_v25, 5  ;;  %v6817_v52 = vpack.c.bf16 %v297_v51, %v295_v53  ;;  %v7686_v47 = vrot.slane %v7680_v15, 1 }
 0x1ad   :  { %5141 = vpow2.f32 %v1736_v10  ;;  %v1229_v10 = vrot.slane %v7684_v17, 6  ;;  %v883_v17 = vsel %vm853_vm9, %v882_v30, %v881_v33  ;;  %v1231_v1 = vrot.slane %v7687_v36, 5  ;;  %v5286_v30 = vld [vmem:[#allocation6 + $0x15] sm:$0x1]  ;;  %v7691_v36 = vld [vmem:[#allocation93_spill] sm:$0xff] }
 0x1ae   :  { %v1803_v19 = vmul.f32 %v1795_v50, %v7683_v3  ;;  %v1043_v50 = vrot.slane %v5284_v7, 7  ;;  %v890_v3 = vrot.slane %v839_v23, 2  ;;  %v1217_v5 = vsel %vm868_vm14, %v7686_v47, %v1215_v62  ;;  %4663 = vmatprep.subr.bf16.mxu1 %v6817_v52  ;;  %v5285_v47 = vld [vmem:[#allocation6 + $0x3c] sm:$0x1] }
 0x1af   :  { %v892_v41 = vrot.slane %v840_v44, 1  ;;  %v885_v51 = vsel %vm856_vm10, %v884_v35, %v883_v17  ;;  %v1230_v20 = vsel %vm853_vm9, %v1229_v10, %v1228_v60  ;;  %v1032_v37 = vrot.slane %v5285_v47, 1 }
 0x1b0   :  { %v1811_v25 = vadd.f32 %v1803_v19, %v6703_v21  ;;  %v7688_v21 = vrot.slane %v6740_v24, 3  ;;  %v887_v28 = vsel %vm859_vm11, %v886_v39, %v885_v51  ;;  %v1045_v53 = vrot.slane %v5286_v30, 6  ;;  %v7689_v24 = vld [vmem:[#allocation92_spill] sm:$0xff]  ;;  %v294_v39 = vld [vmem:[#allocation15 + $0xe0] sm:$0xff] }
 0x1b1   :  { %v889_v62 = vsel %vm862_vm12, %v888_v11, %v887_v28  ;;  %v1233_v19 = vrot.slane %v7689_v24, 4  ;;  %v7690_v60 = vrot.slane %v6743_v49, 2  ;;  %v1235_v51 = vrot.slane %v7691_v36, 3  ;;  %v5289_v30 = vld [vmem:[#allocation6 + $0x25] sm:$0x1] }
 0x1b2   :  { %1915 = vmatmul.mubr.f32.gmra.mrb[6].mxu1 %v1811_v25  ;;  %2025 = vmatmul.mubr.f32.gmra.mrb[22].mxu0 %v1811_v25  ;;  %v1029_v9 = vsel %vm862_vm12, %v7688_v21, %v1027_v31  ;;  %v5287_v31 = vld [vmem:[#allocation6 + $0x5] sm:$0x1]  ;;  %v891_v44 = vsel %vm865_vm13, %v890_v3, %v889_v62  ;;  %v1232_v25 = vsel %vm856_vm10, %v1231_v1, %v1230_v20  ;;  %v5288_v21 = vld [vmem:[#allocation6 + $0x1d] sm:$0x1]  ;;  %v1049_v62 = vrot.slane %v5289_v30, 4 }
 0x1b3   :  { %1920 = vmatprep.mubr.f32.mxu1 %v1217_v5  ;;  %2029 = vmatprep.mubr.f32.mxu0 %v1217_v5  ;;  %v1044_v10 = vsel %vm850_vm8, %v1043_v50, %v5287_v31  ;;  %v1031_v33 = vsel %vm865_vm13, %v7690_v60, %v1029_v9  ;;  %v6845_v11 = vsel %vm868_vm14, %v892_v41, %v891_v44  ;;  %v1047_v28 = vrot.slane %v5288_v21, 5  ;;  %v7693_v31 = vld [vmem:[#allocation94_spill] sm:$0xff]  ;;  %v7694_v60 = vld [vmem:[#allocation101_spill] sm:$0xff]  ;;  %v7696_v21 = vld [vmem:[#allocation99_spill] sm:$0xff] }
 0x1b4   :  { %v1671_v15 = vpop.f32.mrb[10].mxu0  ;;  %v6850_v47 = vpack.c.bf16 %v296_v4, %v294_v39  ;;  %v1033_v9 = vsel %vm868_vm14, %v1032_v37, %v1031_v33  ;;  %v1234_v1 = vsel %vm859_vm11, %v1233_v19, %v1232_v25  ;;  %v1764_v41 = vsub.f32 1.0, %v1217_v5  ;;  %v5290_v39 = vld [vmem:[#allocation6 + $0x2d] sm:$0x1] }
 0x1b5   :  { %v1672_v23 = vadd.f32 %v1671_v15, %v6494_v45  ;;  %v6835_v35 = vpop.f32.mrb[11].mxu0  ;;  %v1046_v15 = vsel %vm853_vm9, %v1045_v53, %v1044_v10  ;;  %v1237_v44 = vrot.slane %v7693_v31, 2  ;;  %v1756_v10 = vmul.f32 %v1217_v5, %v1033_v9  ;;  %v5291_v5 = vld [vmem:[#allocation6 + $0x35] sm:$0x1] }
 0x1b6   :  { %4665 = vmatpush1.bf16.msra.mxu1 %v6850_v47  ;;  %v1048_v53 = vsel %vm856_vm10, %v1047_v28, %v1046_v15  ;;  %v1236_v19 = vsel %vm862_vm12, %v1235_v51, %v1234_v1  ;;  %v1051_v4 = vrot.slane %v5290_v39, 3  ;;  %v1252_v33 = vrot.slane %v7694_v60, 6  ;;  %v5295_v60 = vld [vmem:[#allocation6 + $0x6] sm:$0x1] }
 0x1b7   :  { %v5142_v7 = vpop.eup %5141  ;;  %v1698_v17 = vmax.f32 %v1672_v23, 0.0  ;;  %v7692_v23 = vld [vmem:[#allocation100_spill] sm:$0xff]  ;;  %4691 = vmatprep.subr.bf16.mxu1 %v6425_v34  ;;  %v1050_v36 = vsel %vm859_vm11, %v1049_v62, %v1048_v53  ;;  %v1238_v28 = vsel %vm865_vm13, %v1237_v44, %v1236_v19  ;;  %v5294_v19 = vld [vmem:[#allocation6 + $0x16] sm:$0x1] }
 0x1b8   :  { %v1772_v50 = vmul.f32 %v5142_v7, %v6555_v61  ;;  %v1780_v3 = vsub.f32 1.0, %v5142_v7  ;;  %v1250_v24 = vrot.slane %v7692_v23, 7  ;;  %v7695_v7 = vld [vmem:[#allocation95_spill] sm:$0xff]  ;;  %v1052_v9 = vsel %vm862_vm12, %v1051_v4, %v1050_v36  ;;  %v7699_v36 = vld [vmem:[#allocation104_spill] sm:$0xff] }
 0x1b9   :  { %v1714_v49 = vsub.f32 0.0, %v1698_v17  ;;  %v1239_v17 = vrot.slane %v7695_v7, 1  ;;  %v5293_v23 = vld [vmem:[#allocation6 + $0x3d] sm:$0x1]  ;;  %v1068_v39 = vrot.slane %v5294_v19, 6 }
 0x1ba   :  { %v1788_v20 = vmul.f32 %v1780_v3, %v6589_v13  ;;  %v1251_v3 = vsel %vm850_vm8, %v1250_v24, %v7696_v21  ;;  %v1055_v24 = vrot.slane %v5293_v23, 1  ;;  %v1258_v21 = vrot.slane %v7699_v36, 3  ;;  %v7701_v23 = vld [vmem:[#allocation105_spill] sm:$0xff] }
 0x1bb   :  { %v1740_v61 = vmul.f32 1.442695, %v1714_v49  ;;  %v7697_v49 = vld [vmem:[#allocation102_spill] sm:$0xff]  ;;  %v1253_v1 = vsel %vm853_vm9, %v1252_v33, %v1251_v3  ;;  %v5296_v3 = vld [vmem:[#allocation6 + $0x1e] sm:$0x1] }
 0x1bc   :  { %v1796_v37 = vadd.f32 %v1788_v20, %v1772_v50  ;;  %v1053_v50 = vrot.slane %v5291_v5, 2  ;;  %v1254_v51 = vrot.slane %v7697_v49, 5  ;;  %v5292_v20 = vld [vmem:[#allocation6 + $0xe] sm:$0x1]  ;;  %v7700_v49 = vmov 0.0  }
 0x1bd   :  { %5143 = vpow2.f32 %v1740_v61  ;;  %v1066_v30 = vrot.slane %v5292_v20, 7  ;;  %v7698_v61 = vld [vmem:[#allocation103_spill] sm:$0xff] }
 0x1be   :  { %v1804_v25 = vmul.f32 %v1796_v37, %v1764_v41  ;;  %v1240_v41 = vsel %vm868_vm14, %v1239_v17, %v1238_v28  ;;  %v1256_v31 = vrot.slane %v7698_v61, 4  ;;  %v1255_v37 = vsel %vm856_vm10, %v1254_v51, %v1253_v1 }
 0x1bf   :  { %v1067_v33 = vsel %vm850_vm8, %v1066_v30, %v5295_v60  ;;  %v1070_v28 = vrot.slane %v5296_v3, 5  ;;  %v3979_v51 = vsel %vm810_vm2, 1.0, %v7700_v49 }
 0x1c0   :  { %v1812_v15 = vadd.f32 %v1804_v25, %v1756_v10  ;;  %v1054_v10 = vsel %vm865_vm13, %v1053_v50, %v1052_v9  ;;  %v1257_v17 = vsel %vm859_vm11, %v1256_v31, %v1255_v37  ;;  %v1765_v9 = vsub.f32 1.0, %v1240_v41  ;;  %v5297_v31 = vld [vmem:[#allocation6 + $0x26] sm:$0x1] }
 0x1c1   :  { %v1056_v7 = vsel %vm868_vm14, %v1055_v24, %v1054_v10  ;;  %v1069_v1 = vsel %vm853_vm9, %v1068_v39, %v1067_v33  ;;  %v1260_v24 = vrot.slane %v7701_v23, 2  ;;  %v1259_v61 = vsel %vm862_vm12, %v1258_v21, %v1257_v17 }
 0x1c2   :  { %1921 = vmatmul.mubr.f32.gmra.mrb[8].mxu1 %v1812_v15  ;;  %2030 = vmatmul.mubr.f32.gmra.mrb[24].mxu0 %v1812_v15  ;;  %v1757_v30 = vmul.f32 %v1240_v41, %v1056_v7  ;;  %v904_v10 = vrot.slane %v3979_v51, 7  ;;  %v1071_v19 = vsel %vm856_vm10, %v1070_v28, %v1069_v1  ;;  %v1571_v39 = vsub.s32 1, %v6460_v16 }
 0x1c3   :  { %1926 = vmatprep.mubr.f32.mxu1 %v1240_v41  ;;  %2034 = vmatprep.mubr.f32.mxu0 %v1240_v41  ;;  %v3978_v41 = vsel %vm809_vm4, 1.0, %v7700_v49  ;;  %v3981_v17 = vsel %vm812_vm5, 1.0, %v7700_v49  ;;  %v1261_v21 = vsel %vm865_vm13, %v1260_v24, %v1259_v61  ;;  %v1089_v23 = vrot.slane %v6712_v29, 7 }
 0x1c4   :  { %v1677_v62 = vpop.f32.mrb[12].mxu0  ;;  %v905_v28 = vsel %vm850_vm8, %v904_v10, %v3978_v41  ;;  %v908_v1 = vrot.slane %v3981_v17, 5  ;;  %v1091_v29 = vrot.slane %v6714_v18, 6 }
 0x1c5   :  { %v1678_v44 = vadd.f32 %v1677_v62, %v6494_v45  ;;  %v6873_v53 = vpop.f32.mrb[13].mxu0 }
 0x1c7   :  { %v1700_v4 = vmax.f32 %v1678_v44, 0.0  ;;  %v5144_v25 = vpop.eup %5143  ;;  %v1072_v44 = vrot.slane %v5297_v31, 4  ;;  %v5300_v31 = vld [vmem:[#allocation6 + $0x3e] sm:$0x1] }
 0x1c8   :  { %v1773_v5 = vmul.f32 %v5144_v25, %v6644_v2  ;;  %v1781_v50 = vsub.f32 1.0, %v5144_v25  ;;  %v3980_v2 = vsel %vm811_vm3, 1.0, %v7700_v49  ;;  %v5298_v25 = vld [vmem:[#allocation6 + $0x2e] sm:$0x1] }
 0x1c9   :  { %v1716_v15 = vsub.f32 0.0, %v1700_v4  ;;  %v7702_v4 = vld [vmem:[#allocation106_spill] sm:$0xff]  ;;  %v1074_v7 = vrot.slane %v5298_v25, 3  ;;  %v906_v36 = vrot.slane %v3980_v2, 6  ;;  %v1073_v3 = vsel %vm859_vm11, %v1072_v44, %v1071_v19 }
 0x1ca   :  { %v1789_v62 = vmul.f32 %v1781_v50, %v6589_v13  ;;  %v1262_v60 = vrot.slane %v7702_v4, 1  ;;  %v5299_v50 = vld [vmem:[#allocation6 + $0x36] sm:$0x1]  ;;  %v1078_v44 = vrot.slane %v5300_v31, 1  ;;  %v3983_v2 = vsel %vm814_vm7, 1.0, %v7700_v49 }
 0x1cb   :  { %v1744_v20 = vmul.f32 1.442695, %v1716_v15  ;;  %v1076_v51 = vrot.slane %v5299_v50, 2  ;;  %v912_v17 = vrot.slane %v3983_v2, 3  ;;  %v3985_v50 = vsel %vm816_vm0, 1.0, %v7700_v49 }
 0x1cc   :  { %v1797_v37 = vadd.f32 %v1789_v62, %v1773_v5  ;;  %v6907_v5 = vrot.slane %v6479_v55, %v1571_v39  ;;  %v1075_v62 = vsel %vm862_vm12, %v1074_v7, %v1073_v3  ;;  %v3984_v7 = vsel %vm815_vm15, 1.0, %v7700_v49 }
 0x1cd   :  { %5145 = vpow2.f32 %v1744_v20  ;;  %v1263_v20 = vsel %vm868_vm14, %v1262_v60, %v1261_v21  ;;  %v1090_v60 = vsel %vm850_vm8, %v1089_v23, %v6726_v46  ;;  %v1093_v3 = vrot.slane %v6736_v56, 5 }
 0x1ce   :  { %v1805_v33 = vmul.f32 %v1797_v37, %v1765_v9  ;;  %v3982_v9 = vsel %vm813_vm6, 1.0, %v7700_v49  ;;  %v1077_v37 = vsel %vm865_vm13, %v1076_v51, %v1075_v62  ;;  %v1644_v4 = vadd.f32 %v6513_v54, %v6907_v5 }
 0x1cf   :  { %v910_v10 = vrot.slane %v3982_v9, 4  ;;  %v1079_v21 = vsel %vm868_vm14, %v1078_v44, %v1077_v37  ;;  %v1766_v54 = vsub.f32 1.0, %v1263_v20  ;;  %v1092_v46 = vsel %vm853_vm9, %v1091_v29, %v1090_v60 }
 0x1d0   :  { %v1813_v15 = vadd.f32 %v1805_v33, %v1757_v30  ;;  %v907_v30 = vsel %vm853_vm9, %v906_v36, %v905_v28  ;;  %v914_v51 = vrot.slane %v3984_v7, 2  ;;  %v1758_v9 = vmul.f32 %v1263_v20, %v1079_v21 }
 0x1d1   :  { %v909_v19 = vsel %vm856_vm10, %v908_v1, %v907_v30  ;;  %v1095_v30 = vrot.slane %v6738_v27, 4  ;;  %v1094_v56 = vsel %vm856_vm10, %v1093_v3, %v1092_v46  ;;  %v1097_v44 = vrot.slane %v6754_v43, 3  ;;  %v301_v46 = vld [vmem:[#allocation17 + $0x18] sm:$0xff] }
 0x1d2   :  { %1927 = vmatmul.mubr.f32.gmra.mrb[10].mxu1 %v1813_v15  ;;  %2035 = vmatmul.mubr.f32.gmra.mrb[26].mxu0 %v1813_v15  ;;  %v911_v18 = vsel %vm859_vm11, %v910_v10, %v909_v19  ;;  %v1689_v15 = vmax.f32 %v1644_v4, 0.0  ;;  %v1099_v37 = vrot.slane %v6758_v42, 2  ;;  %v1101_v29 = vrot.slane %v6764_v26, 1 }
 0x1d3   :  { %v1683_v24 = vpop.f32.mrb[14].mxu0  ;;  %1932 = vmatprep.mubr.f32.mxu1 %v1263_v20  ;;  %2039 = vmatprep.mubr.f32.mxu0 %v1263_v20  ;;  %v913_v62 = vsel %vm862_vm12, %v912_v17, %v911_v18  ;;  %v1096_v10 = vsel %vm859_vm11, %v1095_v30, %v1094_v56  ;;  %v131_v18 = vld [vmem:[#allocation9] sm:$0xff]  ;;  %v5525_v3 = vmov 0.0|0.0   ;;  %v306_v30 = vld [vmem:[#allocation17 + $0x40] sm:$0xff]  ;;  %v307_v56 = vld [vmem:[#allocation17 + $0x48] sm:$0xff]  ;;  %vm5526_vm8 = vmmov 0  }
 0x1d4   :  { %v1684_v55 = vadd.f32 %v1683_v24, %v6494_v45  ;;  %v6917_v61 = vpop.f32.mrb[15].mxu0  ;;  %v916_v24 = vrot.slane %v3985_v50, 1  ;;  %v915_v31 = vsel %vm865_vm13, %v914_v51, %v913_v62  ;;  %v1098_v19 = vsel %vm862_vm12, %v1097_v44, %v1096_v10  ;;  %4666 = vmatprep.subr.bf16.mxu0 %v5525_v3  ;;  %v303_v50 = vld [vmem:[#allocation17 + $0x28] sm:$0xff]  ;;  %v310_v44 = vld [vmem:[#allocation17 + $0x60] sm:$0xff] }
 0x1d6   :  { %v1702_v45 = vmax.f32 %v1684_v55, 0.0  ;;  %v1705_v55 = vsub.f32 0.0, %v1689_v15  ;;  %v917_v20 = vsel %vm868_vm14, %v916_v24, %v915_v31  ;;  %v308_v24 = vld [vmem:[#allocation17 + $0x50] sm:$0xff] }
 0x1d7   :  { %v5146_v41 = vpop.eup %5145 }
 0x1d8   :  { %v1774_v33 = vmul.f32 %v5146_v41, %v6734_v6  ;;  %v1782_v25 = vsub.f32 1.0, %v5146_v41  ;;  %v1718_v36 = vsub.f32 0.0, %v1702_v45  ;;  %v1722_v27 = vmul.f32 1.442695, %v1705_v55  ;;  %v309_v55 = vld [vmem:[#allocation17 + $0x58] sm:$0xff] }
 0x1d9   :  { %v1100_v41 = vsel %vm865_vm13, %v1099_v37, %v1098_v19  ;;  %v6997_v31 = vpack.c.bf16 %v309_v55, %v308_v24  ;;  %v313_v37 = vld [vmem:[#allocation17 + $0x78] sm:$0xff] }
 0x1da   :  { %v1790_v28 = vmul.f32 %v1782_v25, %v6589_v13  ;;  %v1748_v6 = vmul.f32 1.442695, %v1718_v36  ;;  %v1102_v60 = vsel %vm868_vm14, %v1101_v29, %v1100_v41 }
 0x1db   :  { %v1759_v42 = vmul.f32 %v1102_v60, %v917_v20 }
 0x1dc   :  { %v1798_v1 = vadd.f32 %v1790_v28, %v1774_v33  ;;  %5147 = vpow2.f32 %v1748_v6  ;;  %v1767_v33 = vsub.f32 1.0, %v917_v20  ;;  %v300_v28 = vld [vmem:[#allocation17 + $0x10] sm:$0xff]  ;;  %v302_v6 = vld [vmem:[#allocation17 + $0x20] sm:$0xff] }
 0x1dd   :  { %5149 = vpow2.f32 %v1722_v27  ;;  %v6981_v15 = vpack.c.bf16 %v301_v46, %v300_v28  ;;  %v6985_v51 = vpack.c.bf16 %v303_v50, %v302_v6 }
 0x1de   :  { %v1806_v23 = vmul.f32 %v1798_v1, %v1766_v54  ;;  %v305_v1 = vld [vmem:[#allocation17 + $0x38] sm:$0xff] }
 0x1e0   :  { %v1814_v2 = vadd.f32 %v1806_v23, %v1758_v9  ;;  %v304_v9 = vld [vmem:[#allocation17 + $0x30] sm:$0xff]  ;;  %v6993_v23 = vpack.c.bf16 %v307_v56, %v306_v30 }
 0x1e1   :  { %v6989_v62 = vpack.c.bf16 %v305_v1, %v304_v9  ;;  %v314_v30 = vld [vmem:[%s7431_s8] sm:$0x7]  ;;  %s5528_s8 = smov [#allocation19]  }
 0x1e2   :  { %1933 = vmatmul.mubr.f32.gmra.mrb[12].mxu1 %v1814_v2  ;;  %2040 = vmatmul.mubr.f32.gmra.mrb[28].mxu0 %v1814_v2  ;;  %v311_v2 = vld [vmem:[#allocation17 + $0x68] sm:$0xff]  ;;  %v7032_v24 = vrot.slane %v314_v30, %v1571_v39  ;;  %v7703_v39 = vsub.s32 0, %v6460_v16  ;;  %s3906_s17 = sshll.u32 %s5528_s8, 4  ;;  %s3907_s17 = int_to_ptr.vmem [resolvable:$true] %s3906_s17 }
 0x1e3   :  { %1938 = vmatprep.mubr.f32.mxu1 %v917_v20  ;;  %2044 = vmatprep.mubr.f32.mxu0 %v917_v20  ;;  %v7001_v10 = vpack.c.bf16 %v311_v2, %v310_v44  ;;  %v312_v20 = vld [vmem:[#allocation17 + $0x70] sm:$0xff]  ;;  %s5455_s18 = scalar_lea.vmem %s3907_s17, 128  ;;  %p5460_p1 = scmp.lt.s32.totalorder %s3907_s17, %s3907_s17 }
 0x1e4   :  { %v7005_v27 = vpack.c.bf16 %v313_v37, %v312_v20  ;;  %p5456_p0 = scmp.ne.s32.totalorder %s3907_s17, %s5455_s18  ;;  %p5461_p2 = scmp.lt.s32.totalorder %s5455_s18, %s5455_s18 }
 0x1e6   :  { %v5148_v4 = vpop.eup %5147  ;;  %p5462_p3 = por %p5461_p2, %p5460_p1 }
 0x1e7   :  { %v1775_v43 = vmul.f32 %v5148_v4, %v6845_v11  ;;  %v1783_v45 = vsub.f32 1.0, %v5148_v4  ;;  %v5150_v21 = vpop.eup %5149  ;;  %v299_v11 = vld [vmem:[#allocation17 + $0x8] sm:$0xff] }
 0x1e8   :  { %v6956_v26 = vmul.f32 %v5150_v21, %v131_v18  ;;  %p5463_p4 = pnand %p5462_p3, %p5456_p0 }
 0x1e9   :  { %v1791_v25 = vmul.f32 %v1783_v45, %v6589_v13  ;;  %v298_v13 = vld [vmem:[#allocation17] sm:$0xff] }
 0x1ea   :  { %v6977_v54 = vpack.c.bf16 %v299_v11, %v298_v13 }
 0x1eb   :  { %v1799_v7 = vadd.f32 %v1791_v25, %v1775_v43 }
 0x1ec   :  { %4668 = vmatpush3.bf16.msra.mxu0 %v6977_v54 }
 0x1ed   :  { %v1807_v17 = vmul.f32 %v1799_v7, %v1767_v33  ;;  %4669 = vmatprep.subr.bf16.mxu0 %v5525_v3 }
 0x1ef   :  { %v1815_v36 = vadd.f32 %v1807_v17, %v1759_v42 }
 0x1f0   :  { %4671 = vmatpush3.bf16.msra.mxu0 %v6981_v15 }
 0x1f1   :  { %1939 = vmatmul.mubr.f32.gmra.mrb[14].mxu1 %v1815_v36  ;;  %2045 = vmatmul.mubr.f32.gmra.mrb[30].mxu0 %v1815_v36 }
 0x1f2   :  { %2116 = vmatprep.mubr.f32.mxu1 %v7700_v49  ;;  %4672 = vmatprep.subr.bf16.mxu0 %v5525_v3 }
 0x1f3   :  { %4258 = vmatprep.mubr.msk.f32.mxu0 %vm5526_vm8, %v7700_v49 }
 0x1f4   :  { %4674 = vmatpush3.bf16.msra.mxu0 %v6985_v51 }
 0x1f5   :  { %2117 = vmatmul.mubr.f32.vlgmr.msra.gmra.mrb[0].mxu1 %v6956_v26  ;;  %4675 = vmatprep.subr.bf16.mxu0 %v5525_v3 }
 0x1f6   :  { %4693 = vmatpush1.bf16.msra.mxu1 %v6566_v58  ;;  %2345 = vmatprep.mubr.f32.mxu1 %v7700_v49 }
 0x1f7   :  { %4695 = vmatprep.subr.bf16.mxu1 %v6572_v22 }
 0x1f8   :  { %4677 = vmatpush3.bf16.msra.mxu0 %v6989_v62 }
 0x1f9   :  { %4678 = vmatprep.subr.bf16.mxu0 %v5525_v3 }
 0x1fa   :  { %4697 = vmatpush1.bf16.msra.mxu1 %v6580_v38 }
 0x1fb   :  { %4699 = vmatprep.subr.bf16.mxu1 %v6591_v63 }
 0x1fc   :  { %4680 = vmatpush3.bf16.msra.mxu0 %v6993_v23 }
 0x1fd   :  { %4681 = vmatprep.subr.bf16.mxu0 %v5525_v3 }
 0x1fe   :  { %4701 = vmatpush1.bf16.msra.mxu1 %v6655_v59 }
 0x1ff   :  { %4703 = vmatprep.subr.bf16.mxu1 %v6668_v8 }
 0x200   :  { %4683 = vmatpush3.bf16.msra.mxu0 %v6997_v31 }
 0x201   :  { %4684 = vmatprep.subr.bf16.mxu0 %v5525_v3 }
 0x202   :  { %4705 = vmatpush1.bf16.msra.mxu1 %v6681_v32 }
 0x203   :  { %4707 = vmatprep.subr.bf16.mxu1 %v6693_v48 }
 0x204   :  { %4686 = vmatpush3.bf16.msra.mxu0 %v7001_v10 }
 0x205   :  { %4687 = vmatprep.subr.bf16.mxu0 %v5525_v3 }
 0x206   :  { %4709 = vmatpush1.bf16.msra.mxu1 %v6707_v0 }
 0x207   :  { %4711 = vmatprep.subr.bf16.mxu1 %v6718_v40 }
 0x208   :  { %4689 = vmatpush3.bf16.msra.mxu0 %v7005_v27 }
 0x209   :  { %4722 = vmatprep.subr.bf16.mxu0 %v5525_v3 }
 0x20a   :  { %4713 = vmatpush1.bf16.msra.mxu1 %v6747_v57 }
 0x20b   :  { %4715 = vmatprep.subr.bf16.mxu1 %v6752_v14 }
 0x20e   :  { %4717 = vmatpush1.bf16.msra.mxu1 %v6772_v12 }
 0x20f   :  { %4719 = vmatprep.subr.bf16.mxu1 %v6817_v52 }
 0x212   :  { %4721 = vmatpush1.bf16.msra.mxu1 %v6850_v47 }
 0x213   :  { %4747 = vmatprep.subr.bf16.mxu1 %v6425_v34 }
 0x266   :  { %v4066_v19 = vpop.f32.mrb[16].mxu0 }
 0x267   :  { %v4067_v29 = vpop.f32.mrb[17].mxu0 }
 0x268   :  { %v7011_v41 = vadd.f32 %v4067_v29, %v4066_v19 }
 0x26a   :  { %v4069_v4 = vpop.f32.mrb[18].mxu0 }
 0x26b   :  { %v4070_v43 = vpop.f32.mrb[19].mxu0 }
 0x26c   :  { %v7013_v45 = vadd.f32 %v4070_v43, %v4069_v4  ;;  %v7056_v43 = vrot.slane %v314_v30, %v7703_v39 }
 0x275   :  { %v4072_v60 = vpop.f32.mrb[20].mxu0 }
 0x276   :  { %v4073_v33 = vpop.f32.mrb[21].mxu0 }
 0x277   :  { %v7015_v25 = vadd.f32 %v4073_v33, %v4072_v60 }
 0x285   :  { %v4075_v42 = vpop.f32.mrb[22].mxu0 }
 0x286   :  { %v4076_v7 = vpop.f32.mrb[23].mxu0 }
 0x287   :  { %v7017_v17 = vadd.f32 %v4076_v7, %v4075_v42  ;;  %v7704_v7 = vld [vmem:[#allocation35_spill] sm:$0xff] }
 0x295   :  { %v4078_v36 = vpop.f32.mrb[24].mxu0 }
 0x296   :  { %v4079_v21 = vpop.f32.mrb[25].mxu0 }
 0x297   :  { %v7019_v18 = vadd.f32 %v4079_v21, %v4078_v36  ;;  %v1650_v36 = vadd.f32 %v7704_v7, %v6907_v5  ;;  %v1827_v21 = vsub.s32 2, %v6460_v16 }
 0x2a5   :  { %v4081_v13 = vpop.f32.mrb[26].mxu0 }
 0x2a6   :  { %v4082_v11 = vpop.f32.mrb[27].mxu0 }
 0x2a7   :  { %v7021_v28 = vadd.f32 %v4082_v11, %v4081_v13  ;;  %v1691_v11 = vmax.f32 %v1650_v36, 0.0 }
 0x2b5   :  { %v4084_v46 = vpop.f32.mrb[28].mxu0 }
 0x2b6   :  { %v4085_v6 = vpop.f32.mrb[29].mxu0 }
 0x2b7   :  { %v7023_v50 = vadd.f32 %v4085_v6, %v4084_v46  ;;  %v7062_v46 = vrot.slane %v314_v30, %v1827_v21  ;;  %v1707_v6 = vsub.f32 0.0, %v1691_v11 }
 0x2c4   :  { %v4087_v9 = vpop.f32.mrb[30].mxu0 }
 0x2c5   :  { %v4088_v1 = vpop.f32.mrb[31].mxu0 }
 0x2c6   :  { %v7028_v56 = vadd.f32 %v4088_v1, %v4087_v9  ;;  %v2012_v9 = vadd.f32 %v7011_v41, %v7062_v46 }
 0x2c8   :  { %v2118_v55 = vpop.f32.mrb[0].mxu1 }
 0x2c9   :  { %v2120_v44 = vpop.f32.mrb[1].mxu1  ;;  %v5082_v60 = vadd.f32 %v2118_v55, %v7056_v43 }
 0x2ca   :  { %v5083_v2 = vadd.f32 %v2120_v44, %v7032_v24 }
 0x2cb   :  { %v3986_v33 = vmul.f32 -1.442695, %v5082_v60 }
 0x2cc   :  { %v3987_v20 = vmul.f32 -1.442695, %v5083_v2  ;;  %v1726_v2 = vmul.f32 1.442695, %v1707_v6 }
 0x2ce   :  { %5151 = vpow2.f32 %v3987_v20  ;;  %v5527_v20 = vmov 1966171168  }
 0x2d8   :  { %v5152_v37 = vpop.eup %5151 }
 0x2d9   :  { %v2134_v19 = vadd.f32 1.0, %v5152_v37  ;;  %v2217_v37 = vunpack.c.l.s4 %v5527_v20 }
 0x2db   :  { %5153 = vrcp.f32 %v2134_v19 }
 0x2dc   :  { %5155 = vpow2.f32 %v3986_v33 }
 0x2e5   :  { %v5154_v29 = vpop.eup %5153 }
 0x2e6   :  { %v2137_v4 = vmul.f32 %v5154_v29, %v6956_v26  ;;  %v5156_v42 = vpop.eup %5155  ;;  %v2218_v29 = vunpack.c.0.s8 %v2217_v37 }
 0x2e7   :  { %v2127_v13 = vadd.f32 1.0, %v5156_v42 }
 0x2e8   :  { %4259 = vmatmul.mubr.f32.vlgmr.msra.gmra.mrb[32].mxu0 %v2137_v4  ;;  %v7067_v30 = vsub.s32 %v2218_v29, %v6460_v16 }
 0x2e9   :  { %4724 = vmatpush3.bf16.msra.mxu0 %v6977_v54  ;;  %4293 = vmatprep.mubr.msk.f32.mxu0 %vm5526_vm8, %v7700_v49  ;;  %5157 = vrcp.f32 %v2127_v13 }
 0x2ea   :  { %4725 = vmatprep.subr.bf16.mxu0 %v5525_v3 }
 0x2ed   :  { %4727 = vmatpush3.bf16.msra.mxu0 %v6981_v15 }
 0x2ee   :  { %4728 = vmatprep.subr.bf16.mxu0 %v5525_v3 }
 0x2f1   :  { %4730 = vmatpush3.bf16.msra.mxu0 %v6985_v51 }
 0x2f2   :  { %4731 = vmatprep.subr.bf16.mxu0 %v5525_v3 }
 0x2f3   :  { %v5158_v19 = vpop.eup %5157 }
 0x2f4   :  { %v2210_v4 = vsub.f32 1.0, %v5158_v19 }
 0x2f5   :  { %4733 = vmatpush3.bf16.msra.mxu0 %v6989_v62 }
 0x2f6   :  { %4734 = vmatprep.subr.bf16.mxu0 %v5525_v3  ;;  %v2211_v33 = vmul.f32 %v2210_v4, %v6956_v26 }
 0x2f9   :  { %4736 = vmatpush3.bf16.msra.mxu0 %v6993_v23 }
 0x2fa   :  { %4737 = vmatprep.subr.bf16.mxu0 %v5525_v3 }
 0x2fd   :  { %4739 = vmatpush3.bf16.msra.mxu0 %v6997_v31 }
 0x2fe   :  { %4740 = vmatprep.subr.bf16.mxu0 %v5525_v3 }
 0x301   :  { %4742 = vmatpush3.bf16.msra.mxu0 %v7001_v10 }
 0x302   :  { %4743 = vmatprep.subr.bf16.mxu0 %v5525_v3 }
 0x305   :  { %4745 = vmatpush3.bf16.msra.mxu0 %v7005_v27 }
 0x306   :  { %4778 = vmatprep.subr.bf16.mxu0 %v5525_v3 }
 0x3bb   :  { %v2204_v1 = vpop.f32.mrb[32].mxu0 }
 0x3bc   :  { %v2208_v44 = vadd.f32 %v2204_v1, %v2012_v9  ;;  %v4260_v55 = vpop.f32.mrb[33].mxu0 }
 0x3be   :  { %5159 = vtanh.f32 %v2208_v44 }
 0x3bf   :  { %5161 = vpow2.f32 %v1726_v2 }
 0x3c8   :  { %v5160_v39 = vpop.eup %5159 }
 0x3c9   :  { %v2212_v60 = vmul.f32 %v5160_v39, %v5158_v19  ;;  %v5162_v41 = vpop.eup %5161 }
 0x3cb   :  { %v2213_v42 = vadd.f32 %v2212_v60, %v2211_v33 }
 0x3cd   :  { %v2215_v7 = vcombine.high %v2213_v42, %v2213_v42  ;;  %v2222_v36 = vrot.slane %v2213_v42, %v7067_v30  ;;  %v7071_v21 = vmul.f32 %v5162_v41, %v2213_v42 }
 0x3cf   :  { %v2229_v13 = vrot.slane %v2215_v7, %v7067_v30  ;;  %v2230_v11 = vcombine.high %v2222_v36, %v2222_v36  ;;  %v2238_v6 = vrot.slane %v2222_v36, %v7067_v30  ;;  %3988 = vst.sshfl [vmem:[#allocation18] sm:$0x1 pattern:$0x73625140] %v2222_v36  ;;  %2346 = vmatmul.mubr.f32.vlgmr.msra.gmra.mrb[2].mxu1 %v7071_v21 }
 0x3d0   :  { %4749 = vmatpush1.bf16.msra.mxu1 %v6566_v58  ;;  %2574 = vmatprep.mubr.f32.mxu1 %v7700_v49 }
 0x3d1   :  { %v2231_v16 = vcombine.high %v2229_v13, %v2229_v13  ;;  %v2245_v26 = vrot.slane %v2229_v13, %v7067_v30  ;;  %v2252_v9 = vrot.slane %v2230_v11, %v7067_v30  ;;  %v2260_v1 = vcombine.high %v2238_v6, %v2238_v6  ;;  %3989 = vst.sshfl [vmem:[#allocation18 + $0x8] sm:$0x1 pattern:$0x73625140] %v2230_v11 }
 0x3d2   :  { %3990 = vst.sshfl [vmem:[#allocation18 + $0x20] sm:$0x1 pattern:$0x73625140] %v2229_v13  ;;  %4751 = vmatprep.subr.bf16.mxu1 %v6572_v22  ;;  %v7705_v13 = vld [vmem:[#allocation36_spill] sm:$0xff] }
 0x3d3   :  { %v2259_v44 = vrot.slane %v2231_v16, %v7067_v30  ;;  %v2261_v55 = vcombine.high %v2245_v26, %v2245_v26  ;;  %v2262_v2 = vcombine.high %v2252_v9, %v2252_v9  ;;  %2274 = vst [vmem:[#allocation18 + $0x10] sm:$0x1] %v2260_v1  ;;  %3991 = vst.sshfl [vmem:[#allocation18 + $0x28] sm:$0x1 pattern:$0x73625140] %v2231_v16 }
 0x3d4   :  { %4753 = vmatpush1.bf16.msra.mxu1 %v6580_v38  ;;  %v1656_v11 = vadd.f32 %v7705_v13, %v6907_v5  ;;  %v2017_v9 = vadd.f32 %v7013_v45, %v7062_v46 }
 0x3d5   :  { %v2263_v20 = vcombine.high %v2259_v44, %v2259_v44  ;;  %2275 = vst [vmem:[#allocation18 + $0x18] sm:$0x1] %v2262_v2  ;;  %2278 = vst [vmem:[#allocation18 + $0x30] sm:$0x1] %v2261_v55  ;;  %4755 = vmatprep.subr.bf16.mxu1 %v6591_v63 }
 0x3d6   :  { %v1693_v16 = vmax.f32 %v1656_v11, 0.0 }
 0x3d7   :  { %2279 = vst [vmem:[#allocation18 + $0x38] sm:$0x1] %v2263_v20 }
 0x3d8   :  { %4757 = vmatpush1.bf16.msra.mxu1 %v6655_v59  ;;  %v1709_v26 = vsub.f32 0.0, %v1693_v16 }
 0x3d9   :  { %4759 = vmatprep.subr.bf16.mxu1 %v6668_v8 }
 0x3da   :  { %v1730_v2 = vmul.f32 1.442695, %v1709_v26 }
 0x3dc   :  { %4761 = vmatpush1.bf16.msra.mxu1 %v6681_v32 }
 0x3dd   :  { %4763 = vmatprep.subr.bf16.mxu1 %v6693_v48 }
 0x3e0   :  { %4765 = vmatpush1.bf16.msra.mxu1 %v6707_v0 }
 0x3e1   :  { %4767 = vmatprep.subr.bf16.mxu1 %v6718_v40 }
 0x3e4   :  { %4769 = vmatpush1.bf16.msra.mxu1 %v6747_v57 }
 0x3e5   :  { %4771 = vmatprep.subr.bf16.mxu1 %v6752_v14 }
 0x3e8   :  { %4773 = vmatpush1.bf16.msra.mxu1 %v6772_v12 }
 0x3e9   :  { %4775 = vmatprep.subr.bf16.mxu1 %v6817_v52 }
 0x3ec   :  { %4777 = vmatpush1.bf16.msra.mxu1 %v6850_v47 }
 0x3ed   :  { %4803 = vmatprep.subr.bf16.mxu1 %v6425_v34 }
 0x4a2   :  { %v2347_v37 = vpop.f32.mrb[2].mxu1 }
 0x4a3   :  { %v2349_v19 = vpop.f32.mrb[3].mxu1  ;;  %v5084_v41 = vadd.f32 %v2347_v37, %v7056_v43 }
 0x4a4   :  { %v5085_v29 = vadd.f32 %v2349_v19, %v7032_v24 }
 0x4a5   :  { %v3992_v7 = vmul.f32 -1.442695, %v5084_v41 }
 0x4a6   :  { %v3993_v4 = vmul.f32 -1.442695, %v5085_v29 }
 0x4a8   :  { %5163 = vpow2.f32 %v3993_v4 }
 0x4b2   :  { %v5164_v39 = vpop.eup %5163 }
 0x4b3   :  { %v2363_v60 = vadd.f32 1.0, %v5164_v39 }
 0x4b5   :  { %5165 = vrcp.f32 %v2363_v60 }
 0x4b6   :  { %5167 = vpow2.f32 %v3992_v7 }
 0x4bf   :  { %v5166_v33 = vpop.eup %5165 }
 0x4c0   :  { %v2366_v42 = vmul.f32 %v5166_v33, %v7071_v21  ;;  %v5168_v36 = vpop.eup %5167 }
 0x4c1   :  { %v2356_v6 = vadd.f32 1.0, %v5168_v36 }
 0x4c2   :  { %4294 = vmatmul.mubr.f32.vlgmr.msra.gmra.mrb[34].mxu0 %v2366_v42 }
 0x4c3   :  { %4780 = vmatpush3.bf16.msra.mxu0 %v6977_v54  ;;  %4328 = vmatprep.mubr.msk.f32.mxu0 %vm5526_vm8, %v7700_v49  ;;  %5169 = vrcp.f32 %v2356_v6 }
 0x4c4   :  { %4781 = vmatprep.subr.bf16.mxu0 %v5525_v3 }
 0x4c7   :  { %4783 = vmatpush3.bf16.msra.mxu0 %v6981_v15 }
 0x4c8   :  { %4784 = vmatprep.subr.bf16.mxu0 %v5525_v3 }
 0x4cb   :  { %4786 = vmatpush3.bf16.msra.mxu0 %v6985_v51 }
 0x4cc   :  { %4787 = vmatprep.subr.bf16.mxu0 %v5525_v3 }
 0x4cd   :  { %v5170_v20 = vpop.eup %5169 }
 0x4ce   :  { %v2439_v37 = vsub.f32 1.0, %v5170_v20 }
 0x4cf   :  { %4789 = vmatpush3.bf16.msra.mxu0 %v6989_v62 }
 0x4d0   :  { %4790 = vmatprep.subr.bf16.mxu0 %v5525_v3  ;;  %v2440_v4 = vmul.f32 %v2439_v37, %v7071_v21 }
 0x4d3   :  { %4792 = vmatpush3.bf16.msra.mxu0 %v6993_v23 }
 0x4d4   :  { %4793 = vmatprep.subr.bf16.mxu0 %v5525_v3 }
 0x4d7   :  { %4795 = vmatpush3.bf16.msra.mxu0 %v6997_v31 }
 0x4d8   :  { %4796 = vmatprep.subr.bf16.mxu0 %v5525_v3 }
 0x4db   :  { %4798 = vmatpush3.bf16.msra.mxu0 %v7001_v10 }
 0x4dc   :  { %4799 = vmatprep.subr.bf16.mxu0 %v5525_v3 }
 0x4df   :  { %4801 = vmatpush3.bf16.msra.mxu0 %v7005_v27 }
 0x4e0   :  { %4834 = vmatprep.subr.bf16.mxu0 %v5525_v3 }
 0x595   :  { %v2433_v1 = vpop.f32.mrb[34].mxu0 }
 0x596   :  { %v2437_v44 = vadd.f32 %v2433_v1, %v2017_v9  ;;  %v4295_v55 = vpop.f32.mrb[35].mxu0 }
 0x598   :  { %5171 = vtanh.f32 %v2437_v44 }
 0x599   :  { %5173 = vpow2.f32 %v1730_v2 }
 0x5a2   :  { %v5172_v19 = vpop.eup %5171 }
 0x5a3   :  { %v2441_v29 = vmul.f32 %v5172_v19, %v5170_v20  ;;  %v5174_v60 = vpop.eup %5173 }
 0x5a5   :  { %v2442_v39 = vadd.f32 %v2441_v29, %v2440_v4 }
 0x5a7   :  { %v2444_v33 = vcombine.high %v2442_v39, %v2442_v39  ;;  %v2451_v42 = vrot.slane %v2442_v39, %v7067_v30  ;;  %v7123_v41 = vmul.f32 %v5174_v60, %v2442_v39 }
 0x5a9   :  { %v2458_v45 = vrot.slane %v2444_v33, %v7067_v30  ;;  %v2459_v7 = vcombine.high %v2451_v42, %v2451_v42  ;;  %v2467_v36 = vrot.slane %v2451_v42, %v7067_v30  ;;  %3994 = vst.sshfl [vmem:[#allocation18 + $0x1] sm:$0x1 pattern:$0x73625140] %v2451_v42  ;;  %2575 = vmatmul.mubr.f32.vlgmr.msra.gmra.mrb[4].mxu1 %v7123_v41  ;;  %v7706_v42 = vld [vmem:[#allocation37_spill] sm:$0xff] }
 0x5aa   :  { %4805 = vmatpush1.bf16.msra.mxu1 %v6566_v58  ;;  %2803 = vmatprep.mubr.f32.mxu1 %v7700_v49 }
 0x5ab   :  { %v2460_v21 = vcombine.high %v2458_v45, %v2458_v45  ;;  %v2474_v13 = vrot.slane %v2458_v45, %v7067_v30  ;;  %v2481_v11 = vrot.slane %v2459_v7, %v7067_v30  ;;  %v2489_v6 = vcombine.high %v2467_v36, %v2467_v36  ;;  %3995 = vst.sshfl [vmem:[#allocation18 + $0x9] sm:$0x1 pattern:$0x73625140] %v2459_v7 }
 0x5ac   :  { %3996 = vst.sshfl [vmem:[#allocation18 + $0x21] sm:$0x1 pattern:$0x73625140] %v2458_v45  ;;  %4807 = vmatprep.subr.bf16.mxu1 %v6572_v22  ;;  %v1662_v45 = vadd.f32 %v7706_v42, %v6907_v5 }
 0x5ad   :  { %v2488_v16 = vrot.slane %v2460_v21, %v7067_v30  ;;  %v2490_v26 = vcombine.high %v2474_v13, %v2474_v13  ;;  %v2491_v9 = vcombine.high %v2481_v11, %v2481_v11  ;;  %2503 = vst [vmem:[#allocation18 + $0x11] sm:$0x1] %v2489_v6  ;;  %3997 = vst.sshfl [vmem:[#allocation18 + $0x29] sm:$0x1 pattern:$0x73625140] %v2460_v21 }
 0x5ae   :  { %4809 = vmatpush1.bf16.msra.mxu1 %v6580_v38  ;;  %v1695_v36 = vmax.f32 %v1662_v45, 0.0  ;;  %v2022_v13 = vadd.f32 %v7015_v25, %v7062_v46 }
 0x5af   :  { %v2492_v1 = vcombine.high %v2488_v16, %v2488_v16  ;;  %2504 = vst [vmem:[#allocation18 + $0x19] sm:$0x1] %v2491_v9  ;;  %2507 = vst [vmem:[#allocation18 + $0x31] sm:$0x1] %v2490_v26  ;;  %4811 = vmatprep.subr.bf16.mxu1 %v6591_v63 }
 0x5b0   :  { %v1711_v21 = vsub.f32 0.0, %v1695_v36 }
 0x5b1   :  { %2508 = vst [vmem:[#allocation18 + $0x39] sm:$0x1] %v2492_v1 }
 0x5b2   :  { %4813 = vmatpush1.bf16.msra.mxu1 %v6655_v59  ;;  %v1734_v26 = vmul.f32 1.442695, %v1711_v21 }
 0x5b3   :  { %4815 = vmatprep.subr.bf16.mxu1 %v6668_v8 }
 0x5b6   :  { %4817 = vmatpush1.bf16.msra.mxu1 %v6681_v32 }
 0x5b7   :  { %4819 = vmatprep.subr.bf16.mxu1 %v6693_v48 }
 0x5ba   :  { %4821 = vmatpush1.bf16.msra.mxu1 %v6707_v0 }
 0x5bb   :  { %4823 = vmatprep.subr.bf16.mxu1 %v6718_v40 }
 0x5be   :  { %4825 = vmatpush1.bf16.msra.mxu1 %v6747_v57 }
 0x5bf   :  { %4827 = vmatprep.subr.bf16.mxu1 %v6752_v14 }
 0x5c2   :  { %4829 = vmatpush1.bf16.msra.mxu1 %v6772_v12 }
 0x5c3   :  { %4831 = vmatprep.subr.bf16.mxu1 %v6817_v52 }
 0x5c6   :  { %4833 = vmatpush1.bf16.msra.mxu1 %v6850_v47 }
 0x5c7   :  { %4859 = vmatprep.subr.bf16.mxu1 %v6425_v34 }
 0x67c   :  { %v2576_v44 = vpop.f32.mrb[4].mxu1 }
 0x67d   :  { %v2578_v55 = vpop.f32.mrb[5].mxu1  ;;  %v5086_v39 = vadd.f32 %v2576_v44, %v7056_v43 }
 0x67e   :  { %v5087_v2 = vadd.f32 %v2578_v55, %v7032_v24 }
 0x67f   :  { %v3998_v60 = vmul.f32 -1.442695, %v5086_v39 }
 0x680   :  { %v3999_v20 = vmul.f32 -1.442695, %v5087_v2 }
 0x682   :  { %5175 = vpow2.f32 %v3999_v20 }
 0x68c   :  { %v5176_v37 = vpop.eup %5175 }
 0x68d   :  { %v2592_v19 = vadd.f32 1.0, %v5176_v37 }
 0x68f   :  { %5177 = vrcp.f32 %v2592_v19 }
 0x690   :  { %5179 = vpow2.f32 %v3998_v60 }
 0x699   :  { %v5178_v29 = vpop.eup %5177 }
 0x69a   :  { %v2595_v4 = vmul.f32 %v5178_v29, %v7123_v41  ;;  %v5180_v33 = vpop.eup %5179 }
 0x69b   :  { %v2585_v7 = vadd.f32 1.0, %v5180_v33 }
 0x69c   :  { %4329 = vmatmul.mubr.f32.vlgmr.msra.gmra.mrb[36].mxu0 %v2595_v4 }
 0x69d   :  { %4836 = vmatpush3.bf16.msra.mxu0 %v6977_v54  ;;  %4363 = vmatprep.mubr.msk.f32.mxu0 %vm5526_vm8, %v7700_v49  ;;  %5181 = vrcp.f32 %v2585_v7 }
 0x69e   :  { %4837 = vmatprep.subr.bf16.mxu0 %v5525_v3 }
 0x6a1   :  { %4839 = vmatpush3.bf16.msra.mxu0 %v6981_v15 }
 0x6a2   :  { %4840 = vmatprep.subr.bf16.mxu0 %v5525_v3 }
 0x6a5   :  { %4842 = vmatpush3.bf16.msra.mxu0 %v6985_v51 }
 0x6a6   :  { %4843 = vmatprep.subr.bf16.mxu0 %v5525_v3 }
 0x6a7   :  { %v5182_v9 = vpop.eup %5181 }
 0x6a8   :  { %v2668_v1 = vsub.f32 1.0, %v5182_v9 }
 0x6a9   :  { %4845 = vmatpush3.bf16.msra.mxu0 %v6989_v62 }
 0x6aa   :  { %4846 = vmatprep.subr.bf16.mxu0 %v5525_v3  ;;  %v2669_v2 = vmul.f32 %v2668_v1, %v7123_v41 }
 0x6ad   :  { %4848 = vmatpush3.bf16.msra.mxu0 %v6993_v23 }
 0x6ae   :  { %4849 = vmatprep.subr.bf16.mxu0 %v5525_v3 }
 0x6b1   :  { %4851 = vmatpush3.bf16.msra.mxu0 %v6997_v31 }
 0x6b2   :  { %4852 = vmatprep.subr.bf16.mxu0 %v5525_v3 }
 0x6b5   :  { %4854 = vmatpush3.bf16.msra.mxu0 %v7001_v10 }
 0x6b6   :  { %4855 = vmatprep.subr.bf16.mxu0 %v5525_v3 }
 0x6b9   :  { %4857 = vmatpush3.bf16.msra.mxu0 %v7005_v27 }
 0x6ba   :  { %4890 = vmatprep.subr.bf16.mxu0 %v5525_v3 }
 0x76f   :  { %v2662_v11 = vpop.f32.mrb[36].mxu0 }
 0x770   :  { %v2666_v6 = vadd.f32 %v2662_v11, %v2022_v13  ;;  %v4330_v16 = vpop.f32.mrb[37].mxu0 }
 0x772   :  { %5183 = vtanh.f32 %v2666_v6 }
 0x773   :  { %5185 = vpow2.f32 %v1734_v26 }
 0x77c   :  { %v5184_v44 = vpop.eup %5183 }
 0x77d   :  { %v2670_v55 = vmul.f32 %v5184_v44, %v5182_v9  ;;  %v5186_v37 = vpop.eup %5185 }
 0x77f   :  { %v2671_v20 = vadd.f32 %v2670_v55, %v2669_v2 }
 0x781   :  { %v2673_v19 = vcombine.high %v2671_v20, %v2671_v20  ;;  %v2680_v29 = vrot.slane %v2671_v20, %v7067_v30  ;;  %v7175_v4 = vmul.f32 %v5186_v37, %v2671_v20 }
 0x783   :  { %v2687_v25 = vrot.slane %v2673_v19, %v7067_v30  ;;  %v2688_v39 = vcombine.high %v2680_v29, %v2680_v29  ;;  %v2696_v60 = vrot.slane %v2680_v29, %v7067_v30  ;;  %4000 = vst.sshfl [vmem:[#allocation18 + $0x2] sm:$0x1 pattern:$0x73625140] %v2680_v29  ;;  %2804 = vmatmul.mubr.f32.vlgmr.msra.gmra.mrb[6].mxu1 %v7175_v4  ;;  %v7707_v19 = vld [vmem:[#allocation38_spill] sm:$0xff] }
 0x784   :  { %4861 = vmatpush1.bf16.msra.mxu1 %v6566_v58  ;;  %3032 = vmatprep.mubr.f32.mxu1 %v7700_v49  ;;  %v1668_v29 = vadd.f32 %v7707_v19, %v6907_v5 }
 0x785   :  { %v2689_v41 = vcombine.high %v2687_v25, %v2687_v25  ;;  %v2703_v33 = vrot.slane %v2687_v25, %v7067_v30  ;;  %v2710_v42 = vrot.slane %v2688_v39, %v7067_v30  ;;  %v2718_v45 = vcombine.high %v2696_v60, %v2696_v60  ;;  %4001 = vst.sshfl [vmem:[#allocation18 + $0xa] sm:$0x1 pattern:$0x73625140] %v2688_v39 }
 0x786   :  { %4002 = vst.sshfl [vmem:[#allocation18 + $0x22] sm:$0x1 pattern:$0x73625140] %v2687_v25  ;;  %4863 = vmatprep.subr.bf16.mxu1 %v6572_v22  ;;  %v1697_v39 = vmax.f32 %v1668_v29, 0.0 }
 0x787   :  { %v2717_v7 = vrot.slane %v2689_v41, %v7067_v30  ;;  %v2719_v36 = vcombine.high %v2703_v33, %v2703_v33  ;;  %v2720_v21 = vcombine.high %v2710_v42, %v2710_v42  ;;  %2732 = vst [vmem:[#allocation18 + $0x12] sm:$0x1] %v2718_v45  ;;  %4003 = vst.sshfl [vmem:[#allocation18 + $0x2a] sm:$0x1 pattern:$0x73625140] %v2689_v41 }
 0x788   :  { %4865 = vmatpush1.bf16.msra.mxu1 %v6580_v38  ;;  %v1713_v60 = vsub.f32 0.0, %v1697_v39  ;;  %v2027_v41 = vadd.f32 %v7017_v17, %v7062_v46 }
 0x789   :  { %v2721_v13 = vcombine.high %v2717_v7, %v2717_v7  ;;  %2733 = vst [vmem:[#allocation18 + $0x1a] sm:$0x1] %v2720_v21  ;;  %2736 = vst [vmem:[#allocation18 + $0x32] sm:$0x1] %v2719_v36  ;;  %4867 = vmatprep.subr.bf16.mxu1 %v6591_v63 }
 0x78a   :  { %v1738_v7 = vmul.f32 1.442695, %v1713_v60 }
 0x78b   :  { %2737 = vst [vmem:[#allocation18 + $0x3a] sm:$0x1] %v2721_v13 }
 0x78c   :  { %4869 = vmatpush1.bf16.msra.mxu1 %v6655_v59 }
 0x78d   :  { %4871 = vmatprep.subr.bf16.mxu1 %v6668_v8 }
 0x790   :  { %4873 = vmatpush1.bf16.msra.mxu1 %v6681_v32 }
 0x791   :  { %4875 = vmatprep.subr.bf16.mxu1 %v6693_v48 }
 0x794   :  { %4877 = vmatpush1.bf16.msra.mxu1 %v6707_v0 }
 0x795   :  { %4879 = vmatprep.subr.bf16.mxu1 %v6718_v40 }
 0x798   :  { %4881 = vmatpush1.bf16.msra.mxu1 %v6747_v57 }
 0x799   :  { %4883 = vmatprep.subr.bf16.mxu1 %v6752_v14 }
 0x79c   :  { %4885 = vmatpush1.bf16.msra.mxu1 %v6772_v12 }
 0x79d   :  { %4887 = vmatprep.subr.bf16.mxu1 %v6817_v52 }
 0x7a0   :  { %4889 = vmatpush1.bf16.msra.mxu1 %v6850_v47 }
 0x7a1   :  { %4915 = vmatprep.subr.bf16.mxu1 %v6425_v34 }
 0x856   :  { %v2805_v11 = vpop.f32.mrb[6].mxu1 }
 0x857   :  { %v2807_v6 = vpop.f32.mrb[7].mxu1  ;;  %v5088_v2 = vadd.f32 %v2805_v11, %v7056_v43 }
 0x858   :  { %v5089_v16 = vadd.f32 %v2807_v6, %v7032_v24 }
 0x859   :  { %v4004_v20 = vmul.f32 -1.442695, %v5088_v2 }
 0x85a   :  { %v4005_v26 = vmul.f32 -1.442695, %v5089_v16 }
 0x85c   :  { %5187 = vpow2.f32 %v4005_v26 }
 0x866   :  { %v5188_v9 = vpop.eup %5187 }
 0x867   :  { %v2821_v1 = vadd.f32 1.0, %v5188_v9 }
 0x869   :  { %5189 = vrcp.f32 %v2821_v1 }
 0x86a   :  { %5191 = vpow2.f32 %v4004_v20 }
 0x873   :  { %v5190_v44 = vpop.eup %5189 }
 0x874   :  { %v2824_v55 = vmul.f32 %v5190_v44, %v7175_v4  ;;  %v5192_v37 = vpop.eup %5191 }
 0x875   :  { %v2814_v25 = vadd.f32 1.0, %v5192_v37 }
 0x876   :  { %4364 = vmatmul.mubr.f32.vlgmr.msra.gmra.mrb[38].mxu0 %v2824_v55 }
 0x877   :  { %4892 = vmatpush3.bf16.msra.mxu0 %v6977_v54  ;;  %4398 = vmatprep.mubr.msk.f32.mxu0 %vm5526_vm8, %v7700_v49  ;;  %5193 = vrcp.f32 %v2814_v25 }
 0x878   :  { %4893 = vmatprep.subr.bf16.mxu0 %v5525_v3 }
 0x87b   :  { %4895 = vmatpush3.bf16.msra.mxu0 %v6981_v15 }
 0x87c   :  { %4896 = vmatprep.subr.bf16.mxu0 %v5525_v3 }
 0x87f   :  { %4898 = vmatpush3.bf16.msra.mxu0 %v6985_v51 }
 0x880   :  { %4899 = vmatprep.subr.bf16.mxu0 %v5525_v3 }
 0x881   :  { %v5194_v36 = vpop.eup %5193 }
 0x882   :  { %v2897_v21 = vsub.f32 1.0, %v5194_v36 }
 0x883   :  { %4901 = vmatpush3.bf16.msra.mxu0 %v6989_v62 }
 0x884   :  { %4902 = vmatprep.subr.bf16.mxu0 %v5525_v3  ;;  %v2898_v6 = vmul.f32 %v2897_v21, %v7175_v4 }
 0x887   :  { %4904 = vmatpush3.bf16.msra.mxu0 %v6993_v23 }
 0x888   :  { %4905 = vmatprep.subr.bf16.mxu0 %v5525_v3 }
 0x88b   :  { %4907 = vmatpush3.bf16.msra.mxu0 %v6997_v31 }
 0x88c   :  { %4908 = vmatprep.subr.bf16.mxu0 %v5525_v3 }
 0x88f   :  { %4910 = vmatpush3.bf16.msra.mxu0 %v7001_v10 }
 0x890   :  { %4911 = vmatprep.subr.bf16.mxu0 %v5525_v3 }
 0x893   :  { %4913 = vmatpush3.bf16.msra.mxu0 %v7005_v27 }
 0x894   :  { %4946 = vmatprep.subr.bf16.mxu0 %v5525_v3 }
 0x949   :  { %v2891_v33 = vpop.f32.mrb[38].mxu0 }
 0x94a   :  { %v2895_v42 = vadd.f32 %v2891_v33, %v2027_v41  ;;  %v4365_v45 = vpop.f32.mrb[39].mxu0 }
 0x94c   :  { %5195 = vtanh.f32 %v2895_v42 }
 0x94d   :  { %5197 = vpow2.f32 %v1738_v7 }
 0x956   :  { %v5196_v13 = vpop.eup %5195 }
 0x957   :  { %v2899_v11 = vmul.f32 %v5196_v13, %v5194_v36  ;;  %v5198_v26 = vpop.eup %5197 }
 0x959   :  { %v2900_v16 = vadd.f32 %v2899_v11, %v2898_v6 }
 0x95b   :  { %v2902_v9 = vcombine.high %v2900_v16, %v2900_v16  ;;  %v2909_v1 = vrot.slane %v2900_v16, %v7067_v30  ;;  %v7227_v44 = vmul.f32 %v5198_v26, %v2900_v16  ;;  %v1674_v26 = vadd.f32 %v6835_v35, %v6907_v5 }
 0x95d   :  { %v2916_v17 = vrot.slane %v2902_v9, %v7067_v30  ;;  %v2917_v55 = vcombine.high %v2909_v1, %v2909_v1  ;;  %v2925_v2 = vrot.slane %v2909_v1, %v7067_v30  ;;  %4006 = vst.sshfl [vmem:[#allocation18 + $0x3] sm:$0x1 pattern:$0x73625140] %v2909_v1  ;;  %3033 = vmatmul.mubr.f32.vlgmr.msra.gmra.mrb[8].mxu1 %v7227_v44  ;;  %v1699_v1 = vmax.f32 %v1674_v26, 0.0 }
 0x95e   :  { %4917 = vmatpush1.bf16.msra.mxu1 %v6566_v58  ;;  %3261 = vmatprep.mubr.f32.mxu1 %v7700_v49 }
 0x95f   :  { %v2918_v4 = vcombine.high %v2916_v17, %v2916_v17  ;;  %v2932_v20 = vrot.slane %v2916_v17, %v7067_v30  ;;  %v2939_v37 = vrot.slane %v2917_v55, %v7067_v30  ;;  %v2947_v19 = vcombine.high %v2925_v2, %v2925_v2  ;;  %4007 = vst.sshfl [vmem:[#allocation18 + $0xb] sm:$0x1 pattern:$0x73625140] %v2917_v55 }
 0x960   :  { %4008 = vst.sshfl [vmem:[#allocation18 + $0x23] sm:$0x1 pattern:$0x73625140] %v2916_v17  ;;  %4919 = vmatprep.subr.bf16.mxu1 %v6572_v22  ;;  %v1715_v17 = vsub.f32 0.0, %v1699_v1  ;;  %v2032_v55 = vadd.f32 %v7019_v18, %v7062_v46 }
 0x961   :  { %v2946_v29 = vrot.slane %v2918_v4, %v7067_v30  ;;  %v2948_v25 = vcombine.high %v2932_v20, %v2932_v20  ;;  %v2949_v39 = vcombine.high %v2939_v37, %v2939_v37  ;;  %2961 = vst [vmem:[#allocation18 + $0x13] sm:$0x1] %v2947_v19  ;;  %4009 = vst.sshfl [vmem:[#allocation18 + $0x2b] sm:$0x1 pattern:$0x73625140] %v2918_v4 }
 0x962   :  { %4921 = vmatpush1.bf16.msra.mxu1 %v6580_v38  ;;  %v1742_v37 = vmul.f32 1.442695, %v1715_v17 }
 0x963   :  { %v2950_v60 = vcombine.high %v2946_v29, %v2946_v29  ;;  %2962 = vst [vmem:[#allocation18 + $0x1b] sm:$0x1] %v2949_v39  ;;  %2965 = vst [vmem:[#allocation18 + $0x33] sm:$0x1] %v2948_v25  ;;  %4923 = vmatprep.subr.bf16.mxu1 %v6591_v63 }
 0x965   :  { %2966 = vst [vmem:[#allocation18 + $0x3b] sm:$0x1] %v2950_v60 }
 0x966   :  { %4925 = vmatpush1.bf16.msra.mxu1 %v6655_v59 }
 0x967   :  { %4927 = vmatprep.subr.bf16.mxu1 %v6668_v8 }
 0x96a   :  { %4929 = vmatpush1.bf16.msra.mxu1 %v6681_v32 }
 0x96b   :  { %4931 = vmatprep.subr.bf16.mxu1 %v6693_v48 }
 0x96e   :  { %4933 = vmatpush1.bf16.msra.mxu1 %v6707_v0 }
 0x96f   :  { %4935 = vmatprep.subr.bf16.mxu1 %v6718_v40 }
 0x972   :  { %4937 = vmatpush1.bf16.msra.mxu1 %v6747_v57 }
 0x973   :  { %4939 = vmatprep.subr.bf16.mxu1 %v6752_v14 }
 0x976   :  { %4941 = vmatpush1.bf16.msra.mxu1 %v6772_v12 }
 0x977   :  { %4943 = vmatprep.subr.bf16.mxu1 %v6817_v52 }
 0x97a   :  { %4945 = vmatpush1.bf16.msra.mxu1 %v6850_v47 }
 0x97b   :  { %4971 = vmatprep.subr.bf16.mxu1 %v6425_v34 }
 0xa30   :  { %v3034_v41 = vpop.f32.mrb[8].mxu1 }
 0xa31   :  { %v3036_v33 = vpop.f32.mrb[9].mxu1  ;;  %v5090_v11 = vadd.f32 %v3034_v41, %v7056_v43 }
 0xa32   :  { %v5091_v42 = vadd.f32 %v3036_v33, %v7032_v24 }
 0xa33   :  { %v4010_v6 = vmul.f32 -1.442695, %v5090_v11 }
 0xa34   :  { %v4011_v45 = vmul.f32 -1.442695, %v5091_v42 }
 0xa36   :  { %5199 = vpow2.f32 %v4011_v45 }
 0xa40   :  { %v5200_v7 = vpop.eup %5199 }
 0xa41   :  { %v3050_v36 = vadd.f32 1.0, %v5200_v7 }
 0xa43   :  { %5201 = vrcp.f32 %v3050_v36 }
 0xa44   :  { %5203 = vpow2.f32 %v4010_v6 }
 0xa4d   :  { %v5202_v21 = vpop.eup %5201 }
 0xa4e   :  { %v3053_v13 = vmul.f32 %v5202_v21, %v7227_v44  ;;  %v5204_v16 = vpop.eup %5203 }
 0xa4f   :  { %v3043_v9 = vadd.f32 1.0, %v5204_v16 }
 0xa50   :  { %4399 = vmatmul.mubr.f32.vlgmr.msra.gmra.mrb[40].mxu0 %v3053_v13 }
 0xa51   :  { %4948 = vmatpush3.bf16.msra.mxu0 %v6977_v54  ;;  %4433 = vmatprep.mubr.msk.f32.mxu0 %vm5526_vm8, %v7700_v49  ;;  %5205 = vrcp.f32 %v3043_v9 }
 0xa52   :  { %4949 = vmatprep.subr.bf16.mxu0 %v5525_v3 }
 0xa55   :  { %4951 = vmatpush3.bf16.msra.mxu0 %v6981_v15 }
 0xa56   :  { %4952 = vmatprep.subr.bf16.mxu0 %v5525_v3 }
 0xa59   :  { %4954 = vmatpush3.bf16.msra.mxu0 %v6985_v51 }
 0xa5a   :  { %4955 = vmatprep.subr.bf16.mxu0 %v5525_v3 }
 0xa5b   :  { %v5206_v19 = vpop.eup %5205 }
 0xa5c   :  { %v3126_v29 = vsub.f32 1.0, %v5206_v19 }
 0xa5d   :  { %4957 = vmatpush3.bf16.msra.mxu0 %v6989_v62 }
 0xa5e   :  { %4958 = vmatprep.subr.bf16.mxu0 %v5525_v3  ;;  %v3127_v60 = vmul.f32 %v3126_v29, %v7227_v44 }
 0xa61   :  { %4960 = vmatpush3.bf16.msra.mxu0 %v6993_v23 }
 0xa62   :  { %4961 = vmatprep.subr.bf16.mxu0 %v5525_v3 }
 0xa65   :  { %4963 = vmatpush3.bf16.msra.mxu0 %v6997_v31 }
 0xa66   :  { %4964 = vmatprep.subr.bf16.mxu0 %v5525_v3 }
 0xa69   :  { %4966 = vmatpush3.bf16.msra.mxu0 %v7001_v10 }
 0xa6a   :  { %4967 = vmatprep.subr.bf16.mxu0 %v5525_v3 }
 0xa6d   :  { %4969 = vmatpush3.bf16.msra.mxu0 %v7005_v27 }
 0xa6e   :  { %5002 = vmatprep.subr.bf16.mxu0 %v5525_v3 }
 0xb23   :  { %v3120_v2 = vpop.f32.mrb[40].mxu0 }
 0xb24   :  { %v3124_v4 = vadd.f32 %v3120_v2, %v2032_v55  ;;  %v4400_v20 = vpop.f32.mrb[41].mxu0 }
 0xb26   :  { %5207 = vtanh.f32 %v3124_v4 }
 0xb27   :  { %5209 = vpow2.f32 %v1742_v37 }
 0xb30   :  { %v5208_v25 = vpop.eup %5207 }
 0xb31   :  { %v3128_v39 = vmul.f32 %v5208_v25, %v5206_v19  ;;  %v5210_v41 = vpop.eup %5209 }
 0xb33   :  { %v3129_v35 = vadd.f32 %v3128_v39, %v3127_v60  ;;  %v1680_v39 = vadd.f32 %v6873_v53, %v6907_v5 }
 0xb35   :  { %v3131_v33 = vcombine.high %v3129_v35, %v3129_v35  ;;  %v3138_v42 = vrot.slane %v3129_v35, %v7067_v30  ;;  %v7279_v45 = vmul.f32 %v5210_v41, %v3129_v35  ;;  %v1701_v35 = vmax.f32 %v1680_v39, 0.0 }
 0xb37   :  { %v3145_v18 = vrot.slane %v3131_v33, %v7067_v30  ;;  %v3146_v7 = vcombine.high %v3138_v42, %v3138_v42  ;;  %v3154_v36 = vrot.slane %v3138_v42, %v7067_v30  ;;  %4012 = vst.sshfl [vmem:[#allocation18 + $0x4] sm:$0x1 pattern:$0x73625140] %v3138_v42  ;;  %3262 = vmatmul.mubr.f32.vlgmr.msra.gmra.mrb[10].mxu1 %v7279_v45  ;;  %v1717_v41 = vsub.f32 0.0, %v1701_v35 }
 0xb38   :  { %4973 = vmatpush1.bf16.msra.mxu1 %v6566_v58  ;;  %3490 = vmatprep.mubr.f32.mxu1 %v7700_v49  ;;  %v2037_v33 = vadd.f32 %v7021_v28, %v7062_v46 }
 0xb39   :  { %v3147_v44 = vcombine.high %v3145_v18, %v3145_v18  ;;  %v3161_v21 = vrot.slane %v3145_v18, %v7067_v30  ;;  %v3168_v13 = vrot.slane %v3146_v7, %v7067_v30  ;;  %v3176_v11 = vcombine.high %v3154_v36, %v3154_v36  ;;  %4013 = vst.sshfl [vmem:[#allocation18 + $0xc] sm:$0x1 pattern:$0x73625140] %v3146_v7 }
 0xb3a   :  { %4014 = vst.sshfl [vmem:[#allocation18 + $0x24] sm:$0x1 pattern:$0x73625140] %v3145_v18  ;;  %4975 = vmatprep.subr.bf16.mxu1 %v6572_v22  ;;  %v1746_v36 = vmul.f32 1.442695, %v1717_v41 }
 0xb3b   :  { %v3175_v6 = vrot.slane %v3147_v44, %v7067_v30  ;;  %v3177_v16 = vcombine.high %v3161_v21, %v3161_v21  ;;  %v3178_v26 = vcombine.high %v3168_v13, %v3168_v13  ;;  %3190 = vst [vmem:[#allocation18 + $0x14] sm:$0x1] %v3176_v11  ;;  %4015 = vst.sshfl [vmem:[#allocation18 + $0x2c] sm:$0x1 pattern:$0x73625140] %v3147_v44 }
 0xb3c   :  { %4977 = vmatpush1.bf16.msra.mxu1 %v6580_v38 }
 0xb3d   :  { %v3179_v9 = vcombine.high %v3175_v6, %v3175_v6  ;;  %3191 = vst [vmem:[#allocation18 + $0x1c] sm:$0x1] %v3178_v26  ;;  %3194 = vst [vmem:[#allocation18 + $0x34] sm:$0x1] %v3177_v16  ;;  %4979 = vmatprep.subr.bf16.mxu1 %v6591_v63 }
 0xb3f   :  { %3195 = vst [vmem:[#allocation18 + $0x3c] sm:$0x1] %v3179_v9 }
 0xb40   :  { %4981 = vmatpush1.bf16.msra.mxu1 %v6655_v59 }
 0xb41   :  { %4983 = vmatprep.subr.bf16.mxu1 %v6668_v8 }
 0xb44   :  { %4985 = vmatpush1.bf16.msra.mxu1 %v6681_v32 }
 0xb45   :  { %4987 = vmatprep.subr.bf16.mxu1 %v6693_v48 }
 0xb48   :  { %4989 = vmatpush1.bf16.msra.mxu1 %v6707_v0 }
 0xb49   :  { %4991 = vmatprep.subr.bf16.mxu1 %v6718_v40 }
 0xb4c   :  { %4993 = vmatpush1.bf16.msra.mxu1 %v6747_v57 }
 0xb4d   :  { %4995 = vmatprep.subr.bf16.mxu1 %v6752_v14 }
 0xb50   :  { %4997 = vmatpush1.bf16.msra.mxu1 %v6772_v12 }
 0xb51   :  { %4999 = vmatprep.subr.bf16.mxu1 %v6817_v52 }
 0xb54   :  { %5001 = vmatpush1.bf16.msra.mxu1 %v6850_v47 }
 0xb55   :  { %5027 = vmatprep.subr.bf16.mxu1 %v6425_v34 }
 0xc0a   :  { %v3263_v1 = vpop.f32.mrb[10].mxu1 }
 0xc0b   :  { %v3265_v17 = vpop.f32.mrb[11].mxu1  ;;  %v5092_v34 = vadd.f32 %v3263_v1, %v7056_v43 }
 0xc0c   :  { %v5093_v55 = vadd.f32 %v3265_v17, %v7032_v24 }
 0xc0d   :  { %v4016_v29 = vmul.f32 -1.442695, %v5092_v34 }
 0xc0e   :  { %v4017_v2 = vmul.f32 -1.442695, %v5093_v55 }
 0xc10   :  { %5211 = vpow2.f32 %v4017_v2 }
 0xc1a   :  { %v5212_v4 = vpop.eup %5211 }
 0xc1b   :  { %v3279_v20 = vadd.f32 1.0, %v5212_v4 }
 0xc1d   :  { %5213 = vrcp.f32 %v3279_v20 }
 0xc1e   :  { %5215 = vpow2.f32 %v4016_v29 }
 0xc27   :  { %v5214_v37 = vpop.eup %5213 }
 0xc28   :  { %v3282_v19 = vmul.f32 %v5214_v37, %v7279_v45  ;;  %v5216_v25 = vpop.eup %5215 }
 0xc29   :  { %v3272_v60 = vadd.f32 1.0, %v5216_v25 }
 0xc2a   :  { %4434 = vmatmul.mubr.f32.vlgmr.msra.gmra.mrb[42].mxu0 %v3282_v19 }
 0xc2b   :  { %5004 = vmatpush3.bf16.msra.mxu0 %v6977_v54  ;;  %4468 = vmatprep.mubr.msk.f32.mxu0 %vm5526_vm8, %v7700_v49  ;;  %5217 = vrcp.f32 %v3272_v60 }
 0xc2c   :  { %5005 = vmatprep.subr.bf16.mxu0 %v5525_v3 }
 0xc2f   :  { %5007 = vmatpush3.bf16.msra.mxu0 %v6981_v15 }
 0xc30   :  { %5008 = vmatprep.subr.bf16.mxu0 %v5525_v3 }
 0xc33   :  { %5010 = vmatpush3.bf16.msra.mxu0 %v6985_v51 }
 0xc34   :  { %5011 = vmatprep.subr.bf16.mxu0 %v5525_v3 }
 0xc35   :  { %v5218_v44 = vpop.eup %5217 }
 0xc36   :  { %v3355_v21 = vsub.f32 1.0, %v5218_v44 }
 0xc37   :  { %5013 = vmatpush3.bf16.msra.mxu0 %v6989_v62 }
 0xc38   :  { %5014 = vmatprep.subr.bf16.mxu0 %v5525_v3  ;;  %v3356_v6 = vmul.f32 %v3355_v21, %v7279_v45 }
 0xc3b   :  { %5016 = vmatpush3.bf16.msra.mxu0 %v6993_v23 }
 0xc3c   :  { %5017 = vmatprep.subr.bf16.mxu0 %v5525_v3 }
 0xc3f   :  { %5019 = vmatpush3.bf16.msra.mxu0 %v6997_v31 }
 0xc40   :  { %5020 = vmatprep.subr.bf16.mxu0 %v5525_v3 }
 0xc43   :  { %5022 = vmatpush3.bf16.msra.mxu0 %v7001_v10 }
 0xc44   :  { %5023 = vmatprep.subr.bf16.mxu0 %v5525_v3 }
 0xc47   :  { %5025 = vmatpush3.bf16.msra.mxu0 %v7005_v27 }
 0xc48   :  { %5058 = vmatprep.subr.bf16.mxu0 %v5525_v3 }
 0xcfd   :  { %v3349_v42 = vpop.f32.mrb[42].mxu0 }
 0xcfe   :  { %v3353_v18 = vadd.f32 %v3349_v42, %v2037_v33  ;;  %v4435_v7 = vpop.f32.mrb[43].mxu0 }
 0xd00   :  { %5219 = vtanh.f32 %v3353_v18 }
 0xd01   :  { %5221 = vpow2.f32 %v1746_v36 }
 0xd0a   :  { %v5220_v13 = vpop.eup %5219 }
 0xd0b   :  { %v3357_v11 = vmul.f32 %v5220_v13, %v5218_v44  ;;  %v5222_v16 = vpop.eup %5221 }
 0xd0d   :  { %v3358_v53 = vadd.f32 %v3357_v11, %v3356_v6 }
 0xd0f   :  { %v3360_v26 = vcombine.high %v3358_v53, %v3358_v53  ;;  %v3367_v9 = vrot.slane %v3358_v53, %v7067_v30  ;;  %v7331_v1 = vmul.f32 %v5222_v16, %v3358_v53 }
 0xd11   :  { %v3374_v28 = vrot.slane %v3360_v26, %v7067_v30  ;;  %v3375_v17 = vcombine.high %v3367_v9, %v3367_v9  ;;  %v3383_v55 = vrot.slane %v3367_v9, %v7067_v30  ;;  %4018 = vst.sshfl [vmem:[#allocation18 + $0x5] sm:$0x1 pattern:$0x73625140] %v3367_v9  ;;  %3491 = vmatmul.mubr.f32.vlgmr.msra.gmra.mrb[12].mxu1 %v7331_v1 }
 0xd12   :  { %5029 = vmatpush1.bf16.msra.mxu1 %v6566_v58  ;;  %3719 = vmatprep.mubr.f32.mxu1 %v7700_v49 }
 0xd13   :  { %v3376_v45 = vcombine.high %v3374_v28, %v3374_v28  ;;  %v3390_v2 = vrot.slane %v3374_v28, %v7067_v30  ;;  %v3397_v4 = vrot.slane %v3375_v17, %v7067_v30  ;;  %v3405_v20 = vcombine.high %v3383_v55, %v3383_v55  ;;  %4019 = vst.sshfl [vmem:[#allocation18 + $0xd] sm:$0x1 pattern:$0x73625140] %v3375_v17 }
 0xd14   :  { %4020 = vst.sshfl [vmem:[#allocation18 + $0x25] sm:$0x1 pattern:$0x73625140] %v3374_v28  ;;  %5031 = vmatprep.subr.bf16.mxu1 %v6572_v22 }
 0xd15   :  { %v3404_v37 = vrot.slane %v3376_v45, %v7067_v30  ;;  %v3406_v19 = vcombine.high %v3390_v2, %v3390_v2  ;;  %v3407_v34 = vcombine.high %v3397_v4, %v3397_v4  ;;  %3419 = vst [vmem:[#allocation18 + $0x15] sm:$0x1] %v3405_v20  ;;  %4021 = vst.sshfl [vmem:[#allocation18 + $0x2d] sm:$0x1 pattern:$0x73625140] %v3376_v45 }
 0xd16   :  { %5033 = vmatpush1.bf16.msra.mxu1 %v6580_v38  ;;  %v2047_v4 = vadd.f32 %v7028_v56, %v7062_v46 }
 0xd17   :  { %v3408_v58 = vcombine.high %v3404_v37, %v3404_v37  ;;  %3420 = vst [vmem:[#allocation18 + $0x1d] sm:$0x1] %v3407_v34  ;;  %3423 = vst [vmem:[#allocation18 + $0x35] sm:$0x1] %v3406_v19  ;;  %5035 = vmatprep.subr.bf16.mxu1 %v6591_v63 }
 0xd19   :  { %3424 = vst [vmem:[#allocation18 + $0x3d] sm:$0x1] %v3408_v58 }
 0xd1a   :  { %5037 = vmatpush1.bf16.msra.mxu1 %v6655_v59 }
 0xd1b   :  { %5039 = vmatprep.subr.bf16.mxu1 %v6668_v8 }
 0xd1e   :  { %5041 = vmatpush1.bf16.msra.mxu1 %v6681_v32 }
 0xd1f   :  { %5043 = vmatprep.subr.bf16.mxu1 %v6693_v48 }
 0xd22   :  { %5045 = vmatpush1.bf16.msra.mxu1 %v6707_v0 }
 0xd23   :  { %5047 = vmatprep.subr.bf16.mxu1 %v6718_v40 }
 0xd26   :  { %5049 = vmatpush1.bf16.msra.mxu1 %v6747_v57 }
 0xd27   :  { %5051 = vmatprep.subr.bf16.mxu1 %v6752_v14 }
 0xd2a   :  { %5053 = vmatpush1.bf16.msra.mxu1 %v6772_v12  ;;  %v1686_v12 = vadd.f32 %v6917_v61, %v6907_v5 }
 0xd2b   :  { %5055 = vmatprep.subr.bf16.mxu1 %v6817_v52 }
 0xd2e   :  { %5057 = vmatpush1.bf16.msra.mxu1 %v6850_v47  ;;  %v1703_v47 = vmax.f32 %v1686_v12, 0.0 }
 0xde4   :  { %v3492_v22 = vpop.f32.mrb[12].mxu1 }
 0xde5   :  { %v3494_v38 = vpop.f32.mrb[13].mxu1  ;;  %v5094_v40 = vadd.f32 %v3492_v22, %v7056_v43 }
 0xde6   :  { %v5095_v63 = vadd.f32 %v3494_v38, %v7032_v24 }
 0xde7   :  { %v4022_v57 = vmul.f32 -1.442695, %v5094_v40 }
 0xde8   :  { %v4023_v59 = vmul.f32 -1.442695, %v5095_v63 }
 0xdea   :  { %5223 = vpow2.f32 %v4023_v59 }
 0xdf4   :  { %v5224_v8 = vpop.eup %5223 }
 0xdf5   :  { %v3508_v32 = vadd.f32 1.0, %v5224_v8 }
 0xdf7   :  { %5225 = vrcp.f32 %v3508_v32 }
 0xdf8   :  { %5227 = vpow2.f32 %v4022_v57 }
 0xe01   :  { %v5226_v48 = vpop.eup %5225 }
 0xe02   :  { %v3511_v0 = vmul.f32 %v5226_v48, %v7331_v1  ;;  %v5228_v14 = vpop.eup %5227 }
 0xe03   :  { %v3501_v52 = vadd.f32 1.0, %v5228_v14 }
 0xe04   :  { %4469 = vmatmul.mubr.f32.vlgmr.msra.gmra.mrb[44].mxu0 %v3511_v0 }
 0xe05   :  { %5060 = vmatpush3.bf16.msra.mxu0 %v6977_v54  ;;  %4503 = vmatprep.mubr.msk.f32.mxu0 %vm5526_vm8, %v7700_v49  ;;  %5229 = vrcp.f32 %v3501_v52  ;;  %v1719_v49 = vsub.f32 0.0, %v1703_v47  ;;  %v2042_v54 = vadd.f32 %v7023_v50, %v7062_v46 }
 0xe06   :  { %5061 = vmatprep.subr.bf16.mxu0 %v5525_v3 }
 0xe09   :  { %5063 = vmatpush3.bf16.msra.mxu0 %v6981_v15 }
 0xe0a   :  { %5064 = vmatprep.subr.bf16.mxu0 %v5525_v3 }
 0xe0d   :  { %5066 = vmatpush3.bf16.msra.mxu0 %v6985_v51 }
 0xe0e   :  { %5067 = vmatprep.subr.bf16.mxu0 %v5525_v3 }
 0xe11   :  { %5069 = vmatpush3.bf16.msra.mxu0 %v6989_v62  ;;  %v1750_v62 = vmul.f32 1.442695, %v1719_v49 }
 0xe12   :  { %5070 = vmatprep.subr.bf16.mxu0 %v5525_v3 }
 0xe15   :  { %5072 = vmatpush3.bf16.msra.mxu0 %v6993_v23  ;;  %v5230_v23 = vpop.eup %5229 }
 0xe16   :  { %5073 = vmatprep.subr.bf16.mxu0 %v5525_v3 }
 0xe19   :  { %5075 = vmatpush3.bf16.msra.mxu0 %v6997_v31  ;;  %v3584_v31 = vsub.f32 1.0, %v5230_v23 }
 0xe1a   :  { %5076 = vmatprep.subr.bf16.mxu0 %v5525_v3 }
 0xe1b   :  { %v3585_v29 = vmul.f32 %v3584_v31, %v7331_v1 }
 0xe1d   :  { %5078 = vmatpush3.bf16.msra.mxu0 %v7001_v10 }
 0xe1e   :  { %5079 = vmatprep.subr.bf16.mxu0 %v5525_v3 }
 0xe21   :  { %5081 = vmatpush3.bf16.msra.mxu0 %v7005_v27 }
 0xed7   :  { %v3578_v15 = vpop.f32.mrb[44].mxu0 }
 0xed8   :  { %v3582_v51 = vadd.f32 %v3578_v15, %v2042_v54  ;;  %v4470_v3 = vpop.f32.mrb[45].mxu0 }
 0xeda   :  { %5231 = vtanh.f32 %v3582_v51 }
 0xedb   :  { %5233 = vpow2.f32 %v1750_v62 }
 0xee4   :  { %v5232_v10 = vpop.eup %5231 }
 0xee5   :  { %v3586_v27 = vmul.f32 %v5232_v10, %v5230_v23  ;;  %v5234_v61 = vpop.eup %5233 }
 0xee7   :  { %v3587_v5 = vadd.f32 %v3586_v27, %v3585_v29 }
 0xee9   :  { %v3589_v25 = vcombine.high %v3587_v5, %v3587_v5  ;;  %v3596_v39 = vrot.slane %v3587_v5, %v7067_v30  ;;  %v3654_v60 = vmul.f32 %v5234_v61, %v3587_v5 }
 0xeeb   :  { %v3603_v50 = vrot.slane %v3589_v25, %v7067_v30  ;;  %v3604_v35 = vcombine.high %v3596_v39, %v3596_v39  ;;  %v3612_v41 = vrot.slane %v3596_v39, %v7067_v30  ;;  %4024 = vst.sshfl [vmem:[#allocation18 + $0x6] sm:$0x1 pattern:$0x73625140] %v3596_v39  ;;  %3720 = vmatmul.mubr.f32.vlgmr.msra.gmra.mrb[14].mxu1 %v3654_v60 }
 0xeed   :  { %v3605_v33 = vcombine.high %v3603_v50, %v3603_v50  ;;  %v3619_v42 = vrot.slane %v3603_v50, %v7067_v30  ;;  %v3626_v18 = vrot.slane %v3604_v35, %v7067_v30  ;;  %v3634_v7 = vcombine.high %v3612_v41, %v3612_v41  ;;  %4025 = vst.sshfl [vmem:[#allocation18 + $0xe] sm:$0x1 pattern:$0x73625140] %v3604_v35 }
 0xeee   :  { %4026 = vst.sshfl [vmem:[#allocation18 + $0x26] sm:$0x1 pattern:$0x73625140] %v3603_v50 }
 0xeef   :  { %v3633_v36 = vrot.slane %v3605_v33, %v7067_v30  ;;  %v3635_v44 = vcombine.high %v3619_v42, %v3619_v42  ;;  %v3636_v21 = vcombine.high %v3626_v18, %v3626_v18  ;;  %3648 = vst [vmem:[#allocation18 + $0x16] sm:$0x1] %v3634_v7  ;;  %4027 = vst.sshfl [vmem:[#allocation18 + $0x2e] sm:$0x1 pattern:$0x73625140] %v3605_v33 }
 0xef1   :  { %v3637_v13 = vcombine.high %v3633_v36, %v3633_v36  ;;  %3649 = vst [vmem:[#allocation18 + $0x1e] sm:$0x1] %v3636_v21  ;;  %3652 = vst [vmem:[#allocation18 + $0x36] sm:$0x1] %v3635_v44 }
 0xef3   :  { %3653 = vst [vmem:[#allocation18 + $0x3e] sm:$0x1] %v3637_v13 }
 0xfbe   :  { %v3721_v11 = vpop.f32.mrb[14].mxu1 }
 0xfbf   :  { %v3723_v6 = vpop.f32.mrb[15].mxu1  ;;  %v5096_v17 = vadd.f32 %v3721_v11, %v7056_v43 }
 0xfc0   :  { %v5097_v53 = vadd.f32 %v3723_v6, %v7032_v24 }
 0xfc1   :  { %v4028_v55 = vmul.f32 -1.442695, %v5096_v17 }
 0xfc2   :  { %v4029_v16 = vmul.f32 -1.442695, %v5097_v53 }
 0xfc4   :  { %5235 = vpow2.f32 %v4029_v16 }
 0xfce   :  { %v5236_v26 = vpop.eup %5235 }
 0xfcf   :  { %v3737_v9 = vadd.f32 1.0, %v5236_v26 }
 0xfd1   :  { %5237 = vrcp.f32 %v3737_v9 }
 0xfd2   :  { %5239 = vpow2.f32 %v4028_v55 }
 0xfdb   :  { %v5238_v1 = vpop.eup %5237 }
 0xfdc   :  { %v3740_v28 = vmul.f32 %v5238_v1, %v3654_v60  ;;  %v5240_v45 = vpop.eup %5239 }
 0xfdd   :  { %v3730_v2 = vadd.f32 1.0, %v5240_v45 }
 0xfde   :  { %4504 = vmatmul.mubr.f32.vlgmr.msra.gmra.mrb[46].mxu0 %v3740_v28 }
 0xfdf   :  { %5241 = vrcp.f32 %v3730_v2 }
 0xfe9   :  { %v5242_v19 = vpop.eup %5241 }
 0xfea   :  { %v3813_v34 = vsub.f32 1.0, %v5242_v19 }
 0xfec   :  { %v3814_v22 = vmul.f32 %v3813_v34, %v3654_v60 }
0x10b1   :  { %v3807_v20 = vpop.f32.mrb[46].mxu0 }
0x10b2   :  { %v3811_v24 = vadd.f32 %v3807_v20, %v2047_v4  ;;  %v4505_v37 = vpop.f32.mrb[47].mxu0 }
0x10b4   :  { %5243 = vtanh.f32 %v3811_v24 }
0x10be   :  { %v5244_v58 = vpop.eup %5243 }
0x10bf   :  { %v3815_v38 = vmul.f32 %v5244_v58, %v5242_v19 }
0x10c1   :  { %v3816_v43 = vadd.f32 %v3815_v38, %v3814_v22 }
0x10c3   :  { %v3818_v63 = vcombine.high %v3816_v43, %v3816_v43  ;;  %v3825_v59 = vrot.slane %v3816_v43, %v7067_v30  ;;  %3887 = vst [vmem:[#allocation19] sm:$0xff] %v3816_v43 }
0x10c4   :  { %5466 = shalt.err (!%p5463_p4)
}
0x10c5   :  { %s5467_s14 = scalar_lea.hbm %s7433_s10, 128 }
0x10c6   :  { %p5468_p5 = scmp.ne.s32.totalorder %s7433_s10, %s5467_s14  ;;  %p5471_p6 = scmp.lt.u32.totalorder %s5467_s14, %s7433_s10 }
0x10c8   :  { %p5473_p7 = pnand %p5471_p6, %p5468_p5 }
0x10ca   :  { %5476 = shalt.err (!%p5473_p7)
}
0x10cb   :  { %3909 = dma.vmem_to_hbm [thread:$0]  %s3907_s17, 128, %s7433_s10, [#allocation20]   ;;  %v3832_v56 = vrot.slane %v3818_v63, %v7067_v30  ;;  %v3833_v46 = vcombine.high %v3825_v59, %v3825_v59  ;;  %v3841_v8 = vrot.slane %v3825_v59, %v7067_v30  ;;  %4030 = vst.sshfl [vmem:[#allocation18 + $0x7] sm:$0x1 pattern:$0x73625140] %v3825_v59 }
0x10cc   :  { %s5529_s28 = smov [#allocation18]  }
0x10cd   :  { %v3834_v32 = vcombine.high %v3832_v56, %v3832_v56  ;;  %v3848_v48 = vrot.slane %v3832_v56, %v7067_v30  ;;  %v3855_v0 = vrot.slane %v3833_v46, %v7067_v30  ;;  %v3863_v40 = vcombine.high %v3841_v8, %v3841_v8  ;;  %4031 = vst.sshfl [vmem:[#allocation18 + $0xf] sm:$0x1 pattern:$0x73625140] %v3833_v46  ;;  %s3893_s29 = sshll.u32 %s5529_s28, 4  ;;  %s3894_s29 = int_to_ptr.vmem [resolvable:$true] %s3893_s29 }
0x10ce   :  { %4032 = vst.sshfl [vmem:[#allocation18 + $0x27] sm:$0x1 pattern:$0x73625140] %v3832_v56  ;;  %s5477_s10 = scalar_lea.vmem %s3894_s29, 1024  ;;  %p5482_p9 = scmp.lt.s32.totalorder %s3894_s29, %s3894_s29 }
0x10cf   :  { %v3862_v57 = vrot.slane %v3834_v32, %v7067_v30  ;;  %v3864_v14 = vcombine.high %v3848_v48, %v3848_v48  ;;  %v3865_v12 = vcombine.high %v3855_v0, %v3855_v0  ;;  %3877 = vst [vmem:[#allocation18 + $0x17] sm:$0x1] %v3863_v40  ;;  %4033 = vst.sshfl [vmem:[#allocation18 + $0x2f] sm:$0x1 pattern:$0x73625140] %v3834_v32  ;;  %p5478_p8 = scmp.ne.s32.totalorder %s3894_s29, %s5477_s10  ;;  %p5483_p10 = scmp.lt.s32.totalorder %s5477_s10, %s5477_s10 }
0x10d1   :  { %v3866_v52 = vcombine.high %v3862_v57, %v3862_v57  ;;  %3878 = vst [vmem:[#allocation18 + $0x1f] sm:$0x1] %v3865_v12  ;;  %3881 = vst [vmem:[#allocation18 + $0x37] sm:$0x1] %v3864_v14  ;;  %p5484_p11 = por %p5483_p10, %p5482_p9 }
0x10d3   :  { %3882 = vst [vmem:[#allocation18 + $0x3f] sm:$0x1] %v3866_v52  ;;  %p5485_p12 = pnand %p5484_p11, %p5478_p8 }
0x10d5   :  { %5488 = shalt.err (!%p5485_p12)
}
0x10d6   :  { %s5489_s30 = scalar_lea.hbm %s7432_s9, 1024 }
0x10d7   :  { %p5490_p13 = scmp.ne.s32.totalorder %s7432_s9, %s5489_s30  ;;  %p5493_p0 = scmp.lt.u32.totalorder %s5489_s30, %s7432_s9 }
0x10d9   :  { %p5495_p1 = pnand %p5493_p0, %p5490_p13 }
0x10db   :  { %5498 = shalt.err (!%p5495_p1)
}
0x10dc   :  { %3899 = dma.vmem_to_hbm [thread:$0]  %s3894_s29, 1024, %s7432_s9, [#allocation8], %s5517_s6, %s5517_s6, %s5518_s1  }
0x10dd   :  { %5507 = dma.done.wait [#allocation8], 1024  }
0x10de   :  { %5508 = vsyncadd [#allocation8], 4294966272 }
0x10df   :  { %5509 = dma.done.wait [#allocation20], 128  }
0x10e0   :  { %5510 = vsyncadd [#allocation20], 4294967168 }
0x10e1   :  { %3916 = vsyncpa [#allocation7], 1 }
0x10e2   :  { %3917 = vsyncpa [#allocation10], 1 }
0x10e3   :  { %3918 = vsyncpa [#allocation13], 1 }
0x10e4   :  { %3919 = vsyncpa [#allocation16], 1 }
0x10e5   :  { %3920 = vsyncpa [#allocation8], 1 }
0x10e6   :  { %3921 = vsyncpa [#allocation20], 1 }

</bundles_post_ra>
